<compile_context>
chip_gen: v7x
topology: tpu7x:2x2x1
jax: 0.10.0
libtpu: 0.0.40
codegen_flags: <defaults>
</compile_context>

<pallas_src>
import jax
import jax.numpy as jnp
from jax import lax
from jax.experimental import pallas as pl
from jax.experimental.pallas import tpu as pltpu
import numpy as np

N_REP = 3    # n=3 RepConv blocks in RepC3
LANE = 128   # TPU lane width


def _silu(v):
    # sigmoid via EUP exp + approx reciprocal (keeps the divide off the VALU)
    return v * pl.reciprocal(1.0 + jnp.exp(-v), approx=True)


def repc3_kernel(x_ref, wcv12_ref, bcv12_ref, w3_ref, brep_ref, o_ref, pad_ref):
    """One batch element per grid step.

    x_ref    : (1, H, W, C1P)      bf16
    wcv12_ref: (C1P, 2*C2P)        bf16  fused cv1|cv2 1x1 weights (BN folded)
    bcv12_ref: (1, 2*C2P)          f32
    w3_ref   : (N_REP, 9*C2P, C2P) bf16  RepConv im2col weights (1x1 folded in)
    brep_ref : (N_REP, 1, C2P)     f32
    o_ref    : (1, H, W, C2P)      f32
    pad_ref  : (H+2, W+2, C2P)     f32   zero-bordered scratch for the 3x3 conv
    """
    _, h, w, c1 = x_ref.shape
    c2 = pad_ref.shape[-1]
    hw = h * w

    # Zero only the 1-pixel border (the interior is fully overwritten before
    # every RepConv matmul), once per grid step.
    pad_ref[0:1, :, :] = jnp.zeros((1, w + 2, c2), pad_ref.dtype)
    pad_ref[h + 1:h + 2, :, :] = jnp.zeros((1, w + 2, c2), pad_ref.dtype)
    pad_ref[:, 0:1, :] = jnp.zeros((h + 2, 1, c2), pad_ref.dtype)
    pad_ref[:, w + 1:w + 2, :] = jnp.zeros((h + 2, 1, c2), pad_ref.dtype)

    x = x_ref[...].reshape(hw, c1)                          # bf16 (HW, C1P)

    # cv1 and cv2 fused into a single 1x1-conv matmul; bias + SiLU in f32.
    y12 = _silu(jnp.dot(x, wcv12_ref[...], preferred_element_type=jnp.float32)
                + bcv12_ref[...])
    y1 = y12[:, :c2]                                        # cv1(x) (HW, C2P)
    y2 = y12[:, c2:]                                        # cv2(x) (HW, C2P)

    cur = y1                                                # f32 (HW, C2P)
    for i in range(N_REP):
        # place current activation in the centre of the zero-bordered scratch
        pad_ref[1:h + 1, 1:w + 1, :] = cur.reshape(h, w, c2)
        # im2col: 9 shifted views, cast to bf16 per-tap -> (HW, 9*C2P) bf16;
        # one deep-K MXU matmul per RepConv.
        cols = jnp.concatenate(
            [pad_ref[dy:dy + h, dx:dx + w, :].reshape(hw, c2).astype(jnp.bfloat16)
             for dy in range(3) for dx in range(3)], axis=1)
        cur = _silu(jnp.dot(cols, w3_ref[i],
                            preferred_element_type=jnp.float32) + brep_ref[i])

    # cv3 is nn.Identity() because c_ == c2 (e=1.0)
    o_ref[...] = (cur + y2).reshape(1, h, w, c2)


def repc3_forward(x_nhwc, params):
    n, h, w, c1p = x_nhwc.shape
    c2p = params["brep"].shape[-1]

    def resident(arr):                      # weights: same block every step
        nd = arr.ndim
        return pl.BlockSpec(arr.shape, lambda b, _nd=nd: (0,) * _nd)

    return pl.pallas_call(
        repc3_kernel,
        out_shape=jax.ShapeDtypeStruct((n, h, w, c2p), jnp.float32),
        grid_spec=pltpu.PrefetchScalarGridSpec(
            num_scalar_prefetch=0,
            grid=(n,),
            in_specs=[
                pl.BlockSpec((1, h, w, c1p), lambda b: (b, 0, 0, 0)),
                resident(params["wcv12"]),
                resident(params["bcv12"]),
                resident(params["w3"]),
                resident(params["brep"]),
            ],
            out_specs=pl.BlockSpec((1, h, w, c2p), lambda b: (b, 0, 0, 0)),
            scratch_shapes=[pltpu.VMEM((h + 2, w + 2, c2p), jnp.float32)],
        ),
        compiler_params=pltpu.CompilerParams(
            dimension_semantics=("parallel",),
            vmem_limit_bytes=32 << 20),
    )(x_nhwc, params["wcv12"], params["bcv12"], params["w3"], params["brep"])


# ---------------- parameter construction (deterministic, BN folded) ----------
def _fold_bn(w, gamma, beta, mean, var, eps=1e-3):
    scale = gamma / jnp.sqrt(var + eps)
    return w * scale[:, None, None, None], beta - mean * scale


def _make_conv_bn(key, cin, cout, k):
    ks = jax.random.split(key, 5)
    w = 0.2 * jax.random.normal(ks[0], (cout, cin, k, k), jnp.float32)
    gamma = 1.0 + 0.1 * jax.random.normal(ks[1], (cout,), jnp.float32)
    beta = 0.1 * jax.random.normal(ks[2], (cout,), jnp.float32)
    mean = 0.1 * jax.random.normal(ks[3], (cout,), jnp.float32)
    var = 0.5 + jnp.abs(jax.random.normal(ks[4], (cout,), jnp.float32))
    return _fold_bn(w, gamma, beta, mean, var)


def _round_up(v, m):
    return ((v + m - 1) // m) * m


def _pad2(mat, rows, cols):
    return jnp.zeros((rows, cols), mat.dtype).at[:mat.shape[0], :mat.shape[1]].set(mat)


if __name__ == "__main__":
    key = jax.random.PRNGKey(0)
    N, C1, H, W = 2, 4, 16, 16
    C2 = 8  # c2; e=1.0 -> c_ = c2 -> cv3 = Identity
    keys = jax.random.split(key, 2 + 2 * N_REP + 1)

    wcv1_f, bcv1_f = _make_conv_bn(keys[0], C1, C2, 1)
    wcv2_f, bcv2_f = _make_conv_bn(keys[1], C1, C2, 1)
    rep3 = [_make_conv_bn(keys[2 + 2 * i], C2, C2, 3) for i in range(N_REP)]
    rep1 = [_make_conv_bn(keys[3 + 2 * i], C2, C2, 1) for i in range(N_REP)]

    x_nchw = jax.random.normal(keys[-1], (N, C1, H, W), jnp.float32)

    # ---- kernel-format params: RepConv/cv1|cv2 fusion, 128-lane padding, bf16
    C1P = _round_up(C1, LANE)
    C2P = _round_up(C2, LANE)

    wcv12 = jnp.concatenate(
        [_pad2(wcv1_f[:, :, 0, 0].T, C1P, C2P),
         _pad2(wcv2_f[:, :, 0, 0].T, C1P, C2P)], axis=1).astype(jnp.bfloat16)
    bcv12 = jnp.concatenate(
        [jnp.zeros((C2P,), jnp.float32).at[:C2].set(bcv1_f),
         jnp.zeros((C2P,), jnp.float32).at[:C2].set(bcv2_f)]).reshape(1, 2 * C2P)

    w3_list, brep_list = [], []
    for i in range(N_REP):
        # RepConv re-parameterization: fold the 1x1 branch into the 3x3 centre tap
        w3f = rep3[i][0].at[:, :, 1, 1].add(rep1[i][0][:, :, 0, 0])
        taps = [_pad2(w3f[:, :, kh, kw].T, C2P, C2P)          # (cin, cout) per tap
                for kh in range(3) for kw in range(3)]         # im2col tap order
        w3_list.append(jnp.concatenate(taps, axis=0))          # (9*C2P, C2P)
        brep_list.append(jnp.zeros((1, C2P), jnp.float32)
                         .at[0, :C2].set(rep3[i][1] + rep1[i][1]))

    params = dict(
        wcv12=wcv12,                                     # (C1P, 2*C2P)    bf16
        bcv12=bcv12,                                     # (1, 2*C2P)      f32
        w3=jnp.stack(w3_list).astype(jnp.bfloat16),      # (n, 9*C2P, C2P) bf16
        brep=jnp.stack(brep_list),                       # (n, 1, C2P)     f32
    )

    # NCHW -> NHWC, zero-pad channels to the lane width, bf16 activations
    x_nhwc = jnp.transpose(x_nchw, (0, 2, 3, 1))
    x_pad = (jnp.zeros((N, H, W, C1P), jnp.bfloat16)
             .at[..., :C1].set(x_nhwc.astype(jnp.bfloat16)))

    out_pad = jax.block_until_ready(repc3_forward(x_pad, params))
    out_nchw = jnp.transpose(out_pad[..., :C2], (0, 3, 1, 2))

    # ---- pure-JAX f32 reference in NCHW (mirrors the PyTorch forward) -------
    def conv2d(x, w_, b, pad):
        y = lax.conv_general_dilated(x, w_, (1, 1), [(pad, pad), (pad, pad)],
                                     dimension_numbers=("NCHW", "OIHW", "NCHW"))
        return y + b[None, :, None, None]

    def silu(v):
        return v * jax.nn.sigmoid(v)

    y1 = silu(conv2d(x_nchw, wcv1_f, bcv1_f, 0))   # cv1
    y2 = silu(conv2d(x_nchw, wcv2_f, bcv2_f, 0))   # cv2
    cur = y1
    for i in range(N_REP):                          # m = 3 x RepConv
        cur = silu(conv2d(cur, rep3[i][0], rep3[i][1], 1)
                   + conv2d(cur, rep1[i][0], rep1[i][1], 0))
    ref = cur + y2                                  # cv3 = Identity

    err = float(np.max(np.abs(np.asarray(out_nchw) - np.asarray(ref))))
    # bf16 matmul operands + approx-reciprocal sigmoid -> relaxed tolerance
    assert np.allclose(np.asarray(out_nchw), np.asarray(ref),
                       atol=5e-2, rtol=5e-2), err
    print("KERNEL_OK")
</pallas_src>

<mosaic_0001>
module attributes {stable_mosaic.version = 11 : i64} {
  func.func @repc3_kernel(%arg0: i32, %arg1: memref<1x16x16x128xbf16, #tpu.memory_space<vmem>>, %arg2: memref<128x256xbf16, #tpu.memory_space<vmem>>, %arg3: memref<1x256xf32, #tpu.memory_space<vmem>>, %arg4: memref<3x1152x128xbf16, #tpu.memory_space<vmem>>, %arg5: memref<3x1x128xf32, #tpu.memory_space<vmem>>, %arg6: memref<1x16x16x128xf32, #tpu.memory_space<vmem>>, %arg7: memref<18x18x128xf32, #tpu.memory_space<vmem>>) attributes {dimension_semantics = [#tpu.dimension_semantics<parallel>], iteration_bounds = array<i64: 2>, scalar_prefetch = 0 : i64, scratch_operands = 1 : i64, tpu.core_type = #tpu.core_type<tc>, window_params = [{transform_indices = @transform_0, window_bounds = array<i64: 1, 16, 16, 128>}, {pipeline_mode = #tpu.pipeline_mode<synchronous>, transform_indices = @transform_1, window_bounds = array<i64: 128, 256>}, {pipeline_mode = #tpu.pipeline_mode<synchronous>, transform_indices = @transform_2, window_bounds = array<i64: 1, 256>}, {pipeline_mode = #tpu.pipeline_mode<synchronous>, transform_indices = @transform_3, window_bounds = array<i64: 3, 1152, 128>}, {pipeline_mode = #tpu.pipeline_mode<synchronous>, transform_indices = @transform_4, window_bounds = array<i64: 3, 1, 128>}, {transform_indices = @transform_5, window_bounds = array<i64: 1, 16, 16, 128>}]} {
    %cst = arith.constant 0.000000e+00 : f32
    %0 = vector.broadcast %cst : f32 to vector<1x18x128xf32>
    %c0 = arith.constant 0 : index
    %c0_0 = arith.constant 0 : index
    %c0_1 = arith.constant 0 : index
    %1 = vector.load %arg7[%c0, %c0_0, %c0_1] : memref<18x18x128xf32, #tpu.memory_space<vmem>>, vector<1x18x128xf32>
    tpu.vector_store %arg7[%c0, %c0_0, %c0_1], %0 {strides = array<i32>} : memref<18x18x128xf32, #tpu.memory_space<vmem>>, vector<1x18x128xf32>,
    %cst_2 = arith.constant 0.000000e+00 : f32
    %2 = vector.broadcast %cst_2 : f32 to vector<1x18x128xf32>
    %c17 = arith.constant 17 : index
    %c0_3 = arith.constant 0 : index
    %c0_4 = arith.constant 0 : index
    %3 = vector.load %arg7[%c17, %c0_3, %c0_4] : memref<18x18x128xf32, #tpu.memory_space<vmem>>, vector<1x18x128xf32>
    tpu.vector_store %arg7[%c17, %c0_3, %c0_4], %2 {strides = array<i32>} : memref<18x18x128xf32, #tpu.memory_space<vmem>>, vector<1x18x128xf32>,
    %cst_5 = arith.constant 0.000000e+00 : f32
    %4 = vector.broadcast %cst_5 : f32 to vector<18x1x128xf32>
    %c0_6 = arith.constant 0 : index
    %c0_7 = arith.constant 0 : index
    %c0_8 = arith.constant 0 : index
    %5 = vector.load %arg7[%c0_6, %c0_7, %c0_8] : memref<18x18x128xf32, #tpu.memory_space<vmem>>, vector<18x1x128xf32>
    tpu.vector_store %arg7[%c0_6, %c0_7, %c0_8], %4 {strides = array<i32>} : memref<18x18x128xf32, #tpu.memory_space<vmem>>, vector<18x1x128xf32>,
    %cst_9 = arith.constant 0.000000e+00 : f32
    %6 = vector.broadcast %cst_9 : f32 to vector<18x1x128xf32>
    %c0_10 = arith.constant 0 : index
    %c17_11 = arith.constant 17 : index
    %c0_12 = arith.constant 0 : index
    %7 = vector.load %arg7[%c0_10, %c17_11, %c0_12] : memref<18x18x128xf32, #tpu.memory_space<vmem>>, vector<18x1x128xf32>
    tpu.vector_store %arg7[%c0_10, %c17_11, %c0_12], %6 {strides = array<i32>} : memref<18x18x128xf32, #tpu.memory_space<vmem>>, vector<18x1x128xf32>,
    %c0_13 = arith.constant 0 : index
    %c0_14 = arith.constant 0 : index
    %c0_15 = arith.constant 0 : index
    %c0_16 = arith.constant 0 : index
    %8 = vector.load %arg1[%c0_13, %c0_14, %c0_15, %c0_16] : memref<1x16x16x128xbf16, #tpu.memory_space<vmem>>, vector<1x16x16x128xbf16>
    %9 = vector.shape_cast %8 : vector<1x16x16x128xbf16> to vector<256x128xbf16>
    %c0_17 = arith.constant 0 : index
    %c0_18 = arith.constant 0 : index
    %10 = vector.load %arg2[%c0_17, %c0_18] : memref<128x256xbf16, #tpu.memory_space<vmem>>, vector<128x256xbf16>
    %cst_19 = arith.constant dense<0.000000e+00> : vector<256x256xf32>
    %11 = tpu.matmul %9, %10, %cst_19 {dimension_numbers = #tpu.dot_dimension_numbers<[1], [0], [0], [1], [0, 0, 1, 1], [], []>} : vector<256x128xbf16>, vector<128x256xbf16>, vector<256x256xf32> -> vector<256x256xf32>
    %c0_20 = arith.constant 0 : index
    %c0_21 = arith.constant 0 : index
    %12 = vector.load %arg3[%c0_20, %c0_21] : memref<1x256xf32, #tpu.memory_space<vmem>>, vector<1x256xf32>
    %13 = vector.broadcast %12 : vector<1x256xf32> to vector<256x256xf32>
    %14 = arith.addf %11, %13 : vector<256x256xf32>
    %cst_22 = arith.constant 0.000000e+00 : f32
    %15 = vector.broadcast %cst_22 : f32 to vector<256x256xf32>
    %16 = arith.subf %15, %14 : vector<256x256xf32>
    %17 = math.exp %16 : vector<256x256xf32>
    %cst_23 = arith.constant 1.000000e+00 : f32
    %18 = vector.broadcast %cst_23 : f32 to vector<256x256xf32>
    %19 = arith.addf %18, %17 : vector<256x256xf32>
    %20 = tpu.reciprocal %19 {approx = true} : vector<256x256xf32> -> vector<256x256xf32>
    %21 = arith.mulf %14, %20 : vector<256x256xf32>
    %22 = vector.extract_strided_slice %21 {offsets = [0, 0], sizes = [256, 128], strides = [1, 1]} : vector<256x256xf32> to vector<256x128xf32>
    %23 = vector.extract_strided_slice %21 {offsets = [0, 128], sizes = [256, 128], strides = [1, 1]} : vector<256x256xf32> to vector<256x128xf32>
    %24 = vector.shape_cast %22 : vector<256x128xf32> to vector<16x16x128xf32>
    %c1 = arith.constant 1 : index
    %c1_24 = arith.constant 1 : index
    %c0_25 = arith.constant 0 : index
    %25 = vector.load %arg7[%c1, %c1_24, %c0_25] : memref<18x18x128xf32, #tpu.memory_space<vmem>>, vector<16x16x128xf32>
    tpu.vector_store %arg7[%c1, %c1_24, %c0_25], %24 {strides = array<i32>} : memref<18x18x128xf32, #tpu.memory_space<vmem>>, vector<16x16x128xf32>,
    %c0_26 = arith.constant 0 : index
    %c0_27 = arith.constant 0 : index
    %c0_28 = arith.constant 0 : index
    %26 = vector.load %arg7[%c0_26, %c0_27, %c0_28] : memref<18x18x128xf32, #tpu.memory_space<vmem>>, vector<16x16x128xf32>
    %27 = vector.shape_cast %26 : vector<16x16x128xf32> to vector<256x128xf32>
    %28 = arith.truncf %27 : vector<256x128xf32> to vector<256x128xbf16>
    %c0_29 = arith.constant 0 : index
    %c1_30 = arith.constant 1 : index
    %c0_31 = arith.constant 0 : index
    %29 = vector.load %arg7[%c0_29, %c1_30, %c0_31] : memref<18x18x128xf32, #tpu.memory_space<vmem>>, vector<16x16x128xf32>
    %30 = vector.shape_cast %29 : vector<16x16x128xf32> to vector<256x128xf32>
    %31 = arith.truncf %30 : vector<256x128xf32> to vector<256x128xbf16>
    %c0_32 = arith.constant 0 : index
    %c2 = arith.constant 2 : index
    %c0_33 = arith.constant 0 : index
    %32 = vector.load %arg7[%c0_32, %c2, %c0_33] : memref<18x18x128xf32, #tpu.memory_space<vmem>>, vector<16x16x128xf32>
    %33 = vector.shape_cast %32 : vector<16x16x128xf32> to vector<256x128xf32>
    %34 = arith.truncf %33 : vector<256x128xf32> to vector<256x128xbf16>
    %c1_34 = arith.constant 1 : index
    %c0_35 = arith.constant 0 : index
    %c0_36 = arith.constant 0 : index
    %35 = vector.load %arg7[%c1_34, %c0_35, %c0_36] : memref<18x18x128xf32, #tpu.memory_space<vmem>>, vector<16x16x128xf32>
    %36 = vector.shape_cast %35 : vector<16x16x128xf32> to vector<256x128xf32>
    %37 = arith.truncf %36 : vector<256x128xf32> to vector<256x128xbf16>
    %c1_37 = arith.constant 1 : index
    %c1_38 = arith.constant 1 : index
    %c0_39 = arith.constant 0 : index
    %38 = vector.load %arg7[%c1_37, %c1_38, %c0_39] : memref<18x18x128xf32, #tpu.memory_space<vmem>>, vector<16x16x128xf32>
    %39 = vector.shape_cast %38 : vector<16x16x128xf32> to vector<256x128xf32>
    %40 = arith.truncf %39 : vector<256x128xf32> to vector<256x128xbf16>
    %c1_40 = arith.constant 1 : index
    %c2_41 = arith.constant 2 : index
    %c0_42 = arith.constant 0 : index
    %41 = vector.load %arg7[%c1_40, %c2_41, %c0_42] : memref<18x18x128xf32, #tpu.memory_space<vmem>>, vector<16x16x128xf32>
    %42 = vector.shape_cast %41 : vector<16x16x128xf32> to vector<256x128xf32>
    %43 = arith.truncf %42 : vector<256x128xf32> to vector<256x128xbf16>
    %c2_43 = arith.constant 2 : index
    %c0_44 = arith.constant 0 : index
    %c0_45 = arith.constant 0 : index
    %44 = vector.load %arg7[%c2_43, %c0_44, %c0_45] : memref<18x18x128xf32, #tpu.memory_space<vmem>>, vector<16x16x128xf32>
    %45 = vector.shape_cast %44 : vector<16x16x128xf32> to vector<256x128xf32>
    %46 = arith.truncf %45 : vector<256x128xf32> to vector<256x128xbf16>
    %c2_46 = arith.constant 2 : index
    %c1_47 = arith.constant 1 : index
    %c0_48 = arith.constant 0 : index
    %47 = vector.load %arg7[%c2_46, %c1_47, %c0_48] : memref<18x18x128xf32, #tpu.memory_space<vmem>>, vector<16x16x128xf32>
    %48 = vector.shape_cast %47 : vector<16x16x128xf32> to vector<256x128xf32>
    %49 = arith.truncf %48 : vector<256x128xf32> to vector<256x128xbf16>
    %c2_49 = arith.constant 2 : index
    %c2_50 = arith.constant 2 : index
    %c0_51 = arith.constant 0 : index
    %50 = vector.load %arg7[%c2_49, %c2_50, %c0_51] : memref<18x18x128xf32, #tpu.memory_space<vmem>>, vector<16x16x128xf32>
    %51 = vector.shape_cast %50 : vector<16x16x128xf32> to vector<256x128xf32>
    %52 = arith.truncf %51 : vector<256x128xf32> to vector<256x128xbf16>
    %53 = tpu.concatenate %28, %31, %34, %37, %40, %43, %46, %49, %52 in 1 : vector<256x128xbf16>, vector<256x128xbf16>, vector<256x128xbf16>, vector<256x128xbf16>, vector<256x128xbf16>, vector<256x128xbf16>, vector<256x128xbf16>, vector<256x128xbf16>, vector<256x128xbf16> -> vector<256x1152xbf16>
    %c0_52 = arith.constant 0 : index
    %c0_53 = arith.constant 0 : index
    %c0_54 = arith.constant 0 : index
    %54 = vector.load %arg4[%c0_52, %c0_53, %c0_54] : memref<3x1152x128xbf16, #tpu.memory_space<vmem>>, vector<1x1152x128xbf16>
    %55 = vector.shape_cast %54 : vector<1x1152x128xbf16> to vector<1152x128xbf16>
    %cst_55 = arith.constant dense<0.000000e+00> : vector<256x128xf32>
    %56 = tpu.matmul %53, %55, %cst_55 {dimension_numbers = #tpu.dot_dimension_numbers<[1], [0], [0], [1], [0, 0, 1, 1], [], []>} : vector<256x1152xbf16>, vector<1152x128xbf16>, vector<256x128xf32> -> vector<256x128xf32>
    %c0_56 = arith.constant 0 : index
    %c0_57 = arith.constant 0 : index
    %c0_58 = arith.constant 0 : index
    %57 = vector.load %arg5[%c0_56, %c0_57, %c0_58] : memref<3x1x128xf32, #tpu.memory_space<vmem>>, vector<1x1x128xf32>
    %58 = vector.shape_cast %57 : vector<1x1x128xf32> to vector<1x128xf32>
    %59 = vector.broadcast %58 : vector<1x128xf32> to vector<256x128xf32>
    %60 = arith.addf %56, %59 : vector<256x128xf32>
    %cst_59 = arith.constant 0.000000e+00 : f32
    %61 = vector.broadcast %cst_59 : f32 to vector<256x128xf32>
    %62 = arith.subf %61, %60 : vector<256x128xf32>
    %63 = math.exp %62 : vector<256x128xf32>
    %cst_60 = arith.constant 1.000000e+00 : f32
    %64 = vector.broadcast %cst_60 : f32 to vector<256x128xf32>
    %65 = arith.addf %64, %63 : vector<256x128xf32>
    %66 = tpu.reciprocal %65 {approx = true} : vector<256x128xf32> -> vector<256x128xf32>
    %67 = arith.mulf %60, %66 : vector<256x128xf32>
    %68 = vector.shape_cast %67 : vector<256x128xf32> to vector<16x16x128xf32>
    %c1_61 = arith.constant 1 : index
    %c1_62 = arith.constant 1 : index
    %c0_63 = arith.constant 0 : index
    %69 = vector.load %arg7[%c1_61, %c1_62, %c0_63] : memref<18x18x128xf32, #tpu.memory_space<vmem>>, vector<16x16x128xf32>
    tpu.vector_store %arg7[%c1_61, %c1_62, %c0_63], %68 {strides = array<i32>} : memref<18x18x128xf32, #tpu.memory_space<vmem>>, vector<16x16x128xf32>,
    %c0_64 = arith.constant 0 : index
    %c0_65 = arith.constant 0 : index
    %c0_66 = arith.constant 0 : index
    %70 = vector.load %arg7[%c0_64, %c0_65, %c0_66] : memref<18x18x128xf32, #tpu.memory_space<vmem>>, vector<16x16x128xf32>
    %71 = vector.shape_cast %70 : vector<16x16x128xf32> to vector<256x128xf32>
    %72 = arith.truncf %71 : vector<256x128xf32> to vector<256x128xbf16>
    %c0_67 = arith.constant 0 : index
    %c1_68 = arith.constant 1 : index
    %c0_69 = arith.constant 0 : index
    %73 = vector.load %arg7[%c0_67, %c1_68, %c0_69] : memref<18x18x128xf32, #tpu.memory_space<vmem>>, vector<16x16x128xf32>
    %74 = vector.shape_cast %73 : vector<16x16x128xf32> to vector<256x128xf32>
    %75 = arith.truncf %74 : vector<256x128xf32> to vector<256x128xbf16>
    %c0_70 = arith.constant 0 : index
    %c2_71 = arith.constant 2 : index
    %c0_72 = arith.constant 0 : index
    %76 = vector.load %arg7[%c0_70, %c2_71, %c0_72] : memref<18x18x128xf32, #tpu.memory_space<vmem>>, vector<16x16x128xf32>
    %77 = vector.shape_cast %76 : vector<16x16x128xf32> to vector<256x128xf32>
    %78 = arith.truncf %77 : vector<256x128xf32> to vector<256x128xbf16>
    %c1_73 = arith.constant 1 : index
    %c0_74 = arith.constant 0 : index
    %c0_75 = arith.constant 0 : index
    %79 = vector.load %arg7[%c1_73, %c0_74, %c0_75] : memref<18x18x128xf32, #tpu.memory_space<vmem>>, vector<16x16x128xf32>
    %80 = vector.shape_cast %79 : vector<16x16x128xf32> to vector<256x128xf32>
    %81 = arith.truncf %80 : vector<256x128xf32> to vector<256x128xbf16>
    %c1_76 = arith.constant 1 : index
    %c1_77 = arith.constant 1 : index
    %c0_78 = arith.constant 0 : index
    %82 = vector.load %arg7[%c1_76, %c1_77, %c0_78] : memref<18x18x128xf32, #tpu.memory_space<vmem>>, vector<16x16x128xf32>
    %83 = vector.shape_cast %82 : vector<16x16x128xf32> to vector<256x128xf32>
    %84 = arith.truncf %83 : vector<256x128xf32> to vector<256x128xbf16>
    %c1_79 = arith.constant 1 : index
    %c2_80 = arith.constant 2 : index
    %c0_81 = arith.constant 0 : index
    %85 = vector.load %arg7[%c1_79, %c2_80, %c0_81] : memref<18x18x128xf32, #tpu.memory_space<vmem>>, vector<16x16x128xf32>
    %86 = vector.shape_cast %85 : vector<16x16x128xf32> to vector<256x128xf32>
    %87 = arith.truncf %86 : vector<256x128xf32> to vector<256x128xbf16>
    %c2_82 = arith.constant 2 : index
    %c0_83 = arith.constant 0 : index
    %c0_84 = arith.constant 0 : index
    %88 = vector.load %arg7[%c2_82, %c0_83, %c0_84] : memref<18x18x128xf32, #tpu.memory_space<vmem>>, vector<16x16x128xf32>
    %89 = vector.shape_cast %88 : vector<16x16x128xf32> to vector<256x128xf32>
    %90 = arith.truncf %89 : vector<256x128xf32> to vector<256x128xbf16>
    %c2_85 = arith.constant 2 : index
    %c1_86 = arith.constant 1 : index
    %c0_87 = arith.constant 0 : index
    %91 = vector.load %arg7[%c2_85, %c1_86, %c0_87] : memref<18x18x128xf32, #tpu.memory_space<vmem>>, vector<16x16x128xf32>
    %92 = vector.shape_cast %91 : vector<16x16x128xf32> to vector<256x128xf32>
    %93 = arith.truncf %92 : vector<256x128xf32> to vector<256x128xbf16>
    %c2_88 = arith.constant 2 : index
    %c2_89 = arith.constant 2 : index
    %c0_90 = arith.constant 0 : index
    %94 = vector.load %arg7[%c2_88, %c2_89, %c0_90] : memref<18x18x128xf32, #tpu.memory_space<vmem>>, vector<16x16x128xf32>
    %95 = vector.shape_cast %94 : vector<16x16x128xf32> to vector<256x128xf32>
    %96 = arith.truncf %95 : vector<256x128xf32> to vector<256x128xbf16>
    %97 = tpu.concatenate %72, %75, %78, %81, %84, %87, %90, %93, %96 in 1 : vector<256x128xbf16>, vector<256x128xbf16>, vector<256x128xbf16>, vector<256x128xbf16>, vector<256x128xbf16>, vector<256x128xbf16>, vector<256x128xbf16>, vector<256x128xbf16>, vector<256x128xbf16> -> vector<256x1152xbf16>
    %c1_91 = arith.constant 1 : index
    %c0_92 = arith.constant 0 : index
    %c0_93 = arith.constant 0 : index
    %98 = vector.load %arg4[%c1_91, %c0_92, %c0_93] : memref<3x1152x128xbf16, #tpu.memory_space<vmem>>, vector<1x1152x128xbf16>
    %99 = vector.shape_cast %98 : vector<1x1152x128xbf16> to vector<1152x128xbf16>
    %cst_94 = arith.constant dense<0.000000e+00> : vector<256x128xf32>
    %100 = tpu.matmul %97, %99, %cst_94 {dimension_numbers = #tpu.dot_dimension_numbers<[1], [0], [0], [1], [0, 0, 1, 1], [], []>} : vector<256x1152xbf16>, vector<1152x128xbf16>, vector<256x128xf32> -> vector<256x128xf32>
    %c1_95 = arith.constant 1 : index
    %c0_96 = arith.constant 0 : index
    %c0_97 = arith.constant 0 : index
    %101 = vector.load %arg5[%c1_95, %c0_96, %c0_97] : memref<3x1x128xf32, #tpu.memory_space<vmem>>, vector<1x1x128xf32>
    %102 = vector.shape_cast %101 : vector<1x1x128xf32> to vector<1x128xf32>
    %103 = vector.broadcast %102 : vector<1x128xf32> to vector<256x128xf32>
    %104 = arith.addf %100, %103 : vector<256x128xf32>
    %cst_98 = arith.constant 0.000000e+00 : f32
    %105 = vector.broadcast %cst_98 : f32 to vector<256x128xf32>
    %106 = arith.subf %105, %104 : vector<256x128xf32>
    %107 = math.exp %106 : vector<256x128xf32>
    %cst_99 = arith.constant 1.000000e+00 : f32
    %108 = vector.broadcast %cst_99 : f32 to vector<256x128xf32>
    %109 = arith.addf %108, %107 : vector<256x128xf32>
    %110 = tpu.reciprocal %109 {approx = true} : vector<256x128xf32> -> vector<256x128xf32>
    %111 = arith.mulf %104, %110 : vector<256x128xf32>
    %112 = vector.shape_cast %111 : vector<256x128xf32> to vector<16x16x128xf32>
    %c1_100 = arith.constant 1 : index
    %c1_101 = arith.constant 1 : index
    %c0_102 = arith.constant 0 : index
    %113 = vector.load %arg7[%c1_100, %c1_101, %c0_102] : memref<18x18x128xf32, #tpu.memory_space<vmem>>, vector<16x16x128xf32>
    tpu.vector_store %arg7[%c1_100, %c1_101, %c0_102], %112 {strides = array<i32>} : memref<18x18x128xf32, #tpu.memory_space<vmem>>, vector<16x16x128xf32>,
    %c0_103 = arith.constant 0 : index
    %c0_104 = arith.constant 0 : index
    %c0_105 = arith.constant 0 : index
    %114 = vector.load %arg7[%c0_103, %c0_104, %c0_105] : memref<18x18x128xf32, #tpu.memory_space<vmem>>, vector<16x16x128xf32>
    %115 = vector.shape_cast %114 : vector<16x16x128xf32> to vector<256x128xf32>
    %116 = arith.truncf %115 : vector<256x128xf32> to vector<256x128xbf16>
    %c0_106 = arith.constant 0 : index
    %c1_107 = arith.constant 1 : index
    %c0_108 = arith.constant 0 : index
    %117 = vector.load %arg7[%c0_106, %c1_107, %c0_108] : memref<18x18x128xf32, #tpu.memory_space<vmem>>, vector<16x16x128xf32>
    %118 = vector.shape_cast %117 : vector<16x16x128xf32> to vector<256x128xf32>
    %119 = arith.truncf %118 : vector<256x128xf32> to vector<256x128xbf16>
    %c0_109 = arith.constant 0 : index
    %c2_110 = arith.constant 2 : index
    %c0_111 = arith.constant 0 : index
    %120 = vector.load %arg7[%c0_109, %c2_110, %c0_111] : memref<18x18x128xf32, #tpu.memory_space<vmem>>, vector<16x16x128xf32>
    %121 = vector.shape_cast %120 : vector<16x16x128xf32> to vector<256x128xf32>
    %122 = arith.truncf %121 : vector<256x128xf32> to vector<256x128xbf16>
    %c1_112 = arith.constant 1 : index
    %c0_113 = arith.constant 0 : index
    %c0_114 = arith.constant 0 : index
    %123 = vector.load %arg7[%c1_112, %c0_113, %c0_114] : memref<18x18x128xf32, #tpu.memory_space<vmem>>, vector<16x16x128xf32>
    %124 = vector.shape_cast %123 : vector<16x16x128xf32> to vector<256x128xf32>
    %125 = arith.truncf %124 : vector<256x128xf32> to vector<256x128xbf16>
    %c1_115 = arith.constant 1 : index
    %c1_116 = arith.constant 1 : index
    %c0_117 = arith.constant 0 : index
    %126 = vector.load %arg7[%c1_115, %c1_116, %c0_117] : memref<18x18x128xf32, #tpu.memory_space<vmem>>, vector<16x16x128xf32>
    %127 = vector.shape_cast %126 : vector<16x16x128xf32> to vector<256x128xf32>
    %128 = arith.truncf %127 : vector<256x128xf32> to vector<256x128xbf16>
    %c1_118 = arith.constant 1 : index
    %c2_119 = arith.constant 2 : index
    %c0_120 = arith.constant 0 : index
    %129 = vector.load %arg7[%c1_118, %c2_119, %c0_120] : memref<18x18x128xf32, #tpu.memory_space<vmem>>, vector<16x16x128xf32>
    %130 = vector.shape_cast %129 : vector<16x16x128xf32> to vector<256x128xf32>
    %131 = arith.truncf %130 : vector<256x128xf32> to vector<256x128xbf16>
    %c2_121 = arith.constant 2 : index
    %c0_122 = arith.constant 0 : index
    %c0_123 = arith.constant 0 : index
    %132 = vector.load %arg7[%c2_121, %c0_122, %c0_123] : memref<18x18x128xf32, #tpu.memory_space<vmem>>, vector<16x16x128xf32>
    %133 = vector.shape_cast %132 : vector<16x16x128xf32> to vector<256x128xf32>
    %134 = arith.truncf %133 : vector<256x128xf32> to vector<256x128xbf16>
    %c2_124 = arith.constant 2 : index
    %c1_125 = arith.constant 1 : index
    %c0_126 = arith.constant 0 : index
    %135 = vector.load %arg7[%c2_124, %c1_125, %c0_126] : memref<18x18x128xf32, #tpu.memory_space<vmem>>, vector<16x16x128xf32>
    %136 = vector.shape_cast %135 : vector<16x16x128xf32> to vector<256x128xf32>
    %137 = arith.truncf %136 : vector<256x128xf32> to vector<256x128xbf16>
    %c2_127 = arith.constant 2 : index
    %c2_128 = arith.constant 2 : index
    %c0_129 = arith.constant 0 : index
    %138 = vector.load %arg7[%c2_127, %c2_128, %c0_129] : memref<18x18x128xf32, #tpu.memory_space<vmem>>, vector<16x16x128xf32>
    %139 = vector.shape_cast %138 : vector<16x16x128xf32> to vector<256x128xf32>
    %140 = arith.truncf %139 : vector<256x128xf32> to vector<256x128xbf16>
    %141 = tpu.concatenate %116, %119, %122, %125, %128, %131, %134, %137, %140 in 1 : vector<256x128xbf16>, vector<256x128xbf16>, vector<256x128xbf16>, vector<256x128xbf16>, vector<256x128xbf16>, vector<256x128xbf16>, vector<256x128xbf16>, vector<256x128xbf16>, vector<256x128xbf16> -> vector<256x1152xbf16>
    %c2_130 = arith.constant 2 : index
    %c0_131 = arith.constant 0 : index
    %c0_132 = arith.constant 0 : index
    %142 = vector.load %arg4[%c2_130, %c0_131, %c0_132] : memref<3x1152x128xbf16, #tpu.memory_space<vmem>>, vector<1x1152x128xbf16>
    %143 = vector.shape_cast %142 : vector<1x1152x128xbf16> to vector<1152x128xbf16>
    %cst_133 = arith.constant dense<0.000000e+00> : vector<256x128xf32>
    %144 = tpu.matmul %141, %143, %cst_133 {dimension_numbers = #tpu.dot_dimension_numbers<[1], [0], [0], [1], [0, 0, 1, 1], [], []>} : vector<256x1152xbf16>, vector<1152x128xbf16>, vector<256x128xf32> -> vector<256x128xf32>
    %c2_134 = arith.constant 2 : index
    %c0_135 = arith.constant 0 : index
    %c0_136 = arith.constant 0 : index
    %145 = vector.load %arg5[%c2_134, %c0_135, %c0_136] : memref<3x1x128xf32, #tpu.memory_space<vmem>>, vector<1x1x128xf32>
    %146 = vector.shape_cast %145 : vector<1x1x128xf32> to vector<1x128xf32>
    %147 = vector.broadcast %146 : vector<1x128xf32> to vector<256x128xf32>
    %148 = arith.addf %144, %147 : vector<256x128xf32>
    %cst_137 = arith.constant 0.000000e+00 : f32
    %149 = vector.broadcast %cst_137 : f32 to vector<256x128xf32>
    %150 = arith.subf %149, %148 : vector<256x128xf32>
    %151 = math.exp %150 : vector<256x128xf32>
    %cst_138 = arith.constant 1.000000e+00 : f32
    %152 = vector.broadcast %cst_138 : f32 to vector<256x128xf32>
    %153 = arith.addf %152, %151 : vector<256x128xf32>
    %154 = tpu.reciprocal %153 {approx = true} : vector<256x128xf32> -> vector<256x128xf32>
    %155 = arith.mulf %148, %154 : vector<256x128xf32>
    %156 = arith.addf %155, %23 : vector<256x128xf32>
    %157 = vector.shape_cast %156 : vector<256x128xf32> to vector<1x16x16x128xf32>
    %c0_139 = arith.constant 0 : index
    %c0_140 = arith.constant 0 : index
    %c0_141 = arith.constant 0 : index
    %c0_142 = arith.constant 0 : index
    %158 = vector.load %arg6[%c0_139, %c0_140, %c0_141, %c0_142] : memref<1x16x16x128xf32, #tpu.memory_space<vmem>>, vector<1x16x16x128xf32>
    tpu.vector_store %arg6[%c0_139, %c0_140, %c0_141, %c0_142], %157 {strides = array<i32>} : memref<1x16x16x128xf32, #tpu.memory_space<vmem>>, vector<1x16x16x128xf32>,
    return
  }
  func.func @transform_0(%arg0: i32) -> (i32, i32, i32, i32) {
    %c0_i32 = arith.constant 0 : i32
    %c0_i32_0 = arith.constant 0 : i32
    %c0_i32_1 = arith.constant 0 : i32
    %c0_i32_2 = arith.constant 0 : i32
    return %arg0, %c0_i32, %c0_i32_0, %c0_i32_1 : i32, i32, i32, i32
  }
  func.func @transform_1(%arg0: i32) -> (i32, i32) {
    %c0_i32 = arith.constant 0 : i32
    %c0_i32_0 = arith.constant 0 : i32
    %c0_i32_1 = arith.constant 0 : i32
    return %c0_i32, %c0_i32_0 : i32, i32
  }
  func.func @transform_2(%arg0: i32) -> (i32, i32) {
    %c0_i32 = arith.constant 0 : i32
    %c0_i32_0 = arith.constant 0 : i32
    %c0_i32_1 = arith.constant 0 : i32
    return %c0_i32, %c0_i32_0 : i32, i32
  }
  func.func @transform_3(%arg0: i32) -> (i32, i32, i32) {
    %c0_i32 = arith.constant 0 : i32
    %c0_i32_0 = arith.constant 0 : i32
    %c0_i32_1 = arith.constant 0 : i32
    %c0_i32_2 = arith.constant 0 : i32
    return %c0_i32, %c0_i32_0, %c0_i32_1 : i32, i32, i32
  }
  func.func @transform_4(%arg0: i32) -> (i32, i32, i32) {
    %c0_i32 = arith.constant 0 : i32
    %c0_i32_0 = arith.constant 0 : i32
    %c0_i32_1 = arith.constant 0 : i32
    %c0_i32_2 = arith.constant 0 : i32
    return %c0_i32, %c0_i32_0, %c0_i32_1 : i32, i32, i32
  }
  func.func @transform_5(%arg0: i32) -> (i32, i32, i32, i32) {
    %c0_i32 = arith.constant 0 : i32
    %c0_i32_0 = arith.constant 0 : i32
    %c0_i32_1 = arith.constant 0 : i32
    %c0_i32_2 = arith.constant 0 : i32
    return %arg0, %c0_i32, %c0_i32_0, %c0_i32_1 : i32, i32, i32, i32
  }
}

</mosaic_0001>

<bundles_post_ra>
// kernel: tpu_custom_call.1
= control target key start
LH: loop header
LB: loop body
LE: loop exit
PB: predicated region body
PF: predicated region fallthrough
CT: control target
= control target key end

     0   :  { %10 = vsyncpa [#allocation4], 0  ;;  %s13241_s0 = inlined_call_operand.hbm [shape: bf16[2,16,16,128], index: 0, kind: input, shape index: {}]   ;;  %s13242_s1 = inlined_call_operand.hbm [shape: bf16[128,256], index: 1, kind: input, shape index: {}]   ;;  %s13243_s2 = inlined_call_operand.vmem [shape: f32[1,256], index: 2, kind: input, shape index: {}]   ;;  %s13244_s3 = inlined_call_operand.hbm [shape: bf16[3,1152,128], index: 3, kind: input, shape index: {}]   ;;  %s13245_s4 = inlined_call_operand.vmem [shape: f32[3,1,128], index: 4, kind: input, shape index: {}]   ;;  %s13246_s5 = inlined_call_operand.hbm [shape: f32[2,16,16,128], index: 5, kind: output, shape index: {}]  }
   0x1   :  { %12 = vsyncpa [#allocation4 + $0x1], 0 }
   0x2   :  { %13 = vsyncpa [#allocation7], 0 }
   0x3   :  { %14 = vsyncpa [#allocation5], 0 }
   0x4   :  { %16 = vsyncpa [#allocation5 + $0x1], 0  ;;  %s10461_s18 = smov 0   ;;  %s10463_s19 = smov 0  }
   0x5   :  { %s10465_s20 = smov 0   ;;  %s10467_s21 = smov 0  }
   0x6 LB: > { %s10482_s22 = sadd.s32 4294967295, %s10417_s21   ;;  %s7437_s23 = sadd.s32 4294967294, %s10417_s21   ;;  %s10417_s21 = sphi %s10467_s21, %s13435_s21   ;;  %s10413_s20 = sphi %s10465_s20, %s13434_s20   ;;  %s10409_s19 = sphi %s10463_s19, %s13433_s19   ;;  %s10405_s18 = sphi %s10461_s18, %s13432_s18  }
   0x7   : > { %p42_p0 = scmp.ne.s32.totalorder %s10409_s19, %s10405_s18  ;;  %p13247_p1 = scmp.eq.s32.totalorder %s10482_s22, 0 }
   0x8   : > { %p156_p3 = scmp.eq.s32.totalorder %s7437_s23, 1  ;;  %p7438_p5 = scmp.ge.s32.totalorder %s10417_s21, 1 }
   0x9   : > { %p10491_p4 = por %p13247_p1, %p42_p0  ;;  %p163_p7 = scmp.lt.s32.totalorder %s10417_s21, 3 }
   0xa   : > { %p10496_p6 = por %p156_p3, %p42_p0  ;;  %s10419_s27 = smov [#allocation6]  }
   0xb   : > { %s13275_s24 = scalar_select %p10491_p4, 1, 0 }
   0xc   : > { %s13276_s25 = scalar_select %p10496_p6, 1, 0 }
   0xd   : > { %p10501_p8 = pnand %p7438_p5, %p163_p7  ;;  %s175_s28 = sshll.u32 %s10419_s27, 4  ;;  %s10505_s28 = int_to_ptr.vmem [resolvable:$true] %s175_s28 }
   0xe   : > { %s10420_s30 = smov [#allocation8]   ;;  %s10261_s9 = scalar_lea.hbm %s13242_s1, 2048 }
   0xf   : > { %p9298_p9 = pneg %p10501_p8  ;;  %s191_s6 = sshll.u32 %s10420_s30, 4  ;;  %s10516_s6 = int_to_ptr.vmem [resolvable:$true] %s191_s6 }
  0x10   : > { %p10262_p12 = scmp.ne.s32.totalorder %s13242_s1, %s10261_s9  ;;  %p10268_p5 = scmp.lt.u32.totalorder %s10261_s9, %s13242_s1 }
  0x11   : > { %p10512_p11 = pnand %p9298_p9, %p13247_p1 }
  0x13   : > { %p10263_p13 = pneg %p10512_p11 }
  0x15   : > { %p10264_p0 = pnand %p10263_p13, %p10262_p12 }
  0x17   : > { %p10265_p3 = pneg %p10264_p0 }
  0x19   : > { %p10270_p7 = pnand %p10268_p5, %p10265_p3 }
  0x1b   : > { %10273 = shalt.err (!%p10270_p7)
}
  0x1c   : > { %s10274_s14 = scalar_lea.vmem %s10505_s28, 2048  ;;  %p10282_p2 = scmp.lt.s32.totalorder %s10505_s28, %s10505_s28 }
  0x1d   : > { %p10275_p9 = scmp.ne.s32.totalorder %s10505_s28, %s10274_s14  ;;  %p10283_p12 = scmp.lt.s32.totalorder %s10274_s14, %s10274_s14 }
  0x1f   : > { %p10277_p10 = pnand %p10275_p9, %p10263_p13  ;;  %p10284_p0 = por %p10283_p12, %p10282_p2 }
  0x21   : > { %p10278_p1 = pneg %p10277_p10 }
  0x23   : > { %p10285_p6 = pnand %p10284_p0, %p10278_p1 }
  0x25   : > { %10288 = shalt.err (!%p10285_p6)
}
  0x26   : > { %s10421_s15 = smov 128   ;;  %s10422_s16 = smov 8  }
  0x27   : > { %9301 = dma.hbm_to_vmem [thread:$0]  (!%p10512_p11), %s13242_s1, 2048, %s10505_s28, [#allocation7], %s10421_s15, %s10421_s15, %s10422_s16  }
  0x28   : > { %s10289_s7 = scalar_lea.hbm %s13244_s3, 27648 }
  0x29   : > { %p10290_p2 = scmp.ne.s32.totalorder %s13244_s3, %s10289_s7  ;;  %p10296_p10 = scmp.lt.u32.totalorder %s10289_s7, %s13244_s3 }
  0x2b   : > { %p10292_p1 = pnand %p10290_p2, %p10263_p13 }
  0x2d   : > { %p10293_p6 = pneg %p10292_p1 }
  0x2f   : > { %p10298_p3 = pnand %p10296_p10, %p10293_p6 }
  0x31   : > { %10301 = shalt.err (!%p10298_p3)
}
  0x32   : > { %s10302_s28 = scalar_lea.vmem %s10516_s6, 27648  ;;  %p10310_p12 = scmp.lt.s32.totalorder %s10516_s6, %s10516_s6 }
  0x33   : > { %p10303_p5 = scmp.ne.s32.totalorder %s10516_s6, %s10302_s28  ;;  %p10311_p0 = scmp.lt.s32.totalorder %s10302_s28, %s10302_s28 }
  0x35   : > { %p10305_p7 = pnand %p10303_p5, %p10263_p13  ;;  %p10312_p2 = por %p10311_p0, %p10310_p12 }
  0x37   : > { %p10306_p9 = pneg %p10305_p7 }
  0x39   : > { %p10313_p1 = pnand %p10312_p2, %p10306_p9 }
  0x3b   : > { %10316 = shalt.err (!%p10313_p1)
}
  0x3c   : > { %s10423_s12 = smov 64   ;;  %s10424_s13 = smov 4  }
  0x3d   : > { %9304 = dma.hbm_to_vmem [thread:$0]  (!%p10512_p11), %s13244_s3, 27648, %s10516_s6, [#allocation7], %s10423_s12, %s10423_s12, %s10424_s13  }
  0x3e   : > { %s10574_s16 = sadd.s32 1, %s10417_s21   ;;  %s29_s23 = sadd.s32 1, %s10413_s20 }
  0x3f   : > { %s26_s17 = ssub.s32 %s10417_s21, %s10574_s16  ;;  %p36_p6 = scmp.ne.s32.totalorder %s10413_s20, %s10409_s19 }
  0x40   : > { %p27_p13 = scmp.eq.s32.totalorder %s26_s17, 0  ;;  %p37_p10 = scmp.eq.s32.totalorder %s10417_s21, 0 }
  0x41   : > { %p13279_p5 = scmp.eq.s32.totalorder %s10482_s22, 1  ;;  %p9315_p9 = scmp.lt.s32.totalorder %s10417_s21, 2 }
  0x42   : > { %s10583_s27 = scalar_select %p27_p13, %s10413_s20, %s29_s23  }
  0x43   : > { %p38_p3 = por %p37_p10, %p36_p6  ;;  %p10587_p7 = por %p13279_p5, %p36_p6 }
  0x44   : > { %s208_s30 = sand.u32 1, %s10413_s20   ;;  %s7708_s6 = sshll.u32 %s10417_s21, 11 }
  0x45   : > { %s13280_s29 = scalar_select %p10587_p7, 1, 0 }
  0x46   : > { %s7442_s7 = sshll.u32 %s208_s30, 7  ;;  %s10597_s10 = scalar_lea.hbm %s13241_s0, %s7708_s6 }
  0x47   : > { %s212_s11 = scalar_lea.vmem [#allocation3], %s7442_s7  ;;  %p10601_p11 = pnand %p9315_p9, %p38_p3 }
  0x48   : > { %s219_s28 = sshll.u32 %s212_s11, 4  ;;  %s10605_s15 = scalar_lea.sflag [#allocation4], %s208_s30  ;;  %s10599_s28 = int_to_ptr.vmem [resolvable:$true] %s219_s28 }
  0x49   : > { %s10317_s17 = scalar_lea.hbm %s10597_s10, 2048  ;;  %p10319_p0 = pneg %p10601_p11 }
  0x4a   : > { %p10318_p12 = scmp.ne.s32.totalorder %s10597_s10, %s10317_s17  ;;  %s10322_s6 = scalar_lea.hbm %s13241_s0, 4096 }
  0x4b   : > { %p10323_p13 = scmp.lt.u32.totalorder %s10597_s10, %s13241_s0  ;;  %p10324_p6 = scmp.lt.u32.totalorder %s10322_s6, %s10317_s17 }
  0x4c   : > { %p10320_p2 = pnand %p10319_p0, %p10318_p12  ;;  %p10326_p3 = scmp.lt.u32.totalorder %s10317_s17, %s10597_s10 }
  0x4d   : > { %p10325_p10 = por %p10324_p6, %p10323_p13 }
  0x4e   : > { %p10321_p1 = pneg %p10320_p2 }
  0x4f   : > { %p10327_p5 = por %p10326_p3, %p10325_p10 }
  0x51   : > { %p10328_p9 = pnand %p10327_p5, %p10321_p1 }
  0x53   : > { %10331 = shalt.err (!%p10328_p9)
}
  0x54   : > { %s10332_s30 = scalar_lea.vmem %s10599_s28, 2048  ;;  %s10425_s11 = smov [#allocation3]  }
  0x55   : > { %p10333_p12 = scmp.ne.s32.totalorder %s10599_s28, %s10332_s30  ;;  %s10337_s23 = sshll.u32 %s10425_s11, 4  ;;  %s10338_s23 = int_to_ptr.vmem [resolvable:$false] %s10337_s23 }
  0x56   : > { %s10339_s7 = scalar_lea.vmem %s10338_s23, 4096  ;;  %p10340_p4 = scmp.lt.s32.totalorder %s10599_s28, %s10338_s23 }
  0x57   : > { %p10335_p2 = pnand %p10333_p12, %p10319_p0  ;;  %p10341_p13 = scmp.lt.s32.totalorder %s10339_s7, %s10332_s30 }
  0x59   : > { %p10336_p7 = pneg %p10335_p2  ;;  %p10342_p6 = por %p10341_p13, %p10340_p4 }
  0x5b   : > { %p10343_p10 = pnand %p10342_p6, %p10336_p7 }
  0x5d   : > { %10346 = shalt.err (!%p10343_p10)
}
  0x5e   : > { %9308 = dma.hbm_to_vmem [thread:$0]  (!%p10601_p11), %s10597_s10, 2048, %s10599_s28, %s10605_s15, %s10423_s12, %s10423_s12, %s10424_s13  }
  0x5f   : > { %231 = sbr.rel (%p10501_p8) target bundleno = 2003 (0x7d3), region = 40 }
  0x66   : > { %s10639_s17 = sand.u32 1, %s10409_s19   ;;  %p13282_p4 = scmp.ne.s32.totalorder %s13275_s24, 0 }
  0x67   : > { %s7446_s6 = sshll.u32 %s10639_s17, 7  ;;  %s234_s8 = scalar_lea.sflag [#allocation4], %s10639_s17 }
  0x68   : > { %s10643_s9 = scalar_lea.vmem [#allocation3], %s7446_s6 }
  0x69   : > { %10392 = dma.done.wait (%p13282_p4), %s234_s8, 2048  }
  0x6a   : > { %10394 = vsyncadd (%p13282_p4), %s234_s8, 4294965248  ;;  %p13283_p7 = scmp.eq.s32.totalorder %s10482_s22, 0 }
  0x6c   : > { %10396 = dma.done.wait (%p13283_p7), [#allocation7], 29696   ;;  %p13284_p8 = pmov %p13283_p7 }
  0x6d   : > { %v10426_v0 = vmov 0   ;;  %v9361_v1 = vld [vmem:[#allocation6 + $0x4] ss:$8 sps:$4 sm:$0xff]   ;;  %v9363_v2 = vld [vmem:[#allocation6] ss:$8 sps:$4 sm:$0xff]   ;;  %v9387_v21 = vld [vmem:[%s10643_s9 + $0x10] sm:$0xff]  }
  0x6e   : > { %10398 = vsyncadd (%p13284_p8), [#allocation7], 4294937600  ;;  %584 = vmatprep.mubr.bf16.mxu0 %v10426_v0  ;;  %704 = vmatprep.mubr.bf16.mxu1 %v10426_v0  ;;  %v9364_v3 = vld [vmem:[#allocation6 + $0x14] ss:$8 sps:$4 sm:$0xff]   ;;  %v9366_v4 = vld [vmem:[#allocation6 + $0x10] ss:$8 sps:$4 sm:$0xff]  }
  0x6f   : > { %552 = vmatprep.subr.bf16.mxu0 %v9361_v1  ;;  %9270 = vmatprep.subr.bf16.mxu1 %v9361_v1  ;;  %v9367_v5 = vld [vmem:[#allocation6 + $0x24] ss:$8 sps:$4 sm:$0xff]   ;;  %v9369_v6 = vld [vmem:[#allocation6 + $0x20] ss:$8 sps:$4 sm:$0xff]   ;;  %v9370_v7 = vld [vmem:[#allocation6 + $0x34] ss:$8 sps:$4 sm:$0xff]  }
  0x70   : > { %553 = vmatpush1.bf16.msra.mxu0 %v9363_v2  ;;  %9278 = vmatpush1.bf16.msra.mxu1 %v9363_v2  ;;  %v9372_v8 = vld [vmem:[#allocation6 + $0x30] ss:$8 sps:$4 sm:$0xff]   ;;  %v9373_v9 = vld [vmem:[#allocation6 + $0x44] ss:$8 sps:$4 sm:$0xff]   ;;  %v9375_v10 = vld [vmem:[#allocation6 + $0x40] ss:$8 sps:$4 sm:$0xff]  }
  0x71   : > { %554 = vmatprep.subr.bf16.mxu0 %v9364_v3  ;;  %9271 = vmatprep.subr.bf16.mxu1 %v9364_v3  ;;  %v9376_v11 = vld [vmem:[#allocation6 + $0x54] ss:$8 sps:$4 sm:$0xff]   ;;  %v9378_v12 = vld [vmem:[#allocation6 + $0x50] ss:$8 sps:$4 sm:$0xff]   ;;  %v9379_v13 = vld [vmem:[#allocation6 + $0x64] ss:$8 sps:$4 sm:$0xff]  }
  0x72   : > { %v9381_v14 = vld [vmem:[#allocation6 + $0x60] ss:$8 sps:$4 sm:$0xff]   ;;  %v9382_v15 = vld [vmem:[#allocation6 + $0x74] ss:$8 sps:$4 sm:$0xff]   ;;  %v9384_v16 = vld [vmem:[#allocation6 + $0x70] ss:$8 sps:$4 sm:$0xff]  }
  0x73   : > { %v9385_v17 = vld [vmem:[%s10643_s9] sm:$0xff]   ;;  %v9386_v19 = vld [vmem:[%s10643_s9 + $0x8] sm:$0xff]   ;;  %v9398_v22 = vld [vmem:[%s10643_s9 + $0x70] sm:$0xff]   ;;  %v10427_v53 = vmov 0.0   ;;  %s7449_s23 = sshll.u32 %s10639_s17, 8  ;;  %s7709_s6 = sshll.u32 %s10482_s22, 12 }
  0x74   : > { %555 = vmatpush1.bf16.msra.mxu0 %v9366_v4  ;;  %9279 = vmatpush1.bf16.msra.mxu1 %v9366_v4  ;;  %v9394_v18 = vld [vmem:[%s10643_s9 + $0x60] sm:$0xff]   ;;  %v9396_v20 = vld [vmem:[%s10643_s9 + $0x68] sm:$0xff]   ;;  %v9388_v23 = vld [vmem:[%s10643_s9 + $0x18] sm:$0xff]   ;;  %273 = vst [vmem:[#allocation2] sm:$0xff] %v10427_v53  ;;  %s13010_s7 = scalar_lea.vmem [#allocation9], %s7449_s23  ;;  %s13192_s22 = scalar_lea.hbm %s13246_s5, %s7709_s6 }
  0x75   : > { %556 = vmatprep.subr.bf16.mxu0 %v9367_v5  ;;  %9272 = vmatprep.subr.bf16.mxu1 %v9367_v5  ;;  %v9400_v24 = vld [vmem:[%s10643_s9 + $0x78] sm:$0xff]   ;;  %v9389_v25 = vld [vmem:[%s10643_s9 + $0x20] sm:$0xff]   ;;  %v9390_v26 = vld [vmem:[%s10643_s9 + $0x28] sm:$0xff]   ;;  %274 = vst [vmem:[#allocation2 + $0x8] sm:$0xff] %v10427_v53  ;;  %s7345_s8 = sshll.u32 %s13010_s7, 4  ;;  %s7332_s26 = scalar_lea.sflag [#allocation5], %s10639_s17  ;;  %s13194_s8 = int_to_ptr.vmem [resolvable:$true] %s7345_s8 }
  0x76   : > { %v9391_v27 = vld [vmem:[%s10643_s9 + $0x30] sm:$0xff]   ;;  %v9392_v28 = vld [vmem:[%s10643_s9 + $0x38] sm:$0xff]   ;;  %v9393_v29 = vld [vmem:[%s10643_s9 + $0x40] sm:$0xff]   ;;  %275 = vst [vmem:[#allocation2 + $0x10] sm:$0x3] %v10427_v53  ;;  %s10347_s12 = scalar_lea.vmem %s13194_s8, 4096 }
  0x77   : > { %v9395_v30 = vld [vmem:[%s10643_s9 + $0x48] sm:$0xff]   ;;  %v9397_v31 = vld [vmem:[%s10643_s9 + $0x50] sm:$0xff]   ;;  %v9399_v32 = vld [vmem:[%s10643_s9 + $0x58] sm:$0xff]   ;;  %277 = vst [vmem:[#allocation2 + $0x198] sm:$0xff] %v10427_v53  ;;  %p10348_p11 = scmp.ne.s32.totalorder %s13194_s8, %s10347_s12  ;;  %p13429_p0 = scmp.ne.s32.totalorder %s13280_s29, 0 }
  0x78   : > { %557 = vmatpush1.bf16.msra.mxu0 %v9369_v6  ;;  %9280 = vmatpush1.bf16.msra.mxu1 %v9369_v6  ;;  %v9401_v33 = vld [vmem:[#allocation8 + $0x40] sm:$0xff]   ;;  %v9403_v35 = vld [vmem:[#allocation8 + $0x48] sm:$0xff]   ;;  %v9405_v37 = vld [vmem:[#allocation8 + $0x50] sm:$0xff]   ;;  %278 = vst [vmem:[#allocation2 + $0x1a0] sm:$0xff] %v10427_v53  ;;  %s10428_s13 = smov [#allocation9]  }
  0x79   : > { %558 = vmatprep.subr.bf16.mxu0 %v9370_v7  ;;  %9273 = vmatprep.subr.bf16.mxu1 %v9370_v7  ;;  %v9402_v34 = vld [vmem:[#allocation8] sm:$0xff]   ;;  %v9404_v36 = vld [vmem:[#allocation8 + $0x8] sm:$0xff]   ;;  %v9406_v38 = vld [vmem:[#allocation8 + $0x10] sm:$0xff]   ;;  %279 = vst [vmem:[#allocation2 + $0x1a8] sm:$0x3] %v10427_v53  ;;  %p10349_p1 = pnand %p10348_p11, %p13429_p0  ;;  %s10351_s10 = sshll.u32 %s10428_s13, 4  ;;  %s10352_s10 = int_to_ptr.vmem [resolvable:$false] %s10351_s10 }
  0x7a   : > { %v9407_v39 = vld [vmem:[#allocation8 + $0xc0] sm:$0xff]   ;;  %v9408_v40 = vld [vmem:[#allocation8 + $0x58] sm:$0xff]   ;;  %v9411_v43 = vld [vmem:[#allocation8 + $0xc8] sm:$0xff]   ;;  %281 = vst [vmem:[#allocation2 + $0x18] sm:$0x1] %v10427_v53  ;;  %s10353_s28 = scalar_lea.vmem %s10352_s10, 8192  ;;  %p10354_p5 = scmp.lt.s32.totalorder %s13194_s8, %s10352_s10 }
  0x7b   : > { %v9409_v41 = vld [vmem:[#allocation8 + $0x80] sm:$0xff]   ;;  %v9410_v42 = vld [vmem:[#allocation8 + $0x18] sm:$0xff]   ;;  %v9413_v45 = vld [vmem:[#allocation8 + $0x88] sm:$0xff]   ;;  %282 = vst [vmem:[#allocation2 + $0x30] sm:$0x1] %v10427_v53  ;;  %p10350_p3 = pneg %p10349_p1  ;;  %p10355_p9 = scmp.lt.s32.totalorder %s10353_s28, %s10347_s12 }
  0x7c   : > { %559 = vmatpush1.bf16.msra.mxu0 %v9372_v8  ;;  %9281 = vmatpush1.bf16.msra.mxu1 %v9372_v8  ;;  %v9412_v44 = vld [vmem:[#allocation8 + $0x60] sm:$0xff]   ;;  %v9415_v47 = vld [vmem:[#allocation8 + $0xd0] sm:$0xff]   ;;  %v9416_v48 = vld [vmem:[#allocation8 + $0x68] sm:$0xff]   ;;  %283 = vst [vmem:[#allocation2 + $0x48] sm:$0x1] %v10427_v53 }
  0x7d   : > { %560 = vmatprep.subr.bf16.mxu0 %v9373_v9  ;;  %9274 = vmatprep.subr.bf16.mxu1 %v9373_v9  ;;  %v9414_v46 = vld [vmem:[#allocation8 + $0x20] sm:$0xff]   ;;  %v9417_v49 = vld [vmem:[#allocation8 + $0x90] sm:$0xff]   ;;  %v9418_v50 = vld [vmem:[#allocation8 + $0x28] sm:$0xff]   ;;  %284 = vst [vmem:[#allocation2 + $0x60] sm:$0x1] %v10427_v53  ;;  %p10356_p12 = por %p10355_p9, %p10354_p5 }
  0x7e   : > { %v9419_v51 = vld [vmem:[#allocation8 + $0xd8] sm:$0xff]   ;;  %v9420_v52 = vld [vmem:[#allocation8 + $0x70] sm:$0xff]   ;;  %285 = vst [vmem:[#allocation2 + $0x78] sm:$0x1] %v10427_v53  ;;  %286 = vst [vmem:[#allocation2 + $0x90] sm:$0x1] %v10427_v53 }
  0x7f   : > { %287 = vst [vmem:[#allocation2 + $0xa8] sm:$0x1] %v10427_v53  ;;  %288 = vst [vmem:[#allocation2 + $0xc0] sm:$0x1] %v10427_v53  ;;  %v9421_v54 = vld [vmem:[#allocation8 + $0x98] sm:$0xff]   ;;  %v9422_v55 = vld [vmem:[#allocation8 + $0x30] sm:$0xff]   ;;  %p10357_p2 = pnand %p10356_p12, %p10350_p3 }
  0x80   : > { %561 = vmatpush1.bf16.msra.mxu0 %v9375_v10  ;;  %9282 = vmatpush1.bf16.msra.mxu1 %v9375_v10  ;;  %289 = vst [vmem:[#allocation2 + $0xd8] sm:$0x1] %v10427_v53  ;;  %290 = vst [vmem:[#allocation2 + $0xf0] sm:$0x1] %v10427_v53  ;;  %v9423_v56 = vld [vmem:[#allocation8 + $0xe0] sm:$0xff]   ;;  %v9424_v57 = vld [vmem:[#allocation8 + $0x78] sm:$0xff]  }
  0x81   : > { %562 = vmatprep.subr.bf16.mxu0 %v9376_v11  ;;  %9275 = vmatprep.subr.bf16.mxu1 %v9376_v11  ;;  %291 = vst [vmem:[#allocation2 + $0x108] sm:$0x1] %v10427_v53  ;;  %292 = vst [vmem:[#allocation2 + $0x120] sm:$0x1] %v10427_v53  ;;  %v9425_v58 = vld [vmem:[#allocation8 + $0xa0] sm:$0xff]   ;;  %v9426_v59 = vld [vmem:[#allocation8 + $0x38] sm:$0xff]  }
  0x82   : > { %293 = vst [vmem:[#allocation2 + $0x138] sm:$0x1] %v10427_v53  ;;  %294 = vst [vmem:[#allocation2 + $0x150] sm:$0x1] %v10427_v53  ;;  %v1210_v60 = vld [vmem:[#allocation2 + $0x1] sm:$0xff]  ;;  %v1211_v61 = vld [vmem:[#allocation2 + $0x9] sm:$0xff] }
  0x83   : > { %295 = vst [vmem:[#allocation2 + $0x168] sm:$0x1] %v10427_v53  ;;  %296 = vst [vmem:[#allocation2 + $0x180] sm:$0x1] %v10427_v53  ;;  %v1242_v62 = vpack.c.bf16 %v1211_v61, %v1210_v60  ;;  %v9428_v2 = vld [vmem:[#allocation8 + $0xa8] sm:$0xff]   ;;  %v9430_v3 = vld [vmem:[#allocation8 + $0xf0] sm:$0xff]  }
  0x84   : > { %563 = vmatpush1.bf16.msra.mxu0 %v9378_v12  ;;  %9283 = vmatpush1.bf16.msra.mxu1 %v9378_v12  ;;  %299 = vst [vmem:[#allocation2 + $0x29] sm:$0x1] %v10427_v53  ;;  %300 = vst [vmem:[#allocation2 + $0x41] sm:$0x1] %v10427_v53  ;;  %v9432_v4 = vld [vmem:[#allocation8 + $0xb0] sm:$0xff]   ;;  %v9433_v5 = vld [vmem:[#allocation8 + $0xf8] sm:$0xff]  }
  0x85   : > { %564 = vmatprep.subr.bf16.mxu0 %v9379_v13  ;;  %9276 = vmatprep.subr.bf16.mxu1 %v9379_v13  ;;  %301 = vst [vmem:[#allocation2 + $0x59] sm:$0x1] %v10427_v53  ;;  %302 = vst [vmem:[#allocation2 + $0x71] sm:$0x1] %v10427_v53  ;;  %v9434_v6 = vld [vmem:[#allocation8 + $0xb8] sm:$0xff]   ;;  %v9429_v7 = vld [vmem:[#allocation8 + $0x140] sm:$0xff]   ;;  %v366_v13 = vlaneseq }
  0x86   : > { %303 = vst [vmem:[#allocation2 + $0x89] sm:$0x1] %v10427_v53  ;;  %304 = vst [vmem:[#allocation2 + $0xa1] sm:$0x1] %v10427_v53  ;;  %v9431_v8 = vld [vmem:[#allocation8 + $0x100] sm:$0xff]   ;;  %v9435_v9 = vld [vmem:[#allocation8 + $0x148] sm:$0xff]  }
  0x87   : > { %305 = vst [vmem:[#allocation2 + $0xb9] sm:$0x1] %v10427_v53  ;;  %306 = vst [vmem:[#allocation2 + $0xd1] sm:$0x1] %v10427_v53  ;;  %v9436_v10 = vld [vmem:[#allocation8 + $0x108] sm:$0xff]   ;;  %v9437_v11 = vld [vmem:[#allocation8 + $0x150] sm:$0xff]  }
  0x88   : > { %565 = vmatpush1.bf16.msra.mxu0 %v9381_v14  ;;  %9284 = vmatpush1.bf16.msra.mxu1 %v9381_v14  ;;  %307 = vst [vmem:[#allocation2 + $0xe9] sm:$0x1] %v10427_v53  ;;  %308 = vst [vmem:[#allocation2 + $0x101] sm:$0x1] %v10427_v53  ;;  %v9438_v12 = vld [vmem:[#allocation8 + $0x110] sm:$0xff]   ;;  %v10685_v14 = vshrl.u32 %v366_v13, 7 }
  0x89   : > { %566 = vmatprep.subr.bf16.mxu0 %v9382_v15  ;;  %9277 = vmatprep.subr.bf16.mxu1 %v9382_v15  ;;  %309 = vst [vmem:[#allocation2 + $0x119] sm:$0x1] %v10427_v53  ;;  %310 = vst [vmem:[#allocation2 + $0x131] sm:$0x1] %v10427_v53 }
  0x8a   : > { %311 = vst [vmem:[#allocation2 + $0x149] sm:$0x1] %v10427_v53  ;;  %312 = vst [vmem:[#allocation2 + $0x161] sm:$0x1] %v10427_v53  ;;  %v368_v15 = vsub.s32 0, %v10685_v14 }
  0x8b   : > { %313 = vst [vmem:[#allocation2 + $0x179] sm:$0x1] %v10427_v53  ;;  %314 = vst [vmem:[#allocation2 + $0x191] sm:$0x1] %v10427_v53 }
  0x8c   : > { %567 = vmatpush1.bf16.msra.mxu0 %v9384_v16  ;;  %9285 = vmatpush1.bf16.msra.mxu1 %v9384_v16  ;;  %280 = vst [vmem:[#allocation2] sm:$0x1] %v10427_v53  ;;  %298 = vst [vmem:[#allocation2 + $0x11] sm:$0x1] %v10427_v53  ;;  %v364_v16 = vld [vmem:[%s13243_s2] sm:$0x3] }
  0x8d   : > { %7710 = vmatprep.subr.bf16.mxu1 %v9401_v33  ;;  %7822 = vmatprep.subr.bf16.mxu0 %v9407_v39  ;;  %297 = vst [vmem:[#allocation2 + $0x198] sm:$0x1] %v10427_v53  ;;  %315 = vst [vmem:[#allocation2 + $0x1a9] sm:$0x1] %v10427_v53  ;;  %v9439_v39 = vld [vmem:[#allocation8 + $0x158] sm:$0xff]  }
  0x8f   : > { %585 = vmatmul.mubr.bf16.vlgmr.msra.gmra.mrb[0].mxu0 %v9385_v17  ;;  %705 = vmatmul.mubr.bf16.vlgmr.msra.gmra.mrb[0].mxu1 %v9394_v18  ;;  %v10691_v17 = vrot.slane %v364_v16, %v368_v15 }
  0x90   : > { %594 = vmatprep.mubr.bf16.mxu0 %v10426_v0  ;;  %714 = vmatprep.mubr.bf16.mxu1 %v10426_v0 }
  0x91   : > { %7711 = vmatpush3.bf16.msra.mxu1 %v9402_v34  ;;  %7823 = vmatpush3.bf16.msra.mxu0 %v9409_v41 }
  0x92   : > { %7712 = vmatprep.subr.bf16.mxu1 %v9403_v35  ;;  %7824 = vmatprep.subr.bf16.mxu0 %v9411_v43 }
  0x93   : > { %v1162_v63 = vld [vmem:[#allocation2] sm:$0xff] }
  0x94   : > { %v1194_v1 = vpack.c.bf16 %v10427_v53, %v1162_v63 }
  0x95   : > { %7713 = vmatpush3.bf16.msra.mxu1 %v9404_v36  ;;  %7825 = vmatpush3.bf16.msra.mxu0 %v9413_v45 }
  0x96   : > { %7714 = vmatprep.subr.bf16.mxu1 %v9405_v37  ;;  %7826 = vmatprep.subr.bf16.mxu0 %v9415_v47 }
  0x97   : > { %595 = vmatmul.mubr.bf16.gmra.mrb[4].mxu0 %v9386_v19  ;;  %715 = vmatmul.mubr.bf16.gmra.mrb[4].mxu1 %v9396_v20 }
  0x98   : > { %604 = vmatprep.mubr.bf16.mxu0 %v10426_v0  ;;  %724 = vmatprep.mubr.bf16.mxu1 %v10426_v0 }
  0x99   : > { %7715 = vmatpush3.bf16.msra.mxu1 %v9406_v38  ;;  %7827 = vmatpush3.bf16.msra.mxu0 %v9417_v49 }
  0x9a   : > { %7716 = vmatprep.subr.bf16.mxu1 %v9408_v40  ;;  %7828 = vmatprep.subr.bf16.mxu0 %v9419_v51  ;;  %v9440_v40 = vld [vmem:[#allocation8 + $0x118] sm:$0xff]  }
  0x9d   : > { %7717 = vmatpush3.bf16.msra.mxu1 %v9410_v42  ;;  %7829 = vmatpush3.bf16.msra.mxu0 %v9421_v54 }
  0x9e   : > { %7718 = vmatprep.subr.bf16.mxu1 %v9412_v44  ;;  %7830 = vmatprep.subr.bf16.mxu0 %v9423_v56 }
  0x9f   : > { %605 = vmatmul.mubr.bf16.gmra.mrb[8].mxu0 %v9387_v21  ;;  %725 = vmatmul.mubr.bf16.gmra.mrb[8].mxu1 %v9398_v22 }
  0xa0   : > { %614 = vmatprep.mubr.bf16.mxu0 %v10426_v0  ;;  %734 = vmatprep.mubr.bf16.mxu1 %v10426_v0 }
  0xa1   : > { %7719 = vmatpush3.bf16.msra.mxu1 %v9414_v46  ;;  %7831 = vmatpush3.bf16.msra.mxu0 %v9425_v58  ;;  %v9442_v58 = vld [vmem:[#allocation8 + $0x120] sm:$0xff]  }
  0xa2   : > { %7720 = vmatprep.subr.bf16.mxu1 %v9416_v48 }
  0xa5   : > { %7721 = vmatpush3.bf16.msra.mxu1 %v9418_v50 }
  0xa6   : > { %7722 = vmatprep.subr.bf16.mxu1 %v9420_v52 }
  0xa7   : > { %615 = vmatmul.mubr.bf16.gmra.mrb[12].mxu0 %v9388_v23  ;;  %735 = vmatmul.mubr.bf16.gmra.mrb[12].mxu1 %v9400_v24 }
  0xa8   : > { %624 = vmatprep.mubr.bf16.mxu0 %v10426_v0  ;;  %2210 = vmatprep.mubr.bf16.mxu1 %v1242_v62 }
  0xa9   : > { %7723 = vmatpush3.bf16.msra.mxu1 %v9422_v55 }
  0xaa   : > { %7724 = vmatprep.subr.bf16.mxu1 %v9424_v57  ;;  %v9441_v57 = vld [vmem:[#allocation8 + $0x160] sm:$0xff]  }
  0xad   : > { %7725 = vmatpush3.bf16.msra.mxu1 %v9426_v59  ;;  %v9443_v59 = vld [vmem:[#allocation8 + $0x168] sm:$0xff]  }
  0xae   : > { %7934 = vmatprep.subr.bf16.mxu1 %v9429_v7 }
  0xaf   : > { %625 = vmatmul.mubr.bf16.gmra.mrb[16].mxu0 %v9389_v25 }
  0xb0   : > { %634 = vmatprep.mubr.bf16.mxu0 %v10426_v0  ;;  %2211 = vmatmul.mubr.bf16.vlgmr.msra.gmra.mrb[16].mxu1 %v1194_v1 }
  0xb1   : > { %7935 = vmatpush3.bf16.msra.mxu1 %v9431_v8 }
  0xb2   : > { %7936 = vmatprep.subr.bf16.mxu1 %v9435_v9 }
  0xb5   : > { %7937 = vmatpush3.bf16.msra.mxu1 %v9436_v10 }
  0xb6   : > { %7938 = vmatprep.subr.bf16.mxu1 %v9437_v11 }
  0xb7   : > { %635 = vmatmul.mubr.bf16.gmra.mrb[20].mxu0 %v9390_v26 }
  0xb8   : > { %644 = vmatprep.mubr.bf16.mxu0 %v10426_v0 }
  0xb9   : > { %7939 = vmatpush3.bf16.msra.mxu1 %v9438_v12 }
  0xba   : > { %7940 = vmatprep.subr.bf16.mxu1 %v9439_v39 }
  0xbd   : > { %7941 = vmatpush3.bf16.msra.mxu1 %v9440_v40 }
  0xbe   : > { %7942 = vmatprep.subr.bf16.mxu1 %v9441_v57 }
  0xbf   : > { %645 = vmatmul.mubr.bf16.gmra.mrb[24].mxu0 %v9391_v27 }
  0xc0   : > { %654 = vmatprep.mubr.bf16.mxu0 %v10426_v0 }
  0xc1   : > { %7943 = vmatpush3.bf16.msra.mxu1 %v9442_v58 }
  0xc2   : > { %7944 = vmatprep.subr.bf16.mxu1 %v9443_v59 }
  0xc7   : > { %655 = vmatmul.mubr.bf16.gmra.mrb[28].mxu0 %v9392_v28 }
  0xc8   : > { %664 = vmatprep.mubr.bf16.mxu0 %v10426_v0 }
  0xcf   : > { %665 = vmatmul.mubr.bf16.gmra.mrb[32].mxu0 %v9393_v29 }
  0xd0   : > { %674 = vmatprep.mubr.bf16.mxu0 %v10426_v0 }
  0xd7   : > { %675 = vmatmul.mubr.bf16.gmra.mrb[36].mxu0 %v9395_v30 }
  0xd8   : > { %684 = vmatprep.mubr.bf16.mxu0 %v10426_v0 }
  0xdf   : > { %685 = vmatmul.mubr.bf16.gmra.mrb[40].mxu0 %v9397_v31 }
  0xe0   : > { %694 = vmatprep.mubr.bf16.mxu0 %v10426_v0  ;;  %v9427_v0 = vld [vmem:[#allocation8 + $0xe8] sm:$0xff]  }
  0xe1   : > { %7832 = vmatprep.subr.bf16.mxu0 %v9427_v0 }
  0xe2   : > { %7833 = vmatpush3.bf16.msra.mxu0 %v9428_v2 }
  0xe3   : > { %7834 = vmatprep.subr.bf16.mxu0 %v9430_v3 }
  0xe6   : > { %7835 = vmatpush3.bf16.msra.mxu0 %v9432_v4  ;;  %v9444_v4 = vld [vmem:[#allocation8 + $0x128] sm:$0xff]  }
  0xe7   : > { %695 = vmatmul.mubr.bf16.gmra.mrb[44].mxu0 %v9399_v32  ;;  %7836 = vmatprep.subr.bf16.mxu0 %v9433_v5 }
  0xe8   : > { %7945 = vmatpush3.bf16.msra.mxu1 %v9444_v4 }
  0xea   : > { %7837 = vmatpush3.bf16.msra.mxu0 %v9434_v6 }
 0x162   : > { %v586_v18 = vpop.f32.mrb[0].mxu0  ;;  %v10693_v19 = vpop.f32.mrb[0].mxu1 }
 0x163   : > { %v10696_v20 = vadd.f32 %v586_v18, %v10691_v17  ;;  %v10698_v21 = vpop.f32.mrb[1].mxu0  ;;  %v10700_v22 = vpop.f32.mrb[1].mxu1 }
 0x164   : > { %v590_v23 = vpop.f32.mrb[2].mxu0  ;;  %v10702_v24 = vpop.f32.mrb[2].mxu1 }
 0x165   : > { %v745_v25 = vsub.f32 0.0, %v10696_v20  ;;  %v10706_v26 = vadd.f32 %v590_v23, %v10691_v17  ;;  %v10708_v27 = vpop.f32.mrb[3].mxu0  ;;  %v10710_v28 = vpop.f32.mrb[3].mxu1 }
 0x167   : > { %v809_v29 = vmul.f32 1.442695, %v745_v25  ;;  %v747_v30 = vsub.f32 0.0, %v10706_v26 }
 0x169   : > { %9617 = vpow2.f32 %v809_v29  ;;  %v813_v31 = vmul.f32 1.442695, %v747_v30  ;;  %v9445_v30 = vld [vmem:[#allocation8 + $0x170] sm:$0xff]  }
 0x16a   : > { %v596_v32 = vpop.f32.mrb[4].mxu0  ;;  %v10713_v33 = vpop.f32.mrb[4].mxu1  ;;  %7946 = vmatprep.subr.bf16.mxu1 %v9445_v30 }
 0x16b   : > { %9619 = vpow2.f32 %v813_v31  ;;  %v10716_v34 = vadd.f32 %v596_v32, %v10691_v17  ;;  %v10718_v35 = vpop.f32.mrb[5].mxu0  ;;  %v10720_v36 = vpop.f32.mrb[5].mxu1 }
 0x16c   : > { %13285 = vst [vmem:[#allocation13_spill] sm:$0xff] %v10720_v36  ;;  %v600_v37 = vpop.f32.mrb[6].mxu0  ;;  %v10722_v38 = vpop.f32.mrb[6].mxu1 }
 0x16d   : > { %v749_v41 = vsub.f32 0.0, %v10716_v34  ;;  %v10726_v42 = vadd.f32 %v600_v37, %v10691_v17  ;;  %v10728_v43 = vpop.f32.mrb[7].mxu0  ;;  %v10730_v44 = vpop.f32.mrb[7].mxu1  ;;  %v9446_v37 = vld [vmem:[#allocation8 + $0x130] sm:$0xff]  }
 0x16e   : > { %13286 = vst [vmem:[#allocation14_spill] sm:$0xff] %v10730_v44  ;;  %7947 = vmatpush3.bf16.msra.mxu1 %v9446_v37 }
 0x16f   : > { %v817_v45 = vmul.f32 1.442695, %v749_v41  ;;  %v751_v46 = vsub.f32 0.0, %v10726_v42 }
 0x171   : > { %9621 = vpow2.f32 %v817_v45  ;;  %v821_v47 = vmul.f32 1.442695, %v751_v46 }
 0x172   : > { %v606_v48 = vpop.f32.mrb[8].mxu0  ;;  %v10733_v49 = vpop.f32.mrb[8].mxu1 }
 0x173   : > { %v9618_v50 = vpop.eup %9617  ;;  %9623 = vpow2.f32 %v821_v47  ;;  %v10736_v51 = vadd.f32 %v606_v48, %v10691_v17  ;;  %v10738_v52 = vpop.f32.mrb[9].mxu0 }
 0x174   : > { %v10740_v53 = vpop.f32.mrb[9].mxu1  ;;  %v937_v54 = vadd.f32 1.0, %v9618_v50  ;;  %v610_v55 = vpop.f32.mrb[10].mxu0 }
 0x175   : > { %13287 = vst [vmem:[#allocation15_spill] sm:$0xff] %v10740_v53  ;;  %v10742_v56 = vpop.f32.mrb[10].mxu1  ;;  %v9620_v60 = vpop.eup %9619  ;;  %v753_v61 = vsub.f32 0.0, %v10736_v51  ;;  %v10746_v62 = vadd.f32 %v610_v55, %v10691_v17 }
 0x176   : > { %v10748_v63 = vpop.f32.mrb[11].mxu0  ;;  %v10750_v0 = vpop.f32.mrb[11].mxu1  ;;  %9625 = vrcp.f32 %v937_v54  ;;  %v939_v1 = vadd.f32 1.0, %v9620_v60  ;;  %v9447_v60 = vld [vmem:[#allocation8 + $0x1c0] sm:$0xff]  }
 0x177   : > { %13288 = vst [vmem:[#allocation16_spill] sm:$0xff] %v10750_v0  ;;  %v825_v2 = vmul.f32 1.442695, %v753_v61  ;;  %v755_v3 = vsub.f32 0.0, %v10746_v62  ;;  %8046 = vmatprep.subr.bf16.mxu0 %v9447_v60 }
 0x178   : > { %9627 = vrcp.f32 %v939_v1 }
 0x179   : > { %v829_v5 = vmul.f32 1.442695, %v755_v3  ;;  %9629 = vpow2.f32 %v825_v2 }
 0x17a   : > { %v616_v6 = vpop.f32.mrb[12].mxu0  ;;  %v10758_v10 = vpop.f32.mrb[12].mxu1 }
 0x17b   : > { %v9622_v7 = vpop.eup %9621  ;;  %v10754_v8 = vadd.f32 %v616_v6, %v10691_v17  ;;  %v10756_v9 = vpop.f32.mrb[13].mxu0  ;;  %9631 = vpow2.f32 %v829_v5 }
 0x17c   : > { %13289 = vst [vmem:[#allocation17_spill] sm:$0xff] %v10756_v9  ;;  %v941_v11 = vadd.f32 1.0, %v9622_v7  ;;  %v620_v12 = vpop.f32.mrb[14].mxu0  ;;  %v10760_v13 = vpop.f32.mrb[13].mxu1  ;;  %v9451_v7 = vld [vmem:[#allocation8 + $0x178] sm:$0xff]  }
 0x17d   : > { %13290 = vst [vmem:[#allocation18_spill] sm:$0xff] %v10760_v13  ;;  %v9624_v15 = vpop.eup %9623  ;;  %v757_v16 = vsub.f32 0.0, %v10754_v8  ;;  %v10764_v18 = vadd.f32 %v620_v12, %v10691_v17  ;;  %v10766_v23 = vpop.f32.mrb[15].mxu0  ;;  %7948 = vmatprep.subr.bf16.mxu1 %v9451_v7  ;;  %v9449_v7 = vld [vmem:[#allocation8 + $0x1c8] sm:$0xff]  }
 0x17e   : > { %13291 = vst [vmem:[#allocation19_spill] sm:$0xff] %v10766_v23  ;;  %v10768_v25 = vpop.f32.mrb[14].mxu1  ;;  %9633 = vrcp.f32 %v941_v11  ;;  %v943_v29 = vadd.f32 1.0, %v9624_v15  ;;  %v10788_v15 = vadd.f32 %v10693_v19, %v10691_v17 }
 0x17f   : > { %v833_v31 = vmul.f32 1.442695, %v757_v16  ;;  %v759_v32 = vsub.f32 0.0, %v10764_v18 }
 0x180   : > { %v9626_v39 = vpop.eup %9625  ;;  %9635 = vrcp.f32 %v943_v29 }
 0x181   : > { %v1065_v40 = vmul.f32 %v9626_v39, %v10696_v20  ;;  %v837_v41 = vmul.f32 1.442695, %v759_v32  ;;  %9637 = vpow2.f32 %v833_v31 }
 0x182   : > { %v9628_v45 = vpop.eup %9627  ;;  %v626_v46 = vpop.f32.mrb[16].mxu0 }
 0x183   : > { %1130 = vst [vmem:[#allocation2 + $0x19] sm:$0xff] %v1065_v40  ;;  %v1067_v47 = vmul.f32 %v9628_v45, %v10706_v26  ;;  %v10774_v48 = vadd.f32 %v626_v46, %v10691_v17  ;;  %v10776_v50 = vpop.f32.mrb[17].mxu0  ;;  %v9630_v54 = vpop.eup %9629  ;;  %9639 = vpow2.f32 %v837_v41  ;;  %v793_v46 = vsub.f32 0.0, %v10788_v15 }
 0x184   : > { %13292 = vst [vmem:[#allocation20_spill] sm:$0xff] %v10776_v50  ;;  %v630_v55 = vpop.f32.mrb[18].mxu0  ;;  %v945_v57 = vadd.f32 1.0, %v9630_v54 }
 0x185   : > { %1131 = vst [vmem:[#allocation2 + $0x21] sm:$0xff] %v1067_v47  ;;  %v761_v20 = vsub.f32 0.0, %v10774_v48  ;;  %v10780_v58 = vadd.f32 %v630_v55, %v10691_v17  ;;  %v10782_v59 = vpop.f32.mrb[19].mxu0  ;;  %v9632_v61 = vpop.eup %9631  ;;  %v1243_v26 = vpack.c.bf16 %v1067_v47, %v1065_v40  ;;  %v1259_v40 = vld [vmem:[#allocation2 + $0xa] sm:$0xff] }
 0x186   : > { %13293 = vst [vmem:[#allocation21_spill] sm:$0xff] %v10782_v59  ;;  %9641 = vrcp.f32 %v945_v57  ;;  %v947_v1 = vadd.f32 1.0, %v9632_v61  ;;  %v9452_v57 = vld [vmem:[#allocation8 + $0x138] sm:$0xff]  }
 0x187   : > { %v841_v2 = vmul.f32 1.442695, %v761_v20  ;;  %v763_v3 = vsub.f32 0.0, %v10780_v58  ;;  %2218 = vmatprep.mubr.bf16.mxu1 %v1243_v26  ;;  %7949 = vmatpush3.bf16.msra.mxu1 %v9452_v57 }
 0x188   : > { %v9634_v4 = vpop.eup %9633  ;;  %9643 = vrcp.f32 %v947_v1 }
 0x189   : > { %v1069_v5 = vmul.f32 %v9634_v4, %v10716_v34  ;;  %v845_v6 = vmul.f32 1.442695, %v763_v3  ;;  %9645 = vpow2.f32 %v841_v2  ;;  %v9448_v3 = vld [vmem:[#allocation8 + $0x180] sm:$0xff]  }
 0x18a   : > { %v9636_v11 = vpop.eup %9635  ;;  %v636_v12 = vpop.f32.mrb[20].mxu0  ;;  %v1306_v20 = vld [vmem:[#allocation2 + $0x18] sm:$0xff] }
 0x18b   : > { %1132 = vst [vmem:[#allocation2 + $0x31] sm:$0xff] %v1069_v5  ;;  %v1071_v16 = vmul.f32 %v9636_v11, %v10726_v42  ;;  %v10792_v29 = vadd.f32 %v636_v12, %v10691_v17  ;;  %v10794_v30 = vpop.f32.mrb[21].mxu0  ;;  %v9638_v34 = vpop.eup %9637  ;;  %9647 = vpow2.f32 %v845_v6  ;;  %v1258_v42 = vld [vmem:[#allocation2 + $0x2] sm:$0xff] }
 0x18c   : > { %13294 = vst [vmem:[#allocation22_spill] sm:$0xff] %v10794_v30  ;;  %v640_v31 = vpop.f32.mrb[22].mxu0  ;;  %v949_v32 = vadd.f32 1.0, %v9638_v34  ;;  %v1307_v45 = vld [vmem:[#allocation2 + $0x20] sm:$0xff]  ;;  %v1290_v60 = vpack.c.bf16 %v1259_v40, %v1258_v42 }
 0x18d   : > { %1133 = vst [vmem:[#allocation2 + $0x39] sm:$0xff] %v1071_v16  ;;  %v765_v37 = vsub.f32 0.0, %v10792_v29  ;;  %v10798_v19 = vadd.f32 %v640_v31, %v10691_v17  ;;  %v10800_v39 = vpop.f32.mrb[23].mxu0  ;;  %v9640_v41 = vpop.eup %9639  ;;  %v1338_v1 = vpack.c.bf16 %v1307_v45, %v1306_v20  ;;  %v1244_v2 = vpack.c.bf16 %v1071_v16, %v1069_v5  ;;  %v1260_v57 = vld [vmem:[#allocation2 + $0x1a] sm:$0xff]  ;;  %v1261_v20 = vld [vmem:[#allocation2 + $0x22] sm:$0xff] }
 0x18e   : > { %13295 = vst [vmem:[#allocation23_spill] sm:$0xff] %v10800_v39  ;;  %9649 = vrcp.f32 %v949_v32  ;;  %v951_v47 = vadd.f32 1.0, %v9640_v41  ;;  %v905_v31 = vmul.f32 1.442695, %v793_v46  ;;  %v9450_v41 = vld [vmem:[#allocation8 + $0x188] sm:$0xff]  }
 0x18f   : > { %v849_v54 = vmul.f32 1.442695, %v765_v37  ;;  %v767_v55 = vsub.f32 0.0, %v10798_v19  ;;  %2371 = vmatprep.mubr.bf16.mxu0 %v1338_v1  ;;  %2219 = vmatmul.mubr.bf16.gmra.mrb[20].mxu1 %v1338_v1 }
 0x190   : > { %v9642_v61 = vpop.eup %9641  ;;  %9651 = vrcp.f32 %v951_v47  ;;  %2372 = vmatmul.mubr.bf16.vlgmr.msra.gmra.mrb[48].mxu0 %v1290_v60  ;;  %2226 = vmatprep.mubr.bf16.mxu1 %v1244_v2 }
 0x191   : > { %v853_v26 = vmul.f32 1.442695, %v767_v55  ;;  %v1073_v4 = vmul.f32 %v9642_v61, %v10736_v51  ;;  %9653 = vpow2.f32 %v849_v54  ;;  %8047 = vmatpush3.bf16.msra.mxu0 %v9448_v3  ;;  %v10822_v3 = vadd.f32 %v10702_v24, %v10691_v17 }
 0x192   : > { %v646_v6 = vpop.f32.mrb[24].mxu0  ;;  %v9644_v11 = vpop.eup %9643  ;;  %v1308_v46 = vld [vmem:[#allocation2 + $0x30] sm:$0xff]  ;;  %8048 = vmatprep.subr.bf16.mxu0 %v9449_v7 }
 0x193   : > { %v10806_v12 = vadd.f32 %v646_v6, %v10691_v17  ;;  %v10808_v34 = vpop.f32.mrb[25].mxu0  ;;  %1134 = vst [vmem:[#allocation2 + $0x49] sm:$0xff] %v1073_v4  ;;  %v1075_v32 = vmul.f32 %v9644_v11, %v10746_v62  ;;  %v9646_v51 = vpop.eup %9645  ;;  %9655 = vpow2.f32 %v853_v26  ;;  %v9453_v62 = vld [vmem:[#allocation8 + $0x1d0] sm:$0xff]   ;;  %v10818_v26 = vld [vmem:[#allocation8 + $0x200] sm:$0xff]  }
 0x194   : > { %13296 = vst [vmem:[#allocation24_spill] sm:$0xff] %v10808_v34  ;;  %v650_v5 = vpop.f32.mrb[26].mxu0  ;;  %v1309_v16 = vld [vmem:[#allocation2 + $0x38] sm:$0xff]  ;;  %v953_v45 = vadd.f32 1.0, %v9646_v51  ;;  %9657 = vpow2.f32 %v905_v31  ;;  %v9454_v6 = vld [vmem:[#allocation8 + $0x190] sm:$0xff]   ;;  %v1291_v31 = vpack.c.bf16 %v1261_v20, %v1260_v57  ;;  %9126 = vmatprep.subr.bf16.mxu1 %v10818_v26 }
 0x195   : > { %v769_v37 = vsub.f32 0.0, %v10806_v12  ;;  %v10813_v42 = vadd.f32 %v650_v5, %v10691_v17  ;;  %v10815_v40 = vpop.f32.mrb[27].mxu0  ;;  %1135 = vst [vmem:[#allocation2 + $0x51] sm:$0xff] %v1075_v32  ;;  %v9648_v47 = vpop.eup %9647  ;;  %v1339_v55 = vpack.c.bf16 %v1309_v16, %v1308_v46  ;;  %v1245_v2 = vpack.c.bf16 %v1075_v32, %v1073_v4  ;;  %8049 = vmatpush3.bf16.msra.mxu0 %v9450_v41  ;;  %v9455_v16 = vld [vmem:[#allocation8 + $0x1d8] sm:$0xff]  }
 0x196   : > { %13297 = vst [vmem:[#allocation25_spill] sm:$0xff] %v10815_v40  ;;  %9659 = vrcp.f32 %v953_v45  ;;  %v955_v60 = vadd.f32 1.0, %v9648_v47  ;;  %8050 = vmatprep.subr.bf16.mxu0 %v9453_v62  ;;  %v795_v62 = vsub.f32 0.0, %v10822_v3  ;;  %v9456_v47 = vld [vmem:[#allocation8 + $0x198] sm:$0xff]  }
 0x197   : > { %v771_v54 = vsub.f32 0.0, %v10813_v42  ;;  %v857_v61 = vmul.f32 1.442695, %v769_v37  ;;  %2379 = vmatprep.mubr.bf16.mxu0 %v1339_v55  ;;  %2227 = vmatmul.mubr.bf16.gmra.mrb[24].mxu1 %v1339_v55  ;;  %v9457_v55 = vld [vmem:[#allocation8 + $0x1e0] sm:$0xff]  }
 0x198   : > { %v9650_v1 = vpop.eup %9649  ;;  %9661 = vrcp.f32 %v955_v60  ;;  %2380 = vmatmul.mubr.bf16.gmra.mrb[52].mxu0 %v1291_v31  ;;  %2234 = vmatprep.mubr.bf16.mxu1 %v1245_v2  ;;  %v1262_v60 = vld [vmem:[#allocation2 + $0x32] sm:$0xff] }
 0x199   : > { %v10825_v7 = vmul.f32 %v9650_v1, %v10754_v8  ;;  %v861_v11 = vmul.f32 1.442695, %v771_v54  ;;  %9663 = vpow2.f32 %v857_v61  ;;  %8051 = vmatpush3.bf16.msra.mxu0 %v9454_v6  ;;  %v1263_v61 = vld [vmem:[#allocation2 + $0x3a] sm:$0xff] }
 0x19a   : > { %v656_v5 = vpop.f32.mrb[28].mxu0  ;;  %v9652_v51 = vpop.eup %9651  ;;  %8052 = vmatprep.subr.bf16.mxu0 %v9455_v16  ;;  %v1310_v31 = vld [vmem:[#allocation2 + $0x48] sm:$0xff]  ;;  %v1292_v13 = vpack.c.bf16 %v1263_v61, %v1262_v60 }
 0x19b   : > { %v10829_v4 = vadd.f32 %v656_v5, %v10691_v17  ;;  %v10831_v24 = vpop.f32.mrb[29].mxu0  ;;  %1136 = vst [vmem:[#allocation2 + $0x61] sm:$0xff] %v10825_v7  ;;  %v1079_v8 = vmul.f32 %v9652_v51, %v10764_v18  ;;  %v9654_v37 = vpop.eup %9653  ;;  %9665 = vpow2.f32 %v861_v11  ;;  %v10845_v5 = vadd.f32 %v10713_v33, %v10691_v17  ;;  %v9458_v11 = vld [vmem:[#allocation8 + $0x1a0] sm:$0xff]  }
 0x19c   : > { %13298 = vst [vmem:[#allocation26_spill] sm:$0xff] %v10831_v24  ;;  %v660_v32 = vpop.f32.mrb[30].mxu0  ;;  %v957_v54 = vadd.f32 1.0, %v9654_v37  ;;  %v1311_v18 = vld [vmem:[#allocation2 + $0x50] sm:$0xff] }
 0x19d   : > { %v773_v41 = vsub.f32 0.0, %v10829_v4  ;;  %v10837_v45 = vadd.f32 %v660_v32, %v10691_v17  ;;  %v10839_v46 = vpop.f32.mrb[31].mxu0  ;;  %1137 = vst [vmem:[#allocation2 + $0x69] sm:$0xff] %v1079_v8  ;;  %v9656_v57 = vpop.eup %9655  ;;  %v1340_v51 = vpack.c.bf16 %v1311_v18, %v1310_v31  ;;  %v909_v32 = vmul.f32 1.442695, %v795_v62  ;;  %8053 = vmatpush3.bf16.msra.mxu0 %v9456_v47 }
 0x19e   : > { %13299 = vst [vmem:[#allocation27_spill] sm:$0xff] %v10839_v46  ;;  %9667 = vrcp.f32 %v957_v54  ;;  %v959_v1 = vadd.f32 1.0, %v9656_v57  ;;  %v9658_v6 = vpop.eup %9657  ;;  %v1246_v53 = vpack.c.bf16 %v1079_v8, %v10825_v7  ;;  %8054 = vmatprep.subr.bf16.mxu0 %v9457_v55  ;;  %v9459_v54 = vld [vmem:[#allocation8 + $0x1e8] sm:$0xff]   ;;  %v1453_v46 = vld [vmem:[#allocation2 + $0x48] sm:$0xff] }
 0x19f   : > { %v775_v20 = vsub.f32 0.0, %v10837_v45  ;;  %v865_v2 = vmul.f32 1.442695, %v773_v41  ;;  %2387 = vmatprep.mubr.bf16.mxu0 %v1340_v51  ;;  %2235 = vmatmul.mubr.bf16.gmra.mrb[28].mxu1 %v1340_v51  ;;  %v985_v47 = vadd.f32 1.0, %v9658_v6  ;;  %v9460_v55 = vld [vmem:[#allocation8 + $0x1a8] sm:$0xff]  }
 0x1a0   : > { %v9660_v16 = vpop.eup %9659  ;;  %9669 = vrcp.f32 %v959_v1  ;;  %2388 = vmatmul.mubr.bf16.gmra.mrb[56].mxu0 %v1292_v13  ;;  %2242 = vmatprep.mubr.bf16.mxu1 %v1246_v53  ;;  %v9462_v53 = vld [vmem:[#allocation8 + $0x1f0] sm:$0xff]  }
 0x1a1   : > { %v869_v37 = vmul.f32 1.442695, %v775_v20  ;;  %v1081_v41 = vmul.f32 %v9660_v16, %v10774_v48  ;;  %9671 = vpow2.f32 %v865_v2  ;;  %v797_v20 = vsub.f32 0.0, %v10845_v5  ;;  %8055 = vmatpush3.bf16.msra.mxu0 %v9458_v11  ;;  %v1265_v2 = vld [vmem:[#allocation2 + $0x52] sm:$0xff] }
 0x1a2   : > { %v666_v0 = vpop.f32.mrb[32].mxu0  ;;  %v9662_v62 = vpop.eup %9661  ;;  %9673 = vpow2.f32 %v909_v32  ;;  %8056 = vmatprep.subr.bf16.mxu0 %v9459_v54  ;;  %v1312_v6 = vld [vmem:[#allocation2 + $0x60] sm:$0xff] }
 0x1a3   : > { %v10850_v33 = vadd.f32 %v666_v0, %v10691_v17  ;;  %v10852_v18 = vpop.f32.mrb[33].mxu0  ;;  %1138 = vst [vmem:[#allocation2 + $0x79] sm:$0xff] %v1081_v41  ;;  %v1083_v7 = vmul.f32 %v9662_v62, %v10780_v58  ;;  %v9664_v60 = vpop.eup %9663  ;;  %9675 = vpow2.f32 %v869_v37  ;;  %v1264_v58 = vld [vmem:[#allocation2 + $0x4a] sm:$0xff]  ;;  %v913_v51 = vmul.f32 1.442695, %v797_v20  ;;  %v9463_v62 = vld [vmem:[#allocation8 + $0x1b0] sm:$0xff]  }
 0x1a4   : > { %13300 = vst [vmem:[#allocation28_spill] sm:$0xff] %v10852_v18  ;;  %v670_v57 = vpop.f32.mrb[34].mxu0  ;;  %v1313_v13 = vld [vmem:[#allocation2 + $0x68] sm:$0xff]  ;;  %v961_v61 = vadd.f32 1.0, %v9664_v60  ;;  %9677 = vrcp.f32 %v985_v47 }
 0x1a5   : > { %v777_v48 = vsub.f32 0.0, %v10850_v33  ;;  %v10858_v8 = vadd.f32 %v670_v57, %v10691_v17  ;;  %v10860_v0 = vpop.f32.mrb[35].mxu0  ;;  %1139 = vst [vmem:[#allocation2 + $0x81] sm:$0xff] %v1083_v7  ;;  %v9666_v31 = vpop.eup %9665  ;;  %v1341_v11 = vpack.c.bf16 %v1313_v13, %v1312_v6  ;;  %8057 = vmatpush3.bf16.msra.mxu0 %v9460_v55  ;;  %v1293_v57 = vpack.c.bf16 %v1265_v2, %v1264_v58  ;;  %v9464_v60 = vld [vmem:[#allocation8 + $0x1f8] sm:$0xff]  }
 0x1a6   : > { %13301 = vst [vmem:[#allocation29_spill] sm:$0xff] %v10860_v0  ;;  %9679 = vrcp.f32 %v961_v61  ;;  %v963_v16 = vadd.f32 1.0, %v9666_v31  ;;  %v1247_v44 = vpack.c.bf16 %v1083_v7, %v1081_v41  ;;  %8058 = vmatprep.subr.bf16.mxu0 %v9462_v53  ;;  %v1266_v58 = vld [vmem:[#allocation2 + $0x62] sm:$0xff]  ;;  %v1267_v2 = vld [vmem:[#allocation2 + $0x6a] sm:$0xff] }
 0x1a7   : > { %v779_v1 = vsub.f32 0.0, %v10858_v8  ;;  %v873_v32 = vmul.f32 1.442695, %v777_v48  ;;  %2395 = vmatprep.mubr.bf16.mxu0 %v1341_v11  ;;  %2243 = vmatmul.mubr.bf16.gmra.mrb[32].mxu1 %v1341_v11  ;;  %v1504_v18 = vld [vmem:[#allocation2 + $0x69] sm:$0xff]  ;;  %v1503_v24 = vld [vmem:[#allocation2 + $0x61] sm:$0xff] }
 0x1a8   : > { %v9668_v37 = vpop.eup %9667  ;;  %9681 = vrcp.f32 %v963_v16  ;;  %2396 = vmatmul.mubr.bf16.gmra.mrb[60].mxu0 %v1293_v57  ;;  %2250 = vmatprep.mubr.bf16.mxu1 %v1247_v44 }
 0x1a9   : > { %v1085_v36 = vmul.f32 %v9668_v37, %v10792_v29  ;;  %v877_v0 = vmul.f32 1.442695, %v779_v1  ;;  %9683 = vpow2.f32 %v913_v51  ;;  %8059 = vmatpush3.bf16.msra.mxu0 %v9463_v62  ;;  %v9465_v29 = vld [vmem:[#allocation8 + $0x1b8] sm:$0xff]   ;;  %v10878_v62 = vpack.c.bf16 %v1267_v2, %v1266_v58 }
 0x1aa   : > { %v676_v54 = vpop.f32.mrb[36].mxu0  ;;  %v9670_v20 = vpop.eup %9669  ;;  %9685 = vpow2.f32 %v873_v32  ;;  %8060 = vmatprep.subr.bf16.mxu0 %v9464_v60  ;;  %v1314_v6 = vld [vmem:[#allocation2 + $0x78] sm:$0xff] }
 0x1ab   : > { %v10864_v47 = vpop.f32.mrb[37].mxu0  ;;  %v10867_v48 = vadd.f32 %v676_v54, %v10691_v17  ;;  %1140 = vst [vmem:[#allocation2 + $0x91] sm:$0xff] %v1085_v36  ;;  %v1087_v41 = vmul.f32 %v9670_v20, %v10798_v19  ;;  %v9672_v13 = vpop.eup %9671  ;;  %9687 = vpow2.f32 %v877_v0 }
 0x1ac   : > { %13302 = vst [vmem:[#allocation30_spill] sm:$0xff] %v10864_v47  ;;  %v680_v55 = vpop.f32.mrb[38].mxu0  ;;  %v1315_v53 = vld [vmem:[#allocation2 + $0x80] sm:$0xff]  ;;  %v9674_v61 = vpop.eup %9673  ;;  %v965_v1 = vadd.f32 1.0, %v9672_v13  ;;  %v1406_v47 = vld [vmem:[#allocation2 + $0x4a] sm:$0xff] }
 0x1ad   : > { %v10870_v7 = vpop.f32.mrb[39].mxu0  ;;  %1141 = vst [vmem:[#allocation2 + $0x99] sm:$0xff] %v1087_v41  ;;  %v9676_v31 = vpop.eup %9675  ;;  %v781_v44 = vsub.f32 0.0, %v10867_v48  ;;  %v10874_v51 = vadd.f32 %v680_v55, %v10691_v17  ;;  %v10876_v16 = vpack.c.bf16 %v1315_v53, %v1314_v6  ;;  %8061 = vmatpush3.bf16.msra.mxu0 %v9465_v29  ;;  %v987_v11 = vadd.f32 1.0, %v9674_v61  ;;  %v1268_v58 = vld [vmem:[#allocation2 + $0x7a] sm:$0xff]  ;;  %v1269_v2 = vld [vmem:[#allocation2 + $0x82] sm:$0xff] }
 0x1ae   : > { %13303 = vst [vmem:[#allocation31_spill] sm:$0xff] %v10870_v7  ;;  %9689 = vrcp.f32 %v965_v1  ;;  %v967_v19 = vadd.f32 1.0, %v9676_v31  ;;  %v9678_v32 = vpop.eup %9677  ;;  %v1248_v0 = vpack.c.bf16 %v1087_v41, %v1085_v36 }
 0x1af   : > { %v10881_v54 = vmul.f32 %v9678_v32, %v10788_v15  ;;  %2403 = vmatprep.mubr.bf16.mxu0 %v10876_v16  ;;  %2251 = vmatmul.mubr.bf16.gmra.mrb[36].mxu1 %v10876_v16  ;;  %v881_v55 = vmul.f32 1.442695, %v781_v44  ;;  %v783_v36 = vsub.f32 0.0, %v10874_v51  ;;  %v10893_v15 = vadd.f32 %v10722_v38, %v10691_v17 }
 0x1b0   : > { %v9680_v57 = vpop.eup %9679  ;;  %9691 = vrcp.f32 %v967_v19  ;;  %2404 = vmatmul.mubr.bf16.gmra.mrb[64].mxu0 %v10878_v62  ;;  %2258 = vmatprep.mubr.bf16.mxu1 %v1248_v0 }
 0x1b1   : > { %v1089_v20 = vmul.f32 %v9680_v57, %v10806_v12  ;;  %1154 = vst [vmem:[#allocation2 + $0x139] sm:$0xff] %v10881_v54  ;;  %9693 = vrcp.f32 %v987_v11  ;;  %v885_v32 = vmul.f32 1.442695, %v783_v36  ;;  %v799_v0 = vsub.f32 0.0, %v10893_v15 }
 0x1b2   : > { %v686_v37 = vpop.f32.mrb[40].mxu0  ;;  %v9682_v13 = vpop.eup %9681  ;;  %9695 = vpow2.f32 %v881_v55  ;;  %v1316_v6 = vld [vmem:[#allocation2 + $0x90] sm:$0xff]  ;;  %v10904_v11 = vpack.c.bf16 %v1269_v2, %v1268_v58 }
 0x1b3   : > { %v10885_v60 = vpop.f32.mrb[41].mxu0  ;;  %v9684_v53 = vpop.eup %9683  ;;  %1142 = vst [vmem:[#allocation2 + $0xa9] sm:$0xff] %v1089_v20  ;;  %v1091_v12 = vmul.f32 %v9682_v13, %v10813_v42  ;;  %v10899_v44 = vadd.f32 %v686_v37, %v10691_v17 }
 0x1b4   : > { %13304 = vst [vmem:[#allocation32_spill] sm:$0xff] %v10885_v60  ;;  %v690_v29 = vpop.f32.mrb[42].mxu0  ;;  %v1317_v61 = vld [vmem:[#allocation2 + $0x98] sm:$0xff]  ;;  %v9686_v1 = vpop.eup %9685  ;;  %v989_v19 = vadd.f32 1.0, %v9684_v53  ;;  %v10916_v53 = vadd.f32 %v10733_v49, %v10691_v17 }
 0x1b5   : > { %v10895_v41 = vpop.f32.mrb[43].mxu0  ;;  %1143 = vst [vmem:[#allocation2 + $0xb1] sm:$0xff] %v1091_v12  ;;  %v969_v31 = vadd.f32 1.0, %v9686_v1  ;;  %v9688_v38 = vpop.eup %9687  ;;  %v10902_v57 = vpack.c.bf16 %v1317_v61, %v1316_v6  ;;  %v785_v36 = vsub.f32 0.0, %v10899_v44  ;;  %v10922_v58 = vadd.f32 %v690_v29, %v10691_v17  ;;  %v1270_v49 = vld [vmem:[#allocation2 + $0x92] sm:$0xff]  ;;  %v1271_v6 = vld [vmem:[#allocation2 + $0x9a] sm:$0xff] }
 0x1b6   : > { %13305 = vst [vmem:[#allocation33_spill] sm:$0xff] %v10895_v41  ;;  %v971_v42 = vadd.f32 1.0, %v9688_v38  ;;  %v1249_v41 = vpack.c.bf16 %v1091_v12, %v1089_v20  ;;  %v917_v12 = vmul.f32 1.442695, %v799_v0  ;;  %v1500_v60 = vld [vmem:[#allocation2 + $0x39] sm:$0xff] }
 0x1b7   : > { %9697 = vrcp.f32 %v969_v31  ;;  %2411 = vmatprep.mubr.bf16.mxu0 %v10902_v57  ;;  %2259 = vmatmul.mubr.bf16.gmra.mrb[40].mxu1 %v10902_v57  ;;  %v787_v29 = vsub.f32 0.0, %v10922_v58 }
 0x1b8   : > { %v9690_v1 = vpop.eup %9689  ;;  %9699 = vrcp.f32 %v971_v42  ;;  %2412 = vmatmul.mubr.bf16.gmra.mrb[68].mxu0 %v10904_v11  ;;  %2266 = vmatprep.mubr.bf16.mxu1 %v1249_v41  ;;  %v889_v42 = vmul.f32 1.442695, %v785_v36  ;;  %v801_v41 = vsub.f32 0.0, %v10916_v53 }
 0x1b9   : > { %v1093_v55 = vmul.f32 %v9690_v1, %v10829_v4  ;;  %9701 = vrcp.f32 %v989_v19 }
 0x1ba   : > { %v10906_v13 = vpop.f32.mrb[44].mxu0  ;;  %v9692_v20 = vpop.eup %9691  ;;  %9703 = vpow2.f32 %v885_v32  ;;  %v1318_v1 = vld [vmem:[#allocation2 + $0xa8] sm:$0xff] }
 0x1bb   : > { %v10910_v37 = vpop.f32.mrb[45].mxu0  ;;  %1144 = vst [vmem:[#allocation2 + $0xc1] sm:$0xff] %v1093_v55  ;;  %v1095_v4 = vmul.f32 %v9692_v20, %v10837_v45  ;;  %v9694_v38 = vpop.eup %9693  ;;  %9705 = vpow2.f32 %v917_v12  ;;  %v10934_v45 = vpack.c.bf16 %v1271_v6, %v1270_v49 }
 0x1bc   : > { %13306 = vst [vmem:[#allocation34_spill] sm:$0xff] %v10910_v37  ;;  %v10919_v61 = vpop.f32.mrb[46].mxu0  ;;  %v1319_v31 = vld [vmem:[#allocation2 + $0xb0] sm:$0xff]  ;;  %v10929_v19 = vmul.f32 %v9694_v38, %v10822_v3  ;;  %9707 = vpow2.f32 %v889_v42  ;;  %v921_v3 = vmul.f32 1.442695, %v801_v41  ;;  %v1405_v37 = vld [vmem:[#allocation2 + $0x3a] sm:$0xff] }
 0x1bd   : > { %v10924_v2 = vpop.f32.mrb[47].mxu0  ;;  %1145 = vst [vmem:[#allocation2 + $0xc9] sm:$0xff] %v1095_v4  ;;  %v10932_v0 = vpack.c.bf16 %v1319_v31, %v1318_v1  ;;  %v1250_v32 = vpack.c.bf16 %v1095_v4, %v1093_v55  ;;  %v893_v55 = vmul.f32 1.442695, %v787_v29  ;;  %v1272_v49 = vld [vmem:[#allocation2 + $0xaa] sm:$0xff]  ;;  %v1273_v1 = vld [vmem:[#allocation2 + $0xb2] sm:$0xff] }
 0x1be   : > { %13307 = vst [vmem:[#allocation35_spill] sm:$0xff] %v10924_v2  ;;  %v9696_v2 = vpop.eup %9695  ;;  %1155 = vst [vmem:[#allocation2 + $0x141] sm:$0xff] %v10929_v19  ;;  %v10953_v29 = vpop.f32.mrb[15].mxu1 }
 0x1bf   : > { %v973_v20 = vadd.f32 1.0, %v9696_v2  ;;  %2419 = vmatprep.mubr.bf16.mxu0 %v10932_v0  ;;  %2267 = vmatmul.mubr.bf16.gmra.mrb[44].mxu1 %v10932_v0  ;;  %v10945_v2 = vadd.f32 %v10742_v56, %v10691_v17  ;;  %13308 = vst [vmem:[#allocation36_spill] sm:$0xff] %v10953_v29 }
 0x1c0   : > { %2420 = vmatmul.mubr.bf16.gmra.mrb[72].mxu0 %v10934_v45  ;;  %2274 = vmatprep.mubr.bf16.mxu1 %v1250_v32 }
 0x1c1   : > { %v9698_v36 = vpop.eup %9697  ;;  %9709 = vrcp.f32 %v973_v20 }
 0x1c2   : > { %v1097_v31 = vmul.f32 %v9698_v36, %v10850_v33  ;;  %v9700_v4 = vpop.eup %9699  ;;  %v1320_v42 = vld [vmem:[#allocation2 + $0xc0] sm:$0xff]  ;;  %9711 = vpow2.f32 %v921_v3  ;;  %v10958_v36 = vpack.c.bf16 %v1273_v1, %v1272_v49  ;;  %v10963_v3 = vadd.f32 %v10906_v13, %v10691_v17 }
 0x1c3   : > { %v9702_v6 = vpop.eup %9701  ;;  %v1099_v38 = vmul.f32 %v9700_v4, %v10858_v8  ;;  %9713 = vpow2.f32 %v893_v55  ;;  %v803_v8 = vsub.f32 0.0, %v10945_v2 }
 0x1c4   : > { %1146 = vst [vmem:[#allocation2 + $0xd9] sm:$0xff] %v1097_v31  ;;  %v1321_v41 = vld [vmem:[#allocation2 + $0xc8] sm:$0xff]  ;;  %v9704_v32 = vpop.eup %9703  ;;  %v10949_v12 = vmul.f32 %v9702_v6, %v10845_v5  ;;  %v10968_v6 = vadd.f32 %v10919_v61, %v10691_v17 }
 0x1c5   : > { %v10951_v33 = vpack.c.bf16 %v1321_v41, %v1320_v42  ;;  %1147 = vst [vmem:[#allocation2 + $0xe1] sm:$0xff] %v1099_v38  ;;  %v975_v56 = vadd.f32 1.0, %v9704_v32  ;;  %v1251_v20 = vpack.c.bf16 %v1099_v38, %v1097_v31  ;;  %v9706_v4 = vpop.eup %9705  ;;  %v925_v55 = vmul.f32 1.442695, %v803_v8  ;;  %v1274_v42 = vld [vmem:[#allocation2 + $0xc2] sm:$0xff]  ;;  %v1275_v41 = vld [vmem:[#allocation2 + $0xca] sm:$0xff] }
 0x1c6   : > { %1156 = vst [vmem:[#allocation2 + $0x151] sm:$0xff] %v10949_v12  ;;  %v991_v5 = vadd.f32 1.0, %v9706_v4  ;;  %v9708_v31 = vpop.eup %9707  ;;  %v789_v32 = vsub.f32 0.0, %v10963_v3  ;;  %v791_v61 = vsub.f32 0.0, %v10968_v6 }
 0x1c7   : > { %2427 = vmatprep.mubr.bf16.mxu0 %v10951_v33  ;;  %9715 = vrcp.f32 %v975_v56  ;;  %2275 = vmatmul.mubr.bf16.gmra.mrb[48].mxu1 %v10951_v33  ;;  %v977_v38 = vadd.f32 1.0, %v9708_v31 }
 0x1c8   : > { %2428 = vmatmul.mubr.bf16.gmra.mrb[76].mxu0 %v10958_v36  ;;  %2282 = vmatprep.mubr.bf16.mxu1 %v1251_v20  ;;  %9717 = vrcp.f32 %v991_v5  ;;  %v10976_v20 = vadd.f32 %v10758_v10, %v10691_v17  ;;  %v10979_v5 = vpack.c.bf16 %v1275_v41, %v1274_v42  ;;  %v901_v41 = vmul.f32 1.442695, %v791_v61 }
 0x1c9   : > { %9719 = vrcp.f32 %v977_v38  ;;  %v897_v38 = vmul.f32 1.442695, %v789_v32 }
 0x1ca   : > { %9721 = vpow2.f32 %v925_v55  ;;  %v805_v10 = vsub.f32 0.0, %v10976_v20  ;;  %v10987_v55 = vadd.f32 %v10768_v25, %v10691_v17 }
 0x1cb   : > { %v9710_v49 = vpop.eup %9709  ;;  %v1322_v13 = vld [vmem:[#allocation2 + $0xd8] sm:$0xff] }
 0x1cc   : > { %v1101_v1 = vmul.f32 %v9710_v49, %v10867_v48  ;;  %v1323_v56 = vld [vmem:[#allocation2 + $0xe0] sm:$0xff]  ;;  %v9712_v8 = vpop.eup %9711 }
 0x1cd   : > { %v10972_v4 = vpack.c.bf16 %v1323_v56, %v1322_v13  ;;  %v9714_v31 = vpop.eup %9713  ;;  %v993_v48 = vadd.f32 1.0, %v9712_v8 }
 0x1ce   : > { %1148 = vst [vmem:[#allocation2 + $0xf1] sm:$0xff] %v1101_v1  ;;  %v979_v49 = vadd.f32 1.0, %v9714_v31  ;;  %v929_v31 = vmul.f32 1.442695, %v805_v10 }
 0x1cf   : > { %2435 = vmatprep.mubr.bf16.mxu0 %v10972_v4  ;;  %2283 = vmatmul.mubr.bf16.gmra.mrb[52].mxu1 %v10972_v4  ;;  %9723 = vrcp.f32 %v993_v48  ;;  %v807_v48 = vsub.f32 0.0, %v10987_v55 }
 0x1d0   : > { %2436 = vmatmul.mubr.bf16.gmra.mrb[80].mxu0 %v10979_v5  ;;  %9725 = vrcp.f32 %v979_v49  ;;  %v1277_v49 = vld [vmem:[#allocation2 + $0xe2] sm:$0xff] }
 0x1d1   : > { %v9716_v13 = vpop.eup %9715  ;;  %9727 = vpow2.f32 %v897_v38 }
 0x1d2   : > { %v1103_v42 = vmul.f32 %v9716_v13, %v10874_v51  ;;  %v9718_v56 = vpop.eup %9717  ;;  %9729 = vpow2.f32 %v901_v41 }
 0x1d3   : > { %v10991_v32 = vmul.f32 %v9718_v56, %v10893_v15  ;;  %v9720_v29 = vpop.eup %9719  ;;  %9731 = vpow2.f32 %v929_v31  ;;  %v1276_v15 = vld [vmem:[#allocation2 + $0xda] sm:$0xff] }
 0x1d4   : > { %1149 = vst [vmem:[#allocation2 + $0xf9] sm:$0xff] %v1103_v42  ;;  %v1252_v8 = vpack.c.bf16 %v1103_v42, %v1101_v1  ;;  %v9722_v25 = vpop.eup %9721  ;;  %v1105_v51 = vmul.f32 %v9720_v29, %v10899_v44  ;;  %v933_v1 = vmul.f32 1.442695, %v807_v48  ;;  %v11004_v17 = vpack.c.bf16 %v1277_v49, %v1276_v15 }
 0x1d5   : > { %1157 = vst [vmem:[#allocation2 + $0x159] sm:$0xff] %v10991_v32  ;;  %v995_v61 = vadd.f32 1.0, %v9722_v25  ;;  %v1324_v13 = vld [vmem:[#allocation2 + $0xf0] sm:$0xff] }
 0x1d6   : > { %2290 = vmatprep.mubr.bf16.mxu1 %v1252_v8  ;;  %1150 = vst [vmem:[#allocation2 + $0x109] sm:$0xff] %v1105_v51 }
 0x1d7   : > { %9733 = vrcp.f32 %v995_v61  ;;  %v7726_v61 = vpop.f32.mrb[16].mxu1 }
 0x1d8   : > { %9735 = vpow2.f32 %v933_v1 }
 0x1d9   : > { %v9724_v38 = vpop.eup %9723 }
 0x1da   : > { %v9726_v42 = vpop.eup %9725  ;;  %v10999_v41 = vmul.f32 %v9724_v38, %v10916_v53 }
 0x1db   : > { %v1325_v10 = vld [vmem:[#allocation2 + $0xf8] sm:$0xff]  ;;  %v1107_v8 = vmul.f32 %v9726_v42, %v10922_v58  ;;  %v9728_v44 = vpop.eup %9727 }
 0x1dc   : > { %v11001_v56 = vpack.c.bf16 %v1325_v10, %v1324_v13  ;;  %1158 = vst [vmem:[#allocation2 + $0x169] sm:$0xff] %v10999_v41  ;;  %v981_v29 = vadd.f32 1.0, %v9728_v44  ;;  %v9730_v31 = vpop.eup %9729  ;;  %v1278_v15 = vld [vmem:[#allocation2 + $0xf2] sm:$0xff]  ;;  %v1279_v49 = vld [vmem:[#allocation2 + $0xfa] sm:$0xff] }
 0x1dd   : > { %1151 = vst [vmem:[#allocation2 + $0x111] sm:$0xff] %v1107_v8  ;;  %v1253_v53 = vpack.c.bf16 %v1107_v8, %v1105_v51  ;;  %v983_v48 = vadd.f32 1.0, %v9730_v31  ;;  %v9732_v58 = vpop.eup %9731  ;;  %v1326_v13 = vld [vmem:[#allocation2 + $0x108] sm:$0xff]  ;;  %v11016_v8 = vpack.c.bf16 %v1279_v49, %v1278_v15 }
 0x1de   : > { %2443 = vmatprep.mubr.bf16.mxu0 %v11001_v56  ;;  %2291 = vmatmul.mubr.bf16.gmra.mrb[56].mxu1 %v11001_v56  ;;  %9737 = vrcp.f32 %v981_v29  ;;  %v997_v25 = vadd.f32 1.0, %v9732_v58 }
 0x1df   : > { %2444 = vmatmul.mubr.bf16.gmra.mrb[84].mxu0 %v11004_v17  ;;  %2298 = vmatprep.mubr.bf16.mxu1 %v1253_v53  ;;  %9739 = vrcp.f32 %v983_v48  ;;  %v7727_v53 = vpop.f32.mrb[17].mxu1 }
 0x1e0   : > { %9741 = vrcp.f32 %v997_v25  ;;  %v11024_v48 = vadd.f32 %v7727_v53, %v7726_v61  ;;  %v7729_v58 = vpop.f32.mrb[18].mxu1  ;;  %v1331_v53 = vld [vmem:[#allocation2 + $0x140] sm:$0xff] }
 0x1e1   : > { %v9734_v1 = vpop.eup %9733 }
 0x1e2   : > { %v11011_v38 = vmul.f32 %v9734_v1, %v10945_v2  ;;  %v9736_v42 = vpop.eup %9735  ;;  %v7730_v1 = vpop.f32.mrb[19].mxu1 }
 0x1e3   : > { %v999_v51 = vadd.f32 1.0, %v9736_v42 }
 0x1e4   : > { %v1327_v10 = vld [vmem:[#allocation2 + $0x110] sm:$0xff]  ;;  %1159 = vst [vmem:[#allocation2 + $0x171] sm:$0xff] %v11011_v38  ;;  %v1257_v29 = vpack.c.bf16 %v11011_v38, %v10999_v41  ;;  %v11029_v41 = vadd.f32 %v7730_v1, %v7729_v58 }
 0x1e5   : > { %v11013_v44 = vpack.c.bf16 %v1327_v10, %v1326_v13  ;;  %9743 = vrcp.f32 %v999_v51  ;;  %v1280_v10 = vld [vmem:[#allocation2 + $0x10a] sm:$0xff]  ;;  %v1281_v42 = vld [vmem:[#allocation2 + $0x112] sm:$0xff] }
 0x1e6   : > { %v1330_v51 = vld [vmem:[#allocation2 + $0x138] sm:$0xff] }
 0x1e7   : > { %2451 = vmatprep.mubr.bf16.mxu0 %v11013_v44  ;;  %2299 = vmatmul.mubr.bf16.gmra.mrb[60].mxu1 %v11013_v44 }
 0x1e8   : > { %2452 = vmatmul.mubr.bf16.gmra.mrb[88].mxu0 %v11016_v8  ;;  %v9738_v2 = vpop.eup %9737 }
 0x1e9   : > { %v1109_v31 = vmul.f32 %v9738_v2, %v10963_v3  ;;  %v9740_v25 = vpop.eup %9739 }
 0x1ea   : > { %v11027_v15 = vmul.f32 %v9740_v25, %v10968_v6  ;;  %v9742_v49 = vpop.eup %9741  ;;  %v11040_v25 = vpack.c.bf16 %v1281_v42, %v1280_v10  ;;  %v13310_v10 = vpack.c.bf16 %v10991_v32, %v10949_v12  ;;  %v1334_v42 = vld [vmem:[#allocation2 + $0x168] sm:$0xff] }
 0x1eb   : > { %1152 = vst [vmem:[#allocation2 + $0x121] sm:$0xff] %v1109_v31  ;;  %v1125_v13 = vmul.f32 %v9742_v49, %v10976_v20  ;;  %v11044_v20 = vpack.c.bf16 %v1331_v53, %v1330_v51  ;;  %v1332_v49 = vld [vmem:[#allocation2 + $0x150] sm:$0xff]  ;;  %v1402_v53 = vld [vmem:[#allocation2 + $0x1a] sm:$0xff] }
 0x1ec   : > { %1153 = vst [vmem:[#allocation2 + $0x129] sm:$0xff] %v11027_v15  ;;  %v1254_v38 = vpack.c.bf16 %v11027_v15, %v1109_v31  ;;  %v1335_v51 = vld [vmem:[#allocation2 + $0x170] sm:$0xff] }
 0x1ed   : > { %1160 = vst [vmem:[#allocation2 + $0x181] sm:$0xff] %v1125_v13 }
 0x1ee   : > { %2306 = vmatprep.mubr.bf16.mxu1 %v1254_v38  ;;  %v1333_v38 = vld [vmem:[#allocation2 + $0x158] sm:$0xff] }
 0x1ef   : > { %v9744_v3 = vpop.eup %9743 }
 0x1f0   : > { %v11035_v61 = vmul.f32 %v9744_v3, %v10987_v55  ;;  %v13309_v55 = vpack.c.bf16 %v10929_v19, %v10881_v54  ;;  %v11054_v3 = vpack.c.bf16 %v1333_v38, %v1332_v49  ;;  %v1284_v54 = vld [vmem:[#allocation2 + $0x13a] sm:$0xff]  ;;  %v1285_v19 = vld [vmem:[#allocation2 + $0x142] sm:$0xff] }
 0x1f2   : > { %1161 = vst [vmem:[#allocation2 + $0x189] sm:$0xff] %v11035_v61  ;;  %v1328_v6 = vld [vmem:[#allocation2 + $0x120] sm:$0xff] }
 0x1f3   : > { %v1329_v2 = vld [vmem:[#allocation2 + $0x128] sm:$0xff] }
 0x1f4   : > { %v11038_v58 = vpack.c.bf16 %v1329_v2, %v1328_v6  ;;  %v1282_v31 = vld [vmem:[#allocation2 + $0x122] sm:$0xff]  ;;  %v1283_v1 = vld [vmem:[#allocation2 + $0x12a] sm:$0xff]  ;;  %v11061_v6 = vpack.c.bf16 %v1285_v19, %v1284_v54  ;;  %v11064_v2 = vpack.c.bf16 %v1335_v51, %v1334_v42  ;;  %v1289_v19 = vld [vmem:[#allocation2 + $0x172] sm:$0xff] }
 0x1f5   : > { %v11051_v13 = vpack.c.bf16 %v1283_v1, %v1282_v31  ;;  %v1336_v12 = vld [vmem:[#allocation2 + $0x180] sm:$0xff]  ;;  %v1288_v54 = vld [vmem:[#allocation2 + $0x16a] sm:$0xff]  ;;  %v1404_v51 = vld [vmem:[#allocation2 + $0x32] sm:$0xff] }
 0x1f6   : > { %2459 = vmatprep.mubr.bf16.mxu0 %v11038_v58  ;;  %2307 = vmatmul.mubr.bf16.gmra.mrb[64].mxu1 %v11038_v58  ;;  %v1287_v31 = vld [vmem:[#allocation2 + $0x15a] sm:$0xff]  ;;  %v1403_v1 = vld [vmem:[#allocation2 + $0x22] sm:$0xff] }
 0x1f7   : > { %2460 = vmatmul.mubr.bf16.gmra.mrb[92].mxu0 %v11040_v25  ;;  %2314 = vmatprep.mubr.bf16.mxu1 %v13309_v55  ;;  %v1286_v55 = vld [vmem:[#allocation2 + $0x152] sm:$0xff] }
 0x1f8   : > { %2467 = vmatprep.mubr.bf16.mxu0 %v11044_v20  ;;  %v11070_v38 = vpack.c.bf16 %v1287_v31, %v1286_v55  ;;  %v1354_v42 = vld [vmem:[#allocation2 + $0x19] sm:$0xff] }
 0x1f9   : > { %v1337_v32 = vld [vmem:[#allocation2 + $0x188] sm:$0xff]  ;;  %v9466_v55 = vld [vmem:[#allocation8 + $0x208] sm:$0xff]  }
 0x1fa   : > { %v11068_v49 = vpack.c.bf16 %v1337_v32, %v1336_v12  ;;  %v11075_v12 = vpack.c.bf16 %v1289_v19, %v1288_v54  ;;  %v1499_v32 = vld [vmem:[#allocation2 + $0x31] sm:$0xff] }
 0x1fb   : > { %v1531_v31 = vpack.c.bf16 %v1500_v60, %v1499_v32  ;;  %v1502_v54 = vld [vmem:[#allocation2 + $0x51] sm:$0xff]  ;;  %v1501_v60 = vld [vmem:[#allocation2 + $0x49] sm:$0xff] }
 0x1fc   : > { %v1451_v19 = vld [vmem:[#allocation2 + $0x30] sm:$0xff] }
 0x1fd   : > { %v1454_v32 = vld [vmem:[#allocation2 + $0x50] sm:$0xff] }
 0x1fe   : > { %2315 = vmatmul.mubr.bf16.gmra.mrb[68].mxu1 %v11044_v20 }
 0x1ff   : > { %2468 = vmatmul.mubr.bf16.gmra.mrb[96].mxu0 %v11051_v13  ;;  %2322 = vmatprep.mubr.bf16.mxu1 %v13310_v10  ;;  %v1434_v10 = vpack.c.bf16 %v1403_v1, %v1402_v53  ;;  %v11077_v53 = vpack.c.bf16 %v1405_v37, %v1404_v51  ;;  %v9467_v1 = vld [vmem:[#allocation8 + $0x210] sm:$0xff]   ;;  %v1532_v51 = vpack.c.bf16 %v1502_v54, %v1501_v60 }
 0x200   : > { %2475 = vmatprep.mubr.bf16.mxu0 %v11054_v3  ;;  %v1455_v54 = vld [vmem:[#allocation2 + $0x60] sm:$0xff] }
 0x206   : > { %2323 = vmatmul.mubr.bf16.gmra.mrb[72].mxu1 %v11054_v3 }
 0x207   : > { %2476 = vmatmul.mubr.bf16.gmra.mrb[100].mxu0 %v11061_v6  ;;  %2330 = vmatprep.mubr.bf16.mxu1 %v1257_v29  ;;  %v1355_v29 = vld [vmem:[#allocation2 + $0x21] sm:$0xff] }
 0x208   : > { %2483 = vmatprep.mubr.bf16.mxu0 %v11064_v2  ;;  %v1386_v7 = vpack.c.bf16 %v1355_v29, %v1354_v42  ;;  %v1407_v29 = vld [vmem:[#allocation2 + $0x52] sm:$0xff]  ;;  %v9468_v42 = vld [vmem:[#allocation8 + $0x218] sm:$0xff]  }
 0x209   : > { %v11082_v37 = vpack.c.bf16 %v1407_v29, %v1406_v47  ;;  %v9470_v47 = vld [vmem:[#allocation8 + $0x228] sm:$0xff]   ;;  %v1506_v29 = vld [vmem:[#allocation2 + $0x81] sm:$0xff] }
 0x20e   : > { %2331 = vmatmul.mubr.bf16.gmra.mrb[76].mxu1 %v11064_v2 }
 0x20f   : > { %2484 = vmatmul.mubr.bf16.gmra.mrb[104].mxu0 %v11070_v38  ;;  %2532 = vmatprep.mubr.bf16.mxu1 %v1434_v10  ;;  %v1452_v10 = vld [vmem:[#allocation2 + $0x38] sm:$0xff] }
 0x210   : > { %2491 = vmatprep.mubr.bf16.mxu0 %v11068_v49 }
 0x216   : > { %2533 = vmatmul.mubr.bf16.vlgmr.msra.gmra.mrb[80].mxu1 %v1386_v7  ;;  %v1483_v7 = vpack.c.bf16 %v1452_v10, %v1451_v19  ;;  %v1533_v10 = vpack.c.bf16 %v1504_v18, %v1503_v24  ;;  %v1508_v24 = vld [vmem:[#allocation2 + $0x99] sm:$0xff]  ;;  %v1507_v18 = vld [vmem:[#allocation2 + $0x91] sm:$0xff] }
 0x217   : > { %2492 = vmatmul.mubr.bf16.gmra.mrb[108].mxu0 %v11075_v12  ;;  %9127 = vmatpush3.bf16.msra.mxu1 %v10818_v26  ;;  %v9469_v26 = vld [vmem:[#allocation8 + $0x220] sm:$0xff]  }
 0x218   : > { %2540 = vmatprep.mubr.bf16.mxu1 %v11077_v53  ;;  %2693 = vmatprep.mubr.bf16.mxu0 %v1531_v31 }
 0x219   : > { %9128 = vmatprep.subr.bf16.mxu1 %v9466_v55 }
 0x21b   : > { %9129 = vmatpush3.bf16.msra.mxu1 %v9466_v55  ;;  %v1484_v55 = vpack.c.bf16 %v1454_v32, %v1453_v46  ;;  %v9472_v46 = vld [vmem:[#allocation8 + $0x238] sm:$0xff]  }
 0x21c   : > { %9130 = vmatprep.subr.bf16.mxu1 %v9467_v1  ;;  %v1511_v32 = vld [vmem:[#allocation2 + $0xc1] sm:$0xff] }
 0x21e   : > { %2541 = vmatmul.mubr.bf16.gmra.mrb[84].mxu1 %v1531_v31  ;;  %v9471_v31 = vld [vmem:[#allocation8 + $0x230] sm:$0xff]  }
 0x21f   : > { %2694 = vmatmul.mubr.bf16.vlgmr.msra.gmra.mrb[112].mxu0 %v1483_v7  ;;  %2548 = vmatprep.mubr.bf16.mxu1 %v11082_v37  ;;  %v1505_v7 = vld [vmem:[#allocation2 + $0x79] sm:$0xff] }
 0x220   : > { %2701 = vmatprep.mubr.bf16.mxu0 %v1532_v51  ;;  %9131 = vmatpush3.bf16.msra.mxu1 %v9467_v1  ;;  %v1456_v1 = vld [vmem:[#allocation2 + $0x68] sm:$0xff]  ;;  %v1534_v60 = vpack.c.bf16 %v1506_v29, %v1505_v7 }
 0x221   : > { %9132 = vmatprep.subr.bf16.mxu1 %v9468_v42  ;;  %v1485_v19 = vpack.c.bf16 %v1456_v1, %v1455_v54 }
 0x224   : > { %9133 = vmatpush3.bf16.msra.mxu1 %v9468_v42  ;;  %v1510_v42 = vld [vmem:[#allocation2 + $0xb1] sm:$0xff] }
 0x225   : > { %9134 = vmatprep.subr.bf16.mxu1 %v9469_v26 }
 0x226   : > { %2549 = vmatmul.mubr.bf16.gmra.mrb[88].mxu1 %v1532_v51  ;;  %v1509_v51 = vld [vmem:[#allocation2 + $0xa9] sm:$0xff] }
 0x227   : > { %2702 = vmatmul.mubr.bf16.gmra.mrb[116].mxu0 %v1484_v55  ;;  %2556 = vmatprep.mubr.bf16.mxu1 %v10878_v62  ;;  %v1535_v62 = vpack.c.bf16 %v1508_v24, %v1507_v18 }
 0x228   : > { %2709 = vmatprep.mubr.bf16.mxu0 %v1533_v10  ;;  %9135 = vmatpush3.bf16.msra.mxu1 %v9469_v26  ;;  %v1536_v26 = vpack.c.bf16 %v1510_v42, %v1509_v51 }
 0x229   : > { %9136 = vmatprep.subr.bf16.mxu1 %v9470_v47 }
 0x22c   : > { %9137 = vmatpush3.bf16.msra.mxu1 %v9470_v47 }
 0x22d   : > { %9138 = vmatprep.subr.bf16.mxu1 %v9471_v31 }
 0x22e   : > { %2557 = vmatmul.mubr.bf16.gmra.mrb[92].mxu1 %v1533_v10 }
 0x22f   : > { %2710 = vmatmul.mubr.bf16.gmra.mrb[120].mxu0 %v1485_v19  ;;  %2564 = vmatprep.mubr.bf16.mxu1 %v10904_v11  ;;  %v1512_v11 = vld [vmem:[#allocation2 + $0xc9] sm:$0xff] }
 0x230   : > { %2717 = vmatprep.mubr.bf16.mxu0 %v1534_v60  ;;  %9139 = vmatpush3.bf16.msra.mxu1 %v9471_v31  ;;  %v1537_v55 = vpack.c.bf16 %v1512_v11, %v1511_v32 }
 0x231   : > { %9140 = vmatprep.subr.bf16.mxu1 %v9472_v46 }
 0x234   : > { %9141 = vmatpush3.bf16.msra.mxu1 %v9472_v46 }
 0x236   : > { %2565 = vmatmul.mubr.bf16.gmra.mrb[96].mxu1 %v1534_v60 }
 0x237   : > { %2718 = vmatmul.mubr.bf16.gmra.mrb[124].mxu0 %v10876_v16  ;;  %2572 = vmatprep.mubr.bf16.mxu1 %v10934_v45  ;;  %v1514_v16 = vld [vmem:[#allocation2 + $0xe1] sm:$0xff]  ;;  %v1513_v45 = vld [vmem:[#allocation2 + $0xd9] sm:$0xff] }
 0x238   : > { %2725 = vmatprep.mubr.bf16.mxu0 %v1535_v62  ;;  %v1538_v47 = vpack.c.bf16 %v1514_v16, %v1513_v45 }
 0x23e   : > { %2573 = vmatmul.mubr.bf16.gmra.mrb[100].mxu1 %v1535_v62  ;;  %v1519_v62 = vld [vmem:[#allocation2 + $0x121] sm:$0xff] }
 0x23f   : > { %2726 = vmatmul.mubr.bf16.gmra.mrb[128].mxu0 %v10902_v57  ;;  %2580 = vmatprep.mubr.bf16.mxu1 %v10958_v36  ;;  %v1516_v57 = vld [vmem:[#allocation2 + $0xf9] sm:$0xff]  ;;  %v1515_v36 = vld [vmem:[#allocation2 + $0xf1] sm:$0xff] }
 0x240   : > { %2733 = vmatprep.mubr.bf16.mxu0 %v1536_v26  ;;  %v1539_v10 = vpack.c.bf16 %v1516_v57, %v1515_v36 }
 0x246   : > { %2581 = vmatmul.mubr.bf16.gmra.mrb[104].mxu1 %v1536_v26  ;;  %v1541_v26 = vpack.c.bf16 %v11027_v15, %v1519_v62  ;;  %v1522_v15 = vld [vmem:[#allocation2 + $0x141] sm:$0xff] }
 0x247   : > { %2734 = vmatmul.mubr.bf16.gmra.mrb[132].mxu0 %v10932_v0  ;;  %2588 = vmatprep.mubr.bf16.mxu1 %v10979_v5  ;;  %v1518_v0 = vld [vmem:[#allocation2 + $0x111] sm:$0xff]  ;;  %v1517_v5 = vld [vmem:[#allocation2 + $0x109] sm:$0xff] }
 0x248   : > { %2741 = vmatprep.mubr.bf16.mxu0 %v1537_v55  ;;  %v1540_v31 = vpack.c.bf16 %v1518_v0, %v1517_v5  ;;  %v1521_v5 = vld [vmem:[#allocation2 + $0x139] sm:$0xff] }
 0x24e   : > { %2589 = vmatmul.mubr.bf16.gmra.mrb[108].mxu1 %v1537_v55 }
 0x24f   : > { %2742 = vmatmul.mubr.bf16.gmra.mrb[136].mxu0 %v10951_v33  ;;  %2596 = vmatprep.mubr.bf16.mxu1 %v11004_v17  ;;  %v11100_v33 = vld [vmem:[%s13245_s4] ss:$0 sm:$0xff] }
 0x250   : > { %2749 = vmatprep.mubr.bf16.mxu0 %v1538_v47  ;;  %v2213_v19 = vadd.f32 %v11024_v48, %v11100_v33 }
 0x256   : > { %2597 = vmatmul.mubr.bf16.gmra.mrb[112].mxu1 %v1538_v47 }
 0x257   : > { %2750 = vmatmul.mubr.bf16.gmra.mrb[140].mxu0 %v10972_v4  ;;  %2604 = vmatprep.mubr.bf16.mxu1 %v11016_v8 }
 0x258   : > { %2757 = vmatprep.mubr.bf16.mxu0 %v1539_v10 }
 0x25e   : > { %2605 = vmatmul.mubr.bf16.gmra.mrb[116].mxu1 %v1539_v10 }
 0x25f   : > { %2758 = vmatmul.mubr.bf16.gmra.mrb[144].mxu0 %v11001_v56  ;;  %2612 = vmatprep.mubr.bf16.mxu1 %v11040_v25  ;;  %v2216_v56 = vadd.f32 %v11029_v41, %v11100_v33 }
 0x260   : > { %2765 = vmatprep.mubr.bf16.mxu0 %v1540_v31 }
 0x262   : > { %v7732_v17 = vpop.f32.mrb[20].mxu1 }
 0x263   : > { %v7838_v1 = vpop.f32.mrb[48].mxu0  ;;  %v7733_v29 = vpop.f32.mrb[21].mxu1 }
 0x264   : > { %v7734_v4 = vadd.f32 %v7733_v29, %v7732_v17  ;;  %v7839_v8 = vpop.f32.mrb[49].mxu0  ;;  %v7735_v54 = vpop.f32.mrb[22].mxu1 }
 0x265   : > { %v7840_v7 = vadd.f32 %v7839_v8, %v7838_v1  ;;  %v7841_v46 = vpop.f32.mrb[50].mxu0  ;;  %v7736_v60 = vpop.f32.mrb[23].mxu1  ;;  %v1542_v1 = vpack.c.bf16 %v1522_v15, %v1521_v5 }
 0x266   : > { %v7737_v24 = vadd.f32 %v7736_v60, %v7735_v54  ;;  %v7842_v18 = vpop.f32.mrb[51].mxu0  ;;  %2613 = vmatmul.mubr.bf16.gmra.mrb[120].mxu1 %v1540_v31  ;;  %v2221_v41 = vadd.f32 %v7734_v4, %v11100_v33 }
 0x267   : > { %v11108_v42 = vadd.f32 %v7840_v7, %v2213_v19  ;;  %v7843_v25 = vadd.f32 %v7842_v18, %v7841_v46  ;;  %2766 = vmatmul.mubr.bf16.gmra.mrb[148].mxu0 %v11013_v44  ;;  %2620 = vmatprep.mubr.bf16.mxu1 %v11051_v13 }
 0x268   : > { %2773 = vmatprep.mubr.bf16.mxu0 %v1541_v26  ;;  %v2224_v31 = vadd.f32 %v7737_v24, %v11100_v33 }
 0x269   : > { %v11110_v51 = vadd.f32 %v7843_v25, %v2216_v56  ;;  %v1523_v25 = vld [vmem:[#allocation2 + $0x151] sm:$0xff] }
 0x26a   : > { %v7738_v11 = vpop.f32.mrb[24].mxu1 }
 0x26b   : > { %v7844_v48 = vpop.f32.mrb[52].mxu0  ;;  %v7739_v32 = vpop.f32.mrb[25].mxu1 }
 0x26c   : > { %v7740_v55 = vadd.f32 %v7739_v32, %v7738_v11  ;;  %v7845_v16 = vpop.f32.mrb[53].mxu0  ;;  %v7741_v45 = vpop.f32.mrb[26].mxu1 }
 0x26d   : > { %v7846_v47 = vadd.f32 %v7845_v16, %v7844_v48  ;;  %v7847_v57 = vpop.f32.mrb[54].mxu0  ;;  %v7742_v36 = vpop.f32.mrb[27].mxu1 }
 0x26e   : > { %v7743_v10 = vadd.f32 %v7742_v36, %v7741_v45  ;;  %v7848_v0 = vpop.f32.mrb[55].mxu0  ;;  %2621 = vmatmul.mubr.bf16.gmra.mrb[124].mxu1 %v1541_v26  ;;  %v2229_v46 = vadd.f32 %v7740_v55, %v11100_v33  ;;  %v1524_v26 = vld [vmem:[#allocation2 + $0x159] sm:$0xff] }
 0x26f   : > { %v11117_v44 = vadd.f32 %v7846_v47, %v2221_v41  ;;  %v7849_v13 = vadd.f32 %v7848_v0, %v7847_v57  ;;  %2774 = vmatmul.mubr.bf16.gmra.mrb[152].mxu0 %v11038_v58  ;;  %2628 = vmatprep.mubr.bf16.mxu1 %v11061_v6  ;;  %v1543_v32 = vpack.c.bf16 %v1524_v26, %v1523_v25  ;;  %v1432_v26 = vld [vmem:[#allocation2 + $0x182] sm:$0xff] }
 0x270   : > { %2781 = vmatprep.mubr.bf16.mxu0 %v1542_v1  ;;  %v2232_v11 = vadd.f32 %v7743_v10, %v11100_v33 }
 0x271   : > { %v11119_v17 = vadd.f32 %v7849_v13, %v2224_v31  ;;  %v1525_v13 = vld [vmem:[#allocation2 + $0x169] sm:$0xff] }
 0x272   : > { %v7744_v29 = vpop.f32.mrb[28].mxu1 }
 0x273   : > { %v7850_v4 = vpop.f32.mrb[56].mxu0  ;;  %v7745_v8 = vpop.f32.mrb[29].mxu1 }
 0x274   : > { %v7746_v54 = vadd.f32 %v7745_v8, %v7744_v29  ;;  %v7851_v19 = vpop.f32.mrb[57].mxu0  ;;  %v7747_v7 = vpop.f32.mrb[30].mxu1 }
 0x275   : > { %v7852_v60 = vadd.f32 %v7851_v19, %v7850_v4  ;;  %v7853_v24 = vpop.f32.mrb[58].mxu0  ;;  %v7748_v18 = vpop.f32.mrb[31].mxu1 }
 0x276   : > { %v7749_v62 = vadd.f32 %v7748_v18, %v7747_v7  ;;  %v7854_v56 = vpop.f32.mrb[59].mxu0  ;;  %2629 = vmatmul.mubr.bf16.gmra.mrb[128].mxu1 %v1542_v1  ;;  %v2237_v36 = vadd.f32 %v7746_v54, %v11100_v33  ;;  %v1526_v1 = vld [vmem:[#allocation2 + $0x171] sm:$0xff] }
 0x277   : > { %v11125_v58 = vadd.f32 %v7852_v60, %v2229_v46  ;;  %v7855_v6 = vadd.f32 %v7854_v56, %v7853_v24  ;;  %2782 = vmatmul.mubr.bf16.gmra.mrb[156].mxu0 %v11044_v20  ;;  %2636 = vmatprep.mubr.bf16.mxu1 %v11070_v38  ;;  %v1544_v8 = vpack.c.bf16 %v1526_v1, %v1525_v13  ;;  %v1529_v1 = vld [vmem:[#allocation2 + $0x199] sm:$0xff] }
 0x278   : > { %2789 = vmatprep.mubr.bf16.mxu0 %v1543_v32  ;;  %v2240_v29 = vadd.f32 %v7749_v62, %v11100_v33 }
 0x279   : > { %v11127_v48 = vadd.f32 %v7855_v6, %v2232_v11  ;;  %v1433_v11 = vld [vmem:[#allocation2 + $0x18a] sm:$0xff] }
 0x27a   : > { %v7750_v16 = vpop.f32.mrb[32].mxu1 }
 0x27b   : > { %v7856_v55 = vpop.f32.mrb[60].mxu0  ;;  %v7751_v45 = vpop.f32.mrb[33].mxu1 }
 0x27c   : > { %v7752_v41 = vadd.f32 %v7751_v45, %v7750_v16  ;;  %v7857_v47 = vpop.f32.mrb[61].mxu0  ;;  %v7753_v57 = vpop.f32.mrb[34].mxu1  ;;  %v1527_v16 = vld [vmem:[#allocation2 + $0x181] sm:$0xff]  ;;  %v11143_v45 = vpack.c.bf16 %v1433_v11, %v1432_v26  ;;  %v1481_v26 = vld [vmem:[#allocation2 + $0x198] sm:$0xff] }
 0x27d   : > { %v7858_v10 = vadd.f32 %v7857_v47, %v7856_v55  ;;  %v7859_v0 = vpop.f32.mrb[62].mxu0  ;;  %v7754_v5 = vpop.f32.mrb[35].mxu1 }
 0x27e   : > { %v7755_v15 = vadd.f32 %v7754_v5, %v7753_v57  ;;  %v7860_v31 = vpop.f32.mrb[63].mxu0  ;;  %2637 = vmatmul.mubr.bf16.gmra.mrb[132].mxu1 %v1543_v32  ;;  %v2245_v18 = vadd.f32 %v7752_v41, %v11100_v33  ;;  %v1545_v41 = vpack.c.bf16 %v11035_v61, %v1527_v16 }
 0x27f   : > { %v11133_v20 = vadd.f32 %v7858_v10, %v2237_v36  ;;  %v7861_v38 = vadd.f32 %v7860_v31, %v7859_v0  ;;  %2790 = vmatmul.mubr.bf16.gmra.mrb[160].mxu0 %v11054_v3  ;;  %2644 = vmatprep.mubr.bf16.mxu1 %v11075_v12  ;;  %v1385_v31 = vld [vmem:[#allocation2 + $0x189] sm:$0xff] }
 0x280   : > { %2797 = vmatprep.mubr.bf16.mxu0 %v1544_v8  ;;  %v2248_v3 = vadd.f32 %v7755_v15, %v11100_v33 }
 0x281   : > { %v11135_v4 = vadd.f32 %v7861_v38, %v2240_v29  ;;  %v1530_v29 = vld [vmem:[#allocation2 + $0x1a1] sm:$0xff] }
 0x282   : > { %v7756_v19 = vpop.f32.mrb[36].mxu1 }
 0x283   : > { %v7862_v54 = vpop.f32.mrb[64].mxu0  ;;  %v7757_v7 = vpop.f32.mrb[37].mxu1 }
 0x284   : > { %v7758_v46 = vadd.f32 %v7757_v7, %v7756_v19  ;;  %v7863_v60 = vpop.f32.mrb[65].mxu0  ;;  %v7759_v24 = vpop.f32.mrb[38].mxu1 }
 0x285   : > { %v7864_v62 = vadd.f32 %v7863_v60, %v7862_v54  ;;  %v7865_v56 = vpop.f32.mrb[66].mxu0  ;;  %v7760_v25 = vpop.f32.mrb[39].mxu1 }
 0x286   : > { %v7761_v6 = vadd.f32 %v7760_v25, %v7759_v24  ;;  %v7866_v32 = vpop.f32.mrb[67].mxu0  ;;  %2645 = vmatmul.mubr.bf16.gmra.mrb[136].mxu1 %v1544_v8  ;;  %v2253_v13 = vadd.f32 %v7758_v46, %v11100_v33  ;;  %v1401_v24 = vpack.c.bf16 %v1385_v31, %v1527_v16 }
 0x287   : > { %v11141_v55 = vadd.f32 %v7864_v62, %v2245_v18  ;;  %v7867_v12 = vadd.f32 %v7866_v32, %v7865_v56  ;;  %2798 = vmatmul.mubr.bf16.gmra.mrb[164].mxu0 %v11064_v2  ;;  %2652 = vmatprep.mubr.bf16.mxu1 %v11143_v45  ;;  %v1546_v18 = vpack.c.bf16 %v1530_v29, %v1529_v1 }
 0x288   : > { %2805 = vmatprep.mubr.bf16.mxu0 %v1545_v41  ;;  %v2256_v2 = vadd.f32 %v7761_v6, %v11100_v33 }
 0x289   : > { %v11145_v47 = vadd.f32 %v7867_v12, %v2248_v3 }
 0x28a   : > { %v7762_v57 = vpop.f32.mrb[40].mxu1 }
 0x28b   : > { %v7868_v36 = vpop.f32.mrb[68].mxu0  ;;  %v7763_v10 = vpop.f32.mrb[41].mxu1 }
 0x28c   : > { %v7764_v0 = vadd.f32 %v7763_v10, %v7762_v57  ;;  %v7869_v5 = vpop.f32.mrb[69].mxu0  ;;  %v7765_v15 = vpop.f32.mrb[42].mxu1  ;;  %v1551_v57 = vld [vmem:[#allocation2 + $0x62] sm:$0xff] }
 0x28d   : > { %v7870_v38 = vadd.f32 %v7869_v5, %v7868_v36  ;;  %v7871_v8 = vpop.f32.mrb[70].mxu0  ;;  %v7766_v19 = vpop.f32.mrb[43].mxu1  ;;  %v1552_v36 = vld [vmem:[#allocation2 + $0x6a] sm:$0xff] }
 0x28e   : > { %v7767_v61 = vadd.f32 %v7766_v19, %v7765_v15  ;;  %v7872_v54 = vpop.f32.mrb[71].mxu0  ;;  %2653 = vmatmul.mubr.bf16.gmra.mrb[140].mxu1 %v1401_v24  ;;  %v2261_v3 = vadd.f32 %v7764_v0, %v11100_v33  ;;  %v11159_v15 = vld [vmem:[#allocation2 + $0x8] sm:$0xff]  ;;  %v1581_v1 = vpack.c.bf16 %v1552_v36, %v1551_v57 }
 0x28f   : > { %v11152_v7 = vadd.f32 %v7870_v38, %v2253_v13  ;;  %v7873_v60 = vadd.f32 %v7872_v54, %v7871_v8  ;;  %2806 = vmatmul.mubr.bf16.gmra.mrb[168].mxu0 %v11068_v49  ;;  %9142 = vmatprep.mubr.bf16.mxu1 %v11077_v53  ;;  %v1498_v49 = vpack.c.bf16 %v11159_v15, %v1481_v26  ;;  %v1554_v24 = vld [vmem:[#allocation2 + $0x82] sm:$0xff]  ;;  %v1556_v26 = vld [vmem:[#allocation2 + $0x9a] sm:$0xff] }
 0x290   : > { %2813 = vmatprep.mubr.bf16.mxu0 %v1546_v18  ;;  %v2264_v53 = vadd.f32 %v7767_v61, %v11100_v33 }
 0x291   : > { %v11154_v62 = vadd.f32 %v7873_v60, %v2256_v2  ;;  %v1553_v60 = vld [vmem:[#allocation2 + $0x7a] sm:$0xff] }
 0x292   : > { %v7768_v56 = vpop.f32.mrb[44].mxu1 }
 0x293   : > { %v7874_v46 = vpop.f32.mrb[72].mxu0  ;;  %v7769_v25 = vpop.f32.mrb[45].mxu1 }
 0x294   : > { %v7770_v11 = vadd.f32 %v7769_v25, %v7768_v56  ;;  %v7875_v32 = vpop.f32.mrb[73].mxu0  ;;  %v7771_v6 = vpop.f32.mrb[46].mxu1  ;;  %v1555_v25 = vld [vmem:[#allocation2 + $0x92] sm:$0xff] }
 0x295   : > { %v7876_v12 = vadd.f32 %v7875_v32, %v7874_v46  ;;  %v7877_v16 = vpop.f32.mrb[74].mxu0  ;;  %v7772_v41 = vpop.f32.mrb[47].mxu1 }
 0x296   : > { %v7773_v10 = vadd.f32 %v7772_v41, %v7771_v6  ;;  %v7878_v5 = vpop.f32.mrb[75].mxu0  ;;  %9143 = vmatmul.mubr.bf16.vlgmr.msra.gmra.mrb[144].mxu1 %v11082_v37  ;;  %v2269_v61 = vadd.f32 %v7770_v11, %v11100_v33  ;;  %v1583_v41 = vpack.c.bf16 %v1556_v26, %v1555_v25 }
 0x297   : > { %v11163_v31 = vadd.f32 %v7876_v12, %v2261_v3  ;;  %v7879_v13 = vadd.f32 %v7878_v5, %v7877_v16  ;;  %2814 = vmatmul.mubr.bf16.gmra.mrb[172].mxu0 %v1498_v49  ;;  %9146 = vmatprep.mubr.bf16.mxu1 %v1581_v1  ;;  %v1582_v16 = vpack.c.bf16 %v1554_v24, %v1553_v60  ;;  %v1557_v1 = vld [vmem:[#allocation2 + $0xaa] sm:$0xff] }
 0x298   : > { %v2272_v37 = vadd.f32 %v7773_v10, %v11100_v33  ;;  %v1560_v60 = vld [vmem:[#allocation2 + $0xca] sm:$0xff] }
 0x299   : > { %v11165_v29 = vadd.f32 %v7879_v13, %v2264_v53 }
 0x29a   : > { %v7774_v0 = vpop.f32.mrb[48].mxu1 }
 0x29b   : > { %v7880_v38 = vpop.f32.mrb[76].mxu0  ;;  %v7775_v8 = vpop.f32.mrb[49].mxu1 }
 0x29c   : > { %v7776_v19 = vadd.f32 %v7775_v8, %v7774_v0  ;;  %v7881_v54 = vpop.f32.mrb[77].mxu0  ;;  %v7777_v2 = vpop.f32.mrb[50].mxu1  ;;  %v1558_v0 = vld [vmem:[#allocation2 + $0xb2] sm:$0xff] }
 0x29d   : > { %v7882_v18 = vadd.f32 %v7881_v54, %v7880_v38  ;;  %v7883_v56 = vpop.f32.mrb[78].mxu0  ;;  %v7778_v46 = vpop.f32.mrb[51].mxu1  ;;  %v1584_v25 = vpack.c.bf16 %v1558_v0, %v1557_v1 }
 0x29e   : > { %v7779_v32 = vadd.f32 %v7778_v46, %v7777_v2  ;;  %v7884_v6 = vpop.f32.mrb[79].mxu0  ;;  %9147 = vmatmul.mubr.bf16.gmra.mrb[148].mxu1 %v1582_v16  ;;  %v2277_v38 = vadd.f32 %v7776_v19, %v11100_v33  ;;  %v1559_v2 = vld [vmem:[#allocation2 + $0xc2] sm:$0xff]  ;;  %v1564_v16 = vld [vmem:[#allocation2 + $0xfa] sm:$0xff] }
 0x29f   : > { %v11170_v3 = vadd.f32 %v7882_v18, %v2269_v61  ;;  %v7885_v12 = vadd.f32 %v7884_v6, %v7883_v56  ;;  %9150 = vmatprep.mubr.bf16.mxu1 %v1583_v41  ;;  %v1585_v26 = vpack.c.bf16 %v1560_v60, %v1559_v2  ;;  %v1562_v19 = vld [vmem:[#allocation2 + $0xe2] sm:$0xff]  ;;  %v1566_v2 = vld [vmem:[#allocation2 + $0x112] sm:$0xff] }
 0x2a0   : > { %v2280_v18 = vadd.f32 %v7779_v32, %v11100_v33 }
 0x2a1   : > { %v11172_v57 = vadd.f32 %v7885_v12, %v2272_v37  ;;  %v1561_v37 = vld [vmem:[#allocation2 + $0xda] sm:$0xff]  ;;  %v1563_v12 = vld [vmem:[#allocation2 + $0xf2] sm:$0xff] }
 0x2a2   : > { %v7780_v36 = vpop.f32.mrb[52].mxu1  ;;  %v1586_v41 = vpack.c.bf16 %v1562_v19, %v1561_v37 }
 0x2a3   : > { %v7886_v11 = vpop.f32.mrb[80].mxu0  ;;  %v7781_v5 = vpop.f32.mrb[53].mxu1 }
 0x2a4   : > { %v7782_v49 = vadd.f32 %v7781_v5, %v7780_v36  ;;  %v7887_v53 = vpop.f32.mrb[81].mxu0  ;;  %v7783_v13 = vpop.f32.mrb[54].mxu1  ;;  %v1587_v36 = vpack.c.bf16 %v1564_v16, %v1563_v12 }
 0x2a5   : > { %v7888_v10 = vadd.f32 %v7887_v53, %v7886_v11  ;;  %v7889_v8 = vpop.f32.mrb[82].mxu0  ;;  %v7784_v54 = vpop.f32.mrb[55].mxu1 }
 0x2a6   : > { %v7785_v24 = vadd.f32 %v7784_v54, %v7783_v13  ;;  %v7890_v61 = vpop.f32.mrb[83].mxu0  ;;  %9151 = vmatmul.mubr.bf16.gmra.mrb[152].mxu1 %v1584_v25  ;;  %v2285_v1 = vadd.f32 %v7782_v49, %v11100_v33  ;;  %v1565_v54 = vld [vmem:[#allocation2 + $0x10a] sm:$0xff] }
 0x2a7   : > { %v11176_v56 = vadd.f32 %v7888_v10, %v2277_v38  ;;  %v7891_v46 = vadd.f32 %v7890_v61, %v7889_v8  ;;  %9154 = vmatprep.mubr.bf16.mxu1 %v1585_v26  ;;  %v1568_v25 = vld [vmem:[#allocation2 + $0x12a] sm:$0xff]  ;;  %v1588_v19 = vpack.c.bf16 %v1566_v2, %v1565_v54 }
 0x2a9   : > { %v11178_v6 = vadd.f32 %v7891_v46, %v2280_v18  ;;  %v2288_v18 = vadd.f32 %v7785_v24, %v11100_v33  ;;  %v1567_v46 = vld [vmem:[#allocation2 + $0x122] sm:$0xff] }
 0x2aa   : > { %v1589_v16 = vpack.c.bf16 %v1568_v25, %v1567_v46 }
 0x2ae   : > { %9155 = vmatmul.mubr.bf16.gmra.mrb[156].mxu1 %v1586_v41  ;;  %v1569_v41 = vld [vmem:[#allocation2 + $0x13a] sm:$0xff] }
 0x2af   : > { %9158 = vmatprep.mubr.bf16.mxu1 %v1587_v36  ;;  %v1570_v36 = vld [vmem:[#allocation2 + $0x142] sm:$0xff] }
 0x2b0   : > { %v1590_v2 = vpack.c.bf16 %v1570_v36, %v1569_v41  ;;  %v1578_v41 = vld [vmem:[#allocation2 + $0x1a2] sm:$0xff] }
 0x2b1   : > { %v7786_v11 = vpop.f32.mrb[56].mxu1 }
 0x2b2   : > { %v7892_v5 = vpop.f32.mrb[84].mxu0  ;;  %v7787_v53 = vpop.f32.mrb[57].mxu1 }
 0x2b3   : > { %v7788_v32 = vadd.f32 %v7787_v53, %v7786_v11  ;;  %v7893_v13 = vpop.f32.mrb[85].mxu0  ;;  %v7789_v38 = vpop.f32.mrb[58].mxu1  ;;  %v1571_v53 = vld [vmem:[#allocation2 + $0x152] sm:$0xff] }
 0x2b4   : > { %v7894_v0 = vadd.f32 %v7893_v13, %v7892_v5  ;;  %v7895_v10 = vpop.f32.mrb[86].mxu0  ;;  %v7790_v8 = vpop.f32.mrb[59].mxu1  ;;  %v1572_v13 = vld [vmem:[#allocation2 + $0x15a] sm:$0xff] }
 0x2b5   : > { %v7791_v60 = vadd.f32 %v7790_v8, %v7789_v38  ;;  %v7896_v61 = vpop.f32.mrb[87].mxu0  ;;  %v1591_v25 = vpack.c.bf16 %v1572_v13, %v1571_v53 }
 0x2b6   : > { %v11182_v26 = vadd.f32 %v7894_v0, %v2285_v1  ;;  %v7897_v37 = vadd.f32 %v7896_v61, %v7895_v10  ;;  %9159 = vmatmul.mubr.bf16.gmra.mrb[160].mxu1 %v1588_v19  ;;  %v2293_v1 = vadd.f32 %v7788_v32, %v11100_v33  ;;  %v1577_v32 = vld [vmem:[#allocation2 + $0x19a] sm:$0xff] }
 0x2b7   : > { %9162 = vmatprep.mubr.bf16.mxu1 %v1589_v16  ;;  %v2296_v46 = vadd.f32 %v7791_v60, %v11100_v33  ;;  %v1594_v60 = vpack.c.bf16 %v1578_v41, %v1577_v32 }
 0x2b8   : > { %v11184_v12 = vadd.f32 %v7897_v37, %v2288_v18 }
 0x2ba   : > { %v7792_v49 = vpop.f32.mrb[60].mxu1 }
 0x2bb   : > { %v7898_v11 = vpop.f32.mrb[88].mxu0  ;;  %v7793_v5 = vpop.f32.mrb[61].mxu1 }
 0x2bc   : > { %v7794_v38 = vadd.f32 %v7793_v5, %v7792_v49  ;;  %v7899_v24 = vpop.f32.mrb[89].mxu0  ;;  %v7795_v8 = vpop.f32.mrb[62].mxu1  ;;  %v1573_v49 = vld [vmem:[#allocation2 + $0x16a] sm:$0xff]  ;;  %v1574_v5 = vld [vmem:[#allocation2 + $0x172] sm:$0xff] }
 0x2bd   : > { %v7900_v0 = vadd.f32 %v7899_v24, %v7898_v11  ;;  %v7901_v10 = vpop.f32.mrb[90].mxu0  ;;  %v7796_v54 = vpop.f32.mrb[63].mxu1  ;;  %v1592_v40 = vpack.c.bf16 %v1574_v5, %v1573_v49 }
 0x2be   : > { %v7797_v61 = vadd.f32 %v7796_v54, %v7795_v8  ;;  %v7902_v18 = vpop.f32.mrb[91].mxu0  ;;  %9163 = vmatmul.mubr.bf16.gmra.mrb[164].mxu1 %v1590_v2 }
 0x2bf   : > { %v11188_v37 = vadd.f32 %v7900_v0, %v2293_v1  ;;  %v7903_v19 = vadd.f32 %v7902_v18, %v7901_v10  ;;  %9166 = vmatprep.mubr.bf16.mxu1 %v1591_v25  ;;  %v2301_v1 = vadd.f32 %v7794_v38, %v11100_v33  ;;  %v9473_v25 = vld [vmem:[#allocation8 + $0x280] sm:$0xff]  }
 0x2c0   : > { %8182 = vmatprep.subr.bf16.mxu1 %v9473_v25 }
 0x2c1   : > { %v11190_v16 = vadd.f32 %v7903_v19, %v2296_v46  ;;  %v9474_v19 = vld [vmem:[#allocation8 + $0x240] sm:$0xff]  }
 0x2c2   : > { %8183 = vmatpush3.bf16.msra.mxu1 %v9474_v19 }
 0x2c6   : > { %9167 = vmatmul.mubr.bf16.gmra.mrb[168].mxu1 %v1592_v40  ;;  %v2304_v40 = vadd.f32 %v7797_v61, %v11100_v33 }
 0x2c7   : > { %9170 = vmatprep.mubr.bf16.mxu1 %v11143_v45 }
 0x2c9   : > { %v7798_v36 = vpop.f32.mrb[64].mxu1 }
 0x2ca   : > { %v7904_v11 = vpop.f32.mrb[92].mxu0  ;;  %v7799_v24 = vpop.f32.mrb[65].mxu1 }
 0x2cb   : > { %v7800_v53 = vadd.f32 %v7799_v24, %v7798_v36  ;;  %v7905_v13 = vpop.f32.mrb[93].mxu0  ;;  %v7801_v8 = vpop.f32.mrb[66].mxu1 }
 0x2cc   : > { %v7906_v0 = vadd.f32 %v7905_v13, %v7904_v11  ;;  %v7907_v10 = vpop.f32.mrb[94].mxu0  ;;  %v7802_v54 = vpop.f32.mrb[67].mxu1 }
 0x2cd   : > { %v7803_v2 = vadd.f32 %v7802_v54, %v7801_v8  ;;  %v7908_v18 = vpop.f32.mrb[95].mxu0  ;;  %v2309_v24 = vadd.f32 %v7800_v53, %v11100_v33 }
 0x2ce   : > { %v11195_v46 = vadd.f32 %v7906_v0, %v2301_v1  ;;  %v7909_v45 = vadd.f32 %v7908_v18, %v7907_v10  ;;  %9171 = vmatmul.mubr.bf16.gmra.mrb[172].mxu1 %v1594_v60  ;;  %v9475_v18 = vld [vmem:[#allocation8 + $0x288] sm:$0xff]  }
 0x2cf   : > { %v2312_v60 = vadd.f32 %v7803_v2, %v11100_v33  ;;  %8184 = vmatprep.subr.bf16.mxu1 %v9475_v18  ;;  %v9478_v18 = vld [vmem:[#allocation8 + $0x250] sm:$0xff]  }
 0x2d0   : > { %v11197_v49 = vadd.f32 %v7909_v45, %v2304_v40  ;;  %v9476_v40 = vld [vmem:[#allocation8 + $0x248] sm:$0xff]  }
 0x2d1   : > { %v7804_v5 = vpop.f32.mrb[68].mxu1  ;;  %8185 = vmatpush3.bf16.msra.mxu1 %v9476_v40 }
 0x2d2   : > { %v7910_v32 = vpop.f32.mrb[96].mxu0  ;;  %v7805_v41 = vpop.f32.mrb[69].mxu1 }
 0x2d3   : > { %v7806_v38 = vadd.f32 %v7805_v41, %v7804_v5  ;;  %v7911_v36 = vpop.f32.mrb[97].mxu0  ;;  %v7807_v11 = vpop.f32.mrb[70].mxu1 }
 0x2d4   : > { %v7912_v13 = vadd.f32 %v7911_v36, %v7910_v32  ;;  %v7913_v61 = vpop.f32.mrb[98].mxu0  ;;  %v7808_v8 = vpop.f32.mrb[71].mxu1 }
 0x2d5   : > { %v7809_v1 = vadd.f32 %v7808_v8, %v7807_v11  ;;  %v7914_v0 = vpop.f32.mrb[99].mxu0  ;;  %v2317_v36 = vadd.f32 %v7806_v38, %v11100_v33 }
 0x2d6   : > { %v11201_v10 = vadd.f32 %v7912_v13, %v2309_v24  ;;  %v7915_v54 = vadd.f32 %v7914_v0, %v7913_v61 }
 0x2d7   : > { %v2320_v61 = vadd.f32 %v7809_v1, %v11100_v33 }
 0x2d8   : > { %v11203_v45 = vadd.f32 %v7915_v54, %v2312_v60  ;;  %v9477_v54 = vld [vmem:[#allocation8 + $0x290] sm:$0xff]  }
 0x2d9   : > { %v7810_v25 = vpop.f32.mrb[72].mxu1  ;;  %8186 = vmatprep.subr.bf16.mxu1 %v9477_v54  ;;  %v9480_v54 = vld [vmem:[#allocation8 + $0x258] sm:$0xff]  }
 0x2da   : > { %v7916_v19 = vpop.f32.mrb[100].mxu0  ;;  %v7811_v5 = vpop.f32.mrb[73].mxu1  ;;  %8187 = vmatpush3.bf16.msra.mxu1 %v9478_v18 }
 0x2db   : > { %v7812_v53 = vadd.f32 %v7811_v5, %v7810_v25  ;;  %v7917_v32 = vpop.f32.mrb[101].mxu0  ;;  %v7813_v41 = vpop.f32.mrb[74].mxu1 }
 0x2dc   : > { %v7918_v11 = vadd.f32 %v7917_v32, %v7916_v19  ;;  %v7919_v8 = vpop.f32.mrb[102].mxu0  ;;  %v7814_v2 = vpop.f32.mrb[75].mxu1 }
 0x2dd   : > { %v7815_v24 = vadd.f32 %v7814_v2, %v7813_v41  ;;  %v7920_v13 = vpop.f32.mrb[103].mxu0  ;;  %v2325_v41 = vadd.f32 %v7812_v53, %v11100_v33 }
 0x2de   : > { %v11207_v0 = vadd.f32 %v7918_v11, %v2317_v36  ;;  %v7921_v60 = vadd.f32 %v7920_v13, %v7919_v8 }
 0x2df   : > { %v2328_v8 = vadd.f32 %v7815_v24, %v11100_v33 }
 0x2e0   : > { %v11209_v34 = vadd.f32 %v7921_v60, %v2320_v61  ;;  %v9479_v60 = vld [vmem:[#allocation8 + $0x298] sm:$0xff]  }
 0x2e1   : > { %v7816_v40 = vpop.f32.mrb[76].mxu1  ;;  %8188 = vmatprep.subr.bf16.mxu1 %v9479_v60 }
 0x2e2   : > { %v7922_v25 = vpop.f32.mrb[104].mxu0  ;;  %v7817_v5 = vpop.f32.mrb[77].mxu1  ;;  %8189 = vmatpush3.bf16.msra.mxu1 %v9480_v54 }
 0x2e3   : > { %v7818_v38 = vadd.f32 %v7817_v5, %v7816_v40  ;;  %v7923_v19 = vpop.f32.mrb[105].mxu0  ;;  %v7819_v32 = vpop.f32.mrb[78].mxu1 }
 0x2e4   : > { %v7924_v2 = vadd.f32 %v7923_v19, %v7922_v25  ;;  %v7925_v39 = vpop.f32.mrb[106].mxu0  ;;  %v7820_v1 = vpop.f32.mrb[79].mxu1 }
 0x2e5   : > { %v7821_v36 = vadd.f32 %v7820_v1, %v7819_v32  ;;  %v7926_v11 = vpop.f32.mrb[107].mxu0  ;;  %v2333_v32 = vadd.f32 %v7818_v38, %v11100_v33 }
 0x2e6   : > { %v11213_v13 = vadd.f32 %v7924_v2, %v2325_v41  ;;  %v7927_v61 = vadd.f32 %v7926_v11, %v7925_v39 }
 0x2e7   : > { %v2336_v11 = vadd.f32 %v7821_v36, %v11100_v33 }
 0x2e8   : > { %v11215_v30 = vadd.f32 %v7927_v61, %v2328_v8 }
 0x2e9   : > { %v7950_v18 = vpop.f32.mrb[80].mxu1 }
 0x2ea   : > { %v7928_v40 = vpop.f32.mrb[108].mxu0  ;;  %v7951_v5 = vpop.f32.mrb[81].mxu1 }
 0x2eb   : > { %v7929_v53 = vpop.f32.mrb[109].mxu0  ;;  %v7952_v25 = vadd.f32 %v7951_v5, %v7950_v18  ;;  %v7953_v19 = vpop.f32.mrb[82].mxu1 }
 0x2ec   : > { %v7930_v1 = vadd.f32 %v7929_v53, %v7928_v40  ;;  %v7931_v59 = vpop.f32.mrb[110].mxu0  ;;  %v7954_v24 = vpop.f32.mrb[83].mxu1 }
 0x2ed   : > { %v2535_v41 = vadd.f32 %v7952_v25, %v11108_v42  ;;  %v7932_v39 = vpop.f32.mrb[111].mxu0  ;;  %v7955_v2 = vadd.f32 %v7954_v24, %v7953_v19 }
 0x2ee   : > { %v11220_v8 = vadd.f32 %v7930_v1, %v2333_v32  ;;  %v7933_v61 = vadd.f32 %v7932_v39, %v7931_v59 }
 0x2ef   : > { %v2538_v60 = vadd.f32 %v7955_v2, %v11110_v51 }
 0x2f0   : > { %v11223_v54 = vadd.f32 %v7933_v61, %v2336_v11 }
 0x2f1   : > { %v7956_v18 = vpop.f32.mrb[84].mxu1 }
 0x2f2   : > { %v8062_v5 = vpop.f32.mrb[112].mxu0  ;;  %v7957_v50 = vpop.f32.mrb[85].mxu1 }
 0x2f3   : > { %v7958_v38 = vadd.f32 %v7957_v50, %v7956_v18  ;;  %v8063_v40 = vpop.f32.mrb[113].mxu0  ;;  %v7959_v53 = vpop.f32.mrb[86].mxu1 }
 0x2f4   : > { %v8064_v23 = vadd.f32 %v8063_v40, %v8062_v5  ;;  %v8065_v9 = vpop.f32.mrb[114].mxu0  ;;  %v7960_v42 = vpop.f32.mrb[87].mxu1 }
 0x2f5   : > { %v2543_v25 = vadd.f32 %v7958_v38, %v11117_v44  ;;  %v7961_v19 = vadd.f32 %v7960_v42, %v7959_v53  ;;  %v8066_v33 = vpop.f32.mrb[115].mxu0 }
 0x2f6   : > { %v8067_v36 = vadd.f32 %v8066_v33, %v8065_v9  ;;  %v11226_v32 = vadd.f32 %v8064_v23, %v2535_v41 }
 0x2f7   : > { %v2546_v59 = vadd.f32 %v7961_v19, %v11119_v17 }
 0x2f8   : > { %v11229_v51 = vadd.f32 %v8067_v36, %v2538_v60 }
 0x2f9   : > { %v7962_v1 = vpop.f32.mrb[88].mxu1 }
 0x2fa   : > { %v8068_v24 = vpop.f32.mrb[116].mxu0  ;;  %v7963_v39 = vpop.f32.mrb[89].mxu1 }
 0x2fb   : > { %v7964_v50 = vadd.f32 %v7963_v39, %v7962_v1  ;;  %v8069_v2 = vpop.f32.mrb[117].mxu0  ;;  %v7965_v11 = vpop.f32.mrb[90].mxu1 }
 0x2fc   : > { %v8070_v61 = vadd.f32 %v8069_v2, %v8068_v24  ;;  %v8071_v18 = vpop.f32.mrb[118].mxu0  ;;  %v7966_v5 = vpop.f32.mrb[91].mxu1 }
 0x2fd   : > { %v2551_v44 = vadd.f32 %v7964_v50, %v11125_v58  ;;  %v7967_v38 = vadd.f32 %v7966_v5, %v7965_v11  ;;  %v8072_v40 = vpop.f32.mrb[119].mxu0 }
 0x2fe   : > { %v8073_v9 = vadd.f32 %v8072_v40, %v8071_v18  ;;  %v11232_v23 = vadd.f32 %v8070_v61, %v2543_v25 }
 0x2ff   : > { %v2554_v17 = vadd.f32 %v7967_v38, %v11127_v48 }
 0x300   : > { %v11235_v41 = vadd.f32 %v8073_v9, %v2546_v59 }
 0x301   : > { %v7968_v60 = vpop.f32.mrb[92].mxu1 }
 0x302   : > { %v8074_v53 = vpop.f32.mrb[120].mxu0  ;;  %v7969_v42 = vpop.f32.mrb[93].mxu1 }
 0x303   : > { %v7970_v19 = vadd.f32 %v7969_v42, %v7968_v60  ;;  %v8075_v33 = vpop.f32.mrb[121].mxu0  ;;  %v7971_v36 = vpop.f32.mrb[94].mxu1 }
 0x304   : > { %v8076_v1 = vadd.f32 %v8075_v33, %v8074_v53  ;;  %v8077_v24 = vpop.f32.mrb[122].mxu0  ;;  %v7972_v39 = vpop.f32.mrb[95].mxu1 }
 0x305   : > { %v2559_v58 = vadd.f32 %v7970_v19, %v11133_v20  ;;  %v7973_v50 = vadd.f32 %v7972_v39, %v7971_v36  ;;  %v8078_v2 = vpop.f32.mrb[123].mxu0  ;;  %v9481_v36 = vld [vmem:[#allocation8 + $0x2a0] sm:$0xff]  }
 0x306   : > { %v8079_v11 = vadd.f32 %v8078_v2, %v8077_v24  ;;  %v11238_v25 = vadd.f32 %v8076_v1, %v2551_v44  ;;  %v9482_v44 = vld [vmem:[#allocation8 + $0x260] sm:$0xff]   ;;  %8190 = vmatprep.subr.bf16.mxu1 %v9481_v36 }
 0x307   : > { %v2562_v48 = vadd.f32 %v7973_v50, %v11135_v4  ;;  %8191 = vmatpush3.bf16.msra.mxu1 %v9482_v44 }
 0x308   : > { %v11241_v59 = vadd.f32 %v8079_v11, %v2554_v17 }
 0x309   : > { %v7974_v61 = vpop.f32.mrb[96].mxu1 }
 0x30a   : > { %v8080_v18 = vpop.f32.mrb[124].mxu0  ;;  %v7975_v5 = vpop.f32.mrb[97].mxu1 }
 0x30b   : > { %v7976_v38 = vadd.f32 %v7975_v5, %v7974_v61  ;;  %v8081_v40 = vpop.f32.mrb[125].mxu0  ;;  %v7977_v9 = vpop.f32.mrb[98].mxu1 }
 0x30c   : > { %v8082_v60 = vadd.f32 %v8081_v40, %v8080_v18  ;;  %v8083_v53 = vpop.f32.mrb[126].mxu0  ;;  %v7978_v42 = vpop.f32.mrb[99].mxu1 }
 0x30d   : > { %v2567_v20 = vadd.f32 %v7976_v38, %v11141_v55  ;;  %v7979_v19 = vadd.f32 %v7978_v42, %v7977_v9  ;;  %v8084_v33 = vpop.f32.mrb[127].mxu0 }
 0x30e   : > { %v8085_v1 = vadd.f32 %v8084_v33, %v8083_v53  ;;  %v11244_v24 = vadd.f32 %v8082_v60, %v2559_v58  ;;  %v9483_v60 = vld [vmem:[#allocation8 + $0x2a8] sm:$0xff]   ;;  %v9486_v33 = vld [vmem:[#allocation8 + $0x2c0] sm:$0xff]  }
 0x30f   : > { %v2570_v4 = vadd.f32 %v7979_v19, %v11145_v47  ;;  %v9484_v53 = vld [vmem:[#allocation8 + $0x268] sm:$0xff]   ;;  %v9485_v47 = vld [vmem:[#allocation8 + $0x300] sm:$0xff]   ;;  %8192 = vmatprep.subr.bf16.mxu1 %v9483_v60  ;;  %v9490_v60 = vld [vmem:[#allocation8 + $0x270] sm:$0xff]  }
 0x310   : > { %v11247_v17 = vadd.f32 %v8085_v1, %v2562_v48  ;;  %8294 = vmatprep.subr.bf16.mxu0 %v9485_v47  ;;  %8193 = vmatpush3.bf16.msra.mxu1 %v9484_v53  ;;  %v9491_v53 = vld [vmem:[#allocation8 + $0x310] sm:$0xff]  }
 0x311   : > { %v7980_v39 = vpop.f32.mrb[100].mxu1  ;;  %8295 = vmatpush3.bf16.msra.mxu0 %v9486_v33  ;;  %v9492_v33 = vld [vmem:[#allocation8 + $0x2d0] sm:$0xff]  }
 0x312   : > { %v8086_v50 = vpop.f32.mrb[128].mxu0  ;;  %v7981_v2 = vpop.f32.mrb[101].mxu1 }
 0x313   : > { %v7982_v11 = vadd.f32 %v7981_v2, %v7980_v39  ;;  %v8087_v61 = vpop.f32.mrb[129].mxu0  ;;  %v7983_v18 = vpop.f32.mrb[102].mxu1 }
 0x314   : > { %v8088_v55 = vadd.f32 %v8087_v61, %v8086_v50  ;;  %v8089_v5 = vpop.f32.mrb[130].mxu0  ;;  %v7984_v38 = vpop.f32.mrb[103].mxu1 }
 0x315   : > { %v2575_v40 = vadd.f32 %v7982_v11, %v11152_v7  ;;  %v7985_v9 = vadd.f32 %v7984_v38, %v7983_v18  ;;  %v8090_v58 = vpop.f32.mrb[131].mxu0  ;;  %v9487_v11 = vld [vmem:[#allocation8 + $0x308] sm:$0xff]  }
 0x316   : > { %v8091_v42 = vadd.f32 %v8090_v58, %v8089_v5  ;;  %v11250_v19 = vadd.f32 %v8088_v55, %v2567_v20  ;;  %v9488_v55 = vld [vmem:[#allocation8 + $0x2c8] sm:$0xff]   ;;  %8296 = vmatprep.subr.bf16.mxu0 %v9487_v11  ;;  %v9489_v58 = vld [vmem:[#allocation8 + $0x2b0] sm:$0xff]  }
 0x317   : > { %v2578_v48 = vadd.f32 %v7985_v9, %v11154_v62  ;;  %8297 = vmatpush3.bf16.msra.mxu0 %v9488_v55  ;;  %8194 = vmatprep.subr.bf16.mxu1 %v9489_v58  ;;  %v9497_v58 = vld [vmem:[#allocation8 + $0x320] sm:$0xff]  }
 0x318   : > { %v11253_v36 = vadd.f32 %v8091_v42, %v2570_v4  ;;  %8298 = vmatprep.subr.bf16.mxu0 %v9491_v53  ;;  %8195 = vmatpush3.bf16.msra.mxu1 %v9490_v60 }
 0x319   : > { %v7986_v44 = vpop.f32.mrb[104].mxu1 }
 0x31a   : > { %v8092_v1 = vpop.f32.mrb[132].mxu0  ;;  %v7987_v39 = vpop.f32.mrb[105].mxu1 }
 0x31b   : > { %v7988_v7 = vadd.f32 %v7987_v39, %v7986_v44  ;;  %v8093_v50 = vpop.f32.mrb[133].mxu0  ;;  %v7989_v2 = vpop.f32.mrb[106].mxu1  ;;  %8299 = vmatpush3.bf16.msra.mxu0 %v9492_v33  ;;  %v9498_v33 = vld [vmem:[#allocation8 + $0x2e0] sm:$0xff]  }
 0x31c   : > { %v8094_v61 = vadd.f32 %v8093_v50, %v8092_v1  ;;  %v8095_v18 = vpop.f32.mrb[134].mxu0  ;;  %v7990_v20 = vpop.f32.mrb[107].mxu1  ;;  %v9493_v50 = vld [vmem:[#allocation8 + $0x318] sm:$0xff]  }
 0x31d   : > { %v2583_v62 = vadd.f32 %v7988_v7, %v11163_v31  ;;  %v7991_v5 = vadd.f32 %v7990_v20, %v7989_v2  ;;  %v8096_v38 = vpop.f32.mrb[135].mxu0  ;;  %8300 = vmatprep.subr.bf16.mxu0 %v9493_v50 }
 0x31e   : > { %v8097_v9 = vadd.f32 %v8096_v38, %v8095_v18  ;;  %v11256_v4 = vadd.f32 %v8094_v61, %v2575_v40  ;;  %v9494_v18 = vld [vmem:[#allocation8 + $0x2d8] sm:$0xff]  }
 0x31f   : > { %v2586_v47 = vadd.f32 %v7991_v5, %v11165_v29  ;;  %8301 = vmatpush3.bf16.msra.mxu0 %v9494_v18  ;;  %v9495_v38 = vld [vmem:[#allocation8 + $0x2b8] sm:$0xff]  }
 0x320   : > { %v11259_v42 = vadd.f32 %v8097_v9, %v2578_v48  ;;  %v9496_v9 = vld [vmem:[#allocation8 + $0x278] sm:$0xff]   ;;  %8196 = vmatprep.subr.bf16.mxu1 %v9495_v38  ;;  %8302 = vmatprep.subr.bf16.mxu0 %v9497_v58 }
 0x321   : > { %v7992_v44 = vpop.f32.mrb[108].mxu1  ;;  %8197 = vmatpush3.bf16.msra.mxu1 %v9496_v9 }
 0x322   : > { %v8098_v31 = vpop.f32.mrb[136].mxu0  ;;  %v7993_v1 = vpop.f32.mrb[109].mxu1 }
 0x323   : > { %v7994_v39 = vadd.f32 %v7993_v1, %v7992_v44  ;;  %v8099_v7 = vpop.f32.mrb[137].mxu0  ;;  %v7995_v40 = vpop.f32.mrb[110].mxu1  ;;  %8303 = vmatpush3.bf16.msra.mxu0 %v9498_v33 }
 0x324   : > { %v8100_v2 = vadd.f32 %v8099_v7, %v8098_v31  ;;  %v8101_v11 = vpop.f32.mrb[138].mxu0  ;;  %v7996_v61 = vpop.f32.mrb[111].mxu1  ;;  %v3256_v31 = vld [vmem:[#allocation2 + $0x9] sm:$0xff]  ;;  %v3207_v7 = vld [vmem:[#allocation2] sm:$0xff] }
 0x325   : > { %v2591_v29 = vadd.f32 %v7994_v39, %v11170_v3  ;;  %v7997_v48 = vadd.f32 %v7996_v61, %v7995_v40  ;;  %v8102_v20 = vpop.f32.mrb[139].mxu0  ;;  %v3255_v3 = vld [vmem:[#allocation2 + $0x1] sm:$0xff] }
 0x326   : > { %v8103_v55 = vadd.f32 %v8102_v20, %v8101_v11  ;;  %v11262_v5 = vadd.f32 %v8100_v2, %v2583_v62  ;;  %v3287_v62 = vpack.c.bf16 %v3256_v31, %v3255_v3  ;;  %v9499_v11 = vld [vmem:[#allocation8 + $0x328] sm:$0xff]   ;;  %v9502_v3 = vld [vmem:[#allocation8 + $0x330] sm:$0xff]  }
 0x327   : > { %v2594_v60 = vadd.f32 %v7997_v48, %v11172_v57  ;;  %v3239_v57 = vpack.c.bf16 %v11159_v15, %v3207_v7  ;;  %v9500_v48 = vld [vmem:[#allocation8 + $0x2e8] sm:$0xff]   ;;  %8304 = vmatprep.subr.bf16.mxu0 %v9499_v11  ;;  %v9503_v15 = vld [vmem:[#allocation8 + $0x340] sm:$0xff]  }
 0x328   : > { %v11265_v53 = vadd.f32 %v8103_v55, %v2586_v47  ;;  %4256 = vmatprep.mubr.bf16.mxu1 %v3287_v62  ;;  %8305 = vmatpush3.bf16.msra.mxu0 %v9500_v48 }
 0x329   : > { %v7998_v44 = vpop.f32.mrb[112].mxu1  ;;  %4257 = vmatmul.mubr.bf16.vlgmr.msra.gmra.mrb[176].mxu1 %v3239_v57  ;;  %8306 = vmatprep.subr.bf16.mxu0 %v9502_v3  ;;  %v9506_v57 = vld [vmem:[#allocation8 + $0x2f8] sm:$0xff]  }
 0x32a   : > { %v8104_v1 = vpop.f32.mrb[140].mxu0  ;;  %v7999_v39 = vpop.f32.mrb[113].mxu1 }
 0x32b   : > { %v8000_v40 = vadd.f32 %v7999_v39, %v7998_v44  ;;  %v8105_v50 = vpop.f32.mrb[141].mxu0  ;;  %v8001_v2 = vpop.f32.mrb[114].mxu1  ;;  %v9501_v44 = vld [vmem:[#allocation8 + $0x380] sm:$0xff]  }
 0x32c   : > { %v8106_v47 = vadd.f32 %v8105_v50, %v8104_v1  ;;  %v8107_v61 = vpop.f32.mrb[142].mxu0  ;;  %v8002_v18 = vpop.f32.mrb[115].mxu1  ;;  %v9504_v1 = vld [vmem:[#allocation8 + $0x2f0] sm:$0xff]   ;;  %8406 = vmatprep.subr.bf16.mxu1 %v9501_v44  ;;  %v9505_v50 = vld [vmem:[#allocation8 + $0x338] sm:$0xff]  }
 0x32d   : > { %v2599_v20 = vadd.f32 %v8000_v40, %v11176_v56  ;;  %v8003_v55 = vadd.f32 %v8002_v18, %v8001_v2  ;;  %v8108_v38 = vpop.f32.mrb[143].mxu0  ;;  %8407 = vmatpush3.bf16.msra.mxu1 %v9503_v15  ;;  %8307 = vmatpush3.bf16.msra.mxu0 %v9504_v1 }
 0x32e   : > { %v8109_v9 = vadd.f32 %v8108_v38, %v8107_v61  ;;  %v11269_v58 = vadd.f32 %v8106_v47, %v2591_v29  ;;  %8308 = vmatprep.subr.bf16.mxu0 %v9505_v50 }
 0x32f   : > { %v2602_v33 = vadd.f32 %v8003_v55, %v11178_v6 }
 0x330   : > { %v11272_v31 = vadd.f32 %v8109_v9, %v2594_v60 }
 0x331   : > { %v8004_v39 = vpop.f32.mrb[116].mxu1  ;;  %8309 = vmatpush3.bf16.msra.mxu0 %v9506_v57 }
 0x332   : > { %v8110_v56 = vpop.f32.mrb[144].mxu0  ;;  %v8005_v62 = vpop.f32.mrb[117].mxu1 }
 0x333   : > { %v8006_v7 = vadd.f32 %v8005_v62, %v8004_v39  ;;  %v8111_v40 = vpop.f32.mrb[145].mxu0  ;;  %v8007_v29 = vpop.f32.mrb[118].mxu1 }
 0x334   : > { %v8112_v2 = vadd.f32 %v8111_v40, %v8110_v56  ;;  %v8113_v11 = vpop.f32.mrb[146].mxu0  ;;  %v8008_v6 = vpop.f32.mrb[119].mxu1 }
 0x335   : > { %v2607_v47 = vadd.f32 %v8006_v7, %v11182_v26  ;;  %v8009_v60 = vadd.f32 %v8008_v6, %v8007_v29  ;;  %v8114_v61 = vpop.f32.mrb[147].mxu0 }
 0x336   : > { %v8115_v18 = vadd.f32 %v8114_v61, %v8113_v11  ;;  %v11275_v48 = vadd.f32 %v8112_v2, %v2599_v20  ;;  %v9507_v2 = vld [vmem:[#allocation8 + $0x388] sm:$0xff]  }
 0x337   : > { %v2610_v55 = vadd.f32 %v8009_v60, %v11184_v12  ;;  %v9508_v11 = vld [vmem:[#allocation8 + $0x348] sm:$0xff]   ;;  %8408 = vmatprep.subr.bf16.mxu1 %v9507_v2 }
 0x338   : > { %v11278_v38 = vadd.f32 %v8115_v18, %v2602_v33  ;;  %8409 = vmatpush3.bf16.msra.mxu1 %v9508_v11 }
 0x339   : > { %v8010_v9 = vpop.f32.mrb[120].mxu1 }
 0x33a   : > { %v8116_v44 = vpop.f32.mrb[148].mxu0  ;;  %v8011_v3 = vpop.f32.mrb[121].mxu1 }
 0x33b   : > { %v8012_v15 = vadd.f32 %v8011_v3, %v8010_v9  ;;  %v8117_v1 = vpop.f32.mrb[149].mxu0  ;;  %v8013_v39 = vpop.f32.mrb[122].mxu1 }
 0x33c   : > { %v8118_v56 = vadd.f32 %v8117_v1, %v8116_v44  ;;  %v8119_v62 = vpop.f32.mrb[150].mxu0  ;;  %v8014_v26 = vpop.f32.mrb[123].mxu1 }
 0x33d   : > { %v2615_v7 = vadd.f32 %v8012_v15, %v11188_v37  ;;  %v8015_v40 = vadd.f32 %v8014_v26, %v8013_v39  ;;  %v8120_v29 = vpop.f32.mrb[151].mxu0  ;;  %v9510_v26 = vld [vmem:[#allocation8 + $0x350] sm:$0xff]  }
 0x33e   : > { %v8121_v20 = vadd.f32 %v8120_v29, %v8119_v62  ;;  %v11281_v50 = vadd.f32 %v8118_v56, %v2607_v47  ;;  %v9509_v62 = vld [vmem:[#allocation8 + $0x390] sm:$0xff]  }
 0x33f   : > { %v2618_v12 = vadd.f32 %v8015_v40, %v11190_v16  ;;  %v9511_v40 = vld [vmem:[#allocation8 + $0x398] sm:$0xff]   ;;  %8410 = vmatprep.subr.bf16.mxu1 %v9509_v62 }
 0x340   : > { %v11284_v33 = vadd.f32 %v8121_v20, %v2610_v55  ;;  %8411 = vmatpush3.bf16.msra.mxu1 %v9510_v26 }
 0x341   : > { %v8016_v6 = vpop.f32.mrb[124].mxu1  ;;  %8412 = vmatprep.subr.bf16.mxu1 %v9511_v40 }
 0x342   : > { %v8122_v57 = vpop.f32.mrb[152].mxu0  ;;  %v8017_v60 = vpop.f32.mrb[125].mxu1 }
 0x343   : > { %v8018_v61 = vadd.f32 %v8017_v60, %v8016_v6  ;;  %v8123_v18 = vpop.f32.mrb[153].mxu0  ;;  %v8019_v9 = vpop.f32.mrb[126].mxu1 }
 0x344   : > { %v8124_v37 = vadd.f32 %v8123_v18, %v8122_v57  ;;  %v8125_v44 = vpop.f32.mrb[154].mxu0  ;;  %v8020_v3 = vpop.f32.mrb[127].mxu1  ;;  %v9513_v18 = vld [vmem:[#allocation8 + $0x3a0] sm:$0xff]  }
 0x345   : > { %v2623_v47 = vadd.f32 %v8018_v61, %v11195_v46  ;;  %v8021_v15 = vadd.f32 %v8020_v3, %v8019_v9  ;;  %v8126_v1 = vpop.f32.mrb[155].mxu0  ;;  %v9512_v46 = vld [vmem:[#allocation8 + $0x358] sm:$0xff]  }
 0x346   : > { %v8127_v16 = vadd.f32 %v8126_v1, %v8125_v44  ;;  %v11287_v55 = vadd.f32 %v8124_v37, %v2615_v7  ;;  %8413 = vmatpush3.bf16.msra.mxu1 %v9512_v46 }
 0x347   : > { %v2626_v39 = vadd.f32 %v8021_v15, %v11197_v49  ;;  %8414 = vmatprep.subr.bf16.mxu1 %v9513_v18 }
 0x348   : > { %v11290_v56 = vadd.f32 %v8127_v16, %v2618_v12 }
 0x349   : > { %v8022_v29 = vpop.f32.mrb[128].mxu1 }
 0x34a   : > { %v8128_v20 = vpop.f32.mrb[156].mxu0  ;;  %v8023_v2 = vpop.f32.mrb[129].mxu1 }
 0x34b   : > { %v8024_v11 = vadd.f32 %v8023_v2, %v8022_v29  ;;  %v8129_v6 = vpop.f32.mrb[157].mxu0  ;;  %v8025_v57 = vpop.f32.mrb[130].mxu1 }
 0x34c   : > { %v8130_v60 = vadd.f32 %v8129_v6, %v8128_v20  ;;  %v8131_v61 = vpop.f32.mrb[158].mxu0  ;;  %v8026_v7 = vpop.f32.mrb[131].mxu1  ;;  %v9514_v20 = vld [vmem:[#allocation8 + $0x360] sm:$0xff]  }
 0x34d   : > { %v2631_v49 = vadd.f32 %v8024_v11, %v11201_v10  ;;  %v8027_v12 = vadd.f32 %v8026_v7, %v8025_v57  ;;  %v8132_v9 = vpop.f32.mrb[159].mxu0  ;;  %8415 = vmatpush3.bf16.msra.mxu1 %v9514_v20 }
 0x34e   : > { %v8133_v37 = vadd.f32 %v8132_v9, %v8131_v61  ;;  %v11293_v44 = vadd.f32 %v8130_v60, %v2623_v47 }
 0x34f   : > { %v2634_v3 = vadd.f32 %v8027_v12, %v11203_v45 }
 0x350   : > { %v11296_v15 = vadd.f32 %v8133_v37, %v2626_v39 }
 0x351   : > { %v8028_v1 = vpop.f32.mrb[132].mxu1 }
 0x352   : > { %v8134_v16 = vpop.f32.mrb[160].mxu0  ;;  %v8029_v62 = vpop.f32.mrb[133].mxu1 }
 0x353   : > { %v8030_v26 = vadd.f32 %v8029_v62, %v8028_v1  ;;  %v8135_v29 = vpop.f32.mrb[161].mxu0  ;;  %v8031_v40 = vpop.f32.mrb[134].mxu1 }
 0x354   : > { %v8136_v2 = vadd.f32 %v8135_v29, %v8134_v16  ;;  %v8137_v10 = vpop.f32.mrb[162].mxu0  ;;  %v8032_v11 = vpop.f32.mrb[135].mxu1 }
 0x355   : > { %v2639_v6 = vadd.f32 %v8030_v26, %v11207_v0  ;;  %v8033_v47 = vadd.f32 %v8032_v11, %v8031_v40  ;;  %v8138_v57 = vpop.f32.mrb[163].mxu0  ;;  %v9515_v0 = vld [vmem:[#allocation8 + $0x3a8] sm:$0xff]  }
 0x356   : > { %v8139_v45 = vadd.f32 %v8138_v57, %v8137_v10  ;;  %v11299_v46 = vadd.f32 %v8136_v2, %v2631_v49  ;;  %8416 = vmatprep.subr.bf16.mxu1 %v9515_v0 }
 0x357   : > { %v2642_v39 = vadd.f32 %v8033_v47, %v11209_v34 }
 0x358   : > { %v11302_v60 = vadd.f32 %v8139_v45, %v2634_v3 }
 0x359   : > { %v8034_v61 = vpop.f32.mrb[136].mxu1 }
 0x35a   : > { %v8140_v7 = vpop.f32.mrb[164].mxu0  ;;  %v8035_v18 = vpop.f32.mrb[137].mxu1 }
 0x35b   : > { %v8036_v12 = vadd.f32 %v8035_v18, %v8034_v61  ;;  %v8141_v9 = vpop.f32.mrb[165].mxu0  ;;  %v8037_v37 = vpop.f32.mrb[138].mxu1  ;;  %v9516_v61 = vld [vmem:[#allocation8 + $0x368] sm:$0xff]  }
 0x35c   : > { %v8142_v1 = vadd.f32 %v8141_v9, %v8140_v7  ;;  %v8143_v16 = vpop.f32.mrb[166].mxu0  ;;  %v8038_v62 = vpop.f32.mrb[139].mxu1  ;;  %8417 = vmatpush3.bf16.msra.mxu1 %v9516_v61 }
 0x35d   : > { %v2647_v26 = vadd.f32 %v8036_v12, %v11213_v13  ;;  %v8039_v29 = vadd.f32 %v8038_v62, %v8037_v37  ;;  %v8144_v40 = vpop.f32.mrb[167].mxu0 }
 0x35e   : > { %v8145_v49 = vadd.f32 %v8144_v40, %v8143_v16  ;;  %v11305_v20 = vadd.f32 %v8142_v1, %v2639_v6 }
 0x35f   : > { %v2650_v34 = vadd.f32 %v8039_v29, %v11215_v30 }
 0x360   : > { %v11308_v3 = vadd.f32 %v8145_v49, %v2642_v39 }
 0x361   : > { %v8040_v2 = vpop.f32.mrb[140].mxu1 }
 0x362   : > { %v8146_v10 = vpop.f32.mrb[168].mxu0  ;;  %v8041_v11 = vpop.f32.mrb[141].mxu1 }
 0x363   : > { %v8042_v47 = vadd.f32 %v8041_v11, %v8040_v2  ;;  %v8147_v57 = vpop.f32.mrb[169].mxu0  ;;  %v8043_v45 = vpop.f32.mrb[142].mxu1 }
 0x364   : > { %v8148_v7 = vadd.f32 %v8147_v57, %v8146_v10  ;;  %v8149_v18 = vpop.f32.mrb[170].mxu0  ;;  %v8044_v13 = vpop.f32.mrb[143].mxu1 }
 0x365   : > { %v2655_v12 = vadd.f32 %v8042_v47, %v11220_v8  ;;  %v8045_v9 = vadd.f32 %v8044_v13, %v8043_v45  ;;  %v8150_v6 = vpop.f32.mrb[171].mxu0 }
 0x366   : > { %v8151_v37 = vadd.f32 %v8150_v6, %v8149_v18  ;;  %v11311_v1 = vadd.f32 %v8148_v7, %v2647_v26 }
 0x367   : > { %v2658_v30 = vadd.f32 %v8045_v9, %v11223_v54 }
 0x368   : > { %v11314_v39 = vadd.f32 %v8151_v37, %v2650_v34  ;;  %v9517_v34 = vld [vmem:[#allocation8 + $0x3b0] sm:$0xff]  }
 0x369   : > { %v9144_v16 = vpop.f32.mrb[144].mxu1  ;;  %8418 = vmatprep.subr.bf16.mxu1 %v9517_v34 }
 0x36a   : > { %v8152_v62 = vpop.f32.mrb[172].mxu0  ;;  %v11317_v0 = vadd.f32 %v9144_v16, %v11232_v23  ;;  %v2856_v29 = vpop.f32.mrb[145].mxu1 }
 0x36b   : > { %v8153_v40 = vpop.f32.mrb[173].mxu0  ;;  %v11320_v49 = vadd.f32 %v2856_v29, %v11226_v32  ;;  %v9145_v8 = vpop.f32.mrb[146].mxu1  ;;  %v9518_v29 = vld [vmem:[#allocation8 + $0x370] sm:$0xff]  }
 0x36c   : > { %v2985_v2 = vsub.f32 0.0, %v11317_v0  ;;  %v8154_v10 = vadd.f32 %v8153_v40, %v8152_v62  ;;  %v8155_v26 = vpop.f32.mrb[174].mxu0  ;;  %v11324_v11 = vadd.f32 %v9145_v8, %v11235_v41  ;;  %v2859_v54 = vpop.f32.mrb[147].mxu1  ;;  %8419 = vmatpush3.bf16.msra.mxu1 %v9518_v29 }
 0x36d   : > { %v2983_v47 = vsub.f32 0.0, %v11320_v49  ;;  %v8156_v57 = vpop.f32.mrb[175].mxu0  ;;  %v11328_v23 = vadd.f32 %v2859_v54, %v11229_v51 }
 0x36e   : > { %v3019_v45 = vmul.f32 1.442695, %v2985_v2  ;;  %v2986_v32 = vsub.f32 0.0, %v11324_v11  ;;  %v8157_v61 = vadd.f32 %v8156_v57, %v8155_v26  ;;  %v11331_v7 = vadd.f32 %v8154_v10, %v2655_v12 }
 0x36f   : > { %v3015_v18 = vmul.f32 1.442695, %v2983_v47  ;;  %v2984_v13 = vsub.f32 0.0, %v11328_v23 }
 0x370   : > { %9745 = vpow2.f32 %v3019_v45  ;;  %v3021_v41 = vmul.f32 1.442695, %v2986_v32  ;;  %v11334_v9 = vadd.f32 %v8157_v61, %v2658_v30 }
 0x371   : > { %9747 = vpow2.f32 %v3015_v18  ;;  %v3017_v6 = vmul.f32 1.442695, %v2984_v13  ;;  %v9148_v37 = vpop.f32.mrb[148].mxu1 }
 0x372   : > { %9749 = vpow2.f32 %v3021_v41  ;;  %v11337_v51 = vadd.f32 %v9148_v37, %v11244_v24  ;;  %v2872_v16 = vpop.f32.mrb[149].mxu1  ;;  %v9519_v41 = vld [vmem:[#allocation8 + $0x400] sm:$0xff]  }
 0x373   : > { %9751 = vpow2.f32 %v3017_v6  ;;  %v11340_v12 = vadd.f32 %v2872_v16, %v11238_v25  ;;  %v9149_v62 = vpop.f32.mrb[150].mxu1  ;;  %8518 = vmatprep.subr.bf16.mxu0 %v9519_v41 }
 0x374   : > { %v2989_v40 = vsub.f32 0.0, %v11337_v51  ;;  %v11344_v8 = vadd.f32 %v9149_v62, %v11247_v17  ;;  %v2875_v30 = vpop.f32.mrb[151].mxu1 }
 0x375   : > { %v2987_v2 = vsub.f32 0.0, %v11340_v12  ;;  %v11348_v10 = vadd.f32 %v2875_v30, %v11241_v59 }
 0x376   : > { %v3027_v24 = vmul.f32 1.442695, %v2989_v40  ;;  %v2990_v26 = vsub.f32 0.0, %v11344_v8 }
 0x377   : > { %v3023_v54 = vmul.f32 1.442695, %v2987_v2  ;;  %v2988_v25 = vsub.f32 0.0, %v11348_v10 }
 0x378   : > { %9753 = vpow2.f32 %v3027_v24  ;;  %v3029_v34 = vmul.f32 1.442695, %v2990_v26 }
 0x379   : > { %9755 = vpow2.f32 %v3023_v54  ;;  %v3025_v47 = vmul.f32 1.442695, %v2988_v25  ;;  %v9152_v57 = vpop.f32.mrb[152].mxu1 }
 0x37a   : > { %v9746_v17 = vpop.eup %9745  ;;  %9757 = vpow2.f32 %v3029_v34  ;;  %v11353_v45 = vadd.f32 %v9152_v57, %v11256_v4  ;;  %v2888_v32 = vpop.f32.mrb[153].mxu1 }
 0x37b   : > { %v9748_v59 = vpop.eup %9747  ;;  %v3081_v61 = vadd.f32 1.0, %v9746_v17  ;;  %9759 = vpow2.f32 %v3025_v47  ;;  %v11356_v18 = vadd.f32 %v2888_v32, %v11250_v19  ;;  %v9153_v13 = vpop.f32.mrb[154].mxu1  ;;  %v9523_v19 = vld [vmem:[#allocation8 + $0x3b8] sm:$0xff]  }
 0x37c   : > { %v9750_v6 = vpop.eup %9749  ;;  %v3079_v37 = vadd.f32 1.0, %v9748_v59  ;;  %v2993_v16 = vsub.f32 0.0, %v11353_v45  ;;  %v11360_v62 = vadd.f32 %v9153_v13, %v11259_v42  ;;  %v2891_v29 = vpop.f32.mrb[155].mxu1  ;;  %8420 = vmatprep.subr.bf16.mxu1 %v9523_v19 }
 0x37d   : > { %v9752_v40 = vpop.eup %9751  ;;  %9761 = vrcp.f32 %v3081_v61  ;;  %v3082_v4 = vadd.f32 1.0, %v9750_v6  ;;  %v2991_v30 = vsub.f32 0.0, %v11356_v18  ;;  %v11364_v2 = vadd.f32 %v2891_v29, %v11253_v36  ;;  %v9524_v6 = vld [vmem:[#allocation8 + $0x378] sm:$0xff]  }
 0x37e   : > { %9763 = vrcp.f32 %v3079_v37  ;;  %v3080_v24 = vadd.f32 1.0, %v9752_v40  ;;  %v3035_v26 = vmul.f32 1.442695, %v2993_v16  ;;  %v2994_v54 = vsub.f32 0.0, %v11360_v62  ;;  %8421 = vmatpush3.bf16.msra.mxu1 %v9524_v6 }
 0x37f   : > { %9765 = vrcp.f32 %v3082_v4  ;;  %v3031_v25 = vmul.f32 1.442695, %v2991_v30  ;;  %v2992_v42 = vsub.f32 0.0, %v11364_v2 }
 0x380   : > { %9767 = vrcp.f32 %v3080_v24  ;;  %v3037_v34 = vmul.f32 1.442695, %v2994_v54 }
 0x381   : > { %9769 = vpow2.f32 %v3035_v26  ;;  %v3033_v47 = vmul.f32 1.442695, %v2992_v42  ;;  %v9156_v57 = vpop.f32.mrb[156].mxu1 }
 0x382   : > { %v9754_v17 = vpop.eup %9753  ;;  %9771 = vpow2.f32 %v3031_v25  ;;  %v11369_v36 = vadd.f32 %v9156_v57, %v11269_v58  ;;  %v2904_v32 = vpop.f32.mrb[157].mxu1 }
 0x383   : > { %v9756_v59 = vpop.eup %9755  ;;  %v3085_v61 = vadd.f32 1.0, %v9754_v17  ;;  %9773 = vpow2.f32 %v3037_v34  ;;  %v11372_v13 = vadd.f32 %v2904_v32, %v11262_v5  ;;  %v9157_v41 = vpop.f32.mrb[158].mxu1 }
 0x384   : > { %v9758_v37 = vpop.eup %9757  ;;  %v3083_v16 = vadd.f32 1.0, %v9756_v59  ;;  %9775 = vpow2.f32 %v3033_v47  ;;  %v2997_v29 = vsub.f32 0.0, %v11369_v36  ;;  %v11376_v40 = vadd.f32 %v9157_v41, %v11272_v31  ;;  %v2907_v4 = vpop.f32.mrb[159].mxu1 }
 0x385   : > { %v9760_v58 = vpop.eup %9759  ;;  %9777 = vrcp.f32 %v3085_v61  ;;  %v3086_v30 = vadd.f32 1.0, %v9758_v37  ;;  %v2995_v19 = vsub.f32 0.0, %v11372_v13  ;;  %v11380_v24 = vadd.f32 %v2907_v4, %v11265_v53 }
 0x386   : > { %9779 = vrcp.f32 %v3083_v16  ;;  %v3084_v5 = vadd.f32 1.0, %v9760_v58  ;;  %v3043_v26 = vmul.f32 1.442695, %v2997_v29  ;;  %v2998_v54 = vsub.f32 0.0, %v11376_v40 }
 0x387   : > { %v9762_v25 = vpop.eup %9761  ;;  %9781 = vrcp.f32 %v3086_v30  ;;  %v3039_v42 = vmul.f32 1.442695, %v2995_v19  ;;  %v2996_v31 = vsub.f32 0.0, %v11380_v24 }
 0x388   : > { %v9764_v34 = vpop.eup %9763  ;;  %v11385_v47 = vmul.f32 %v9762_v25, %v11317_v0  ;;  %9783 = vrcp.f32 %v3084_v5  ;;  %v3045_v57 = vmul.f32 1.442695, %v2998_v54  ;;  %v11408_v54 = vld [vmem:[#allocation8 + $0x440] sm:$0xff]  }
 0x389   : > { %v9766_v17 = vpop.eup %9765  ;;  %v3143_v53 = vmul.f32 %v9764_v34, %v11320_v49  ;;  %9785 = vpow2.f32 %v3043_v26  ;;  %v3041_v32 = vmul.f32 1.442695, %v2996_v31  ;;  %v9160_v59 = vpop.f32.mrb[160].mxu1  ;;  %9174 = vmatprep.subr.bf16.mxu1 %v11408_v54 }
 0x38a   : > { %v9768_v61 = vpop.eup %9767  ;;  %3177 = vst [vmem:[#allocation2 + $0x31] sm:$0xff] %v11385_v47  ;;  %v11390_v41 = vmul.f32 %v9766_v17, %v11324_v11  ;;  %9787 = vpow2.f32 %v3039_v42  ;;  %v11393_v6 = vadd.f32 %v9160_v59, %v11281_v50  ;;  %v2920_v0 = vpop.f32.mrb[161].mxu1 }
 0x38b   : > { %v9770_v37 = vpop.eup %9769  ;;  %3175 = vst [vmem:[#allocation2 + $0x19] sm:$0xff] %v3143_v53  ;;  %v3144_v16 = vmul.f32 %v9768_v61, %v11328_v23  ;;  %9789 = vpow2.f32 %v3045_v57  ;;  %v11397_v49 = vadd.f32 %v2920_v0, %v11275_v48  ;;  %v9161_v29 = vpop.f32.mrb[162].mxu1  ;;  %v11416_v61 = vld [vmem:[#allocation2 + $0x2] sm:$0xff]  ;;  %v11418_v0 = vld [vmem:[#allocation2 + $0xa] sm:$0xff] }
 0x38c   : > { %v9772_v4 = vpop.eup %9771  ;;  %3178 = vst [vmem:[#allocation2 + $0x39] sm:$0xff] %v11390_v41  ;;  %v3089_v58 = vadd.f32 1.0, %v9770_v37  ;;  %9791 = vpow2.f32 %v3041_v32  ;;  %v3001_v11 = vsub.f32 0.0, %v11393_v6  ;;  %v11402_v50 = vadd.f32 %v9161_v29, %v11284_v33  ;;  %v2923_v30 = vpop.f32.mrb[163].mxu1 }
 0x38d   : > { %v9774_v19 = vpop.eup %9773  ;;  %3176 = vst [vmem:[#allocation2 + $0x21] sm:$0xff] %v3144_v16  ;;  %v3087_v5 = vadd.f32 1.0, %v9772_v4  ;;  %v2999_v23 = vsub.f32 0.0, %v11397_v49  ;;  %v11406_v48 = vadd.f32 %v2923_v30, %v11278_v38  ;;  %v3288_v26 = vpack.c.bf16 %v3144_v16, %v3143_v53 }
 0x38e   : > { %v9776_v25 = vpop.eup %9775  ;;  %9793 = vrcp.f32 %v3089_v58  ;;  %v3090_v42 = vadd.f32 1.0, %v9774_v19  ;;  %v3051_v31 = vmul.f32 1.442695, %v3001_v11  ;;  %v3002_v34 = vsub.f32 0.0, %v11402_v50 }
 0x38f   : > { %v9778_v33 = vpop.eup %9777  ;;  %9795 = vrcp.f32 %v3087_v5  ;;  %v3088_v57 = vadd.f32 1.0, %v9776_v25  ;;  %v3047_v17 = vmul.f32 1.442695, %v2999_v23  ;;  %v3000_v32 = vsub.f32 0.0, %v11406_v48  ;;  %4264 = vmatprep.mubr.bf16.mxu1 %v3288_v26 }
 0x390   : > { %v9780_v38 = vpop.eup %9779  ;;  %v11414_v53 = vmul.f32 %v9778_v33, %v11337_v51  ;;  %9797 = vrcp.f32 %v3090_v42  ;;  %v3053_v59 = vmul.f32 1.442695, %v3002_v34  ;;  %v3289_v37 = vpack.c.bf16 %v11390_v41, %v11385_v47 }
 0x391   : > { %v9782_v16 = vpop.eup %9781  ;;  %v11423_v29 = vmul.f32 %v9780_v38, %v11340_v12  ;;  %9799 = vrcp.f32 %v3088_v57  ;;  %v3049_v4 = vmul.f32 1.442695, %v3000_v32  ;;  %v9164_v58 = vpop.f32.mrb[164].mxu1 }
 0x392   : > { %v9784_v11 = vpop.eup %9783  ;;  %3181 = vst [vmem:[#allocation2 + $0x61] sm:$0xff] %v11414_v53  ;;  %v11427_v51 = vmul.f32 %v9782_v16, %v11344_v8  ;;  %9801 = vpow2.f32 %v3051_v31  ;;  %v11430_v30 = vadd.f32 %v9164_v58, %v11293_v44  ;;  %v2936_v19 = vpop.f32.mrb[165].mxu1  ;;  %v3335_v8 = vpack.c.bf16 %v11418_v0, %v11416_v61 }
 0x393   : > { %v9786_v5 = vpop.eup %9785  ;;  %3179 = vst [vmem:[#allocation2 + $0x49] sm:$0xff] %v11423_v29  ;;  %v11434_v12 = vmul.f32 %v9784_v11, %v11348_v10  ;;  %9803 = vpow2.f32 %v3047_v17  ;;  %v11437_v23 = vadd.f32 %v2936_v19, %v11287_v55  ;;  %v9165_v26 = vpop.f32.mrb[166].mxu1  ;;  %v3351_v11 = vld [vmem:[#allocation2 + $0x18] sm:$0xff] }
 0x394   : > { %v9788_v25 = vpop.eup %9787  ;;  %3182 = vst [vmem:[#allocation2 + $0x69] sm:$0xff] %v11427_v51  ;;  %v3093_v44 = vadd.f32 1.0, %v9786_v5  ;;  %9805 = vpow2.f32 %v3053_v59  ;;  %v3005_v42 = vsub.f32 0.0, %v11430_v30  ;;  %v11444_v31 = vadd.f32 %v9165_v26, %v11296_v15  ;;  %v2939_v10 = vpop.f32.mrb[167].mxu1  ;;  %v3352_v17 = vld [vmem:[#allocation2 + $0x20] sm:$0xff]  ;;  %v3354_v15 = vld [vmem:[#allocation2 + $0x38] sm:$0xff] }
 0x395   : > { %v9790_v34 = vpop.eup %9789  ;;  %3180 = vst [vmem:[#allocation2 + $0x51] sm:$0xff] %v11434_v12  ;;  %v3091_v55 = vadd.f32 1.0, %v9788_v25  ;;  %9807 = vpow2.f32 %v3049_v4  ;;  %v3003_v33 = vsub.f32 0.0, %v11437_v23  ;;  %v11449_v57 = vadd.f32 %v2939_v10, %v11290_v56  ;;  %v3353_v56 = vld [vmem:[#allocation2 + $0x30] sm:$0xff] }
 0x396   : > { %v9792_v32 = vpop.eup %9791  ;;  %9809 = vrcp.f32 %v3093_v44  ;;  %v3094_v38 = vadd.f32 1.0, %v9790_v34  ;;  %v3059_v59 = vmul.f32 1.442695, %v3005_v42  ;;  %v3006_v61 = vsub.f32 0.0, %v11444_v31  ;;  %v9520_v26 = vld [vmem:[#allocation8 + $0x3c0] sm:$0xff]  }
 0x397   : > { %9811 = vrcp.f32 %v3091_v55  ;;  %v3092_v0 = vadd.f32 1.0, %v9792_v32  ;;  %v3055_v16 = vmul.f32 1.442695, %v3003_v33  ;;  %v3004_v58 = vsub.f32 0.0, %v11449_v57  ;;  %v9521_v55 = vld [vmem:[#allocation8 + $0x408] sm:$0xff]  }
 0x398   : > { %v9794_v4 = vpop.eup %9793  ;;  %9813 = vrcp.f32 %v3094_v38  ;;  %v3061_v19 = vmul.f32 1.442695, %v3006_v61  ;;  %v3383_v5 = vpack.c.bf16 %v3352_v17, %v3351_v11  ;;  %v11456_v34 = vpack.c.bf16 %v3354_v15, %v3353_v56 }
 0x399   : > { %v9796_v25 = vpop.eup %9795  ;;  %v11454_v44 = vmul.f32 %v9794_v4, %v11353_v45  ;;  %9815 = vrcp.f32 %v3092_v0  ;;  %v3057_v42 = vmul.f32 1.442695, %v3004_v58  ;;  %v9168_v10 = vpop.f32.mrb[168].mxu1  ;;  %v3290_v45 = vpack.c.bf16 %v11434_v12, %v11423_v29  ;;  %v3306_v0 = vld [vmem:[#allocation2 + $0x22] sm:$0xff] }
 0x39a   : > { %v9798_v33 = vpop.eup %9797  ;;  %v11459_v32 = vmul.f32 %v9796_v25, %v11356_v18  ;;  %9817 = vpow2.f32 %v3059_v59  ;;  %4417 = vmatprep.mubr.bf16.mxu0 %v3383_v5  ;;  %4265 = vmatmul.mubr.bf16.gmra.mrb[180].mxu1 %v3383_v5  ;;  %v11462_v17 = vadd.f32 %v9168_v10, %v11305_v20  ;;  %v2952_v38 = vpop.f32.mrb[169].mxu1  ;;  %v3305_v59 = vld [vmem:[#allocation2 + $0x1a] sm:$0xff]  ;;  %v9528_v12 = vld [vmem:[#allocation8 + $0x3d8] sm:$0xff]  }
 0x39b   : > { %v9800_v61 = vpop.eup %9799  ;;  %3185 = vst [vmem:[#allocation2 + $0x91] sm:$0xff] %v11454_v44  ;;  %v11468_v15 = vmul.f32 %v9798_v33, %v11360_v62  ;;  %9819 = vpow2.f32 %v3055_v16  ;;  %4418 = vmatmul.mubr.bf16.vlgmr.msra.gmra.mrb[176].mxu0 %v3335_v8  ;;  %4272 = vmatprep.mubr.bf16.mxu1 %v3289_v37  ;;  %v11474_v18 = vadd.f32 %v2952_v38, %v11299_v46  ;;  %v9169_v20 = vpop.f32.mrb[170].mxu1  ;;  %v9522_v46 = vld [vmem:[#allocation8 + $0x3c8] sm:$0xff]   ;;  %v9525_v4 = vld [vmem:[#allocation8 + $0x410] sm:$0xff]  }
 0x39c   : > { %v9802_v58 = vpop.eup %9801  ;;  %3183 = vst [vmem:[#allocation2 + $0x79] sm:$0xff] %v11459_v32  ;;  %v11478_v11 = vmul.f32 %v9800_v61, %v11364_v2  ;;  %9821 = vpow2.f32 %v3061_v19  ;;  %v3009_v62 = vsub.f32 0.0, %v11462_v17  ;;  %4425 = vmatprep.mubr.bf16.mxu0 %v11456_v34  ;;  %v11483_v47 = vadd.f32 %v9169_v20, %v11308_v3  ;;  %v2955_v41 = vpop.f32.mrb[171].mxu1  ;;  %8519 = vmatpush3.bf16.msra.mxu0 %v9520_v26  ;;  %v3356_v26 = vld [vmem:[#allocation2 + $0x50] sm:$0xff]  ;;  %v3355_v61 = vld [vmem:[#allocation2 + $0x48] sm:$0xff] }
 0x39d   : > { %v9804_v37 = vpop.eup %9803  ;;  %3186 = vst [vmem:[#allocation2 + $0x99] sm:$0xff] %v11468_v15  ;;  %v3097_v8 = vadd.f32 1.0, %v9802_v58  ;;  %9823 = vpow2.f32 %v3057_v42  ;;  %v3007_v16 = vsub.f32 0.0, %v11474_v18  ;;  %v11488_v2 = vadd.f32 %v2955_v41, %v11302_v60  ;;  %8520 = vmatprep.subr.bf16.mxu0 %v9521_v55  ;;  %v9526_v58 = vld [vmem:[#allocation8 + $0x3d0] sm:$0xff]  }
 0x39e   : > { %v9806_v19 = vpop.eup %9805  ;;  %3184 = vst [vmem:[#allocation2 + $0x81] sm:$0xff] %v11478_v11  ;;  %v3095_v3 = vadd.f32 1.0, %v9804_v37  ;;  %v3010_v5 = vsub.f32 0.0, %v11483_v47  ;;  %v11492_v56 = vpack.c.bf16 %v3306_v0, %v3305_v59  ;;  %v3067_v42 = vmul.f32 1.442695, %v3009_v62 }
 0x39f   : > { %v9808_v25 = vpop.eup %9807  ;;  %9825 = vrcp.f32 %v3097_v8  ;;  %v3098_v10 = vadd.f32 1.0, %v9806_v19  ;;  %v3008_v33 = vsub.f32 0.0, %v11488_v2  ;;  %v3063_v55 = vmul.f32 1.442695, %v3007_v16  ;;  %v9527_v8 = vld [vmem:[#allocation8 + $0x418] sm:$0xff]  }
 0x3a0   : > { %v9810_v38 = vpop.eup %9809  ;;  %9827 = vrcp.f32 %v3095_v3  ;;  %v3096_v60 = vadd.f32 1.0, %v9808_v25  ;;  %v3291_v20 = vpack.c.bf16 %v11427_v51, %v11414_v53  ;;  %8521 = vmatpush3.bf16.msra.mxu0 %v9522_v46  ;;  %v3069_v0 = vmul.f32 1.442695, %v3010_v5  ;;  %v9534_v51 = vld [vmem:[#allocation8 + $0x430] sm:$0xff]  }
 0x3a1   : > { %v9812_v41 = vpop.eup %9811  ;;  %v11498_v59 = vmul.f32 %v9810_v38, %v11369_v36  ;;  %9829 = vrcp.f32 %v3098_v10  ;;  %v9172_v37 = vpop.f32.mrb[172].mxu1  ;;  %v11500_v62 = vpack.c.bf16 %v3356_v26, %v3355_v61  ;;  %8522 = vmatprep.subr.bf16.mxu0 %v9525_v4  ;;  %v3065_v3 = vmul.f32 1.442695, %v3008_v33  ;;  %v9529_v38 = vld [vmem:[#allocation8 + $0x420] sm:$0xff]  }
 0x3a2   : > { %v9814_v19 = vpop.eup %9813  ;;  %v11503_v16 = vmul.f32 %v9812_v41, %v11372_v13  ;;  %9831 = vrcp.f32 %v3096_v60  ;;  %4273 = vmatmul.mubr.bf16.gmra.mrb[184].mxu1 %v11456_v34  ;;  %v11507_v46 = vadd.f32 %v9172_v37, %v11331_v7  ;;  %v2968_v36 = vpop.f32.mrb[173].mxu1  ;;  %v3292_v7 = vpack.c.bf16 %v11478_v11, %v11459_v32  ;;  %v3307_v61 = vld [vmem:[#allocation2 + $0x32] sm:$0xff]  ;;  %v3311_v11 = vld [vmem:[#allocation2 + $0x62] sm:$0xff] }
 0x3a3   : > { %v9816_v25 = vpop.eup %9815  ;;  %3189 = vst [vmem:[#allocation2 + $0xc1] sm:$0xff] %v11498_v59  ;;  %v11511_v5 = vmul.f32 %v9814_v19, %v11376_v40  ;;  %9833 = vpow2.f32 %v3067_v42  ;;  %4426 = vmatmul.mubr.bf16.gmra.mrb[180].mxu0 %v11492_v56  ;;  %4280 = vmatprep.mubr.bf16.mxu1 %v3290_v45  ;;  %v11518_v13 = vadd.f32 %v2968_v36, %v11311_v1  ;;  %v9173_v4 = vpop.f32.mrb[174].mxu1  ;;  %v3358_v36 = vld [vmem:[#allocation2 + $0x68] sm:$0xff] }
 0x3a4   : > { %v9818_v26 = vpop.eup %9817  ;;  %3187 = vst [vmem:[#allocation2 + $0xa9] sm:$0xff] %v11503_v16  ;;  %v11524_v40 = vmul.f32 %v9816_v25, %v11380_v24  ;;  %9835 = vpow2.f32 %v3063_v55  ;;  %v3013_v10 = vsub.f32 0.0, %v11507_v46  ;;  %4433 = vmatprep.mubr.bf16.mxu0 %v11500_v62  ;;  %v11529_v29 = vadd.f32 %v9173_v4, %v11334_v9  ;;  %v2971_v1 = vpop.f32.mrb[175].mxu1  ;;  %8523 = vmatpush3.bf16.msra.mxu0 %v9526_v58  ;;  %v3308_v58 = vld [vmem:[#allocation2 + $0x3a] sm:$0xff]  ;;  %v9530_v25 = vld [vmem:[#allocation8 + $0x3e0] sm:$0xff]  }
 0x3a5   : > { %v9820_v45 = vpop.eup %9819  ;;  %3190 = vst [vmem:[#allocation2 + $0xc9] sm:$0xff] %v11511_v5  ;;  %v3101_v42 = vadd.f32 1.0, %v9818_v26  ;;  %9837 = vpow2.f32 %v3069_v0  ;;  %v3011_v33 = vsub.f32 0.0, %v11518_v13  ;;  %v11534_v24 = vadd.f32 %v2971_v1, %v11314_v39  ;;  %8524 = vmatprep.subr.bf16.mxu0 %v9527_v8  ;;  %v3357_v1 = vld [vmem:[#allocation2 + $0x60] sm:$0xff] }
 0x3a6   : > { %v9822_v60 = vpop.eup %9821  ;;  %3188 = vst [vmem:[#allocation2 + $0xb1] sm:$0xff] %v11524_v40  ;;  %v3099_v9 = vadd.f32 1.0, %v9820_v45  ;;  %9839 = vpow2.f32 %v3065_v3  ;;  %v3014_v55 = vsub.f32 0.0, %v11529_v29  ;;  %v3075_v0 = vmul.f32 1.442695, %v3013_v10 }
 0x3a7   : > { %v9824_v41 = vpop.eup %9823  ;;  %9841 = vrcp.f32 %v3101_v42  ;;  %v3102_v37 = vadd.f32 1.0, %v9822_v60  ;;  %v3012_v19 = vsub.f32 0.0, %v11534_v24  ;;  %v3071_v8 = vmul.f32 1.442695, %v3011_v33  ;;  %v9531_v42 = vld [vmem:[#allocation8 + $0x428] sm:$0xff]  }
 0x3a8   : > { %9843 = vrcp.f32 %v3099_v9  ;;  %v3100_v39 = vadd.f32 1.0, %v9824_v41  ;;  %8525 = vmatpush3.bf16.msra.mxu0 %v9528_v12  ;;  %v3077_v26 = vmul.f32 1.442695, %v3014_v55  ;;  %v11539_v3 = vpack.c.bf16 %v3308_v58, %v3307_v61  ;;  %v9532_v58 = vld [vmem:[#allocation8 + $0x3e8] sm:$0xff]  }
 0x3a9   : > { %v9826_v4 = vpop.eup %9825  ;;  %9845 = vrcp.f32 %v3102_v37  ;;  %v3293_v45 = vpack.c.bf16 %v11468_v15, %v11454_v44  ;;  %8526 = vmatprep.subr.bf16.mxu0 %v9529_v38  ;;  %v3073_v9 = vmul.f32 1.442695, %v3012_v19  ;;  %v11547_v12 = vpack.c.bf16 %v3358_v36, %v3357_v1  ;;  %v3309_v37 = vld [vmem:[#allocation2 + $0x4a] sm:$0xff]  ;;  %v3314_v44 = vld [vmem:[#allocation2 + $0x82] sm:$0xff] }
 0x3aa   : > { %v9828_v10 = vpop.eup %9827  ;;  %v11544_v60 = vmul.f32 %v9826_v4, %v11393_v6  ;;  %9847 = vrcp.f32 %v3100_v39  ;;  %4281 = vmatmul.mubr.bf16.gmra.mrb[188].mxu1 %v11500_v62  ;;  %v3294_v6 = vpack.c.bf16 %v11524_v40, %v11503_v16  ;;  %v3360_v39 = vld [vmem:[#allocation2 + $0x80] sm:$0xff] }
 0x3ab   : > { %v9830_v33 = vpop.eup %9829  ;;  %v11550_v55 = vmul.f32 %v9828_v10, %v11397_v49  ;;  %9849 = vpow2.f32 %v3075_v0  ;;  %4434 = vmatmul.mubr.bf16.gmra.mrb[184].mxu0 %v11539_v3  ;;  %4288 = vmatprep.mubr.bf16.mxu1 %v3291_v20  ;;  %v3295_v49 = vpack.c.bf16 %v11511_v5, %v11498_v59  ;;  %v3310_v0 = vld [vmem:[#allocation2 + $0x52] sm:$0xff] }
 0x3ac   : > { %v9832_v38 = vpop.eup %9831  ;;  %3193 = vst [vmem:[#allocation2 + $0xf1] sm:$0xff] %v11544_v60  ;;  %v11560_v61 = vmul.f32 %v9830_v33, %v11402_v50  ;;  %9851 = vpow2.f32 %v3071_v8  ;;  %4441 = vmatprep.mubr.bf16.mxu0 %v11547_v12  ;;  %8527 = vmatpush3.bf16.msra.mxu0 %v9530_v25  ;;  %v11575_v10 = vpack.c.bf16 %v3310_v0, %v3309_v37  ;;  %v9536_v33 = vld [vmem:[#allocation8 + $0x438] sm:$0xff]  }
 0x3ad   : > { %v9834_v41 = vpop.eup %9833  ;;  %3191 = vst [vmem:[#allocation2 + $0xd9] sm:$0xff] %v11550_v55  ;;  %v11567_v53 = vmul.f32 %v9832_v38, %v11406_v48  ;;  %9853 = vpow2.f32 %v3077_v26  ;;  %8528 = vmatprep.subr.bf16.mxu0 %v9531_v42  ;;  %v9535_v26 = vld [vmem:[#allocation8 + $0x3f0] sm:$0xff]   ;;  %v9537_v37 = vld [vmem:[#allocation8 + $0x3f8] sm:$0xff]   ;;  %v3364_v15 = vld [vmem:[#allocation2 + $0xb0] sm:$0xff] }
 0x3ae   : > { %v9836_v20 = vpop.eup %9835  ;;  %3194 = vst [vmem:[#allocation2 + $0xf9] sm:$0xff] %v11560_v61  ;;  %v3105_v50 = vadd.f32 1.0, %v9834_v41  ;;  %9855 = vpow2.f32 %v3073_v9  ;;  %v3297_v48 = vpack.c.bf16 %v11560_v61, %v11544_v60  ;;  %v3359_v9 = vld [vmem:[#allocation2 + $0x78] sm:$0xff]  ;;  %v3366_v16 = vld [vmem:[#allocation2 + $0xc8] sm:$0xff] }
 0x3af   : > { %v9838_v19 = vpop.eup %9837  ;;  %3192 = vst [vmem:[#allocation2 + $0xe1] sm:$0xff] %v11567_v53  ;;  %v3103_v36 = vadd.f32 1.0, %v9836_v20  ;;  %v3296_v8 = vpack.c.bf16 %v11567_v53, %v11550_v55  ;;  %v11581_v20 = vpack.c.bf16 %v3360_v39, %v3359_v9  ;;  %v3361_v9 = vld [vmem:[#allocation2 + $0x90] sm:$0xff]  ;;  %v3319_v59 = vld [vmem:[#allocation2 + $0xc2] sm:$0xff] }
 0x3b0   : > { %v9840_v25 = vpop.eup %9839  ;;  %9857 = vrcp.f32 %v3105_v50  ;;  %v3106_v4 = vadd.f32 1.0, %v9838_v19  ;;  %8529 = vmatpush3.bf16.msra.mxu0 %v9532_v58  ;;  %v3320_v5 = vld [vmem:[#allocation2 + $0xca] sm:$0xff] }
 0x3b1   : > { %v9842_v1 = vpop.eup %9841  ;;  %9859 = vrcp.f32 %v3103_v36  ;;  %v3104_v42 = vadd.f32 1.0, %v9840_v25  ;;  %8530 = vmatprep.subr.bf16.mxu0 %v9534_v51  ;;  %v3362_v25 = vld [vmem:[#allocation2 + $0x98] sm:$0xff] }
 0x3b2   : > { %v9844_v38 = vpop.eup %9843  ;;  %v11578_v41 = vmul.f32 %v9842_v1, %v11430_v30  ;;  %9861 = vrcp.f32 %v3106_v4  ;;  %4289 = vmatmul.mubr.bf16.gmra.mrb[192].mxu1 %v11547_v12 }
 0x3b3   : > { %v9846_v50 = vpop.eup %9845  ;;  %v11584_v58 = vmul.f32 %v9844_v38, %v11437_v23  ;;  %9863 = vrcp.f32 %v3104_v42  ;;  %4442 = vmatmul.mubr.bf16.gmra.mrb[188].mxu0 %v11575_v10  ;;  %4296 = vmatprep.mubr.bf16.mxu1 %v3292_v7  ;;  %v3312_v7 = vld [vmem:[#allocation2 + $0x6a] sm:$0xff]  ;;  %v11608_v38 = vpack.c.bf16 %v3362_v25, %v3361_v9 }
 0x3b4   : > { %v9848_v51 = vpop.eup %9847  ;;  %3197 = vst [vmem:[#allocation2 + $0x121] sm:$0xff] %v11578_v41  ;;  %v11592_v30 = vmul.f32 %v9846_v50, %v11444_v31  ;;  %4449 = vmatprep.mubr.bf16.mxu0 %v11581_v20  ;;  %8531 = vmatpush3.bf16.msra.mxu0 %v9535_v26  ;;  %v11605_v42 = vpack.c.bf16 %v3312_v7, %v3311_v11  ;;  %v3313_v11 = vld [vmem:[#allocation2 + $0x7a] sm:$0xff]  ;;  %v3363_v7 = vld [vmem:[#allocation2 + $0xa8] sm:$0xff] }
 0x3b5   : > { %v9850_v0 = vpop.eup %9849  ;;  %3195 = vst [vmem:[#allocation2 + $0x109] sm:$0xff] %v11584_v58  ;;  %v11597_v23 = vmul.f32 %v9848_v51, %v11449_v57  ;;  %8532 = vmatprep.subr.bf16.mxu0 %v9536_v33  ;;  %v3323_v60 = vld [vmem:[#allocation2 + $0xf2] sm:$0xff]  ;;  %v3324_v61 = vld [vmem:[#allocation2 + $0xfa] sm:$0xff] }
 0x3b6   : > { %v9852_v19 = vpop.eup %9851  ;;  %3198 = vst [vmem:[#allocation2 + $0x129] sm:$0xff] %v11592_v30  ;;  %v3109_v32 = vadd.f32 1.0, %v9850_v0  ;;  %v3299_v31 = vpack.c.bf16 %v11592_v30, %v11578_v41  ;;  %v3321_v55 = vld [vmem:[#allocation2 + $0xda] sm:$0xff]  ;;  %v3322_v53 = vld [vmem:[#allocation2 + $0xe2] sm:$0xff] }
 0x3b7   : > { %v9854_v36 = vpop.eup %9853  ;;  %3196 = vst [vmem:[#allocation2 + $0x111] sm:$0xff] %v11597_v23  ;;  %v3107_v39 = vadd.f32 1.0, %v9852_v19  ;;  %v3298_v4 = vpack.c.bf16 %v11597_v23, %v11584_v58 }
 0x3b8   : > { %v9856_v57 = vpop.eup %9855  ;;  %9865 = vrcp.f32 %v3109_v32  ;;  %v3110_v26 = vadd.f32 1.0, %v9854_v36  ;;  %8533 = vmatpush3.bf16.msra.mxu0 %v9537_v37 }
 0x3b9   : > { %9867 = vrcp.f32 %v3107_v39  ;;  %v3108_v1 = vadd.f32 1.0, %v9856_v57 }
 0x3ba   : > { %v9858_v33 = vpop.eup %9857  ;;  %9869 = vrcp.f32 %v3110_v26  ;;  %4297 = vmatmul.mubr.bf16.gmra.mrb[196].mxu1 %v11581_v20 }
 0x3bb   : > { %v9860_v50 = vpop.eup %9859  ;;  %v11611_v51 = vmul.f32 %v9858_v33, %v11462_v17  ;;  %9871 = vrcp.f32 %v3108_v1  ;;  %4450 = vmatmul.mubr.bf16.gmra.mrb[192].mxu0 %v11605_v42  ;;  %4304 = vmatprep.mubr.bf16.mxu1 %v3293_v45  ;;  %v3315_v33 = vld [vmem:[#allocation2 + $0x92] sm:$0xff] }
 0x3bc   : > { %v9862_v37 = vpop.eup %9861  ;;  %v11618_v0 = vmul.f32 %v9860_v50, %v11474_v18  ;;  %4457 = vmatprep.mubr.bf16.mxu0 %v11608_v38  ;;  %v3316_v50 = vld [vmem:[#allocation2 + $0x9a] sm:$0xff] }
 0x3bd   : > { %v9864_v19 = vpop.eup %9863  ;;  %3201 = vst [vmem:[#allocation2 + $0x151] sm:$0xff] %v11611_v51  ;;  %v11623_v32 = vmul.f32 %v9862_v37, %v11483_v47  ;;  %v11635_v47 = vpack.c.bf16 %v3314_v44, %v3313_v11  ;;  %v11657_v40 = vpack.c.bf16 %v3316_v50, %v3315_v33  ;;  %v3318_v37 = vld [vmem:[#allocation2 + $0xb2] sm:$0xff]  ;;  %v3373_v33 = vld [vmem:[#allocation2 + $0x120] sm:$0xff]  ;;  %v3328_v30 = vld [vmem:[#allocation2 + $0x12a] sm:$0xff] }
 0x3be   : > { %3199 = vst [vmem:[#allocation2 + $0x139] sm:$0xff] %v11618_v0  ;;  %v11627_v17 = vmul.f32 %v9864_v19, %v11488_v2  ;;  %v11638_v2 = vpack.c.bf16 %v3364_v15, %v3363_v7  ;;  %v3368_v19 = vld [vmem:[#allocation2 + $0xe0] sm:$0xff]  ;;  %v3367_v44 = vld [vmem:[#allocation2 + $0xd8] sm:$0xff]  ;;  %v11677_v7 = vpack.c.bf16 %v3320_v5, %v3319_v59  ;;  %v3325_v58 = vld [vmem:[#allocation2 + $0x10a] sm:$0xff] }
 0x3bf   : > { %3202 = vst [vmem:[#allocation2 + $0x159] sm:$0xff] %v11623_v32  ;;  %v3301_v18 = vpack.c.bf16 %v11623_v32, %v11611_v51  ;;  %v11670_v15 = vpack.c.bf16 %v3368_v19, %v3367_v44  ;;  %v3326_v23 = vld [vmem:[#allocation2 + $0x112] sm:$0xff]  ;;  %v3327_v41 = vld [vmem:[#allocation2 + $0x122] sm:$0xff] }
 0x3c0   : > { %3200 = vst [vmem:[#allocation2 + $0x141] sm:$0xff] %v11627_v17  ;;  %v3300_v45 = vpack.c.bf16 %v11627_v17, %v11618_v0 }
 0x3c2   : > { %v9866_v36 = vpop.eup %9865  ;;  %4305 = vmatmul.mubr.bf16.gmra.mrb[200].mxu1 %v11608_v38 }
 0x3c3   : > { %v9868_v39 = vpop.eup %9867  ;;  %v3173_v25 = vmul.f32 %v9866_v36, %v11507_v46  ;;  %4458 = vmatmul.mubr.bf16.gmra.mrb[196].mxu0 %v11635_v47  ;;  %4312 = vmatprep.mubr.bf16.mxu1 %v3294_v6  ;;  %v3365_v6 = vld [vmem:[#allocation2 + $0xc0] sm:$0xff]  ;;  %v3369_v36 = vld [vmem:[#allocation2 + $0xf0] sm:$0xff] }
 0x3c4   : > { %v9870_v57 = vpop.eup %9869  ;;  %v11646_v26 = vmul.f32 %v9868_v39, %v11518_v13  ;;  %4465 = vmatprep.mubr.bf16.mxu0 %v11638_v2  ;;  %v3377_v19 = vld [vmem:[#allocation2 + $0x150] sm:$0xff] }
 0x3c5   : > { %v9872_v1 = vpop.eup %9871  ;;  %3205 = vst [vmem:[#allocation2 + $0x181] sm:$0xff] %v3173_v25  ;;  %v3174_v9 = vmul.f32 %v9870_v57, %v11529_v29  ;;  %v11660_v29 = vpack.c.bf16 %v3366_v16, %v3365_v6  ;;  %v11687_v25 = vpack.c.bf16 %v3322_v53, %v3321_v55  ;;  %v3371_v57 = vld [vmem:[#allocation2 + $0x108] sm:$0xff]  ;;  %v11707_v16 = vpack.c.bf16 %v3326_v23, %v3325_v58  ;;  %v3375_v6 = vld [vmem:[#allocation2 + $0x138] sm:$0xff] }
 0x3c6   : > { %3203 = vst [vmem:[#allocation2 + $0x169] sm:$0xff] %v11646_v26  ;;  %v11652_v46 = vmul.f32 %v9872_v1, %v11534_v24  ;;  %v3317_v24 = vld [vmem:[#allocation2 + $0xaa] sm:$0xff]  ;;  %v3399_v58 = vld [vmem:[#allocation2 + $0x19] sm:$0xff] }
 0x3c7   : > { %3206 = vst [vmem:[#allocation2 + $0x189] sm:$0xff] %v3174_v9  ;;  %v11667_v11 = vpack.c.bf16 %v3318_v37, %v3317_v24  ;;  %v11697_v9 = vpack.c.bf16 %v3324_v61, %v3323_v60  ;;  %v11717_v37 = vpack.c.bf16 %v3328_v30, %v3327_v41  ;;  %v3329_v0 = vld [vmem:[#allocation2 + $0x13a] sm:$0xff]  ;;  %v3330_v17 = vld [vmem:[#allocation2 + $0x142] sm:$0xff]  ;;  %v3543_v41 = vld [vmem:[#allocation2 + $0x31] sm:$0xff] }
 0x3c8   : > { %3204 = vst [vmem:[#allocation2 + $0x171] sm:$0xff] %v11652_v46  ;;  %v3302_v13 = vpack.c.bf16 %v11652_v46, %v11646_v26  ;;  %v11727_v5 = vpack.c.bf16 %v3330_v17, %v3329_v0  ;;  %v3400_v26 = vld [vmem:[#allocation2 + $0x21] sm:$0xff]  ;;  %v3544_v23 = vld [vmem:[#allocation2 + $0x39] sm:$0xff]  ;;  %v3545_v0 = vld [vmem:[#allocation2 + $0x49] sm:$0xff] }
 0x3c9   : > { %v9538_v30 = vld [vmem:[#allocation8 + $0x448] sm:$0xff]   ;;  %v9540_v17 = vld [vmem:[#allocation8 + $0x458] sm:$0xff]  }
 0x3ca   : > { %4313 = vmatmul.mubr.bf16.gmra.mrb[204].mxu1 %v11638_v2 }
 0x3cb   : > { %4466 = vmatmul.mubr.bf16.gmra.mrb[200].mxu0 %v11657_v40  ;;  %4320 = vmatprep.mubr.bf16.mxu1 %v3295_v49  ;;  %v3370_v49 = vld [vmem:[#allocation2 + $0xf8] sm:$0xff] }
 0x3cc   : > { %4473 = vmatprep.mubr.bf16.mxu0 %v11660_v29  ;;  %v11680_v39 = vpack.c.bf16 %v3370_v49, %v3369_v36 }
 0x3cd   : > { %v3379_v49 = vld [vmem:[#allocation2 + $0x168] sm:$0xff] }
 0x3ce   : > { %v3382_v60 = vld [vmem:[#allocation2 + $0x188] sm:$0xff] }
 0x3cf   : > { %v3333_v46 = vld [vmem:[#allocation2 + $0x16a] sm:$0xff] }
 0x3d2   : > { %4321 = vmatmul.mubr.bf16.gmra.mrb[208].mxu1 %v11660_v29 }
 0x3d3   : > { %4474 = vmatmul.mubr.bf16.gmra.mrb[204].mxu0 %v11667_v11  ;;  %4328 = vmatprep.mubr.bf16.mxu1 %v3296_v8  ;;  %v3372_v8 = vld [vmem:[#allocation2 + $0x110] sm:$0xff] }
 0x3d4   : > { %4481 = vmatprep.mubr.bf16.mxu0 %v11670_v15  ;;  %v11690_v1 = vpack.c.bf16 %v3372_v8, %v3371_v57  ;;  %v3332_v57 = vld [vmem:[#allocation2 + $0x15a] sm:$0xff] }
 0x3da   : > { %4329 = vmatmul.mubr.bf16.gmra.mrb[212].mxu1 %v11670_v15 }
 0x3db   : > { %4482 = vmatmul.mubr.bf16.gmra.mrb[208].mxu0 %v11677_v7  ;;  %4336 = vmatprep.mubr.bf16.mxu1 %v3297_v48  ;;  %v3374_v48 = vld [vmem:[#allocation2 + $0x128] sm:$0xff] }
 0x3dc   : > { %4489 = vmatprep.mubr.bf16.mxu0 %v11680_v39  ;;  %v11700_v50 = vpack.c.bf16 %v3374_v48, %v3373_v33  ;;  %v3381_v48 = vld [vmem:[#allocation2 + $0x180] sm:$0xff] }
 0x3dd   : > { %v11744_v33 = vpack.c.bf16 %v3382_v60, %v3381_v48  ;;  %v3554_v60 = vld [vmem:[#allocation2 + $0xb1] sm:$0xff]  ;;  %v3553_v48 = vld [vmem:[#allocation2 + $0xa9] sm:$0xff] }
 0x3e2   : > { %4337 = vmatmul.mubr.bf16.gmra.mrb[216].mxu1 %v11680_v39 }
 0x3e3   : > { %4490 = vmatmul.mubr.bf16.gmra.mrb[212].mxu0 %v11687_v25  ;;  %4344 = vmatprep.mubr.bf16.mxu1 %v3298_v4  ;;  %v3376_v4 = vld [vmem:[#allocation2 + $0x140] sm:$0xff] }
 0x3e4   : > { %4497 = vmatprep.mubr.bf16.mxu0 %v11690_v1  ;;  %v11710_v24 = vpack.c.bf16 %v3376_v4, %v3375_v6  ;;  %v3431_v4 = vpack.c.bf16 %v3400_v26, %v3399_v58  ;;  %v3580_v26 = vpack.c.bf16 %v3554_v60, %v3553_v48 }
 0x3ea   : > { %4345 = vmatmul.mubr.bf16.gmra.mrb[220].mxu1 %v11690_v1 }
 0x3eb   : > { %4498 = vmatmul.mubr.bf16.gmra.mrb[216].mxu0 %v11697_v9  ;;  %4352 = vmatprep.mubr.bf16.mxu1 %v3299_v31  ;;  %v3378_v31 = vld [vmem:[#allocation2 + $0x158] sm:$0xff] }
 0x3ec   : > { %4505 = vmatprep.mubr.bf16.mxu0 %v11700_v50  ;;  %v11720_v44 = vpack.c.bf16 %v3378_v31, %v3377_v19  ;;  %v3575_v31 = vpack.c.bf16 %v3544_v23, %v3543_v41  ;;  %v3546_v19 = vld [vmem:[#allocation2 + $0x51] sm:$0xff] }
 0x3f2   : > { %4353 = vmatmul.mubr.bf16.gmra.mrb[224].mxu1 %v11700_v50 }
 0x3f3   : > { %4506 = vmatmul.mubr.bf16.gmra.mrb[220].mxu0 %v11707_v16  ;;  %4360 = vmatprep.mubr.bf16.mxu1 %v3300_v45  ;;  %v3380_v45 = vld [vmem:[#allocation2 + $0x170] sm:$0xff] }
 0x3f4   : > { %4513 = vmatprep.mubr.bf16.mxu0 %v11710_v24  ;;  %v11730_v55 = vpack.c.bf16 %v3380_v45, %v3379_v49  ;;  %v3576_v45 = vpack.c.bf16 %v3546_v19, %v3545_v0  ;;  %v9542_v49 = vld [vmem:[#allocation8 + $0x468] sm:$0xff]  }
 0x3f5   : > { %v3568_v19 = vld [vmem:[#allocation2 + $0x159] sm:$0xff] }
 0x3fa   : > { %4361 = vmatmul.mubr.bf16.gmra.mrb[228].mxu1 %v11710_v24 }
 0x3fb   : > { %4514 = vmatmul.mubr.bf16.gmra.mrb[224].mxu0 %v11717_v37  ;;  %4368 = vmatprep.mubr.bf16.mxu1 %v3301_v18  ;;  %v3331_v18 = vld [vmem:[#allocation2 + $0x152] sm:$0xff] }
 0x3fc   : > { %4521 = vmatprep.mubr.bf16.mxu0 %v11720_v44  ;;  %v8198_v59 = vpop.f32.mrb[176].mxu1  ;;  %v11741_v61 = vpack.c.bf16 %v3332_v57, %v3331_v18 }
 0x3fd   : > { %v8199_v36 = vpop.f32.mrb[177].mxu1 }
 0x3fe   : > { %v11732_v53 = vadd.f32 %v8199_v36, %v8198_v59  ;;  %v8201_v8 = vpop.f32.mrb[178].mxu1  ;;  %v3548_v59 = vld [vmem:[#allocation2 + $0x69] sm:$0xff] }
 0x3ff   : > { %v8202_v51 = vpop.f32.mrb[179].mxu1 }
 0x400   : > { %v11739_v32 = vadd.f32 %v8202_v51, %v8201_v8  ;;  %v3549_v8 = vld [vmem:[#allocation2 + $0x79] sm:$0xff]  ;;  %v9544_v51 = vld [vmem:[#allocation8 + $0x478] sm:$0xff]  }
 0x402   : > { %4369 = vmatmul.mubr.bf16.gmra.mrb[232].mxu1 %v11720_v44 }
 0x403   : > { %4522 = vmatmul.mubr.bf16.gmra.mrb[228].mxu0 %v11727_v5  ;;  %4376 = vmatprep.mubr.bf16.mxu1 %v3302_v13  ;;  %v3334_v13 = vld [vmem:[#allocation2 + $0x172] sm:$0xff] }
 0x404   : > { %4529 = vmatprep.mubr.bf16.mxu0 %v11730_v55  ;;  %v11749_v6 = vpack.c.bf16 %v3334_v13, %v3333_v46 }
 0x40a   : > { %4377 = vmatmul.mubr.bf16.gmra.mrb[236].mxu1 %v11730_v55 }
 0x40b   : > { %4530 = vmatmul.mubr.bf16.gmra.mrb[232].mxu0 %v11741_v61  ;;  %4578 = vmatprep.mubr.bf16.mxu1 %v11492_v56  ;;  %v9539_v56 = vld [vmem:[#allocation8 + $0x450] sm:$0xff]  }
 0x40c   : > { %4537 = vmatprep.mubr.bf16.mxu0 %v11744_v33 }
 0x412   : > { %4579 = vmatmul.mubr.bf16.vlgmr.msra.gmra.mrb[240].mxu1 %v3431_v4 }
 0x413   : > { %4538 = vmatmul.mubr.bf16.gmra.mrb[236].mxu0 %v11749_v6  ;;  %9175 = vmatpush3.bf16.msra.mxu1 %v11408_v54  ;;  %v9541_v54 = vld [vmem:[#allocation8 + $0x460] sm:$0xff]  }
 0x414   : > { %4586 = vmatprep.mubr.bf16.mxu1 %v11539_v3  ;;  %4739 = vmatprep.mubr.bf16.mxu0 %v3575_v31  ;;  %v3547_v3 = vld [vmem:[#allocation2 + $0x61] sm:$0xff] }
 0x415   : > { %9176 = vmatprep.subr.bf16.mxu1 %v9538_v30  ;;  %v3577_v36 = vpack.c.bf16 %v3548_v59, %v3547_v3  ;;  %v3567_v59 = vld [vmem:[#allocation2 + $0x151] sm:$0xff] }
 0x417   : > { %9177 = vmatpush3.bf16.msra.mxu1 %v9538_v30 }
 0x418   : > { %9178 = vmatprep.subr.bf16.mxu1 %v9539_v56 }
 0x41a   : > { %4587 = vmatmul.mubr.bf16.gmra.mrb[244].mxu1 %v3575_v31 }
 0x41b   : > { %4740 = vmatmul.mubr.bf16.vlgmr.msra.gmra.mrb[240].mxu0 %v11456_v34  ;;  %4594 = vmatprep.mubr.bf16.mxu1 %v11575_v10  ;;  %v9543_v34 = vld [vmem:[#allocation8 + $0x470] sm:$0xff]  }
 0x41c   : > { %4747 = vmatprep.mubr.bf16.mxu0 %v3576_v45  ;;  %9179 = vmatpush3.bf16.msra.mxu1 %v9539_v56  ;;  %v3550_v10 = vld [vmem:[#allocation2 + $0x81] sm:$0xff] }
 0x41d   : > { %9180 = vmatprep.subr.bf16.mxu1 %v9540_v17  ;;  %v3578_v18 = vpack.c.bf16 %v3550_v10, %v3549_v8 }
 0x420   : > { %9181 = vmatpush3.bf16.msra.mxu1 %v9540_v17 }
 0x421   : > { %9182 = vmatprep.subr.bf16.mxu1 %v9541_v54 }
 0x422   : > { %4595 = vmatmul.mubr.bf16.gmra.mrb[248].mxu1 %v3576_v45 }
 0x423   : > { %4748 = vmatmul.mubr.bf16.gmra.mrb[244].mxu0 %v11500_v62  ;;  %4602 = vmatprep.mubr.bf16.mxu1 %v11605_v42  ;;  %v3552_v62 = vld [vmem:[#allocation2 + $0x99] sm:$0xff]  ;;  %v3551_v42 = vld [vmem:[#allocation2 + $0x91] sm:$0xff] }
 0x424   : > { %4755 = vmatprep.mubr.bf16.mxu0 %v3577_v36  ;;  %9183 = vmatpush3.bf16.msra.mxu1 %v9541_v54  ;;  %v3579_v57 = vpack.c.bf16 %v3552_v62, %v3551_v42 }
 0x425   : > { %9184 = vmatprep.subr.bf16.mxu1 %v9542_v49 }
 0x428   : > { %9185 = vmatpush3.bf16.msra.mxu1 %v9542_v49 }
 0x429   : > { %9186 = vmatprep.subr.bf16.mxu1 %v9543_v34 }
 0x42a   : > { %4603 = vmatmul.mubr.bf16.gmra.mrb[252].mxu1 %v3577_v36  ;;  %v3587_v36 = vpack.c.bf16 %v3568_v19, %v3567_v59  ;;  %v3591_v59 = vld [vmem:[#allocation2 + $0x32] sm:$0xff] }
 0x42b   : > { %4756 = vmatmul.mubr.bf16.gmra.mrb[248].mxu0 %v11547_v12  ;;  %4610 = vmatprep.mubr.bf16.mxu1 %v11635_v47  ;;  %v3556_v12 = vld [vmem:[#allocation2 + $0xc9] sm:$0xff]  ;;  %v3555_v47 = vld [vmem:[#allocation2 + $0xc1] sm:$0xff] }
 0x42c   : > { %4763 = vmatprep.mubr.bf16.mxu0 %v3578_v18  ;;  %9187 = vmatpush3.bf16.msra.mxu1 %v9543_v34  ;;  %v3581_v46 = vpack.c.bf16 %v3556_v12, %v3555_v47 }
 0x42d   : > { %9188 = vmatprep.subr.bf16.mxu1 %v9544_v51 }
 0x430   : > { %9189 = vmatpush3.bf16.msra.mxu1 %v9544_v51 }
 0x432   : > { %4611 = vmatmul.mubr.bf16.gmra.mrb[0].mxu1 %v3578_v18 }
 0x433   : > { %4764 = vmatmul.mubr.bf16.gmra.mrb[252].mxu0 %v11581_v20  ;;  %4618 = vmatprep.mubr.bf16.mxu1 %v11657_v40  ;;  %v3558_v20 = vld [vmem:[#allocation2 + $0xe1] sm:$0xff]  ;;  %v3557_v40 = vld [vmem:[#allocation2 + $0xd9] sm:$0xff] }
 0x434   : > { %4771 = vmatprep.mubr.bf16.mxu0 %v3579_v57  ;;  %v3582_v13 = vpack.c.bf16 %v3558_v20, %v3557_v40 }
 0x43a   : > { %4619 = vmatmul.mubr.bf16.gmra.mrb[4].mxu1 %v3579_v57  ;;  %v3570_v57 = vld [vmem:[#allocation2 + $0x171] sm:$0xff] }
 0x43b   : > { %4772 = vmatmul.mubr.bf16.gmra.mrb[0].mxu0 %v11608_v38  ;;  %4626 = vmatprep.mubr.bf16.mxu1 %v11667_v11  ;;  %v3560_v38 = vld [vmem:[#allocation2 + $0xf9] sm:$0xff]  ;;  %v3559_v11 = vld [vmem:[#allocation2 + $0xf1] sm:$0xff] }
 0x43c   : > { %4779 = vmatprep.mubr.bf16.mxu0 %v3580_v26  ;;  %v3583_v58 = vpack.c.bf16 %v3560_v38, %v3559_v11 }
 0x442   : > { %4627 = vmatmul.mubr.bf16.gmra.mrb[8].mxu1 %v3580_v26 }
 0x443   : > { %4780 = vmatmul.mubr.bf16.gmra.mrb[4].mxu0 %v11638_v2  ;;  %4634 = vmatprep.mubr.bf16.mxu1 %v11677_v7  ;;  %v3562_v2 = vld [vmem:[#allocation2 + $0x111] sm:$0xff]  ;;  %v3561_v7 = vld [vmem:[#allocation2 + $0x109] sm:$0xff] }
 0x444   : > { %4787 = vmatprep.mubr.bf16.mxu0 %v3581_v46  ;;  %v3584_v23 = vpack.c.bf16 %v3562_v2, %v3561_v7  ;;  %v3477_v2 = vld [vmem:[#allocation2 + $0x182] sm:$0xff]  ;;  %v3478_v7 = vld [vmem:[#allocation2 + $0x18a] sm:$0xff] }
 0x44a   : > { %4635 = vmatmul.mubr.bf16.gmra.mrb[12].mxu1 %v3581_v46 }
 0x44b   : > { %4788 = vmatmul.mubr.bf16.gmra.mrb[8].mxu0 %v11660_v29  ;;  %4642 = vmatprep.mubr.bf16.mxu1 %v11687_v25  ;;  %v3564_v29 = vld [vmem:[#allocation2 + $0x129] sm:$0xff]  ;;  %v3563_v25 = vld [vmem:[#allocation2 + $0x121] sm:$0xff] }
 0x44c   : > { %4795 = vmatprep.mubr.bf16.mxu0 %v3582_v13  ;;  %v3585_v4 = vpack.c.bf16 %v3564_v29, %v3563_v25 }
 0x452   : > { %4643 = vmatmul.mubr.bf16.gmra.mrb[16].mxu1 %v3582_v13 }
 0x453   : > { %4796 = vmatmul.mubr.bf16.gmra.mrb[12].mxu0 %v11670_v15  ;;  %4650 = vmatprep.mubr.bf16.mxu1 %v11697_v9  ;;  %v3566_v15 = vld [vmem:[#allocation2 + $0x141] sm:$0xff]  ;;  %v3565_v9 = vld [vmem:[#allocation2 + $0x139] sm:$0xff] }
 0x454   : > { %4803 = vmatprep.mubr.bf16.mxu0 %v3583_v58  ;;  %v3586_v41 = vpack.c.bf16 %v3566_v15, %v3565_v9 }
 0x45a   : > { %4651 = vmatmul.mubr.bf16.gmra.mrb[20].mxu1 %v3583_v58 }
 0x45b   : > { %4804 = vmatmul.mubr.bf16.gmra.mrb[16].mxu0 %v11680_v39  ;;  %4658 = vmatprep.mubr.bf16.mxu1 %v11707_v16  ;;  %v11779_v39 = vld [vmem:[%s13245_s4 + $0x1] ss:$0 sm:$0xff] }
 0x45c   : > { %4811 = vmatprep.mubr.bf16.mxu0 %v3584_v23  ;;  %v4259_v0 = vadd.f32 %v11732_v53, %v11779_v39  ;;  %v4262_v3 = vadd.f32 %v11739_v32, %v11779_v39 }
 0x462   : > { %4659 = vmatmul.mubr.bf16.gmra.mrb[24].mxu1 %v3584_v23 }
 0x463   : > { %4812 = vmatmul.mubr.bf16.gmra.mrb[20].mxu0 %v11690_v1  ;;  %4666 = vmatprep.mubr.bf16.mxu1 %v11717_v37 }
 0x464   : > { %4819 = vmatprep.mubr.bf16.mxu0 %v3585_v4 }
 0x46a   : > { %4667 = vmatmul.mubr.bf16.gmra.mrb[28].mxu1 %v3585_v4  ;;  %v3572_v4 = vld [vmem:[#allocation2 + $0x189] sm:$0xff] }
 0x46b   : > { %4820 = vmatmul.mubr.bf16.gmra.mrb[24].mxu0 %v11700_v50  ;;  %4674 = vmatprep.mubr.bf16.mxu1 %v11727_v5 }
 0x46c   : > { %4827 = vmatprep.mubr.bf16.mxu0 %v3586_v41 }
 0x46d   : > { %v8204_v16 = vpop.f32.mrb[180].mxu1 }
 0x46e   : > { %v8310_v30 = vpop.f32.mrb[176].mxu0  ;;  %v8205_v1 = vpop.f32.mrb[181].mxu1 }
 0x46f   : > { %v8206_v31 = vadd.f32 %v8205_v1, %v8204_v16  ;;  %v8311_v37 = vpop.f32.mrb[177].mxu0  ;;  %v8207_v56 = vpop.f32.mrb[182].mxu1  ;;  %v3571_v1 = vld [vmem:[#allocation2 + $0x181] sm:$0xff] }
 0x470   : > { %v8312_v17 = vadd.f32 %v8311_v37, %v8310_v30  ;;  %v8313_v50 = vpop.f32.mrb[178].mxu0  ;;  %v8208_v45 = vpop.f32.mrb[183].mxu1 }
 0x471   : > { %v8209_v5 = vadd.f32 %v8208_v45, %v8207_v56  ;;  %v8314_v54 = vpop.f32.mrb[179].mxu0  ;;  %v4267_v32 = vadd.f32 %v8206_v31, %v11779_v39  ;;  %v3589_v56 = vpack.c.bf16 %v3572_v4, %v3571_v1  ;;  %v3574_v45 = vld [vmem:[#allocation2 + $0x1a1] sm:$0xff] }
 0x472   : > { %v8315_v49 = vadd.f32 %v8314_v54, %v8313_v50  ;;  %4675 = vmatmul.mubr.bf16.gmra.mrb[32].mxu1 %v3586_v41  ;;  %v11785_v34 = vadd.f32 %v8312_v17, %v4259_v0  ;;  %v3573_v50 = vld [vmem:[#allocation2 + $0x199] sm:$0xff] }
 0x473   : > { %4828 = vmatmul.mubr.bf16.gmra.mrb[28].mxu0 %v11710_v24  ;;  %4682 = vmatprep.mubr.bf16.mxu1 %v11741_v61  ;;  %v3569_v24 = vld [vmem:[#allocation2 + $0x169] sm:$0xff]  ;;  %v4270_v61 = vadd.f32 %v8209_v5, %v11779_v39 }
 0x474   : > { %4835 = vmatprep.mubr.bf16.mxu0 %v3587_v36  ;;  %v11789_v53 = vadd.f32 %v8315_v49, %v4262_v3  ;;  %v3588_v20 = vpack.c.bf16 %v3570_v57, %v3569_v24  ;;  %v3592_v3 = vld [vmem:[#allocation2 + $0x3a] sm:$0xff] }
 0x475   : > { %v8210_v10 = vpop.f32.mrb[184].mxu1  ;;  %v3525_v24 = vld [vmem:[#allocation2 + $0x198] sm:$0xff] }
 0x476   : > { %v8316_v8 = vpop.f32.mrb[180].mxu0  ;;  %v8211_v51 = vpop.f32.mrb[185].mxu1 }
 0x477   : > { %v8212_v18 = vadd.f32 %v8211_v51, %v8210_v10  ;;  %v8317_v62 = vpop.f32.mrb[181].mxu0  ;;  %v8213_v42 = vpop.f32.mrb[186].mxu1 }
 0x478   : > { %v8318_v60 = vadd.f32 %v8317_v62, %v8316_v8  ;;  %v8319_v48 = vpop.f32.mrb[182].mxu0  ;;  %v8214_v26 = vpop.f32.mrb[187].mxu1  ;;  %v3590_v62 = vpack.c.bf16 %v3574_v45, %v3573_v50 }
 0x479   : > { %v8215_v12 = vadd.f32 %v8214_v26, %v8213_v42  ;;  %v8320_v47 = vpop.f32.mrb[183].mxu0  ;;  %v4275_v15 = vadd.f32 %v8212_v18, %v11779_v39 }
 0x47a   : > { %v8321_v46 = vadd.f32 %v8320_v47, %v8319_v48  ;;  %4683 = vmatmul.mubr.bf16.gmra.mrb[36].mxu1 %v3587_v36  ;;  %v11793_v40 = vadd.f32 %v8318_v60, %v4267_v32  ;;  %v3623_v32 = vpack.c.bf16 %v3592_v3, %v3591_v59  ;;  %v9546_v47 = vld [vmem:[#allocation8 + $0x480] sm:$0xff]  }
 0x47b   : > { %4836 = vmatmul.mubr.bf16.gmra.mrb[32].mxu0 %v11720_v44  ;;  %4690 = vmatprep.mubr.bf16.mxu1 %v11749_v6  ;;  %v11800_v6 = vpack.c.bf16 %v3478_v7, %v3477_v2  ;;  %v4278_v31 = vadd.f32 %v8215_v12, %v11779_v39  ;;  %v9545_v12 = vld [vmem:[#allocation8 + $0x4c0] sm:$0xff]   ;;  %v3595_v2 = vld [vmem:[#allocation2 + $0x62] sm:$0xff] }
 0x47c   : > { %4843 = vmatprep.mubr.bf16.mxu0 %v3588_v20  ;;  %v11797_v13 = vadd.f32 %v8321_v46, %v4270_v61  ;;  %8654 = vmatprep.subr.bf16.mxu0 %v9545_v12  ;;  %v3596_v7 = vld [vmem:[#allocation2 + $0x6a] sm:$0xff] }
 0x47d   : > { %v8216_v38 = vpop.f32.mrb[188].mxu1  ;;  %8655 = vmatpush3.bf16.msra.mxu0 %v9546_v47 }
 0x47e   : > { %v8322_v11 = vpop.f32.mrb[184].mxu0  ;;  %v8217_v58 = vpop.f32.mrb[189].mxu1 }
 0x47f   : > { %v8218_v23 = vadd.f32 %v8217_v58, %v8216_v38  ;;  %v8323_v29 = vpop.f32.mrb[185].mxu0  ;;  %v8219_v25 = vpop.f32.mrb[190].mxu1  ;;  %v3594_v38 = vld [vmem:[#allocation2 + $0x52] sm:$0xff] }
 0x480   : > { %v8324_v9 = vadd.f32 %v8323_v29, %v8322_v11  ;;  %v8325_v41 = vpop.f32.mrb[186].mxu0  ;;  %v8220_v16 = vpop.f32.mrb[191].mxu1 }
 0x481   : > { %v8221_v44 = vadd.f32 %v8220_v16, %v8219_v25  ;;  %v8326_v30 = vpop.f32.mrb[187].mxu0  ;;  %v4283_v8 = vadd.f32 %v8218_v23, %v11779_v39 }
 0x482   : > { %v8327_v37 = vadd.f32 %v8326_v30, %v8325_v41  ;;  %4691 = vmatmul.mubr.bf16.gmra.mrb[40].mxu1 %v3588_v20  ;;  %v11803_v19 = vadd.f32 %v8324_v9, %v4275_v15  ;;  %v3593_v20 = vld [vmem:[#allocation2 + $0x4a] sm:$0xff] }
 0x483   : > { %4844 = vmatmul.mubr.bf16.gmra.mrb[36].mxu0 %v11730_v55  ;;  %4698 = vmatprep.mubr.bf16.mxu1 %v11800_v6  ;;  %v4286_v60 = vadd.f32 %v8221_v44, %v11779_v39  ;;  %v3624_v44 = vpack.c.bf16 %v3594_v38, %v3593_v20  ;;  %v9548_v20 = vld [vmem:[#allocation8 + $0x488] sm:$0xff]  }
 0x484   : > { %4851 = vmatprep.mubr.bf16.mxu0 %v3589_v56  ;;  %v11807_v0 = vadd.f32 %v8327_v37, %v4278_v31  ;;  %v3625_v31 = vpack.c.bf16 %v3596_v7, %v3595_v2  ;;  %v3602_v2 = vld [vmem:[#allocation2 + $0xb2] sm:$0xff] }
 0x485   : > { %v8222_v17 = vpop.f32.mrb[192].mxu1 }
 0x486   : > { %v8328_v5 = vpop.f32.mrb[188].mxu0  ;;  %v8223_v54 = vpop.f32.mrb[193].mxu1 }
 0x487   : > { %v8224_v49 = vadd.f32 %v8223_v54, %v8222_v17  ;;  %v8329_v36 = vpop.f32.mrb[189].mxu0  ;;  %v8225_v10 = vpop.f32.mrb[194].mxu1  ;;  %v3598_v54 = vld [vmem:[#allocation2 + $0x82] sm:$0xff] }
 0x488   : > { %v8330_v51 = vadd.f32 %v8329_v36, %v8328_v5  ;;  %v8331_v18 = vpop.f32.mrb[190].mxu0  ;;  %v8226_v55 = vpop.f32.mrb[195].mxu1  ;;  %v3597_v5 = vld [vmem:[#allocation2 + $0x7a] sm:$0xff] }
 0x489   : > { %v8227_v42 = vadd.f32 %v8226_v55, %v8225_v10  ;;  %v8332_v57 = vpop.f32.mrb[191].mxu0  ;;  %v4291_v15 = vadd.f32 %v8224_v49, %v11779_v39  ;;  %v3599_v49 = vld [vmem:[#allocation2 + $0x92] sm:$0xff]  ;;  %v3600_v36 = vld [vmem:[#allocation2 + $0x9a] sm:$0xff] }
 0x48a   : > { %v8333_v48 = vadd.f32 %v8332_v57, %v8331_v18  ;;  %4699 = vmatmul.mubr.bf16.gmra.mrb[44].mxu1 %v3589_v56  ;;  %v11811_v26 = vadd.f32 %v8330_v51, %v4283_v8  ;;  %v3626_v57 = vpack.c.bf16 %v3598_v54, %v3597_v5 }
 0x48b   : > { %4852 = vmatmul.mubr.bf16.gmra.mrb[40].mxu0 %v11744_v33  ;;  %9190 = vmatprep.mubr.bf16.mxu1 %v3623_v32  ;;  %v11816_v33 = vld [vmem:[#allocation2 + $0x8] sm:$0xff]  ;;  %v4294_v37 = vadd.f32 %v8227_v42, %v11779_v39 }
 0x48c   : > { %4859 = vmatprep.mubr.bf16.mxu0 %v3590_v62  ;;  %v11814_v61 = vadd.f32 %v8333_v48, %v4286_v60  ;;  %v3542_v4 = vpack.c.bf16 %v11816_v33, %v3525_v24  ;;  %v3627_v48 = vpack.c.bf16 %v3600_v36, %v3599_v49  ;;  %v3605_v49 = vld [vmem:[#allocation2 + $0xda] sm:$0xff]  ;;  %v3606_v36 = vld [vmem:[#allocation2 + $0xe2] sm:$0xff] }
 0x48d   : > { %v8228_v46 = vpop.f32.mrb[196].mxu1 }
 0x48e   : > { %v8334_v11 = vpop.f32.mrb[192].mxu0  ;;  %v8229_v58 = vpop.f32.mrb[197].mxu1 }
 0x48f   : > { %v8230_v23 = vadd.f32 %v8229_v58, %v8228_v46  ;;  %v8335_v29 = vpop.f32.mrb[193].mxu0  ;;  %v8231_v25 = vpop.f32.mrb[198].mxu1  ;;  %v9547_v46 = vld [vmem:[#allocation8 + $0x4c8] sm:$0xff]   ;;  %v3601_v58 = vld [vmem:[#allocation2 + $0xaa] sm:$0xff] }
 0x490   : > { %v8336_v9 = vadd.f32 %v8335_v29, %v8334_v11  ;;  %v8337_v41 = vpop.f32.mrb[194].mxu0  ;;  %v8232_v16 = vpop.f32.mrb[199].mxu1  ;;  %8656 = vmatprep.subr.bf16.mxu0 %v9547_v46  ;;  %v3603_v29 = vld [vmem:[#allocation2 + $0xc2] sm:$0xff] }
 0x491   : > { %v8233_v30 = vadd.f32 %v8232_v16, %v8231_v25  ;;  %v8338_v1 = vpop.f32.mrb[195].mxu0  ;;  %v4299_v18 = vadd.f32 %v8230_v23, %v11779_v39  ;;  %v3604_v25 = vld [vmem:[#allocation2 + $0xca] sm:$0xff]  ;;  %8657 = vmatpush3.bf16.msra.mxu0 %v9548_v20 }
 0x492   : > { %v8339_v56 = vadd.f32 %v8338_v1, %v8337_v41  ;;  %9191 = vmatmul.mubr.bf16.vlgmr.msra.gmra.mrb[48].mxu1 %v3624_v44  ;;  %v11821_v17 = vadd.f32 %v8336_v9, %v4291_v15  ;;  %v3628_v1 = vpack.c.bf16 %v3602_v2, %v3601_v58 }
 0x493   : > { %4860 = vmatmul.mubr.bf16.gmra.mrb[44].mxu0 %v3542_v4  ;;  %9194 = vmatprep.mubr.bf16.mxu1 %v3625_v31  ;;  %v4302_v12 = vadd.f32 %v8233_v30, %v11779_v39 }
 0x494   : > { %v11823_v50 = vadd.f32 %v8339_v56, %v4294_v37  ;;  %v3629_v56 = vpack.c.bf16 %v3604_v25, %v3603_v29 }
 0x495   : > { %v8234_v45 = vpop.f32.mrb[200].mxu1 }
 0x496   : > { %v8340_v59 = vpop.f32.mrb[196].mxu0  ;;  %v8235_v3 = vpop.f32.mrb[201].mxu1 }
 0x497   : > { %v8236_v10 = vadd.f32 %v8235_v3, %v8234_v45  ;;  %v8341_v8 = vpop.f32.mrb[197].mxu0  ;;  %v8237_v51 = vpop.f32.mrb[202].mxu1 }
 0x498   : > { %v8342_v55 = vadd.f32 %v8341_v8, %v8340_v59  ;;  %v8343_v62 = vpop.f32.mrb[198].mxu0  ;;  %v8238_v42 = vpop.f32.mrb[203].mxu1 }
 0x499   : > { %v8239_v32 = vadd.f32 %v8238_v42, %v8237_v51  ;;  %v8344_v60 = vpop.f32.mrb[199].mxu0  ;;  %v4307_v41 = vadd.f32 %v8236_v10, %v11779_v39  ;;  %v3607_v51 = vld [vmem:[#allocation2 + $0xf2] sm:$0xff] }
 0x49a   : > { %v8345_v47 = vadd.f32 %v8344_v60, %v8343_v62  ;;  %9195 = vmatmul.mubr.bf16.gmra.mrb[52].mxu1 %v3626_v57  ;;  %v11827_v24 = vadd.f32 %v8342_v55, %v4299_v18  ;;  %v3608_v18 = vld [vmem:[#allocation2 + $0xfa] sm:$0xff] }
 0x49b   : > { %9198 = vmatprep.mubr.bf16.mxu1 %v3627_v48  ;;  %v4310_v45 = vadd.f32 %v8239_v32, %v11779_v39  ;;  %v3631_v20 = vpack.c.bf16 %v3608_v18, %v3607_v51 }
 0x49c   : > { %v11829_v38 = vadd.f32 %v8345_v47, %v4302_v12  ;;  %v3630_v12 = vpack.c.bf16 %v3606_v36, %v3605_v49 }
 0x49d   : > { %v8240_v11 = vpop.f32.mrb[204].mxu1 }
 0x49e   : > { %v8346_v7 = vpop.f32.mrb[200].mxu0  ;;  %v8241_v23 = vpop.f32.mrb[205].mxu1 }
 0x49f   : > { %v8242_v4 = vadd.f32 %v8241_v23, %v8240_v11  ;;  %v8347_v15 = vpop.f32.mrb[201].mxu0  ;;  %v8243_v9 = vpop.f32.mrb[206].mxu1  ;;  %v9550_v23 = vld [vmem:[#allocation8 + $0x490] sm:$0xff]  }
 0x4a0   : > { %v8348_v16 = vadd.f32 %v8347_v15, %v8346_v7  ;;  %v8349_v44 = vpop.f32.mrb[202].mxu0  ;;  %v8244_v30 = vpop.f32.mrb[207].mxu1  ;;  %v9549_v7 = vld [vmem:[#allocation8 + $0x4d0] sm:$0xff]   ;;  %v3610_v15 = vld [vmem:[#allocation2 + $0x112] sm:$0xff] }
 0x4a1   : > { %v8245_v31 = vadd.f32 %v8244_v30, %v8243_v9  ;;  %v8350_v37 = vpop.f32.mrb[203].mxu0  ;;  %v4315_v57 = vadd.f32 %v8242_v4, %v11779_v39  ;;  %v3609_v4 = vld [vmem:[#allocation2 + $0x10a] sm:$0xff]  ;;  %8658 = vmatprep.subr.bf16.mxu0 %v9549_v7 }
 0x4a2   : > { %v8351_v5 = vadd.f32 %v8350_v37, %v8349_v44  ;;  %9199 = vmatmul.mubr.bf16.gmra.mrb[56].mxu1 %v3628_v1  ;;  %v11833_v54 = vadd.f32 %v8348_v16, %v4307_v41  ;;  %v3611_v16 = vld [vmem:[#allocation2 + $0x122] sm:$0xff]  ;;  %v3612_v44 = vld [vmem:[#allocation2 + $0x12a] sm:$0xff]  ;;  %8659 = vmatpush3.bf16.msra.mxu0 %v9550_v23 }
 0x4a3   : > { %9202 = vmatprep.mubr.bf16.mxu1 %v3629_v56  ;;  %v4318_v11 = vadd.f32 %v8245_v31, %v11779_v39 }
 0x4a4   : > { %v11835_v59 = vadd.f32 %v8351_v5, %v4310_v45 }
 0x4a5   : > { %v8246_v3 = vpop.f32.mrb[208].mxu1 }
 0x4a6   : > { %v8352_v10 = vpop.f32.mrb[204].mxu0  ;;  %v8247_v8 = vpop.f32.mrb[209].mxu1 }
 0x4a7   : > { %v8248_v55 = vadd.f32 %v8247_v8, %v8246_v3  ;;  %v8353_v62 = vpop.f32.mrb[205].mxu0  ;;  %v8249_v42 = vpop.f32.mrb[210].mxu1  ;;  %v3632_v3 = vpack.c.bf16 %v3610_v15, %v3609_v4 }
 0x4a8   : > { %v8354_v32 = vadd.f32 %v8353_v62, %v8352_v10  ;;  %v8355_v60 = vpop.f32.mrb[206].mxu0  ;;  %v8250_v48 = vpop.f32.mrb[211].mxu1  ;;  %v3633_v10 = vpack.c.bf16 %v3612_v44, %v3611_v16 }
 0x4a9   : > { %v8251_v47 = vadd.f32 %v8250_v48, %v8249_v42  ;;  %v8356_v46 = vpop.f32.mrb[207].mxu0  ;;  %v4323_v37 = vadd.f32 %v8248_v55, %v11779_v39  ;;  %v3615_v48 = vld [vmem:[#allocation2 + $0x152] sm:$0xff] }
 0x4aa   : > { %v8357_v58 = vadd.f32 %v8356_v46, %v8355_v60  ;;  %9203 = vmatmul.mubr.bf16.gmra.mrb[60].mxu1 %v3630_v12  ;;  %v11839_v2 = vadd.f32 %v8354_v32, %v4315_v57  ;;  %v3613_v57 = vld [vmem:[#allocation2 + $0x13a] sm:$0xff]  ;;  %v3614_v32 = vld [vmem:[#allocation2 + $0x142] sm:$0xff] }
 0x4ab   : > { %9206 = vmatprep.mubr.bf16.mxu1 %v3631_v20  ;;  %v4326_v8 = vadd.f32 %v8251_v47, %v11779_v39  ;;  %v3616_v12 = vld [vmem:[#allocation2 + $0x15a] sm:$0xff] }
 0x4ac   : > { %v11841_v29 = vadd.f32 %v8357_v58, %v4318_v11 }
 0x4ad   : > { %v8252_v25 = vpop.f32.mrb[212].mxu1 }
 0x4ae   : > { %v8358_v9 = vpop.f32.mrb[208].mxu0  ;;  %v8253_v41 = vpop.f32.mrb[213].mxu1 }
 0x4af   : > { %v8254_v30 = vadd.f32 %v8253_v41, %v8252_v25  ;;  %v8359_v1 = vpop.f32.mrb[209].mxu0  ;;  %v8255_v31 = vpop.f32.mrb[214].mxu1  ;;  %v3634_v25 = vpack.c.bf16 %v3614_v32, %v3613_v57 }
 0x4b0   : > { %v8360_v56 = vadd.f32 %v8359_v1, %v8358_v9  ;;  %v8361_v45 = vpop.f32.mrb[210].mxu0  ;;  %v8256_v5 = vpop.f32.mrb[215].mxu1  ;;  %v3635_v9 = vpack.c.bf16 %v3616_v12, %v3615_v48  ;;  %v9551_v1 = vld [vmem:[#allocation8 + $0x4d8] sm:$0xff]  }
 0x4b1   : > { %v8257_v49 = vadd.f32 %v8256_v5, %v8255_v31  ;;  %v8362_v36 = vpop.f32.mrb[211].mxu0  ;;  %v4331_v58 = vadd.f32 %v8254_v30, %v11779_v39  ;;  %v9552_v31 = vld [vmem:[#allocation8 + $0x498] sm:$0xff]   ;;  %8660 = vmatprep.subr.bf16.mxu0 %v9551_v1 }
 0x4b2   : > { %v11845_v51 = vadd.f32 %v8360_v56, %v4323_v37  ;;  %v8363_v18 = vadd.f32 %v8362_v36, %v8361_v45  ;;  %9207 = vmatmul.mubr.bf16.gmra.mrb[64].mxu1 %v3632_v3  ;;  %v3617_v30 = vld [vmem:[#allocation2 + $0x16a] sm:$0xff]  ;;  %v3618_v45 = vld [vmem:[#allocation2 + $0x172] sm:$0xff]  ;;  %8661 = vmatpush3.bf16.msra.mxu0 %v9552_v31 }
 0x4b3   : > { %9210 = vmatprep.mubr.bf16.mxu1 %v3633_v10  ;;  %v4334_v41 = vadd.f32 %v8257_v49, %v11779_v39  ;;  %v3636_v32 = vpack.c.bf16 %v3618_v45, %v3617_v30 }
 0x4b4   : > { %v11847_v62 = vadd.f32 %v8363_v18, %v4326_v8 }
 0x4b5   : > { %v8258_v42 = vpop.f32.mrb[216].mxu1 }
 0x4b6   : > { %v8364_v55 = vpop.f32.mrb[212].mxu0  ;;  %v8259_v60 = vpop.f32.mrb[217].mxu1 }
 0x4b7   : > { %v8260_v46 = vadd.f32 %v8259_v60, %v8258_v42  ;;  %v8365_v20 = vpop.f32.mrb[213].mxu0  ;;  %v8261_v11 = vpop.f32.mrb[218].mxu1 }
 0x4b8   : > { %v8366_v47 = vadd.f32 %v8365_v20, %v8364_v55  ;;  %v8367_v7 = vpop.f32.mrb[214].mxu0  ;;  %v8262_v23 = vpop.f32.mrb[219].mxu1 }
 0x4b9   : > { %v8263_v4 = vadd.f32 %v8262_v23, %v8261_v11  ;;  %v8368_v15 = vpop.f32.mrb[215].mxu0  ;;  %v4339_v49 = vadd.f32 %v8260_v46, %v11779_v39  ;;  %v3621_v11 = vld [vmem:[#allocation2 + $0x19a] sm:$0xff] }
 0x4ba   : > { %v11851_v16 = vadd.f32 %v8366_v47, %v4331_v58  ;;  %v8369_v44 = vadd.f32 %v8368_v15, %v8367_v7  ;;  %9211 = vmatmul.mubr.bf16.gmra.mrb[68].mxu1 %v3634_v25  ;;  %v3622_v58 = vld [vmem:[#allocation2 + $0x1a2] sm:$0xff] }
 0x4bb   : > { %9214 = vmatprep.mubr.bf16.mxu1 %v3635_v9  ;;  %v4342_v48 = vadd.f32 %v8263_v4, %v11779_v39  ;;  %v3638_v25 = vpack.c.bf16 %v3622_v58, %v3621_v11 }
 0x4bc   : > { %v11853_v37 = vadd.f32 %v8369_v44, %v4334_v41 }
 0x4bd   : > { %v8264_v56 = vpop.f32.mrb[220].mxu1 }
 0x4be   : > { %v8370_v5 = vpop.f32.mrb[216].mxu0  ;;  %v8265_v3 = vpop.f32.mrb[221].mxu1 }
 0x4bf   : > { %v8266_v36 = vadd.f32 %v8265_v3, %v8264_v56  ;;  %v8371_v10 = vpop.f32.mrb[217].mxu0  ;;  %v8267_v8 = vpop.f32.mrb[222].mxu1  ;;  %v9553_v3 = vld [vmem:[#allocation8 + $0x4e0] sm:$0xff]  }
 0x4c0   : > { %v8372_v18 = vadd.f32 %v8371_v10, %v8370_v5  ;;  %v8373_v42 = vpop.f32.mrb[218].mxu0  ;;  %v8268_v57 = vpop.f32.mrb[223].mxu1  ;;  %v9554_v10 = vld [vmem:[#allocation8 + $0x4a0] sm:$0xff]   ;;  %8662 = vmatprep.subr.bf16.mxu0 %v9553_v3 }
 0x4c1   : > { %v8269_v55 = vadd.f32 %v8268_v57, %v8267_v8  ;;  %v8374_v60 = vpop.f32.mrb[219].mxu0  ;;  %v4347_v44 = vadd.f32 %v8266_v36, %v11779_v39  ;;  %8663 = vmatpush3.bf16.msra.mxu0 %v9554_v10 }
 0x4c2   : > { %v11857_v12 = vadd.f32 %v8372_v18, %v4339_v49  ;;  %v8375_v20 = vadd.f32 %v8374_v60, %v8373_v42  ;;  %9215 = vmatmul.mubr.bf16.gmra.mrb[72].mxu1 %v3636_v32 }
 0x4c3   : > { %9218 = vmatprep.mubr.bf16.mxu1 %v11800_v6  ;;  %v4350_v6 = vadd.f32 %v8269_v55, %v11779_v39 }
 0x4c4   : > { %v11860_v47 = vadd.f32 %v8375_v20, %v4342_v48 }
 0x4c5   : > { %v8270_v7 = vpop.f32.mrb[224].mxu1 }
 0x4c6   : > { %v8376_v46 = vpop.f32.mrb[220].mxu0  ;;  %v8271_v23 = vpop.f32.mrb[225].mxu1 }
 0x4c7   : > { %v8272_v15 = vadd.f32 %v8271_v23, %v8270_v7  ;;  %v8377_v9 = vpop.f32.mrb[221].mxu0  ;;  %v8273_v41 = vpop.f32.mrb[226].mxu1 }
 0x4c8   : > { %v8378_v4 = vadd.f32 %v8377_v9, %v8376_v46  ;;  %v8379_v1 = vpop.f32.mrb[222].mxu0  ;;  %v8274_v31 = vpop.f32.mrb[227].mxu1 }
 0x4c9   : > { %v8275_v56 = vadd.f32 %v8274_v31, %v8273_v41  ;;  %v8380_v30 = vpop.f32.mrb[223].mxu0  ;;  %v4355_v60 = vadd.f32 %v8272_v15, %v11779_v39 }
 0x4ca   : > { %v11864_v45 = vadd.f32 %v8378_v4, %v4347_v44  ;;  %v8381_v5 = vadd.f32 %v8380_v30, %v8379_v1  ;;  %9219 = vmatmul.mubr.bf16.gmra.mrb[76].mxu1 %v3638_v25 }
 0x4cb   : > { %v4358_v7 = vadd.f32 %v8275_v56, %v11779_v39 }
 0x4cc   : > { %v11866_v8 = vadd.f32 %v8381_v5, %v4350_v6 }
 0x4cd   : > { %v8276_v49 = vpop.f32.mrb[228].mxu1 }
 0x4ce   : > { %v8382_v18 = vpop.f32.mrb[224].mxu0  ;;  %v8277_v42 = vpop.f32.mrb[229].mxu1 }
 0x4cf   : > { %v8278_v36 = vadd.f32 %v8277_v42, %v8276_v49  ;;  %v8383_v57 = vpop.f32.mrb[225].mxu0  ;;  %v8279_v32 = vpop.f32.mrb[230].mxu1  ;;  %v9555_v42 = vld [vmem:[#allocation8 + $0x4e8] sm:$0xff]  }
 0x4d0   : > { %v8384_v48 = vadd.f32 %v8383_v57, %v8382_v18  ;;  %v8385_v55 = vpop.f32.mrb[226].mxu0  ;;  %v8280_v20 = vpop.f32.mrb[231].mxu1  ;;  %v9556_v57 = vld [vmem:[#allocation8 + $0x4a8] sm:$0xff]   ;;  %8664 = vmatprep.subr.bf16.mxu0 %v9555_v42 }
 0x4d1   : > { %v8281_v11 = vadd.f32 %v8280_v20, %v8279_v32  ;;  %v8386_v58 = vpop.f32.mrb[227].mxu0  ;;  %v4363_v15 = vadd.f32 %v8278_v36, %v11779_v39  ;;  %8665 = vmatpush3.bf16.msra.mxu0 %v9556_v57 }
 0x4d2   : > { %v11870_v46 = vadd.f32 %v8384_v48, %v4355_v60  ;;  %v8387_v23 = vadd.f32 %v8386_v58, %v8385_v55 }
 0x4d3   : > { %v4366_v56 = vadd.f32 %v8281_v11, %v11779_v39 }
 0x4d4   : > { %v11872_v25 = vadd.f32 %v8387_v23, %v4358_v7 }
 0x4d5   : > { %v8282_v9 = vpop.f32.mrb[232].mxu1 }
 0x4d6   : > { %v8388_v41 = vpop.f32.mrb[228].mxu0  ;;  %v8283_v44 = vpop.f32.mrb[233].mxu1 }
 0x4d7   : > { %v8284_v4 = vadd.f32 %v8283_v44, %v8282_v9  ;;  %v8389_v1 = vpop.f32.mrb[229].mxu0  ;;  %v8285_v31 = vpop.f32.mrb[234].mxu1 }
 0x4d8   : > { %v8390_v30 = vadd.f32 %v8389_v1, %v8388_v41  ;;  %v8391_v6 = vpop.f32.mrb[230].mxu0  ;;  %v8286_v5 = vpop.f32.mrb[235].mxu1 }
 0x4d9   : > { %v8287_v3 = vadd.f32 %v8286_v5, %v8285_v31  ;;  %v8392_v10 = vpop.f32.mrb[231].mxu0  ;;  %v4371_v7 = vadd.f32 %v8284_v4, %v11779_v39 }
 0x4da   : > { %v11876_v49 = vadd.f32 %v8390_v30, %v4363_v15  ;;  %v8393_v18 = vadd.f32 %v8392_v10, %v8391_v6 }
 0x4db   : > { %v4374_v1 = vadd.f32 %v8287_v3, %v11779_v39 }
 0x4dc   : > { %v11878_v32 = vadd.f32 %v8393_v18, %v4366_v56 }
 0x4dd   : > { %v8288_v60 = vpop.f32.mrb[236].mxu1 }
 0x4de   : > { %v8394_v48 = vpop.f32.mrb[232].mxu0  ;;  %v8289_v55 = vpop.f32.mrb[237].mxu1 }
 0x4df   : > { %v8290_v36 = vadd.f32 %v8289_v55, %v8288_v60  ;;  %v8395_v20 = vpop.f32.mrb[233].mxu0  ;;  %v8291_v58 = vpop.f32.mrb[238].mxu1 }
 0x4e0   : > { %v8396_v23 = vadd.f32 %v8395_v20, %v8394_v48  ;;  %v8397_v9 = vpop.f32.mrb[234].mxu0  ;;  %v8292_v11 = vpop.f32.mrb[239].mxu1 }
 0x4e1   : > { %v8293_v41 = vadd.f32 %v8292_v11, %v8291_v58  ;;  %v8398_v44 = vpop.f32.mrb[235].mxu0  ;;  %v4379_v4 = vadd.f32 %v8290_v36, %v11779_v39 }
 0x4e2   : > { %v11882_v31 = vadd.f32 %v8396_v23, %v4371_v7  ;;  %v8399_v15 = vadd.f32 %v8398_v44, %v8397_v9 }
 0x4e3   : > { %v4382_v58 = vadd.f32 %v8293_v41, %v11779_v39 }
 0x4e4   : > { %v11884_v30 = vadd.f32 %v8399_v15, %v4374_v1 }
 0x4e5   : > { %v8422_v6 = vpop.f32.mrb[240].mxu1 }
 0x4e6   : > { %v8400_v5 = vpop.f32.mrb[236].mxu0  ;;  %v8423_v10 = vpop.f32.mrb[241].mxu1 }
 0x4e7   : > { %v8401_v56 = vpop.f32.mrb[237].mxu0  ;;  %v8424_v18 = vadd.f32 %v8423_v10, %v8422_v6  ;;  %v8425_v42 = vpop.f32.mrb[242].mxu1 }
 0x4e8   : > { %v8402_v57 = vadd.f32 %v8401_v56, %v8400_v5  ;;  %v8403_v60 = vpop.f32.mrb[238].mxu0  ;;  %v8426_v48 = vpop.f32.mrb[243].mxu1 }
 0x4e9   : > { %v4581_v55 = vadd.f32 %v8424_v18, %v11785_v34  ;;  %v8404_v20 = vpop.f32.mrb[239].mxu0  ;;  %v8427_v3 = vadd.f32 %v8426_v48, %v8425_v42 }
 0x4ea   : > { %v11889_v7 = vadd.f32 %v8402_v57, %v4379_v4  ;;  %v8405_v23 = vadd.f32 %v8404_v20, %v8403_v60 }
 0x4eb   : > { %v4584_v9 = vadd.f32 %v8427_v3, %v11789_v53 }
 0x4ec   : > { %v11892_v11 = vadd.f32 %v8405_v23, %v4382_v58 }
 0x4ed   : > { %v8428_v44 = vpop.f32.mrb[244].mxu1 }
 0x4ee   : > { %v8534_v1 = vpop.f32.mrb[240].mxu0  ;;  %v8429_v15 = vpop.f32.mrb[245].mxu1 }
 0x4ef   : > { %v8430_v36 = vadd.f32 %v8429_v15, %v8428_v44  ;;  %v8535_v6 = vpop.f32.mrb[241].mxu0  ;;  %v8431_v5 = vpop.f32.mrb[246].mxu1 }
 0x4f0   : > { %v8536_v10 = vadd.f32 %v8535_v6, %v8534_v1  ;;  %v8537_v56 = vpop.f32.mrb[242].mxu0  ;;  %v8432_v34 = vpop.f32.mrb[247].mxu1 }
 0x4f1   : > { %v4589_v18 = vadd.f32 %v8430_v36, %v11793_v40  ;;  %v8433_v42 = vadd.f32 %v8432_v34, %v8431_v5  ;;  %v8538_v39 = vpop.f32.mrb[243].mxu0 }
 0x4f2   : > { %v8539_v41 = vadd.f32 %v8538_v39, %v8537_v56  ;;  %v11895_v4 = vadd.f32 %v8536_v10, %v4581_v55 }
 0x4f3   : > { %v4592_v53 = vadd.f32 %v8433_v42, %v11797_v13 }
 0x4f4   : > { %v11898_v57 = vadd.f32 %v8539_v41, %v4584_v9 }
 0x4f5   : > { %v8434_v60 = vpop.f32.mrb[248].mxu1 }
 0x4f6   : > { %v8540_v48 = vpop.f32.mrb[244].mxu0  ;;  %v8435_v20 = vpop.f32.mrb[249].mxu1 }
 0x4f7   : > { %v8436_v3 = vadd.f32 %v8435_v20, %v8434_v60  ;;  %v8541_v58 = vpop.f32.mrb[245].mxu0  ;;  %v8437_v23 = vpop.f32.mrb[250].mxu1 }
 0x4f8   : > { %v8542_v44 = vadd.f32 %v8541_v58, %v8540_v48  ;;  %v8543_v1 = vpop.f32.mrb[246].mxu0  ;;  %v8438_v15 = vpop.f32.mrb[251].mxu1 }
 0x4f9   : > { %v4597_v40 = vadd.f32 %v8436_v3, %v11803_v19  ;;  %v8439_v36 = vadd.f32 %v8438_v15, %v8437_v23  ;;  %v8544_v6 = vpop.f32.mrb[247].mxu0 }
 0x4fa   : > { %v8545_v5 = vadd.f32 %v8544_v6, %v8543_v1  ;;  %v11901_v55 = vadd.f32 %v8542_v44, %v4589_v18 }
 0x4fb   : > { %v4600_v13 = vadd.f32 %v8439_v36, %v11807_v0 }
 0x4fc   : > { %v11904_v9 = vadd.f32 %v8545_v5, %v4592_v53 }
 0x4fd   : > { %v8440_v10 = vpop.f32.mrb[252].mxu1 }
 0x4fe   : > { %v8546_v56 = vpop.f32.mrb[248].mxu0  ;;  %v8441_v34 = vpop.f32.mrb[253].mxu1 }
 0x4ff   : > { %v8442_v42 = vadd.f32 %v8441_v34, %v8440_v10  ;;  %v8547_v39 = vpop.f32.mrb[249].mxu0  ;;  %v8443_v41 = vpop.f32.mrb[254].mxu1 }
 0x500   : > { %v8548_v60 = vadd.f32 %v8547_v39, %v8546_v56  ;;  %v8549_v48 = vpop.f32.mrb[250].mxu0  ;;  %v8444_v20 = vpop.f32.mrb[255].mxu1 }
 0x501   : > { %v4605_v19 = vadd.f32 %v8442_v42, %v11811_v26  ;;  %v8445_v3 = vadd.f32 %v8444_v20, %v8443_v41  ;;  %v8550_v58 = vpop.f32.mrb[251].mxu0  ;;  %v9557_v41 = vld [vmem:[#allocation8 + $0x4f0] sm:$0xff]  }
 0x502   : > { %v8551_v23 = vadd.f32 %v8550_v58, %v8549_v48  ;;  %v11907_v18 = vadd.f32 %v8548_v60, %v4597_v40  ;;  %v9558_v40 = vld [vmem:[#allocation8 + $0x4b0] sm:$0xff]   ;;  %8666 = vmatprep.subr.bf16.mxu0 %v9557_v41 }
 0x503   : > { %v4608_v0 = vadd.f32 %v8445_v3, %v11814_v61  ;;  %8667 = vmatpush3.bf16.msra.mxu0 %v9558_v40  ;;  %v9562_v40 = vld [vmem:[#allocation8 + $0x508] sm:$0xff]  }
 0x504   : > { %v11910_v53 = vadd.f32 %v8551_v23, %v4600_v13 }
 0x505   : > { %v8446_v44 = vpop.f32.mrb[0].mxu1 }
 0x506   : > { %v8552_v1 = vpop.f32.mrb[252].mxu0  ;;  %v8447_v15 = vpop.f32.mrb[1].mxu1 }
 0x507   : > { %v8448_v36 = vadd.f32 %v8447_v15, %v8446_v44  ;;  %v8553_v6 = vpop.f32.mrb[253].mxu0  ;;  %v8449_v5 = vpop.f32.mrb[2].mxu1 }
 0x508   : > { %v8554_v10 = vadd.f32 %v8553_v6, %v8552_v1  ;;  %v8555_v56 = vpop.f32.mrb[254].mxu0  ;;  %v8450_v34 = vpop.f32.mrb[3].mxu1  ;;  %v9559_v6 = vld [vmem:[#allocation8 + $0x540] sm:$0xff]  }
 0x509   : > { %v4613_v26 = vadd.f32 %v8448_v36, %v11821_v17  ;;  %v8451_v42 = vadd.f32 %v8450_v34, %v8449_v5  ;;  %v8556_v39 = vpop.f32.mrb[255].mxu0  ;;  %8766 = vmatprep.subr.bf16.mxu1 %v9559_v6 }
 0x50a   : > { %v8557_v60 = vadd.f32 %v8556_v39, %v8555_v56  ;;  %v11913_v48 = vadd.f32 %v8554_v10, %v4605_v19  ;;  %v9560_v56 = vld [vmem:[#allocation8 + $0x500] sm:$0xff]   ;;  %v9561_v39 = vld [vmem:[#allocation8 + $0x548] sm:$0xff]  }
 0x50b   : > { %v4616_v61 = vadd.f32 %v8451_v42, %v11823_v50  ;;  %8767 = vmatpush3.bf16.msra.mxu1 %v9560_v56 }
 0x50c   : > { %v11916_v13 = vadd.f32 %v8557_v60, %v4608_v0  ;;  %8768 = vmatprep.subr.bf16.mxu1 %v9561_v39  ;;  %v9567_v39 = vld [vmem:[#allocation8 + $0x558] sm:$0xff]  }
 0x50d   : > { %v8452_v20 = vpop.f32.mrb[4].mxu1 }
 0x50e   : > { %v8558_v3 = vpop.f32.mrb[0].mxu0  ;;  %v8453_v58 = vpop.f32.mrb[5].mxu1 }
 0x50f   : > { %v8454_v23 = vadd.f32 %v8453_v58, %v8452_v20  ;;  %v8559_v44 = vpop.f32.mrb[1].mxu0  ;;  %v8455_v1 = vpop.f32.mrb[6].mxu1  ;;  %8769 = vmatpush3.bf16.msra.mxu1 %v9562_v40  ;;  %v9568_v40 = vld [vmem:[#allocation8 + $0x518] sm:$0xff]  }
 0x510   : > { %v8560_v17 = vadd.f32 %v8559_v44, %v8558_v3  ;;  %v8561_v15 = vpop.f32.mrb[2].mxu0  ;;  %v8456_v36 = vpop.f32.mrb[7].mxu1 }
 0x511   : > { %v4621_v5 = vadd.f32 %v8454_v23, %v11827_v24  ;;  %v8457_v19 = vadd.f32 %v8456_v36, %v8455_v1  ;;  %v8562_v10 = vpop.f32.mrb[3].mxu0 }
 0x512   : > { %v8563_v50 = vadd.f32 %v8562_v10, %v8561_v15  ;;  %v11919_v34 = vadd.f32 %v8560_v17, %v4613_v26  ;;  %v9565_v26 = vld [vmem:[#allocation8 + $0x550] sm:$0xff]   ;;  %v9564_v10 = vld [vmem:[#allocation8 + $0x4b8] sm:$0xff]  }
 0x513   : > { %v4624_v0 = vadd.f32 %v8457_v19, %v11829_v38  ;;  %v9563_v19 = vld [vmem:[#allocation8 + $0x4f8] sm:$0xff]   ;;  %8770 = vmatprep.subr.bf16.mxu1 %v9565_v26  ;;  %v9570_v26 = vld [vmem:[#allocation8 + $0x520] sm:$0xff]  }
 0x514   : > { %v11922_v42 = vadd.f32 %v8563_v50, %v4616_v61  ;;  %v9566_v61 = vld [vmem:[#allocation8 + $0x510] sm:$0xff]   ;;  %8668 = vmatprep.subr.bf16.mxu0 %v9563_v19 }
 0x515   : > { %v8458_v41 = vpop.f32.mrb[8].mxu1  ;;  %8771 = vmatpush3.bf16.msra.mxu1 %v9566_v61  ;;  %8669 = vmatpush3.bf16.msra.mxu0 %v9564_v10  ;;  %v5301_v61 = vld [vmem:[#allocation2 + $0x1] sm:$0xff] }
 0x516   : > { %v8564_v60 = vpop.f32.mrb[4].mxu0  ;;  %v8459_v20 = vpop.f32.mrb[9].mxu1  ;;  %8772 = vmatprep.subr.bf16.mxu1 %v9567_v39  ;;  %v5253_v39 = vld [vmem:[#allocation2] sm:$0xff] }
 0x517   : > { %v8460_v3 = vadd.f32 %v8459_v20, %v8458_v41  ;;  %v8565_v24 = vpop.f32.mrb[5].mxu0  ;;  %v8461_v58 = vpop.f32.mrb[10].mxu1 }
 0x518   : > { %v8566_v23 = vadd.f32 %v8565_v24, %v8564_v60  ;;  %v8567_v44 = vpop.f32.mrb[6].mxu0  ;;  %v8462_v1 = vpop.f32.mrb[11].mxu1 }
 0x519   : > { %v4629_v17 = vadd.f32 %v8460_v3, %v11833_v54  ;;  %v8463_v38 = vadd.f32 %v8462_v1, %v8461_v58  ;;  %v8568_v15 = vpop.f32.mrb[7].mxu0  ;;  %8773 = vmatpush3.bf16.msra.mxu1 %v9568_v40  ;;  %v9571_v40 = vld [vmem:[#allocation8 + $0x568] sm:$0xff]  }
 0x51a   : > { %v8569_v36 = vadd.f32 %v8568_v15, %v8567_v44  ;;  %v11925_v6 = vadd.f32 %v8566_v23, %v4621_v5  ;;  %v9569_v44 = vld [vmem:[#allocation8 + $0x560] sm:$0xff]  }
 0x51b   : > { %v4632_v56 = vadd.f32 %v8463_v38, %v11835_v59  ;;  %8774 = vmatprep.subr.bf16.mxu1 %v9569_v44  ;;  %v9574_v44 = vld [vmem:[#allocation8 + $0x570] sm:$0xff]  }
 0x51c   : > { %v11928_v50 = vadd.f32 %v8569_v36, %v4624_v0  ;;  %v5302_v36 = vld [vmem:[#allocation2 + $0x9] sm:$0xff] }
 0x51d   : > { %v8464_v41 = vpop.f32.mrb[12].mxu1  ;;  %8775 = vmatpush3.bf16.msra.mxu1 %v9570_v26  ;;  %v5333_v10 = vpack.c.bf16 %v5302_v36, %v5301_v61  ;;  %v9573_v36 = vld [vmem:[#allocation8 + $0x5c0] sm:$0xff]  }
 0x51e   : > { %v8570_v54 = vpop.f32.mrb[8].mxu0  ;;  %v8465_v60 = vpop.f32.mrb[13].mxu1  ;;  %8776 = vmatprep.subr.bf16.mxu1 %v9571_v40  ;;  %v9577_v40 = vld [vmem:[#allocation8 + $0x578] sm:$0xff]   ;;  %8878 = vmatprep.subr.bf16.mxu0 %v9573_v36 }
 0x51f   : > { %v8466_v20 = vadd.f32 %v8465_v60, %v8464_v41  ;;  %v8571_v3 = vpop.f32.mrb[9].mxu0  ;;  %v8467_v5 = vpop.f32.mrb[14].mxu1  ;;  %6302 = vmatprep.mubr.bf16.mxu0 %v5333_v10  ;;  %v9572_v60 = vld [vmem:[#allocation8 + $0x528] sm:$0xff]   ;;  %v9575_v10 = vld [vmem:[#allocation8 + $0x580] sm:$0xff]  }
 0x520   : > { %v8572_v24 = vadd.f32 %v8571_v3, %v8570_v54  ;;  %v8573_v58 = vpop.f32.mrb[10].mxu0  ;;  %v8468_v23 = vpop.f32.mrb[15].mxu1  ;;  %v5285_v54 = vpack.c.bf16 %v11816_v33, %v5253_v39  ;;  %v9576_v33 = vld [vmem:[#allocation8 + $0x530] sm:$0xff]  }
 0x521   : > { %v4637_v59 = vadd.f32 %v8466_v20, %v11839_v2  ;;  %v8469_v0 = vadd.f32 %v8468_v23, %v8467_v5  ;;  %v8574_v1 = vpop.f32.mrb[11].mxu0  ;;  %8777 = vmatpush3.bf16.msra.mxu1 %v9572_v60 }
 0x522   : > { %v8575_v38 = vadd.f32 %v8574_v1, %v8573_v58  ;;  %v11931_v15 = vadd.f32 %v8572_v24, %v4629_v17  ;;  %6303 = vmatmul.mubr.bf16.vlgmr.msra.gmra.mrb[48].mxu0 %v5285_v54  ;;  %8778 = vmatprep.subr.bf16.mxu1 %v9574_v44 }
 0x523   : > { %v4640_v19 = vadd.f32 %v8469_v0, %v11841_v29  ;;  %8879 = vmatpush3.bf16.msra.mxu0 %v9575_v10 }
 0x524   : > { %v11934_v41 = vadd.f32 %v8575_v38, %v4632_v56 }
 0x525   : > { %v8470_v2 = vpop.f32.mrb[16].mxu1  ;;  %8779 = vmatpush3.bf16.msra.mxu1 %v9576_v33 }
 0x526   : > { %v8576_v20 = vpop.f32.mrb[12].mxu0  ;;  %v8471_v3 = vpop.f32.mrb[17].mxu1  ;;  %8780 = vmatprep.subr.bf16.mxu1 %v9577_v40 }
 0x527   : > { %v8472_v17 = vadd.f32 %v8471_v3, %v8470_v2  ;;  %v8577_v5 = vpop.f32.mrb[13].mxu0  ;;  %v8473_v24 = vpop.f32.mrb[18].mxu1  ;;  %v9578_v2 = vld [vmem:[#allocation8 + $0x538] sm:$0xff]  }
 0x528   : > { %v8578_v29 = vadd.f32 %v8577_v5, %v8576_v20  ;;  %v8579_v58 = vpop.f32.mrb[14].mxu0  ;;  %v8474_v23 = vpop.f32.mrb[19].mxu1 }
 0x529   : > { %v4645_v56 = vadd.f32 %v8472_v17, %v11845_v51  ;;  %v8475_v0 = vadd.f32 %v8474_v23, %v8473_v24  ;;  %v8580_v1 = vpop.f32.mrb[15].mxu0  ;;  %8781 = vmatpush3.bf16.msra.mxu1 %v9578_v2 }
 0x52a   : > { %v8581_v26 = vadd.f32 %v8580_v1, %v8579_v58  ;;  %v11938_v38 = vadd.f32 %v8578_v29, %v4637_v59 }
 0x52b   : > { %v4648_v61 = vadd.f32 %v8475_v0, %v11847_v62 }
 0x52c   : > { %v11941_v39 = vadd.f32 %v8581_v26, %v4640_v19 }
 0x52d   : > { %v8476_v54 = vpop.f32.mrb[20].mxu1 }
 0x52e   : > { %v8582_v60 = vpop.f32.mrb[16].mxu0  ;;  %v8477_v51 = vpop.f32.mrb[21].mxu1 }
 0x52f   : > { %v8478_v20 = vadd.f32 %v8477_v51, %v8476_v54  ;;  %v8583_v3 = vpop.f32.mrb[17].mxu0  ;;  %v8479_v59 = vpop.f32.mrb[22].mxu1 }
 0x530   : > { %v8584_v17 = vadd.f32 %v8583_v3, %v8582_v60  ;;  %v8585_v5 = vpop.f32.mrb[18].mxu0  ;;  %v8480_v62 = vpop.f32.mrb[23].mxu1 }
 0x531   : > { %v4653_v24 = vadd.f32 %v8478_v20, %v11851_v16  ;;  %v8481_v29 = vadd.f32 %v8480_v62, %v8479_v59  ;;  %v8586_v19 = vpop.f32.mrb[19].mxu0  ;;  %v9579_v59 = vld [vmem:[#allocation8 + $0x5c8] sm:$0xff]  }
 0x532   : > { %v8587_v58 = vadd.f32 %v8586_v19, %v8585_v5  ;;  %v11944_v23 = vadd.f32 %v8584_v17, %v4645_v56  ;;  %v9580_v17 = vld [vmem:[#allocation8 + $0x588] sm:$0xff]   ;;  %8880 = vmatprep.subr.bf16.mxu0 %v9579_v59 }
 0x533   : > { %v4656_v44 = vadd.f32 %v8481_v29, %v11853_v37  ;;  %8881 = vmatpush3.bf16.msra.mxu0 %v9580_v17 }
 0x534   : > { %v11947_v0 = vadd.f32 %v8587_v58, %v4648_v61 }
 0x535   : > { %v8482_v1 = vpop.f32.mrb[24].mxu1 }
 0x536   : > { %v8588_v33 = vpop.f32.mrb[20].mxu0  ;;  %v8483_v26 = vpop.f32.mrb[25].mxu1 }
 0x537   : > { %v8484_v36 = vadd.f32 %v8483_v26, %v8482_v1  ;;  %v8589_v10 = vpop.f32.mrb[21].mxu0  ;;  %v8485_v40 = vpop.f32.mrb[26].mxu1 }
 0x538   : > { %v8590_v54 = vadd.f32 %v8589_v10, %v8588_v33  ;;  %v8591_v2 = vpop.f32.mrb[22].mxu0  ;;  %v8486_v60 = vpop.f32.mrb[27].mxu1 }
 0x539   : > { %v4661_v16 = vadd.f32 %v8484_v36, %v11857_v12  ;;  %v8487_v51 = vadd.f32 %v8486_v60, %v8485_v40  ;;  %v8592_v20 = vpop.f32.mrb[23].mxu0  ;;  %v9582_v60 = vld [vmem:[#allocation8 + $0x590] sm:$0xff]  }
 0x53a   : > { %v8593_v3 = vadd.f32 %v8592_v20, %v8591_v2  ;;  %v11950_v56 = vadd.f32 %v8590_v54, %v4653_v24  ;;  %v9581_v2 = vld [vmem:[#allocation8 + $0x5d0] sm:$0xff]  }
 0x53b   : > { %v4664_v37 = vadd.f32 %v8487_v51, %v11860_v47  ;;  %v9583_v51 = vld [vmem:[#allocation8 + $0x5d8] sm:$0xff]   ;;  %8882 = vmatprep.subr.bf16.mxu0 %v9581_v2 }
 0x53c   : > { %v11953_v61 = vadd.f32 %v8593_v3, %v4656_v44  ;;  %8883 = vmatpush3.bf16.msra.mxu0 %v9582_v60 }
 0x53d   : > { %v8488_v5 = vpop.f32.mrb[28].mxu1  ;;  %8884 = vmatprep.subr.bf16.mxu0 %v9583_v51 }
 0x53e   : > { %v8594_v62 = vpop.f32.mrb[24].mxu0  ;;  %v8489_v29 = vpop.f32.mrb[29].mxu1 }
 0x53f   : > { %v8490_v19 = vadd.f32 %v8489_v29, %v8488_v5  ;;  %v8595_v58 = vpop.f32.mrb[25].mxu0  ;;  %v8491_v1 = vpop.f32.mrb[30].mxu1 }
 0x540   : > { %v8596_v12 = vadd.f32 %v8595_v58, %v8594_v62  ;;  %v8597_v33 = vpop.f32.mrb[26].mxu0  ;;  %v8492_v26 = vpop.f32.mrb[31].mxu1  ;;  %v9585_v58 = vld [vmem:[#allocation8 + $0x640] sm:$0xff]  }
 0x541   : > { %v4669_v24 = vadd.f32 %v8490_v19, %v11864_v45  ;;  %v8493_v36 = vadd.f32 %v8492_v26, %v8491_v1  ;;  %v8598_v10 = vpop.f32.mrb[27].mxu0  ;;  %v9584_v45 = vld [vmem:[#allocation8 + $0x598] sm:$0xff]   ;;  %8990 = vmatprep.subr.bf16.mxu1 %v9585_v58 }
 0x542   : > { %v8599_v47 = vadd.f32 %v8598_v10, %v8597_v33  ;;  %v11956_v44 = vadd.f32 %v8596_v12, %v4661_v16  ;;  %8885 = vmatpush3.bf16.msra.mxu0 %v9584_v45 }
 0x543   : > { %v4672_v40 = vadd.f32 %v8493_v36, %v11866_v8  ;;  %v9587_v8 = vld [vmem:[#allocation8 + $0x5e0] sm:$0xff]  }
 0x544   : > { %v11959_v54 = vadd.f32 %v8599_v47, %v4664_v37  ;;  %8886 = vmatprep.subr.bf16.mxu0 %v9587_v8 }
 0x545   : > { %v8494_v20 = vpop.f32.mrb[32].mxu1 }
 0x546   : > { %v8600_v3 = vpop.f32.mrb[28].mxu0  ;;  %v8495_v59 = vpop.f32.mrb[33].mxu1 }
 0x547   : > { %v8496_v17 = vadd.f32 %v8495_v59, %v8494_v20  ;;  %v8601_v5 = vpop.f32.mrb[29].mxu0  ;;  %v8497_v62 = vpop.f32.mrb[34].mxu1  ;;  %v9588_v59 = vld [vmem:[#allocation8 + $0x5a0] sm:$0xff]  }
 0x548   : > { %v8602_v29 = vadd.f32 %v8601_v5, %v8600_v3  ;;  %v8603_v19 = vpop.f32.mrb[30].mxu0  ;;  %v8498_v16 = vpop.f32.mrb[35].mxu1  ;;  %8887 = vmatpush3.bf16.msra.mxu0 %v9588_v59 }
 0x549   : > { %v4677_v37 = vadd.f32 %v8496_v17, %v11870_v46  ;;  %v8499_v1 = vadd.f32 %v8498_v16, %v8497_v62  ;;  %v8604_v12 = vpop.f32.mrb[31].mxu0 }
 0x54a   : > { %v8605_v33 = vadd.f32 %v8604_v12, %v8603_v19  ;;  %v11962_v26 = vadd.f32 %v8602_v29, %v4669_v24 }
 0x54b   : > { %v4680_v36 = vadd.f32 %v8499_v1, %v11872_v25 }
 0x54c   : > { %v11965_v10 = vadd.f32 %v8605_v33, %v4672_v40 }
 0x54d   : > { %v8500_v47 = vpop.f32.mrb[36].mxu1 }
 0x54e   : > { %v8606_v2 = vpop.f32.mrb[32].mxu0  ;;  %v8501_v60 = vpop.f32.mrb[37].mxu1 }
 0x54f   : > { %v8502_v51 = vadd.f32 %v8501_v60, %v8500_v47  ;;  %v8607_v20 = vpop.f32.mrb[33].mxu0  ;;  %v8503_v3 = vpop.f32.mrb[38].mxu1 }
 0x550   : > { %v8608_v46 = vadd.f32 %v8607_v20, %v8606_v2  ;;  %v8609_v17 = vpop.f32.mrb[34].mxu0  ;;  %v8504_v5 = vpop.f32.mrb[39].mxu1 }
 0x551   : > { %v4685_v24 = vadd.f32 %v8502_v51, %v11876_v49  ;;  %v8505_v62 = vadd.f32 %v8504_v5, %v8503_v3  ;;  %v8610_v29 = vpop.f32.mrb[35].mxu0  ;;  %v9591_v49 = vld [vmem:[#allocation8 + $0x5e8] sm:$0xff]  }
 0x552   : > { %v8611_v25 = vadd.f32 %v8610_v29, %v8609_v17  ;;  %v11968_v45 = vadd.f32 %v8608_v46, %v4677_v37  ;;  %8888 = vmatprep.subr.bf16.mxu0 %v9591_v49 }
 0x553   : > { %v4688_v40 = vadd.f32 %v8505_v62, %v11878_v32 }
 0x554   : > { %v11971_v19 = vadd.f32 %v8611_v25, %v4680_v36 }
 0x555   : > { %v8506_v16 = vpop.f32.mrb[40].mxu1 }
 0x556   : > { %v8612_v58 = vpop.f32.mrb[36].mxu0  ;;  %v8507_v8 = vpop.f32.mrb[41].mxu1 }
 0x557   : > { %v8508_v1 = vadd.f32 %v8507_v8, %v8506_v16  ;;  %v8613_v12 = vpop.f32.mrb[37].mxu0  ;;  %v8509_v33 = vpop.f32.mrb[42].mxu1  ;;  %v9592_v16 = vld [vmem:[#allocation8 + $0x5a8] sm:$0xff]  }
 0x558   : > { %v8614_v47 = vadd.f32 %v8613_v12, %v8612_v58  ;;  %v8615_v2 = vpop.f32.mrb[38].mxu0  ;;  %v8510_v60 = vpop.f32.mrb[43].mxu1  ;;  %8889 = vmatpush3.bf16.msra.mxu0 %v9592_v16 }
 0x559   : > { %v4693_v51 = vadd.f32 %v8508_v1, %v11882_v31  ;;  %v8511_v20 = vadd.f32 %v8510_v60, %v8509_v33  ;;  %v8616_v3 = vpop.f32.mrb[39].mxu0 }
 0x55a   : > { %v8617_v37 = vadd.f32 %v8616_v3, %v8615_v2  ;;  %v11974_v59 = vadd.f32 %v8614_v47, %v4685_v24 }
 0x55b   : > { %v4696_v32 = vadd.f32 %v8511_v20, %v11884_v30 }
 0x55c   : > { %v11977_v36 = vadd.f32 %v8617_v37, %v4688_v40 }
 0x55d   : > { %v8512_v46 = vpop.f32.mrb[44].mxu1 }
 0x55e   : > { %v8618_v17 = vpop.f32.mrb[40].mxu0  ;;  %v8513_v5 = vpop.f32.mrb[45].mxu1 }
 0x55f   : > { %v8514_v62 = vadd.f32 %v8513_v5, %v8512_v46  ;;  %v8619_v29 = vpop.f32.mrb[41].mxu0  ;;  %v8515_v25 = vpop.f32.mrb[46].mxu1 }
 0x560   : > { %v8620_v58 = vadd.f32 %v8619_v29, %v8618_v17  ;;  %v8621_v8 = vpop.f32.mrb[42].mxu0  ;;  %v8516_v31 = vpop.f32.mrb[47].mxu1 }
 0x561   : > { %v4701_v1 = vadd.f32 %v8514_v62, %v11889_v7  ;;  %v8517_v12 = vadd.f32 %v8516_v31, %v8515_v25  ;;  %v8622_v24 = vpop.f32.mrb[43].mxu0 }
 0x562   : > { %v8623_v33 = vadd.f32 %v8622_v24, %v8621_v8  ;;  %v11980_v47 = vadd.f32 %v8620_v58, %v4693_v51 }
 0x563   : > { %v4704_v30 = vadd.f32 %v8517_v12, %v11892_v11 }
 0x564   : > { %v11983_v40 = vadd.f32 %v8623_v33, %v4696_v32  ;;  %v9595_v32 = vld [vmem:[#allocation8 + $0x5f0] sm:$0xff]  }
 0x565   : > { %v9192_v2 = vpop.f32.mrb[48].mxu1  ;;  %8890 = vmatprep.subr.bf16.mxu0 %v9595_v32 }
 0x566   : > { %v8624_v60 = vpop.f32.mrb[44].mxu0  ;;  %v11986_v49 = vadd.f32 %v9192_v2, %v11901_v55  ;;  %v4902_v20 = vpop.f32.mrb[49].mxu1 }
 0x567   : > { %v8625_v3 = vpop.f32.mrb[45].mxu0  ;;  %v11989_v37 = vadd.f32 %v4902_v20, %v11895_v4  ;;  %v9193_v7 = vpop.f32.mrb[50].mxu1  ;;  %v9596_v20 = vld [vmem:[#allocation8 + $0x5b0] sm:$0xff]  }
 0x568   : > { %v5031_v46 = vsub.f32 0.0, %v11986_v49  ;;  %v8626_v17 = vadd.f32 %v8625_v3, %v8624_v60  ;;  %v8627_v51 = vpop.f32.mrb[46].mxu0  ;;  %v11993_v5 = vadd.f32 %v9193_v7, %v11904_v9  ;;  %v4905_v11 = vpop.f32.mrb[51].mxu1  ;;  %8891 = vmatpush3.bf16.msra.mxu0 %v9596_v20  ;;  %v9599_v20 = vld [vmem:[#allocation8 + $0x5f8] sm:$0xff]  }
 0x569   : > { %v5029_v62 = vsub.f32 0.0, %v11989_v37  ;;  %v8628_v29 = vpop.f32.mrb[47].mxu0  ;;  %v11997_v55 = vadd.f32 %v4905_v11, %v11898_v57  ;;  %8892 = vmatprep.subr.bf16.mxu0 %v9599_v20 }
 0x56a   : > { %v5065_v25 = vmul.f32 1.442695, %v5031_v46  ;;  %v5032_v4 = vsub.f32 0.0, %v11993_v5  ;;  %v8629_v16 = vadd.f32 %v8628_v29, %v8627_v51  ;;  %v12000_v58 = vadd.f32 %v8626_v17, %v4701_v1 }
 0x56b   : > { %v5061_v8 = vmul.f32 1.442695, %v5029_v62  ;;  %v5030_v31 = vsub.f32 0.0, %v11997_v55 }
 0x56c   : > { %9873 = vpow2.f32 %v5065_v25  ;;  %v5067_v9 = vmul.f32 1.442695, %v5032_v4  ;;  %v12003_v12 = vadd.f32 %v8629_v16, %v4704_v30 }
 0x56d   : > { %9875 = vpow2.f32 %v5061_v8  ;;  %v5063_v24 = vmul.f32 1.442695, %v5030_v31  ;;  %v9196_v33 = vpop.f32.mrb[52].mxu1 }
 0x56e   : > { %9877 = vpow2.f32 %v5067_v9  ;;  %v12006_v57 = vadd.f32 %v9196_v33, %v11913_v48  ;;  %v4918_v2 = vpop.f32.mrb[53].mxu1 }
 0x56f   : > { %9879 = vpow2.f32 %v5063_v24  ;;  %v12009_v1 = vadd.f32 %v4918_v2, %v11907_v18  ;;  %v9197_v60 = vpop.f32.mrb[54].mxu1 }
 0x570   : > { %v5035_v3 = vsub.f32 0.0, %v12006_v57  ;;  %v12013_v7 = vadd.f32 %v9197_v60, %v11916_v13  ;;  %v4921_v30 = vpop.f32.mrb[55].mxu1 }
 0x571   : > { %v5033_v46 = vsub.f32 0.0, %v12009_v1  ;;  %v12017_v17 = vadd.f32 %v4921_v30, %v11910_v53 }
 0x572   : > { %v5073_v48 = vmul.f32 1.442695, %v5035_v3  ;;  %v5036_v51 = vsub.f32 0.0, %v12013_v7 }
 0x573   : > { %v5069_v11 = vmul.f32 1.442695, %v5033_v46  ;;  %v5034_v18 = vsub.f32 0.0, %v12017_v17 }
 0x574   : > { %9881 = vpow2.f32 %v5073_v48  ;;  %v5075_v32 = vmul.f32 1.442695, %v5036_v51 }
 0x575   : > { %9883 = vpow2.f32 %v5069_v11  ;;  %v5071_v62 = vmul.f32 1.442695, %v5034_v18  ;;  %v9200_v29 = vpop.f32.mrb[56].mxu1 }
 0x576   : > { %v9874_v13 = vpop.eup %9873  ;;  %9885 = vpow2.f32 %v5075_v32  ;;  %v12022_v25 = vadd.f32 %v9200_v29, %v11925_v6  ;;  %v4934_v4 = vpop.f32.mrb[57].mxu1 }
 0x577   : > { %v9876_v53 = vpop.eup %9875  ;;  %v5127_v16 = vadd.f32 1.0, %v9874_v13  ;;  %9887 = vpow2.f32 %v5071_v62  ;;  %v12025_v8 = vadd.f32 %v4934_v4, %v11919_v34  ;;  %v9201_v31 = vpop.f32.mrb[58].mxu1 }
 0x578   : > { %v9878_v9 = vpop.eup %9877  ;;  %v5125_v24 = vadd.f32 1.0, %v9876_v53  ;;  %v5039_v33 = vsub.f32 0.0, %v12022_v25  ;;  %v12029_v2 = vadd.f32 %v9201_v31, %v11928_v50  ;;  %v4937_v60 = vpop.f32.mrb[59].mxu1 }
 0x579   : > { %v9880_v3 = vpop.eup %9879  ;;  %9889 = vrcp.f32 %v5127_v16  ;;  %v5128_v6 = vadd.f32 1.0, %v9878_v9  ;;  %v5037_v30 = vsub.f32 0.0, %v12025_v8  ;;  %v12033_v46 = vadd.f32 %v4937_v60, %v11922_v42  ;;  %v9600_v9 = vld [vmem:[#allocation8 + $0x5b8] sm:$0xff]  }
 0x57a   : > { %9891 = vrcp.f32 %v5125_v24  ;;  %v5126_v34 = vadd.f32 1.0, %v9880_v3  ;;  %v5081_v48 = vmul.f32 1.442695, %v5039_v33  ;;  %v5040_v51 = vsub.f32 0.0, %v12029_v2  ;;  %8893 = vmatpush3.bf16.msra.mxu0 %v9600_v9 }
 0x57b   : > { %9893 = vrcp.f32 %v5128_v6  ;;  %v5077_v11 = vmul.f32 1.442695, %v5037_v30  ;;  %v5038_v50 = vsub.f32 0.0, %v12033_v46 }
 0x57c   : > { %9895 = vrcp.f32 %v5126_v34  ;;  %v5083_v18 = vmul.f32 1.442695, %v5040_v51 }
 0x57d   : > { %9897 = vpow2.f32 %v5081_v48  ;;  %v5079_v32 = vmul.f32 1.442695, %v5038_v50  ;;  %v9204_v62 = vpop.f32.mrb[60].mxu1 }
 0x57e   : > { %v9882_v29 = vpop.eup %9881  ;;  %9899 = vpow2.f32 %v5077_v11  ;;  %v12038_v42 = vadd.f32 %v9204_v62, %v11938_v38  ;;  %v4950_v13 = vpop.f32.mrb[61].mxu1 }
 0x57f   : > { %v9884_v4 = vpop.eup %9883  ;;  %v5131_v53 = vadd.f32 1.0, %v9882_v29  ;;  %9901 = vpow2.f32 %v5083_v18  ;;  %v12041_v16 = vadd.f32 %v4950_v13, %v11931_v15  ;;  %v9205_v31 = vpop.f32.mrb[62].mxu1 }
 0x580   : > { %v9886_v24 = vpop.eup %9885  ;;  %v5129_v33 = vadd.f32 1.0, %v9884_v4  ;;  %9903 = vpow2.f32 %v5079_v32  ;;  %v5043_v60 = vsub.f32 0.0, %v12038_v42  ;;  %v12045_v20 = vadd.f32 %v9205_v31, %v11941_v39  ;;  %v4953_v3 = vpop.f32.mrb[63].mxu1 }
 0x581   : > { %v9888_v38 = vpop.eup %9887  ;;  %9905 = vrcp.f32 %v5131_v53  ;;  %v5132_v6 = vadd.f32 1.0, %v9886_v24  ;;  %v5041_v30 = vsub.f32 0.0, %v12041_v16  ;;  %v12049_v34 = vadd.f32 %v4953_v3, %v11934_v41 }
 0x582   : > { %9907 = vrcp.f32 %v5129_v33  ;;  %v5130_v15 = vadd.f32 1.0, %v9888_v38  ;;  %v5089_v48 = vmul.f32 1.442695, %v5043_v60  ;;  %v5044_v51 = vsub.f32 0.0, %v12045_v20 }
 0x583   : > { %v9890_v11 = vpop.eup %9889  ;;  %9909 = vrcp.f32 %v5132_v6  ;;  %v5085_v50 = vmul.f32 1.442695, %v5041_v30  ;;  %v5042_v39 = vsub.f32 0.0, %v12049_v34 }
 0x584   : > { %v9892_v18 = vpop.eup %9891  ;;  %v12054_v32 = vmul.f32 %v9890_v11, %v11986_v49  ;;  %9911 = vrcp.f32 %v5130_v15  ;;  %v5091_v62 = vmul.f32 1.442695, %v5044_v51  ;;  %v12077_v51 = vld [vmem:[#allocation8 + $0x680] sm:$0xff]  }
 0x585   : > { %v9894_v29 = vpop.eup %9893  ;;  %v5189_v41 = vmul.f32 %v9892_v18, %v11989_v37  ;;  %9913 = vpow2.f32 %v5089_v48  ;;  %v5087_v13 = vmul.f32 1.442695, %v5042_v39  ;;  %v9208_v4 = vpop.f32.mrb[64].mxu1  ;;  %9222 = vmatprep.subr.bf16.mxu0 %v12077_v51 }
 0x586   : > { %v9896_v53 = vpop.eup %9895  ;;  %5223 = vst [vmem:[#allocation2 + $0x31] sm:$0xff] %v12054_v32  ;;  %v12059_v31 = vmul.f32 %v9894_v29, %v11993_v5  ;;  %9915 = vpow2.f32 %v5085_v50  ;;  %v12062_v9 = vadd.f32 %v9208_v4, %v11950_v56  ;;  %v4966_v49 = vpop.f32.mrb[65].mxu1 }
 0x587   : > { %v9898_v24 = vpop.eup %9897  ;;  %5221 = vst [vmem:[#allocation2 + $0x19] sm:$0xff] %v5189_v41  ;;  %v5190_v33 = vmul.f32 %v9896_v53, %v11997_v55  ;;  %9917 = vpow2.f32 %v5091_v62  ;;  %v12066_v37 = vadd.f32 %v4966_v49, %v11944_v23  ;;  %v9209_v60 = vpop.f32.mrb[66].mxu1  ;;  %v12085_v53 = vld [vmem:[#allocation2 + $0x2] sm:$0xff]  ;;  %v12087_v49 = vld [vmem:[#allocation2 + $0xa] sm:$0xff] }
 0x588   : > { %v9900_v3 = vpop.eup %9899  ;;  %5224 = vst [vmem:[#allocation2 + $0x39] sm:$0xff] %v12059_v31  ;;  %v5135_v38 = vadd.f32 1.0, %v9898_v24  ;;  %9919 = vpow2.f32 %v5087_v13  ;;  %v5047_v5 = vsub.f32 0.0, %v12062_v9  ;;  %v12071_v56 = vadd.f32 %v9209_v60, %v11953_v61  ;;  %v4969_v6 = vpop.f32.mrb[67].mxu1 }
 0x589   : > { %v9902_v30 = vpop.eup %9901  ;;  %5222 = vst [vmem:[#allocation2 + $0x21] sm:$0xff] %v5190_v33  ;;  %v5133_v15 = vadd.f32 1.0, %v9900_v3  ;;  %v5045_v55 = vsub.f32 0.0, %v12066_v37  ;;  %v12075_v23 = vadd.f32 %v4969_v6, %v11947_v0  ;;  %v5334_v48 = vpack.c.bf16 %v5190_v33, %v5189_v41 }
 0x58a   : > { %v9904_v11 = vpop.eup %9903  ;;  %9921 = vrcp.f32 %v5135_v38  ;;  %v5136_v50 = vadd.f32 1.0, %v9902_v30  ;;  %v5097_v39 = vmul.f32 1.442695, %v5047_v5  ;;  %v5048_v18 = vsub.f32 0.0, %v12071_v56 }
 0x58b   : > { %v9906_v61 = vpop.eup %9905  ;;  %9923 = vrcp.f32 %v5133_v15  ;;  %v5134_v62 = vadd.f32 1.0, %v9904_v11  ;;  %v5093_v29 = vmul.f32 1.442695, %v5045_v55  ;;  %v5046_v13 = vsub.f32 0.0, %v12075_v23  ;;  %6310 = vmatprep.mubr.bf16.mxu0 %v5334_v48 }
 0x58c   : > { %v9908_v0 = vpop.eup %9907  ;;  %v12083_v41 = vmul.f32 %v9906_v61, %v12006_v57  ;;  %9925 = vrcp.f32 %v5136_v50  ;;  %v5099_v4 = vmul.f32 1.442695, %v5048_v18  ;;  %v5335_v24 = vpack.c.bf16 %v12059_v31, %v12054_v32 }
 0x58d   : > { %v9910_v33 = vpop.eup %9909  ;;  %v12092_v60 = vmul.f32 %v9908_v0, %v12009_v1  ;;  %9927 = vrcp.f32 %v5134_v62  ;;  %v5095_v3 = vmul.f32 1.442695, %v5046_v13  ;;  %v9212_v38 = vpop.f32.mrb[68].mxu1 }
 0x58e   : > { %v9912_v5 = vpop.eup %9911  ;;  %5227 = vst [vmem:[#allocation2 + $0x61] sm:$0xff] %v12083_v41  ;;  %v12096_v57 = vmul.f32 %v9910_v33, %v12013_v7  ;;  %9929 = vpow2.f32 %v5097_v39  ;;  %v12099_v6 = vadd.f32 %v9212_v38, %v11962_v26  ;;  %v4982_v30 = vpop.f32.mrb[69].mxu1  ;;  %v5381_v7 = vpack.c.bf16 %v12087_v49, %v12085_v53 }
 0x58f   : > { %v9914_v15 = vpop.eup %9913  ;;  %5225 = vst [vmem:[#allocation2 + $0x49] sm:$0xff] %v12092_v60  ;;  %v12103_v1 = vmul.f32 %v9912_v5, %v12017_v17  ;;  %9931 = vpow2.f32 %v5093_v29  ;;  %v12106_v55 = vadd.f32 %v4982_v30, %v11956_v44  ;;  %v9213_v48 = vpop.f32.mrb[70].mxu1  ;;  %v5397_v5 = vld [vmem:[#allocation2 + $0x18] sm:$0xff] }
 0x590   : > { %v9916_v11 = vpop.eup %9915  ;;  %5228 = vst [vmem:[#allocation2 + $0x69] sm:$0xff] %v12096_v57  ;;  %v5139_v26 = vadd.f32 1.0, %v9914_v15  ;;  %9933 = vpow2.f32 %v5099_v4  ;;  %v5051_v50 = vsub.f32 0.0, %v12099_v6  ;;  %v12113_v39 = vadd.f32 %v9213_v48, %v11965_v10  ;;  %v4985_v17 = vpop.f32.mrb[71].mxu1  ;;  %v5398_v29 = vld [vmem:[#allocation2 + $0x20] sm:$0xff]  ;;  %v5400_v10 = vld [vmem:[#allocation2 + $0x38] sm:$0xff] }
 0x591   : > { %v9918_v18 = vpop.eup %9917  ;;  %5226 = vst [vmem:[#allocation2 + $0x51] sm:$0xff] %v12103_v1  ;;  %v5137_v44 = vadd.f32 1.0, %v9916_v11  ;;  %9935 = vpow2.f32 %v5095_v3  ;;  %v5049_v61 = vsub.f32 0.0, %v12106_v55  ;;  %v12118_v62 = vadd.f32 %v4985_v17, %v11959_v54  ;;  %v5399_v54 = vld [vmem:[#allocation2 + $0x30] sm:$0xff] }
 0x592   : > { %v9920_v13 = vpop.eup %9919  ;;  %9937 = vrcp.f32 %v5139_v26  ;;  %v5140_v0 = vadd.f32 1.0, %v9918_v18  ;;  %v5105_v4 = vmul.f32 1.442695, %v5051_v50  ;;  %v5052_v53 = vsub.f32 0.0, %v12113_v39  ;;  %v9586_v48 = vld [vmem:[#allocation8 + $0x600] sm:$0xff]  }
 0x593   : > { %9939 = vrcp.f32 %v5137_v44  ;;  %v5138_v49 = vadd.f32 1.0, %v9920_v13  ;;  %v5101_v33 = vmul.f32 1.442695, %v5049_v61  ;;  %v5050_v38 = vsub.f32 0.0, %v12118_v62  ;;  %v9589_v44 = vld [vmem:[#allocation8 + $0x648] sm:$0xff]  }
 0x594   : > { %v9922_v3 = vpop.eup %9921  ;;  %9941 = vrcp.f32 %v5140_v0  ;;  %v5107_v30 = vmul.f32 1.442695, %v5052_v53  ;;  %v5429_v15 = vpack.c.bf16 %v5398_v29, %v5397_v5  ;;  %v12125_v18 = vpack.c.bf16 %v5400_v10, %v5399_v54 }
 0x595   : > { %v9924_v11 = vpop.eup %9923  ;;  %v12123_v26 = vmul.f32 %v9922_v3, %v12022_v25  ;;  %9943 = vrcp.f32 %v5138_v49  ;;  %v5103_v50 = vmul.f32 1.442695, %v5050_v38  ;;  %v9216_v17 = vpop.f32.mrb[72].mxu1  ;;  %v5336_v25 = vpack.c.bf16 %v12103_v1, %v12092_v60  ;;  %v5352_v49 = vld [vmem:[#allocation2 + $0x22] sm:$0xff] }
 0x596   : > { %v9926_v61 = vpop.eup %9925  ;;  %v12128_v13 = vmul.f32 %v9924_v11, %v12025_v8  ;;  %9945 = vpow2.f32 %v5105_v4  ;;  %6463 = vmatprep.mubr.bf16.mxu1 %v5429_v15  ;;  %6311 = vmatmul.mubr.bf16.gmra.mrb[52].mxu0 %v5429_v15  ;;  %v12131_v29 = vadd.f32 %v9216_v17, %v11974_v59  ;;  %v4998_v0 = vpop.f32.mrb[73].mxu1  ;;  %v5351_v4 = vld [vmem:[#allocation2 + $0x1a] sm:$0xff]  ;;  %v9598_v1 = vld [vmem:[#allocation8 + $0x618] sm:$0xff]  }
 0x597   : > { %v9928_v53 = vpop.eup %9927  ;;  %5231 = vst [vmem:[#allocation2 + $0x91] sm:$0xff] %v12123_v26  ;;  %v12137_v10 = vmul.f32 %v9926_v61, %v12029_v2  ;;  %9947 = vpow2.f32 %v5101_v33  ;;  %6464 = vmatmul.mubr.bf16.vlgmr.msra.gmra.mrb[80].mxu1 %v5381_v7  ;;  %6318 = vmatprep.mubr.bf16.mxu0 %v5335_v24  ;;  %v12143_v8 = vadd.f32 %v4998_v0, %v11968_v45  ;;  %v9217_v59 = vpop.f32.mrb[74].mxu1  ;;  %v9590_v45 = vld [vmem:[#allocation8 + $0x608] sm:$0xff]   ;;  %v9593_v3 = vld [vmem:[#allocation8 + $0x650] sm:$0xff]  }
 0x598   : > { %v9930_v38 = vpop.eup %9929  ;;  %5229 = vst [vmem:[#allocation2 + $0x79] sm:$0xff] %v12128_v13  ;;  %v12147_v5 = vmul.f32 %v9928_v53, %v12033_v46  ;;  %9949 = vpow2.f32 %v5107_v30  ;;  %v5055_v2 = vsub.f32 0.0, %v12131_v29  ;;  %6471 = vmatprep.mubr.bf16.mxu1 %v12125_v18  ;;  %v12152_v32 = vadd.f32 %v9217_v59, %v11977_v36  ;;  %v5001_v31 = vpop.f32.mrb[75].mxu1  ;;  %8991 = vmatpush3.bf16.msra.mxu1 %v9586_v48  ;;  %v5402_v48 = vld [vmem:[#allocation2 + $0x50] sm:$0xff]  ;;  %v5401_v53 = vld [vmem:[#allocation2 + $0x48] sm:$0xff] }
 0x599   : > { %v9932_v24 = vpop.eup %9931  ;;  %5232 = vst [vmem:[#allocation2 + $0x99] sm:$0xff] %v12137_v10  ;;  %v5143_v7 = vadd.f32 1.0, %v9930_v38  ;;  %9951 = vpow2.f32 %v5103_v50  ;;  %v5053_v33 = vsub.f32 0.0, %v12143_v8  ;;  %v12157_v46 = vadd.f32 %v5001_v31, %v11971_v19  ;;  %8992 = vmatprep.subr.bf16.mxu1 %v9589_v44  ;;  %v9594_v38 = vld [vmem:[#allocation8 + $0x610] sm:$0xff]  }
 0x59a   : > { %v9934_v30 = vpop.eup %9933  ;;  %5230 = vst [vmem:[#allocation2 + $0x81] sm:$0xff] %v12147_v5  ;;  %v5141_v36 = vadd.f32 1.0, %v9932_v24  ;;  %v5056_v15 = vsub.f32 0.0, %v12152_v32  ;;  %v12161_v54 = vpack.c.bf16 %v5352_v49, %v5351_v4  ;;  %v5113_v50 = vmul.f32 1.442695, %v5055_v2 }
 0x59b   : > { %v9936_v11 = vpop.eup %9935  ;;  %9953 = vrcp.f32 %v5143_v7  ;;  %v5144_v17 = vadd.f32 1.0, %v9934_v30  ;;  %v5054_v61 = vsub.f32 0.0, %v12157_v46  ;;  %v5109_v44 = vmul.f32 1.442695, %v5053_v33  ;;  %v9597_v7 = vld [vmem:[#allocation8 + $0x658] sm:$0xff]  }
 0x59c   : > { %v9938_v0 = vpop.eup %9937  ;;  %9955 = vrcp.f32 %v5141_v36  ;;  %v5142_v19 = vadd.f32 1.0, %v9936_v11  ;;  %v5337_v59 = vpack.c.bf16 %v12096_v57, %v12083_v41  ;;  %8993 = vmatpush3.bf16.msra.mxu1 %v9590_v45  ;;  %v5115_v49 = vmul.f32 1.442695, %v5056_v15  ;;  %v9606_v57 = vld [vmem:[#allocation8 + $0x670] sm:$0xff]  }
 0x59d   : > { %v9940_v31 = vpop.eup %9939  ;;  %v12167_v4 = vmul.f32 %v9938_v0, %v12038_v42  ;;  %9957 = vrcp.f32 %v5144_v17  ;;  %v9220_v24 = vpop.f32.mrb[76].mxu1  ;;  %v12169_v2 = vpack.c.bf16 %v5402_v48, %v5401_v53  ;;  %8994 = vmatprep.subr.bf16.mxu1 %v9593_v3  ;;  %v5111_v36 = vmul.f32 1.442695, %v5054_v61  ;;  %v9601_v0 = vld [vmem:[#allocation8 + $0x660] sm:$0xff]  }
 0x59e   : > { %v9942_v30 = vpop.eup %9941  ;;  %v12172_v33 = vmul.f32 %v9940_v31, %v12041_v16  ;;  %9959 = vrcp.f32 %v5142_v19  ;;  %6319 = vmatmul.mubr.bf16.gmra.mrb[56].mxu0 %v12125_v18  ;;  %v12176_v45 = vadd.f32 %v9220_v24, %v12000_v58  ;;  %v5014_v42 = vpop.f32.mrb[77].mxu1  ;;  %v5338_v58 = vpack.c.bf16 %v12147_v5, %v12128_v13  ;;  %v5353_v53 = vld [vmem:[#allocation2 + $0x32] sm:$0xff]  ;;  %v5357_v5 = vld [vmem:[#allocation2 + $0x62] sm:$0xff] }
 0x59f   : > { %v9944_v11 = vpop.eup %9943  ;;  %5235 = vst [vmem:[#allocation2 + $0xc1] sm:$0xff] %v12167_v4  ;;  %v12180_v15 = vmul.f32 %v9942_v30, %v12045_v20  ;;  %9961 = vpow2.f32 %v5113_v50  ;;  %6472 = vmatmul.mubr.bf16.gmra.mrb[84].mxu1 %v12161_v54  ;;  %6326 = vmatprep.mubr.bf16.mxu0 %v5336_v25  ;;  %v12187_v16 = vadd.f32 %v5014_v42, %v11980_v47  ;;  %v9221_v3 = vpop.f32.mrb[78].mxu1  ;;  %v5404_v42 = vld [vmem:[#allocation2 + $0x68] sm:$0xff] }
 0x5a0   : > { %v9946_v48 = vpop.eup %9945  ;;  %5233 = vst [vmem:[#allocation2 + $0xa9] sm:$0xff] %v12172_v33  ;;  %v12193_v20 = vmul.f32 %v9944_v11, %v12049_v34  ;;  %9963 = vpow2.f32 %v5109_v44  ;;  %v5059_v17 = vsub.f32 0.0, %v12176_v45  ;;  %6479 = vmatprep.mubr.bf16.mxu1 %v12169_v2  ;;  %v12198_v60 = vadd.f32 %v9221_v3, %v12003_v12  ;;  %v5017_v47 = vpop.f32.mrb[79].mxu1  ;;  %8995 = vmatpush3.bf16.msra.mxu1 %v9594_v38  ;;  %v5354_v38 = vld [vmem:[#allocation2 + $0x3a] sm:$0xff]  ;;  %v9602_v11 = vld [vmem:[#allocation8 + $0x620] sm:$0xff]  }
 0x5a1   : > { %v9948_v25 = vpop.eup %9947  ;;  %5236 = vst [vmem:[#allocation2 + $0xc9] sm:$0xff] %v12180_v15  ;;  %v5147_v50 = vadd.f32 1.0, %v9946_v48  ;;  %9965 = vpow2.f32 %v5115_v49  ;;  %v5057_v61 = vsub.f32 0.0, %v12187_v16  ;;  %v12203_v34 = vadd.f32 %v5017_v47, %v11983_v40  ;;  %8996 = vmatprep.subr.bf16.mxu1 %v9597_v7  ;;  %v5403_v47 = vld [vmem:[#allocation2 + $0x60] sm:$0xff] }
 0x5a2   : > { %v9950_v19 = vpop.eup %9949  ;;  %5234 = vst [vmem:[#allocation2 + $0xb1] sm:$0xff] %v12193_v20  ;;  %v5145_v12 = vadd.f32 1.0, %v9948_v25  ;;  %9967 = vpow2.f32 %v5111_v36  ;;  %v5060_v44 = vsub.f32 0.0, %v12198_v60  ;;  %v5121_v49 = vmul.f32 1.442695, %v5059_v17 }
 0x5a3   : > { %v9952_v31 = vpop.eup %9951  ;;  %9969 = vrcp.f32 %v5147_v50  ;;  %v5148_v24 = vadd.f32 1.0, %v9950_v19  ;;  %v5058_v30 = vsub.f32 0.0, %v12203_v34  ;;  %v5117_v7 = vmul.f32 1.442695, %v5057_v61  ;;  %v9603_v50 = vld [vmem:[#allocation8 + $0x668] sm:$0xff]  }
 0x5a4   : > { %9971 = vrcp.f32 %v5145_v12  ;;  %v5146_v40 = vadd.f32 1.0, %v9952_v31  ;;  %8997 = vmatpush3.bf16.msra.mxu1 %v9598_v1  ;;  %v5123_v48 = vmul.f32 1.442695, %v5060_v44  ;;  %v12208_v36 = vpack.c.bf16 %v5354_v38, %v5353_v53  ;;  %v9604_v38 = vld [vmem:[#allocation8 + $0x628] sm:$0xff]  }
 0x5a5   : > { %v9954_v3 = vpop.eup %9953  ;;  %9973 = vrcp.f32 %v5148_v24  ;;  %v5339_v25 = vpack.c.bf16 %v12137_v10, %v12123_v26  ;;  %8998 = vmatprep.subr.bf16.mxu1 %v9601_v0  ;;  %v5119_v12 = vmul.f32 1.442695, %v5058_v30  ;;  %v12216_v1 = vpack.c.bf16 %v5404_v42, %v5403_v47  ;;  %v5355_v24 = vld [vmem:[#allocation2 + $0x4a] sm:$0xff]  ;;  %v5360_v26 = vld [vmem:[#allocation2 + $0x82] sm:$0xff] }
 0x5a6   : > { %v9956_v17 = vpop.eup %9955  ;;  %v12213_v19 = vmul.f32 %v9954_v3, %v12062_v9  ;;  %9975 = vrcp.f32 %v5146_v40  ;;  %6327 = vmatmul.mubr.bf16.gmra.mrb[60].mxu0 %v12169_v2  ;;  %v5340_v9 = vpack.c.bf16 %v12193_v20, %v12172_v33  ;;  %v5406_v40 = vld [vmem:[#allocation2 + $0x80] sm:$0xff] }
 0x5a7   : > { %v9958_v61 = vpop.eup %9957  ;;  %v12219_v44 = vmul.f32 %v9956_v17, %v12066_v37  ;;  %9977 = vpow2.f32 %v5121_v49  ;;  %6480 = vmatmul.mubr.bf16.gmra.mrb[88].mxu1 %v12208_v36  ;;  %6334 = vmatprep.mubr.bf16.mxu0 %v5337_v59  ;;  %v5341_v37 = vpack.c.bf16 %v12180_v15, %v12167_v4  ;;  %v5356_v49 = vld [vmem:[#allocation2 + $0x52] sm:$0xff] }
 0x5a8   : > { %v9960_v0 = vpop.eup %9959  ;;  %5239 = vst [vmem:[#allocation2 + $0xf1] sm:$0xff] %v12213_v19  ;;  %v12229_v53 = vmul.f32 %v9958_v61, %v12071_v56  ;;  %9979 = vpow2.f32 %v5117_v7  ;;  %6487 = vmatprep.mubr.bf16.mxu1 %v12216_v1  ;;  %8999 = vmatpush3.bf16.msra.mxu1 %v9602_v11  ;;  %v12244_v17 = vpack.c.bf16 %v5356_v49, %v5355_v24  ;;  %v9608_v61 = vld [vmem:[#allocation8 + $0x678] sm:$0xff]  }
 0x5a9   : > { %v9962_v31 = vpop.eup %9961  ;;  %5237 = vst [vmem:[#allocation2 + $0xd9] sm:$0xff] %v12219_v44  ;;  %v12236_v41 = vmul.f32 %v9960_v0, %v12075_v23  ;;  %9981 = vpow2.f32 %v5123_v48  ;;  %9000 = vmatprep.subr.bf16.mxu1 %v9603_v50  ;;  %v9607_v48 = vld [vmem:[#allocation8 + $0x630] sm:$0xff]   ;;  %v9609_v24 = vld [vmem:[#allocation8 + $0x638] sm:$0xff]   ;;  %v5410_v10 = vld [vmem:[#allocation2 + $0xb0] sm:$0xff] }
 0x5aa   : > { %v9964_v59 = vpop.eup %9963  ;;  %5240 = vst [vmem:[#allocation2 + $0xf9] sm:$0xff] %v12229_v53  ;;  %v5151_v56 = vadd.f32 1.0, %v9962_v31  ;;  %9983 = vpow2.f32 %v5119_v12  ;;  %v5343_v23 = vpack.c.bf16 %v12229_v53, %v12213_v19  ;;  %v5405_v12 = vld [vmem:[#allocation2 + $0x78] sm:$0xff]  ;;  %v5412_v33 = vld [vmem:[#allocation2 + $0xc8] sm:$0xff] }
 0x5ab   : > { %v9966_v30 = vpop.eup %9965  ;;  %5238 = vst [vmem:[#allocation2 + $0xe1] sm:$0xff] %v12236_v41  ;;  %v5149_v42 = vadd.f32 1.0, %v9964_v59  ;;  %v5342_v7 = vpack.c.bf16 %v12236_v41, %v12219_v44  ;;  %v12250_v59 = vpack.c.bf16 %v5406_v40, %v5405_v12  ;;  %v5407_v12 = vld [vmem:[#allocation2 + $0x90] sm:$0xff]  ;;  %v5365_v4 = vld [vmem:[#allocation2 + $0xc2] sm:$0xff] }
 0x5ac   : > { %v9968_v11 = vpop.eup %9967  ;;  %9985 = vrcp.f32 %v5151_v56  ;;  %v5152_v3 = vadd.f32 1.0, %v9966_v30  ;;  %9001 = vmatpush3.bf16.msra.mxu1 %v9604_v38  ;;  %v5366_v15 = vld [vmem:[#allocation2 + $0xca] sm:$0xff] }
 0x5ad   : > { %v9970_v47 = vpop.eup %9969  ;;  %9987 = vrcp.f32 %v5149_v42  ;;  %v5150_v50 = vadd.f32 1.0, %v9968_v11  ;;  %9002 = vmatprep.subr.bf16.mxu1 %v9606_v57  ;;  %v5408_v11 = vld [vmem:[#allocation2 + $0x98] sm:$0xff] }
 0x5ae   : > { %v9972_v0 = vpop.eup %9971  ;;  %v12247_v31 = vmul.f32 %v9970_v47, %v12099_v6  ;;  %9989 = vrcp.f32 %v5152_v3  ;;  %6335 = vmatmul.mubr.bf16.gmra.mrb[64].mxu0 %v12216_v1 }
 0x5af   : > { %v9974_v56 = vpop.eup %9973  ;;  %v12253_v38 = vmul.f32 %v9972_v0, %v12106_v55  ;;  %9991 = vrcp.f32 %v5150_v50  ;;  %6488 = vmatmul.mubr.bf16.gmra.mrb[92].mxu1 %v12244_v17  ;;  %6342 = vmatprep.mubr.bf16.mxu0 %v5338_v58  ;;  %v5358_v58 = vld [vmem:[#allocation2 + $0x6a] sm:$0xff]  ;;  %v12277_v0 = vpack.c.bf16 %v5408_v11, %v5407_v12 }
 0x5b0   : > { %v9976_v57 = vpop.eup %9975  ;;  %5243 = vst [vmem:[#allocation2 + $0x121] sm:$0xff] %v12247_v31  ;;  %v12261_v6 = vmul.f32 %v9974_v56, %v12113_v39  ;;  %6495 = vmatprep.mubr.bf16.mxu1 %v12250_v59  ;;  %9003 = vmatpush3.bf16.msra.mxu1 %v9607_v48  ;;  %v12274_v50 = vpack.c.bf16 %v5358_v58, %v5357_v5  ;;  %v5359_v5 = vld [vmem:[#allocation2 + $0x7a] sm:$0xff]  ;;  %v5409_v58 = vld [vmem:[#allocation2 + $0xa8] sm:$0xff] }
 0x5b1   : > { %v9978_v49 = vpop.eup %9977  ;;  %5241 = vst [vmem:[#allocation2 + $0x109] sm:$0xff] %v12253_v38  ;;  %v12266_v55 = vmul.f32 %v9976_v57, %v12118_v62  ;;  %9004 = vmatprep.subr.bf16.mxu1 %v9608_v61  ;;  %v5369_v19 = vld [vmem:[#allocation2 + $0xf2] sm:$0xff]  ;;  %v5370_v53 = vld [vmem:[#allocation2 + $0xfa] sm:$0xff] }
 0x5b2   : > { %v9980_v30 = vpop.eup %9979  ;;  %5244 = vst [vmem:[#allocation2 + $0x129] sm:$0xff] %v12261_v6  ;;  %v5155_v13 = vadd.f32 1.0, %v9978_v49  ;;  %v5345_v39 = vpack.c.bf16 %v12261_v6, %v12247_v31  ;;  %v5367_v44 = vld [vmem:[#allocation2 + $0xda] sm:$0xff]  ;;  %v5368_v41 = vld [vmem:[#allocation2 + $0xe2] sm:$0xff] }
 0x5b3   : > { %v9982_v42 = vpop.eup %9981  ;;  %5242 = vst [vmem:[#allocation2 + $0x111] sm:$0xff] %v12266_v55  ;;  %v5153_v40 = vadd.f32 1.0, %v9980_v30  ;;  %v5344_v3 = vpack.c.bf16 %v12266_v55, %v12253_v38 }
 0x5b4   : > { %v9984_v62 = vpop.eup %9983  ;;  %9993 = vrcp.f32 %v5155_v13  ;;  %v5156_v48 = vadd.f32 1.0, %v9982_v42  ;;  %9005 = vmatpush3.bf16.msra.mxu1 %v9609_v24 }
 0x5b5   : > { %9995 = vrcp.f32 %v5153_v40  ;;  %v5154_v47 = vadd.f32 1.0, %v9984_v62 }
 0x5b6   : > { %v9986_v61 = vpop.eup %9985  ;;  %9997 = vrcp.f32 %v5156_v48  ;;  %6343 = vmatmul.mubr.bf16.gmra.mrb[68].mxu0 %v12250_v59 }
 0x5b7   : > { %v9988_v56 = vpop.eup %9987  ;;  %v12280_v57 = vmul.f32 %v9986_v61, %v12131_v29  ;;  %9999 = vrcp.f32 %v5154_v47  ;;  %6496 = vmatmul.mubr.bf16.gmra.mrb[96].mxu1 %v12274_v50  ;;  %6350 = vmatprep.mubr.bf16.mxu0 %v5339_v25  ;;  %v5361_v61 = vld [vmem:[#allocation2 + $0x92] sm:$0xff] }
 0x5b8   : > { %v9990_v24 = vpop.eup %9989  ;;  %v12287_v49 = vmul.f32 %v9988_v56, %v12143_v8  ;;  %6503 = vmatprep.mubr.bf16.mxu1 %v12277_v0  ;;  %v5362_v56 = vld [vmem:[#allocation2 + $0x9a] sm:$0xff] }
 0x5b9   : > { %v9992_v30 = vpop.eup %9991  ;;  %5247 = vst [vmem:[#allocation2 + $0x151] sm:$0xff] %v12280_v57  ;;  %v12292_v13 = vmul.f32 %v9990_v24, %v12152_v32  ;;  %v12304_v32 = vpack.c.bf16 %v5360_v26, %v5359_v5  ;;  %v12326_v20 = vpack.c.bf16 %v5362_v56, %v5361_v61  ;;  %v5364_v24 = vld [vmem:[#allocation2 + $0xb2] sm:$0xff]  ;;  %v5419_v61 = vld [vmem:[#allocation2 + $0x120] sm:$0xff]  ;;  %v5374_v6 = vld [vmem:[#allocation2 + $0x12a] sm:$0xff] }
 0x5ba   : > { %5245 = vst [vmem:[#allocation2 + $0x139] sm:$0xff] %v12287_v49  ;;  %v12296_v29 = vmul.f32 %v9992_v30, %v12157_v46  ;;  %v12307_v46 = vpack.c.bf16 %v5410_v10, %v5409_v58  ;;  %v5414_v30 = vld [vmem:[#allocation2 + $0xe0] sm:$0xff]  ;;  %v5413_v26 = vld [vmem:[#allocation2 + $0xd8] sm:$0xff]  ;;  %v12346_v58 = vpack.c.bf16 %v5366_v15, %v5365_v4  ;;  %v5371_v38 = vld [vmem:[#allocation2 + $0x10a] sm:$0xff] }
 0x5bb   : > { %5248 = vst [vmem:[#allocation2 + $0x159] sm:$0xff] %v12292_v13  ;;  %v5347_v8 = vpack.c.bf16 %v12292_v13, %v12280_v57  ;;  %v12339_v10 = vpack.c.bf16 %v5414_v30, %v5413_v26  ;;  %v5372_v55 = vld [vmem:[#allocation2 + $0x112] sm:$0xff]  ;;  %v5373_v31 = vld [vmem:[#allocation2 + $0x122] sm:$0xff] }
 0x5bc   : > { %5246 = vst [vmem:[#allocation2 + $0x141] sm:$0xff] %v12296_v29  ;;  %v5346_v25 = vpack.c.bf16 %v12296_v29, %v12287_v49 }
 0x5be   : > { %v9994_v42 = vpop.eup %9993  ;;  %6351 = vmatmul.mubr.bf16.gmra.mrb[72].mxu0 %v12277_v0 }
 0x5bf   : > { %v9996_v40 = vpop.eup %9995  ;;  %v5219_v11 = vmul.f32 %v9994_v42, %v12176_v45  ;;  %6504 = vmatmul.mubr.bf16.gmra.mrb[100].mxu1 %v12304_v32  ;;  %6358 = vmatprep.mubr.bf16.mxu0 %v5340_v9  ;;  %v5411_v9 = vld [vmem:[#allocation2 + $0xc0] sm:$0xff]  ;;  %v5415_v42 = vld [vmem:[#allocation2 + $0xf0] sm:$0xff] }
 0x5c0   : > { %v9998_v62 = vpop.eup %9997  ;;  %v12315_v48 = vmul.f32 %v9996_v40, %v12187_v16  ;;  %6511 = vmatprep.mubr.bf16.mxu1 %v12307_v46  ;;  %v5423_v30 = vld [vmem:[#allocation2 + $0x150] sm:$0xff] }
 0x5c1   : > { %v10000_v47 = vpop.eup %9999  ;;  %5251 = vst [vmem:[#allocation2 + $0x181] sm:$0xff] %v5219_v11  ;;  %v5220_v12 = vmul.f32 %v9998_v62, %v12198_v60  ;;  %v12329_v60 = vpack.c.bf16 %v5412_v33, %v5411_v9  ;;  %v12356_v11 = vpack.c.bf16 %v5368_v41, %v5367_v44  ;;  %v5417_v62 = vld [vmem:[#allocation2 + $0x108] sm:$0xff]  ;;  %v12376_v33 = vpack.c.bf16 %v5372_v55, %v5371_v38  ;;  %v5421_v9 = vld [vmem:[#allocation2 + $0x138] sm:$0xff] }
 0x5c2   : > { %5249 = vst [vmem:[#allocation2 + $0x169] sm:$0xff] %v12315_v48  ;;  %v12321_v45 = vmul.f32 %v10000_v47, %v12203_v34  ;;  %v5363_v34 = vld [vmem:[#allocation2 + $0xaa] sm:$0xff]  ;;  %v5377_v13 = vld [vmem:[#allocation2 + $0x152] sm:$0xff] }
 0x5c3   : > { %5252 = vst [vmem:[#allocation2 + $0x189] sm:$0xff] %v5220_v12  ;;  %v12336_v5 = vpack.c.bf16 %v5364_v24, %v5363_v34  ;;  %v12366_v12 = vpack.c.bf16 %v5370_v53, %v5369_v19  ;;  %v12386_v24 = vpack.c.bf16 %v5374_v6, %v5373_v31  ;;  %v5375_v29 = vld [vmem:[#allocation2 + $0x13a] sm:$0xff]  ;;  %v5589_v31 = vld [vmem:[#allocation2 + $0x31] sm:$0xff] }
 0x5c4   : > { %5250 = vst [vmem:[#allocation2 + $0x171] sm:$0xff] %v12321_v45  ;;  %v5348_v16 = vpack.c.bf16 %v12321_v45, %v12315_v48  ;;  %v5446_v48 = vld [vmem:[#allocation2 + $0x21] sm:$0xff]  ;;  %v5445_v38 = vld [vmem:[#allocation2 + $0x19] sm:$0xff] }
 0x5c5   : > { %v5590_v55 = vld [vmem:[#allocation2 + $0x39] sm:$0xff] }
 0x5c6   : > { %6359 = vmatmul.mubr.bf16.gmra.mrb[76].mxu0 %v12307_v46  ;;  %v9610_v6 = vld [vmem:[#allocation8 + $0x688] sm:$0xff]  }
 0x5c7   : > { %6512 = vmatmul.mubr.bf16.gmra.mrb[104].mxu1 %v12326_v20  ;;  %6366 = vmatprep.mubr.bf16.mxu0 %v5341_v37  ;;  %v5416_v37 = vld [vmem:[#allocation2 + $0xf8] sm:$0xff] }
 0x5c8   : > { %6519 = vmatprep.mubr.bf16.mxu1 %v12329_v60  ;;  %v12349_v40 = vpack.c.bf16 %v5416_v37, %v5415_v42 }
 0x5ca   : > { %v5428_v19 = vld [vmem:[#allocation2 + $0x188] sm:$0xff] }
 0x5cb   : > { %v5426_v15 = vld [vmem:[#allocation2 + $0x170] sm:$0xff] }
 0x5cc   : > { %v5379_v45 = vld [vmem:[#allocation2 + $0x16a] sm:$0xff] }
 0x5ce   : > { %6367 = vmatmul.mubr.bf16.gmra.mrb[80].mxu0 %v12329_v60 }
 0x5cf   : > { %6520 = vmatmul.mubr.bf16.gmra.mrb[108].mxu1 %v12336_v5  ;;  %6374 = vmatprep.mubr.bf16.mxu0 %v5342_v7  ;;  %v5418_v7 = vld [vmem:[#allocation2 + $0x110] sm:$0xff] }
 0x5d0   : > { %6527 = vmatprep.mubr.bf16.mxu1 %v12339_v10  ;;  %v12359_v47 = vpack.c.bf16 %v5418_v7, %v5417_v62  ;;  %v5425_v7 = vld [vmem:[#allocation2 + $0x168] sm:$0xff] }
 0x5d1   : > { %v12403_v57 = vpack.c.bf16 %v5426_v15, %v5425_v7  ;;  %v9614_v15 = vld [vmem:[#allocation8 + $0x6a8] sm:$0xff]   ;;  %v9616_v7 = vld [vmem:[#allocation8 + $0x6b8] sm:$0xff]  }
 0x5d6   : > { %6375 = vmatmul.mubr.bf16.gmra.mrb[84].mxu0 %v12339_v10 }
 0x5d7   : > { %6528 = vmatmul.mubr.bf16.gmra.mrb[112].mxu1 %v12346_v58  ;;  %6382 = vmatprep.mubr.bf16.mxu0 %v5343_v23  ;;  %v5420_v23 = vld [vmem:[#allocation2 + $0x128] sm:$0xff] }
 0x5d8   : > { %6535 = vmatprep.mubr.bf16.mxu1 %v12349_v40  ;;  %v12369_v56 = vpack.c.bf16 %v5420_v23, %v5419_v61  ;;  %v5427_v23 = vld [vmem:[#allocation2 + $0x180] sm:$0xff] }
 0x5d9   : > { %v12413_v61 = vpack.c.bf16 %v5428_v19, %v5427_v23  ;;  %v5600_v19 = vld [vmem:[#allocation2 + $0xb1] sm:$0xff]  ;;  %v5599_v23 = vld [vmem:[#allocation2 + $0xa9] sm:$0xff] }
 0x5de   : > { %6383 = vmatmul.mubr.bf16.gmra.mrb[88].mxu0 %v12349_v40 }
 0x5df   : > { %6536 = vmatmul.mubr.bf16.gmra.mrb[116].mxu1 %v12356_v11  ;;  %6390 = vmatprep.mubr.bf16.mxu0 %v5344_v3  ;;  %v5422_v3 = vld [vmem:[#allocation2 + $0x140] sm:$0xff] }
 0x5e0   : > { %6543 = vmatprep.mubr.bf16.mxu1 %v12359_v47  ;;  %v12379_v34 = vpack.c.bf16 %v5422_v3, %v5421_v9  ;;  %v5477_v3 = vpack.c.bf16 %v5446_v48, %v5445_v38  ;;  %v5626_v48 = vpack.c.bf16 %v5600_v19, %v5599_v23 }
 0x5e6   : > { %6391 = vmatmul.mubr.bf16.gmra.mrb[92].mxu0 %v12359_v47 }
 0x5e7   : > { %6544 = vmatmul.mubr.bf16.gmra.mrb[120].mxu1 %v12366_v12  ;;  %6398 = vmatprep.mubr.bf16.mxu0 %v5345_v39  ;;  %v5424_v39 = vld [vmem:[#allocation2 + $0x158] sm:$0xff] }
 0x5e8   : > { %6551 = vmatprep.mubr.bf16.mxu1 %v12369_v56  ;;  %v12389_v26 = vpack.c.bf16 %v5424_v39, %v5423_v30  ;;  %v5621_v39 = vpack.c.bf16 %v5590_v55, %v5589_v31  ;;  %v5592_v30 = vld [vmem:[#allocation2 + $0x51] sm:$0xff] }
 0x5ee   : > { %6399 = vmatmul.mubr.bf16.gmra.mrb[96].mxu0 %v12369_v56 }
 0x5ef   : > { %6552 = vmatmul.mubr.bf16.gmra.mrb[124].mxu1 %v12376_v33  ;;  %6406 = vmatprep.mubr.bf16.mxu0 %v5346_v25  ;;  %v5376_v25 = vld [vmem:[#allocation2 + $0x142] sm:$0xff] }
 0x5f0   : > { %6559 = vmatprep.mubr.bf16.mxu1 %v12379_v34  ;;  %v12398_v41 = vpack.c.bf16 %v5376_v25, %v5375_v29  ;;  %v9612_v29 = vld [vmem:[#allocation8 + $0x698] sm:$0xff]  }
 0x5f5   : > { %v8670_v49 = vpop.f32.mrb[48].mxu0 }
 0x5f6   : > { %6407 = vmatmul.mubr.bf16.gmra.mrb[100].mxu0 %v12379_v34  ;;  %v8671_v4 = vpop.f32.mrb[49].mxu0 }
 0x5f7   : > { %6560 = vmatmul.mubr.bf16.gmra.mrb[128].mxu1 %v12386_v24  ;;  %6414 = vmatprep.mubr.bf16.mxu0 %v5347_v8  ;;  %v12396_v37 = vadd.f32 %v8671_v4, %v8670_v49  ;;  %v8673_v42 = vpop.f32.mrb[50].mxu0  ;;  %v5378_v8 = vld [vmem:[#allocation2 + $0x15a] sm:$0xff]  ;;  %v5591_v49 = vld [vmem:[#allocation2 + $0x49] sm:$0xff] }
 0x5f8   : > { %6567 = vmatprep.mubr.bf16.mxu1 %v12389_v26  ;;  %v8674_v44 = vpop.f32.mrb[51].mxu0  ;;  %v12410_v53 = vpack.c.bf16 %v5378_v8, %v5377_v13  ;;  %v5622_v25 = vpack.c.bf16 %v5592_v30, %v5591_v49  ;;  %v5594_v4 = vld [vmem:[#allocation2 + $0x69] sm:$0xff]  ;;  %v5614_v30 = vld [vmem:[#allocation2 + $0x159] sm:$0xff] }
 0x5f9   : > { %v12400_v62 = vadd.f32 %v8674_v44, %v8673_v42  ;;  %v5595_v44 = vld [vmem:[#allocation2 + $0x79] sm:$0xff] }
 0x5fe   : > { %6415 = vmatmul.mubr.bf16.gmra.mrb[104].mxu0 %v12389_v26 }
 0x5ff   : > { %6568 = vmatmul.mubr.bf16.gmra.mrb[132].mxu1 %v12398_v41  ;;  %6422 = vmatprep.mubr.bf16.mxu0 %v5348_v16  ;;  %v5380_v16 = vld [vmem:[#allocation2 + $0x172] sm:$0xff] }
 0x600   : > { %6575 = vmatprep.mubr.bf16.mxu1 %v12403_v57  ;;  %v12418_v9 = vpack.c.bf16 %v5380_v16, %v5379_v45 }
 0x606   : > { %6423 = vmatmul.mubr.bf16.gmra.mrb[108].mxu0 %v12403_v57 }
 0x607   : > { %6576 = vmatmul.mubr.bf16.gmra.mrb[136].mxu1 %v12410_v53  ;;  %6624 = vmatprep.mubr.bf16.mxu0 %v12161_v54  ;;  %v9611_v54 = vld [vmem:[#allocation8 + $0x690] sm:$0xff]  }
 0x608   : > { %6583 = vmatprep.mubr.bf16.mxu1 %v12413_v61 }
 0x60e   : > { %6625 = vmatmul.mubr.bf16.vlgmr.msra.gmra.mrb[112].mxu0 %v5477_v3 }
 0x60f   : > { %6584 = vmatmul.mubr.bf16.gmra.mrb[140].mxu1 %v12418_v9  ;;  %9223 = vmatpush3.bf16.msra.mxu0 %v12077_v51  ;;  %v9613_v51 = vld [vmem:[#allocation8 + $0x6a0] sm:$0xff]  }
 0x610   : > { %6632 = vmatprep.mubr.bf16.mxu0 %v12208_v36  ;;  %6785 = vmatprep.mubr.bf16.mxu1 %v5621_v39  ;;  %v5593_v36 = vld [vmem:[#allocation2 + $0x61] sm:$0xff] }
 0x611   : > { %9224 = vmatprep.subr.bf16.mxu0 %v9610_v6  ;;  %v5623_v42 = vpack.c.bf16 %v5594_v4, %v5593_v36  ;;  %v5613_v4 = vld [vmem:[#allocation2 + $0x151] sm:$0xff] }
 0x613   : > { %9225 = vmatpush3.bf16.msra.mxu0 %v9610_v6 }
 0x614   : > { %9226 = vmatprep.subr.bf16.mxu0 %v9611_v54 }
 0x616   : > { %6633 = vmatmul.mubr.bf16.gmra.mrb[116].mxu0 %v5621_v39 }
 0x617   : > { %6786 = vmatmul.mubr.bf16.vlgmr.msra.gmra.mrb[144].mxu1 %v12125_v18  ;;  %6640 = vmatprep.mubr.bf16.mxu0 %v12244_v17  ;;  %v9615_v18 = vld [vmem:[#allocation8 + $0x6b0] sm:$0xff]  }
 0x618   : > { %6793 = vmatprep.mubr.bf16.mxu1 %v5622_v25  ;;  %9227 = vmatpush3.bf16.msra.mxu0 %v9611_v54  ;;  %v5596_v17 = vld [vmem:[#allocation2 + $0x81] sm:$0xff] }
 0x619   : > { %9228 = vmatprep.subr.bf16.mxu0 %v9612_v29  ;;  %v5624_v13 = vpack.c.bf16 %v5596_v17, %v5595_v44 }
 0x61c   : > { %9229 = vmatpush3.bf16.msra.mxu0 %v9612_v29 }
 0x61d   : > { %9230 = vmatprep.subr.bf16.mxu0 %v9613_v51 }
 0x61e   : > { %6641 = vmatmul.mubr.bf16.gmra.mrb[120].mxu0 %v5622_v25 }
 0x61f   : > { %6794 = vmatmul.mubr.bf16.gmra.mrb[148].mxu1 %v12169_v2  ;;  %6648 = vmatprep.mubr.bf16.mxu0 %v12274_v50  ;;  %v5598_v2 = vld [vmem:[#allocation2 + $0x99] sm:$0xff]  ;;  %v5597_v50 = vld [vmem:[#allocation2 + $0x91] sm:$0xff] }
 0x620   : > { %6801 = vmatprep.mubr.bf16.mxu1 %v5623_v42  ;;  %9231 = vmatpush3.bf16.msra.mxu0 %v9613_v51  ;;  %v5625_v8 = vpack.c.bf16 %v5598_v2, %v5597_v50 }
 0x621   : > { %9232 = vmatprep.subr.bf16.mxu0 %v9614_v15 }
 0x624   : > { %9233 = vmatpush3.bf16.msra.mxu0 %v9614_v15 }
 0x625   : > { %9234 = vmatprep.subr.bf16.mxu0 %v9615_v18 }
 0x626   : > { %6649 = vmatmul.mubr.bf16.gmra.mrb[124].mxu0 %v5623_v42 }
 0x627   : > { %6802 = vmatmul.mubr.bf16.gmra.mrb[152].mxu1 %v12216_v1  ;;  %6656 = vmatprep.mubr.bf16.mxu0 %v12304_v32  ;;  %v5602_v1 = vld [vmem:[#allocation2 + $0xc9] sm:$0xff]  ;;  %v5601_v32 = vld [vmem:[#allocation2 + $0xc1] sm:$0xff] }
 0x628   : > { %6809 = vmatprep.mubr.bf16.mxu1 %v5624_v13  ;;  %9235 = vmatpush3.bf16.msra.mxu0 %v9615_v18  ;;  %v5627_v45 = vpack.c.bf16 %v5602_v1, %v5601_v32  ;;  %v5633_v18 = vpack.c.bf16 %v5614_v30, %v5613_v4  ;;  %v5637_v4 = vld [vmem:[#allocation2 + $0x32] sm:$0xff] }
 0x629   : > { %9236 = vmatprep.subr.bf16.mxu0 %v9616_v7 }
 0x62c   : > { %9237 = vmatpush3.bf16.msra.mxu0 %v9616_v7 }
 0x62e   : > { %6657 = vmatmul.mubr.bf16.gmra.mrb[128].mxu0 %v5624_v13 }
 0x62f   : > { %6810 = vmatmul.mubr.bf16.gmra.mrb[156].mxu1 %v12250_v59  ;;  %6664 = vmatprep.mubr.bf16.mxu0 %v12326_v20  ;;  %v5604_v59 = vld [vmem:[#allocation2 + $0xe1] sm:$0xff]  ;;  %v5603_v20 = vld [vmem:[#allocation2 + $0xd9] sm:$0xff] }
 0x630   : > { %6817 = vmatprep.mubr.bf16.mxu1 %v5625_v8  ;;  %v5628_v16 = vpack.c.bf16 %v5604_v59, %v5603_v20 }
 0x636   : > { %6665 = vmatmul.mubr.bf16.gmra.mrb[132].mxu0 %v5625_v8  ;;  %v5616_v8 = vld [vmem:[#allocation2 + $0x171] sm:$0xff] }
 0x637   : > { %6818 = vmatmul.mubr.bf16.gmra.mrb[160].mxu1 %v12277_v0  ;;  %6672 = vmatprep.mubr.bf16.mxu0 %v12336_v5  ;;  %v5606_v0 = vld [vmem:[#allocation2 + $0xf9] sm:$0xff]  ;;  %v5605_v5 = vld [vmem:[#allocation2 + $0xf1] sm:$0xff] }
 0x638   : > { %6825 = vmatprep.mubr.bf16.mxu1 %v5626_v48  ;;  %v5629_v38 = vpack.c.bf16 %v5606_v0, %v5605_v5 }
 0x63e   : > { %6673 = vmatmul.mubr.bf16.gmra.mrb[136].mxu0 %v5626_v48 }
 0x63f   : > { %6826 = vmatmul.mubr.bf16.gmra.mrb[164].mxu1 %v12307_v46  ;;  %6680 = vmatprep.mubr.bf16.mxu0 %v12346_v58  ;;  %v5608_v46 = vld [vmem:[#allocation2 + $0x111] sm:$0xff]  ;;  %v5607_v58 = vld [vmem:[#allocation2 + $0x109] sm:$0xff] }
 0x640   : > { %6833 = vmatprep.mubr.bf16.mxu1 %v5627_v45  ;;  %v5630_v55 = vpack.c.bf16 %v5608_v46, %v5607_v58  ;;  %v5523_v46 = vld [vmem:[#allocation2 + $0x182] sm:$0xff]  ;;  %v5524_v58 = vld [vmem:[#allocation2 + $0x18a] sm:$0xff] }
 0x646   : > { %6681 = vmatmul.mubr.bf16.gmra.mrb[140].mxu0 %v5627_v45 }
 0x647   : > { %6834 = vmatmul.mubr.bf16.gmra.mrb[168].mxu1 %v12329_v60  ;;  %6688 = vmatprep.mubr.bf16.mxu0 %v12356_v11  ;;  %v5610_v60 = vld [vmem:[#allocation2 + $0x129] sm:$0xff]  ;;  %v5609_v11 = vld [vmem:[#allocation2 + $0x121] sm:$0xff] }
 0x648   : > { %6841 = vmatprep.mubr.bf16.mxu1 %v5628_v16  ;;  %v5631_v3 = vpack.c.bf16 %v5610_v60, %v5609_v11 }
 0x64e   : > { %6689 = vmatmul.mubr.bf16.gmra.mrb[144].mxu0 %v5628_v16 }
 0x64f   : > { %6842 = vmatmul.mubr.bf16.gmra.mrb[172].mxu1 %v12339_v10  ;;  %6696 = vmatprep.mubr.bf16.mxu0 %v12366_v12  ;;  %v5612_v10 = vld [vmem:[#allocation2 + $0x141] sm:$0xff]  ;;  %v5611_v12 = vld [vmem:[#allocation2 + $0x139] sm:$0xff] }
 0x650   : > { %6849 = vmatprep.mubr.bf16.mxu1 %v5629_v38  ;;  %v5632_v31 = vpack.c.bf16 %v5612_v10, %v5611_v12 }
 0x656   : > { %6697 = vmatmul.mubr.bf16.gmra.mrb[148].mxu0 %v5629_v38 }
 0x657   : > { %6850 = vmatmul.mubr.bf16.gmra.mrb[176].mxu1 %v12349_v40  ;;  %6704 = vmatprep.mubr.bf16.mxu0 %v12376_v33  ;;  %v12448_v40 = vld [vmem:[%s13245_s4 + $0x2] ss:$0 sm:$0xff] }
 0x658   : > { %6857 = vmatprep.mubr.bf16.mxu1 %v5630_v55  ;;  %v6305_v49 = vadd.f32 %v12396_v37, %v12448_v40  ;;  %v6308_v36 = vadd.f32 %v12400_v62, %v12448_v40 }
 0x65e   : > { %6705 = vmatmul.mubr.bf16.gmra.mrb[152].mxu0 %v5630_v55 }
 0x65f   : > { %6858 = vmatmul.mubr.bf16.gmra.mrb[180].mxu1 %v12359_v47  ;;  %6712 = vmatprep.mubr.bf16.mxu0 %v12386_v24 }
 0x660   : > { %6865 = vmatprep.mubr.bf16.mxu1 %v5631_v3 }
 0x666   : > { %6713 = vmatmul.mubr.bf16.gmra.mrb[156].mxu0 %v5631_v3  ;;  %v5618_v3 = vld [vmem:[#allocation2 + $0x189] sm:$0xff] }
 0x667   : > { %6866 = vmatmul.mubr.bf16.gmra.mrb[184].mxu1 %v12369_v56  ;;  %6720 = vmatprep.mubr.bf16.mxu0 %v12398_v41 }
 0x668   : > { %6873 = vmatprep.mubr.bf16.mxu1 %v5632_v31 }
 0x669   : > { %v8676_v33 = vpop.f32.mrb[52].mxu0 }
 0x66a   : > { %v8782_v6 = vpop.f32.mrb[80].mxu1  ;;  %v8677_v47 = vpop.f32.mrb[53].mxu0 }
 0x66b   : > { %v8678_v39 = vadd.f32 %v8677_v47, %v8676_v33  ;;  %v8783_v24 = vpop.f32.mrb[81].mxu1  ;;  %v8679_v54 = vpop.f32.mrb[54].mxu0  ;;  %v5617_v47 = vld [vmem:[#allocation2 + $0x181] sm:$0xff] }
 0x66c   : > { %v8784_v29 = vadd.f32 %v8783_v24, %v8782_v6  ;;  %v8785_v56 = vpop.f32.mrb[82].mxu1  ;;  %v8680_v25 = vpop.f32.mrb[55].mxu0  ;;  %v5635_v30 = vpack.c.bf16 %v5618_v3, %v5617_v47 }
 0x66d   : > { %v8681_v41 = vadd.f32 %v8680_v25, %v8679_v54  ;;  %v8786_v51 = vpop.f32.mrb[83].mxu1  ;;  %v6313_v62 = vadd.f32 %v8678_v39, %v12448_v40  ;;  %v5620_v25 = vld [vmem:[#allocation2 + $0x1a1] sm:$0xff] }
 0x66e   : > { %v12454_v15 = vadd.f32 %v8784_v29, %v6305_v49  ;;  %v8787_v42 = vadd.f32 %v8786_v51, %v8785_v56  ;;  %6721 = vmatmul.mubr.bf16.gmra.mrb[160].mxu0 %v5632_v31  ;;  %v5619_v56 = vld [vmem:[#allocation2 + $0x199] sm:$0xff] }
 0x66f   : > { %6874 = vmatmul.mubr.bf16.gmra.mrb[188].mxu1 %v12379_v34  ;;  %6728 = vmatprep.mubr.bf16.mxu0 %v12410_v53  ;;  %v5615_v34 = vld [vmem:[#allocation2 + $0x169] sm:$0xff]  ;;  %v6316_v53 = vadd.f32 %v8681_v41, %v12448_v40 }
 0x670   : > { %v12458_v17 = vadd.f32 %v8787_v42, %v6308_v36  ;;  %6881 = vmatprep.mubr.bf16.mxu1 %v5633_v18  ;;  %v5634_v20 = vpack.c.bf16 %v5616_v8, %v5615_v34  ;;  %v5638_v36 = vld [vmem:[#allocation2 + $0x3a] sm:$0xff] }
 0x671   : > { %v8682_v37 = vpop.f32.mrb[56].mxu0 }
 0x672   : > { %v8788_v44 = vpop.f32.mrb[84].mxu1  ;;  %v8683_v7 = vpop.f32.mrb[57].mxu0 }
 0x673   : > { %v8684_v13 = vadd.f32 %v8683_v7, %v8682_v37  ;;  %v8789_v2 = vpop.f32.mrb[85].mxu1  ;;  %v8685_v50 = vpop.f32.mrb[58].mxu0 }
 0x674   : > { %v8790_v19 = vadd.f32 %v8789_v2, %v8788_v44  ;;  %v8791_v23 = vpop.f32.mrb[86].mxu1  ;;  %v8686_v48 = vpop.f32.mrb[59].mxu0  ;;  %v5636_v2 = vpack.c.bf16 %v5620_v25, %v5619_v56  ;;  %v5643_v56 = vld [vmem:[#allocation2 + $0x7a] sm:$0xff]  ;;  %v5644_v25 = vld [vmem:[#allocation2 + $0x82] sm:$0xff] }
 0x675   : > { %v8687_v1 = vadd.f32 %v8686_v48, %v8685_v50  ;;  %v8792_v32 = vpop.f32.mrb[87].mxu1  ;;  %v6321_v10 = vadd.f32 %v8684_v13, %v12448_v40 }
 0x676   : > { %v12462_v45 = vadd.f32 %v8790_v19, %v6313_v62  ;;  %v8793_v59 = vadd.f32 %v8792_v32, %v8791_v23  ;;  %6729 = vmatmul.mubr.bf16.gmra.mrb[164].mxu0 %v5633_v18  ;;  %v5669_v62 = vpack.c.bf16 %v5638_v36, %v5637_v4  ;;  %v5571_v32 = vld [vmem:[#allocation2 + $0x198] sm:$0xff] }
 0x677   : > { %6882 = vmatmul.mubr.bf16.gmra.mrb[192].mxu1 %v12389_v26  ;;  %6736 = vmatprep.mubr.bf16.mxu0 %v12418_v9  ;;  %v12469_v9 = vpack.c.bf16 %v5524_v58, %v5523_v46  ;;  %v6324_v39 = vadd.f32 %v8687_v1, %v12448_v40  ;;  %v5645_v4 = vld [vmem:[#allocation2 + $0x92] sm:$0xff]  ;;  %v5646_v36 = vld [vmem:[#allocation2 + $0x9a] sm:$0xff] }
 0x678   : > { %v12466_v16 = vadd.f32 %v8793_v59, %v6316_v53  ;;  %6889 = vmatprep.mubr.bf16.mxu1 %v5634_v20  ;;  %v5639_v53 = vld [vmem:[#allocation2 + $0x4a] sm:$0xff]  ;;  %v5640_v59 = vld [vmem:[#allocation2 + $0x52] sm:$0xff] }
 0x679   : > { %v8688_v0 = vpop.f32.mrb[60].mxu0 }
 0x67a   : > { %v8794_v5 = vpop.f32.mrb[88].mxu1  ;;  %v8689_v38 = vpop.f32.mrb[61].mxu0 }
 0x67b   : > { %v8690_v55 = vadd.f32 %v8689_v38, %v8688_v0  ;;  %v8795_v60 = vpop.f32.mrb[89].mxu1  ;;  %v8691_v11 = vpop.f32.mrb[62].mxu0  ;;  %v5642_v38 = vld [vmem:[#allocation2 + $0x6a] sm:$0xff] }
 0x67c   : > { %v8796_v12 = vadd.f32 %v8795_v60, %v8794_v5  ;;  %v8797_v31 = vpop.f32.mrb[90].mxu1  ;;  %v8692_v33 = vpop.f32.mrb[63].mxu0  ;;  %v5641_v5 = vld [vmem:[#allocation2 + $0x62] sm:$0xff] }
 0x67d   : > { %v8693_v26 = vadd.f32 %v8692_v33, %v8691_v11  ;;  %v8798_v6 = vpop.f32.mrb[91].mxu1  ;;  %v6329_v44 = vadd.f32 %v8690_v55, %v12448_v40  ;;  %v10259_v60 = vld [vmem:[#allocation2 + $0x8] sm:$0xff] }
 0x67e   : > { %v12472_v24 = vadd.f32 %v8796_v12, %v6321_v10  ;;  %v8799_v54 = vadd.f32 %v8798_v6, %v8797_v31  ;;  %6737 = vmatmul.mubr.bf16.gmra.mrb[168].mxu0 %v5634_v20  ;;  %v5588_v11 = vpack.c.bf16 %v10259_v60, %v5571_v32  ;;  %v5670_v31 = vpack.c.bf16 %v5640_v59, %v5639_v53  ;;  %v5647_v59 = vld [vmem:[#allocation2 + $0xaa] sm:$0xff] }
 0x67f   : > { %6890 = vmatmul.mubr.bf16.gmra.mrb[196].mxu1 %v12403_v57  ;;  %6744 = vmatprep.mubr.bf16.mxu0 %v12469_v9  ;;  %v6332_v19 = vadd.f32 %v8693_v26, %v12448_v40  ;;  %v5671_v6 = vpack.c.bf16 %v5642_v38, %v5641_v5  ;;  %v5649_v38 = vld [vmem:[#allocation2 + $0xc2] sm:$0xff] }
 0x680   : > { %v12476_v49 = vadd.f32 %v8799_v54, %v6324_v39  ;;  %6897 = vmatprep.mubr.bf16.mxu1 %v5635_v30 }
 0x681   : > { %v8694_v29 = vpop.f32.mrb[64].mxu0 }
 0x682   : > { %v8800_v41 = vpop.f32.mrb[92].mxu1  ;;  %v8695_v51 = vpop.f32.mrb[65].mxu0 }
 0x683   : > { %v8696_v42 = vadd.f32 %v8695_v51, %v8694_v29  ;;  %v8801_v18 = vpop.f32.mrb[93].mxu1  ;;  %v8697_v37 = vpop.f32.mrb[66].mxu0 }
 0x684   : > { %v8802_v7 = vadd.f32 %v8801_v18, %v8800_v41  ;;  %v8803_v13 = vpop.f32.mrb[94].mxu1  ;;  %v8698_v57 = vpop.f32.mrb[67].mxu0 }
 0x685   : > { %v8699_v50 = vadd.f32 %v8698_v57, %v8697_v37  ;;  %v8804_v8 = vpop.f32.mrb[95].mxu1  ;;  %v6337_v3 = vadd.f32 %v8696_v42, %v12448_v40 }
 0x686   : > { %v12480_v23 = vadd.f32 %v8802_v7, %v6329_v44  ;;  %v8805_v48 = vadd.f32 %v8804_v8, %v8803_v13  ;;  %6745 = vmatmul.mubr.bf16.gmra.mrb[172].mxu0 %v5635_v30 }
 0x687   : > { %6898 = vmatmul.mubr.bf16.gmra.mrb[200].mxu1 %v12413_v61  ;;  %9238 = vmatprep.mubr.bf16.mxu0 %v5669_v62  ;;  %v6340_v47 = vadd.f32 %v8699_v50, %v12448_v40  ;;  %v5673_v62 = vpack.c.bf16 %v5646_v36, %v5645_v4  ;;  %v5653_v36 = vld [vmem:[#allocation2 + $0xf2] sm:$0xff] }
 0x688   : > { %v12483_v1 = vadd.f32 %v8805_v48, %v6332_v19  ;;  %6905 = vmatprep.mubr.bf16.mxu1 %v5636_v2  ;;  %v5672_v2 = vpack.c.bf16 %v5644_v25, %v5643_v56  ;;  %v5651_v25 = vld [vmem:[#allocation2 + $0xda] sm:$0xff] }
 0x689   : > { %v8700_v34 = vpop.f32.mrb[68].mxu0 }
 0x68a   : > { %v8806_v20 = vpop.f32.mrb[96].mxu1  ;;  %v8701_v0 = vpop.f32.mrb[69].mxu0 }
 0x68b   : > { %v8702_v46 = vadd.f32 %v8701_v0, %v8700_v34  ;;  %v8807_v58 = vpop.f32.mrb[97].mxu1  ;;  %v8703_v55 = vpop.f32.mrb[70].mxu0 }
 0x68c   : > { %v8808_v61 = vadd.f32 %v8807_v58, %v8806_v20  ;;  %v8809_v10 = vpop.f32.mrb[98].mxu1  ;;  %v8704_v12 = vpop.f32.mrb[71].mxu0  ;;  %v5648_v20 = vld [vmem:[#allocation2 + $0xb2] sm:$0xff] }
 0x68d   : > { %v8705_v33 = vadd.f32 %v8704_v12, %v8703_v55  ;;  %v8810_v26 = vpop.f32.mrb[99].mxu1  ;;  %v6345_v44 = vadd.f32 %v8702_v46, %v12448_v40  ;;  %v5650_v46 = vld [vmem:[#allocation2 + $0xca] sm:$0xff]  ;;  %v5674_v12 = vpack.c.bf16 %v5648_v20, %v5647_v59 }
 0x68e   : > { %v12487_v39 = vadd.f32 %v8808_v61, %v6337_v3  ;;  %v8811_v54 = vadd.f32 %v8810_v26, %v8809_v10  ;;  %9239 = vmatmul.mubr.bf16.vlgmr.msra.gmra.mrb[176].mxu0 %v5670_v31  ;;  %v5675_v26 = vpack.c.bf16 %v5650_v46, %v5649_v38  ;;  %v5656_v38 = vld [vmem:[#allocation2 + $0x112] sm:$0xff] }
 0x68f   : > { %6906 = vmatmul.mubr.bf16.gmra.mrb[204].mxu1 %v5588_v11  ;;  %9242 = vmatprep.mubr.bf16.mxu0 %v5671_v6  ;;  %v6348_v19 = vadd.f32 %v8705_v33, %v12448_v40 }
 0x690   : > { %v12489_v30 = vadd.f32 %v8811_v54, %v6340_v47 }
 0x691   : > { %v8706_v29 = vpop.f32.mrb[72].mxu0 }
 0x692   : > { %v8812_v41 = vpop.f32.mrb[100].mxu1  ;;  %v8707_v51 = vpop.f32.mrb[73].mxu0 }
 0x693   : > { %v8708_v42 = vadd.f32 %v8707_v51, %v8706_v29  ;;  %v8813_v18 = vpop.f32.mrb[101].mxu1  ;;  %v8709_v37 = vpop.f32.mrb[74].mxu0 }
 0x694   : > { %v8814_v7 = vadd.f32 %v8813_v18, %v8812_v41  ;;  %v8815_v13 = vpop.f32.mrb[102].mxu1  ;;  %v8710_v57 = vpop.f32.mrb[75].mxu0  ;;  %v5652_v41 = vld [vmem:[#allocation2 + $0xe2] sm:$0xff] }
 0x695   : > { %v8711_v50 = vadd.f32 %v8710_v57, %v8709_v37  ;;  %v8816_v8 = vpop.f32.mrb[103].mxu1  ;;  %v6353_v11 = vadd.f32 %v8708_v42, %v12448_v40  ;;  %v5654_v42 = vld [vmem:[#allocation2 + $0xfa] sm:$0xff] }
 0x696   : > { %v12493_v48 = vadd.f32 %v8814_v7, %v6345_v44  ;;  %v8817_v32 = vadd.f32 %v8816_v8, %v8815_v13  ;;  %9243 = vmatmul.mubr.bf16.gmra.mrb[180].mxu0 %v5672_v2 }
 0x697   : > { %9246 = vmatprep.mubr.bf16.mxu0 %v5673_v62  ;;  %v6356_v6 = vadd.f32 %v8711_v50, %v12448_v40  ;;  %v5676_v50 = vpack.c.bf16 %v5652_v41, %v5651_v25 }
 0x698   : > { %v12495_v34 = vadd.f32 %v8817_v32, %v6348_v19  ;;  %v5677_v19 = vpack.c.bf16 %v5654_v42, %v5653_v36  ;;  %v5659_v42 = vld [vmem:[#allocation2 + $0x13a] sm:$0xff] }
 0x699   : > { %v8712_v53 = vpop.f32.mrb[76].mxu0 }
 0x69a   : > { %v8818_v0 = vpop.f32.mrb[104].mxu1  ;;  %v8713_v5 = vpop.f32.mrb[77].mxu0 }
 0x69b   : > { %v8714_v58 = vadd.f32 %v8713_v5, %v8712_v53  ;;  %v8819_v55 = vpop.f32.mrb[105].mxu1  ;;  %v8715_v60 = vpop.f32.mrb[78].mxu0  ;;  %v5655_v5 = vld [vmem:[#allocation2 + $0x10a] sm:$0xff] }
 0x69c   : > { %v8820_v3 = vadd.f32 %v8819_v55, %v8818_v0  ;;  %v8821_v61 = vpop.f32.mrb[106].mxu1  ;;  %v8716_v10 = vpop.f32.mrb[79].mxu0  ;;  %v5657_v55 = vld [vmem:[#allocation2 + $0x122] sm:$0xff] }
 0x69d   : > { %v8717_v31 = vadd.f32 %v8716_v10, %v8715_v60  ;;  %v8822_v33 = vpop.f32.mrb[107].mxu1  ;;  %v6361_v7 = vadd.f32 %v8714_v58, %v12448_v40  ;;  %v5658_v60 = vld [vmem:[#allocation2 + $0x12a] sm:$0xff] }
 0x69e   : > { %v12499_v47 = vadd.f32 %v8820_v3, %v6353_v11  ;;  %v8823_v54 = vadd.f32 %v8822_v33, %v8821_v61  ;;  %9247 = vmatmul.mubr.bf16.gmra.mrb[184].mxu0 %v5674_v12 }
 0x69f   : > { %9250 = vmatprep.mubr.bf16.mxu0 %v5675_v26  ;;  %v6364_v32 = vadd.f32 %v8717_v31, %v12448_v40  ;;  %v5678_v26 = vpack.c.bf16 %v5656_v38, %v5655_v5 }
 0x6a0   : > { %v12501_v29 = vadd.f32 %v8823_v54, %v6356_v6 }
 0x6a1   : > { %v8718_v56 = vpop.f32.mrb[80].mxu0 }
 0x6a2   : > { %v8824_v51 = vpop.f32.mrb[108].mxu1  ;;  %v8719_v4 = vpop.f32.mrb[81].mxu0 }
 0x6a3   : > { %v8720_v18 = vadd.f32 %v8719_v4, %v8718_v56  ;;  %v8825_v37 = vpop.f32.mrb[109].mxu1  ;;  %v8721_v44 = vpop.f32.mrb[82].mxu0  ;;  %v5679_v56 = vpack.c.bf16 %v5658_v60, %v5657_v55 }
 0x6a4   : > { %v8826_v13 = vadd.f32 %v8825_v37, %v8824_v51  ;;  %v8827_v57 = vpop.f32.mrb[110].mxu1  ;;  %v8722_v2 = vpop.f32.mrb[83].mxu0  ;;  %v5660_v37 = vld [vmem:[#allocation2 + $0x142] sm:$0xff] }
 0x6a5   : > { %v8723_v8 = vadd.f32 %v8722_v2, %v8721_v44  ;;  %v8828_v62 = vpop.f32.mrb[111].mxu1  ;;  %v6369_v10 = vadd.f32 %v8720_v18, %v12448_v40 }
 0x6a6   : > { %v12505_v53 = vadd.f32 %v8826_v13, %v6361_v7  ;;  %v8829_v59 = vadd.f32 %v8828_v62, %v8827_v57  ;;  %9251 = vmatmul.mubr.bf16.gmra.mrb[188].mxu0 %v5676_v50  ;;  %v5661_v7 = vld [vmem:[#allocation2 + $0x152] sm:$0xff]  ;;  %v5662_v13 = vld [vmem:[#allocation2 + $0x15a] sm:$0xff] }
 0x6a7   : > { %9254 = vmatprep.mubr.bf16.mxu0 %v5677_v19  ;;  %v6372_v25 = vadd.f32 %v8723_v8, %v12448_v40  ;;  %v5681_v38 = vpack.c.bf16 %v5662_v13, %v5661_v7  ;;  %v5667_v7 = vld [vmem:[#allocation2 + $0x19a] sm:$0xff]  ;;  %v5668_v13 = vld [vmem:[#allocation2 + $0x1a2] sm:$0xff] }
 0x6a8   : > { %v12507_v20 = vadd.f32 %v8829_v59, %v6364_v32  ;;  %v5680_v59 = vpack.c.bf16 %v5660_v37, %v5659_v42 }
 0x6a9   : > { %v8724_v0 = vpop.f32.mrb[84].mxu0 }
 0x6aa   : > { %v8830_v46 = vpop.f32.mrb[112].mxu1  ;;  %v8725_v58 = vpop.f32.mrb[85].mxu0 }
 0x6ab   : > { %v8726_v11 = vadd.f32 %v8725_v58, %v8724_v0  ;;  %v8831_v3 = vpop.f32.mrb[113].mxu1  ;;  %v8727_v61 = vpop.f32.mrb[86].mxu0 }
 0x6ac   : > { %v8832_v12 = vadd.f32 %v8831_v3, %v8830_v46  ;;  %v8833_v31 = vpop.f32.mrb[114].mxu1  ;;  %v8728_v33 = vpop.f32.mrb[87].mxu0 }
 0x6ad   : > { %v8729_v6 = vadd.f32 %v8728_v33, %v8727_v61  ;;  %v8834_v54 = vpop.f32.mrb[115].mxu1  ;;  %v6377_v62 = vadd.f32 %v8726_v11, %v12448_v40  ;;  %v5663_v61 = vld [vmem:[#allocation2 + $0x16a] sm:$0xff] }
 0x6ae   : > { %v12511_v41 = vadd.f32 %v8832_v12, %v6369_v10  ;;  %v8835_v51 = vadd.f32 %v8834_v54, %v8833_v31  ;;  %9255 = vmatmul.mubr.bf16.gmra.mrb[192].mxu0 %v5678_v26  ;;  %v5664_v10 = vld [vmem:[#allocation2 + $0x172] sm:$0xff] }
 0x6af   : > { %9258 = vmatprep.mubr.bf16.mxu0 %v5679_v56  ;;  %v6380_v46 = vadd.f32 %v8729_v6, %v12448_v40 }
 0x6b0   : > { %v12513_v4 = vadd.f32 %v8835_v51, %v6372_v25  ;;  %v5682_v51 = vpack.c.bf16 %v5664_v10, %v5663_v61 }
 0x6b1   : > { %v8730_v36 = vpop.f32.mrb[88].mxu0 }
 0x6b2   : > { %v8836_v18 = vpop.f32.mrb[116].mxu1  ;;  %v8731_v44 = vpop.f32.mrb[89].mxu0 }
 0x6b3   : > { %v8732_v57 = vadd.f32 %v8731_v44, %v8730_v36  ;;  %v8837_v2 = vpop.f32.mrb[117].mxu1  ;;  %v8733_v50 = vpop.f32.mrb[90].mxu0 }
 0x6b4   : > { %v8838_v8 = vadd.f32 %v8837_v2, %v8836_v18  ;;  %v8839_v19 = vpop.f32.mrb[118].mxu1  ;;  %v8734_v32 = vpop.f32.mrb[91].mxu0 }
 0x6b5   : > { %v8735_v0 = vadd.f32 %v8734_v32, %v8733_v50  ;;  %v8840_v5 = vpop.f32.mrb[119].mxu1  ;;  %v6385_v54 = vadd.f32 %v8732_v57, %v12448_v40 }
 0x6b6   : > { %v12517_v58 = vadd.f32 %v8838_v8, %v6377_v62  ;;  %v8841_v55 = vadd.f32 %v8840_v5, %v8839_v19  ;;  %9259 = vmatmul.mubr.bf16.gmra.mrb[196].mxu0 %v5680_v59  ;;  %v5684_v8 = vpack.c.bf16 %v5668_v13, %v5667_v7 }
 0x6b7   : > { %9262 = vmatprep.mubr.bf16.mxu0 %v5681_v38  ;;  %v6388_v37 = vadd.f32 %v8735_v0, %v12448_v40 }
 0x6b8   : > { %v12519_v60 = vadd.f32 %v8841_v55, %v6380_v46 }
 0x6b9   : > { %v8736_v3 = vpop.f32.mrb[92].mxu0 }
 0x6ba   : > { %v8842_v11 = vpop.f32.mrb[120].mxu1  ;;  %v8737_v12 = vpop.f32.mrb[93].mxu0 }
 0x6bb   : > { %v8738_v31 = vadd.f32 %v8737_v12, %v8736_v3  ;;  %v8843_v33 = vpop.f32.mrb[121].mxu1  ;;  %v8739_v26 = vpop.f32.mrb[94].mxu0 }
 0x6bc   : > { %v8844_v56 = vadd.f32 %v8843_v33, %v8842_v11  ;;  %v8845_v25 = vpop.f32.mrb[122].mxu1  ;;  %v8740_v6 = vpop.f32.mrb[95].mxu0 }
 0x6bd   : > { %v8741_v36 = vadd.f32 %v8740_v6, %v8739_v26  ;;  %v8846_v42 = vpop.f32.mrb[123].mxu1  ;;  %v6393_v5 = vadd.f32 %v8738_v31, %v12448_v40 }
 0x6be   : > { %v12523_v18 = vadd.f32 %v8844_v56, %v6385_v54  ;;  %v8847_v44 = vadd.f32 %v8846_v42, %v8845_v25  ;;  %9263 = vmatmul.mubr.bf16.gmra.mrb[200].mxu0 %v5682_v51 }
 0x6bf   : > { %9266 = vmatprep.mubr.bf16.mxu0 %v12469_v9  ;;  %v6396_v9 = vadd.f32 %v8741_v36, %v12448_v40 }
 0x6c0   : > { %v12526_v2 = vadd.f32 %v8847_v44, %v6388_v37 }
 0x6c1   : > { %v8742_v50 = vpop.f32.mrb[96].mxu0 }
 0x6c2   : > { %v8848_v57 = vpop.f32.mrb[124].mxu1  ;;  %v8743_v62 = vpop.f32.mrb[97].mxu0 }
 0x6c3   : > { %v8744_v19 = vadd.f32 %v8743_v62, %v8742_v50  ;;  %v8849_v32 = vpop.f32.mrb[125].mxu1  ;;  %v8745_v59 = vpop.f32.mrb[98].mxu0 }
 0x6c4   : > { %v8850_v0 = vadd.f32 %v8849_v32, %v8848_v57  ;;  %v8851_v38 = vpop.f32.mrb[126].mxu1  ;;  %v8746_v46 = vpop.f32.mrb[99].mxu0 }
 0x6c5   : > { %v8747_v55 = vadd.f32 %v8746_v46, %v8745_v59  ;;  %v8852_v3 = vpop.f32.mrb[127].mxu1  ;;  %v6401_v31 = vadd.f32 %v8744_v19, %v12448_v40 }
 0x6c6   : > { %v12530_v61 = vadd.f32 %v8850_v0, %v6393_v5  ;;  %v8853_v10 = vadd.f32 %v8852_v3, %v8851_v38  ;;  %9267 = vmatmul.mubr.bf16.gmra.mrb[204].mxu0 %v5684_v8 }
 0x6c7   : > { %v6404_v36 = vadd.f32 %v8747_v55, %v12448_v40 }
 0x6c8   : > { %v12532_v11 = vadd.f32 %v8853_v10, %v6396_v9 }
 0x6c9   : > { %v8748_v12 = vpop.f32.mrb[100].mxu0 }
 0x6ca   : > { %v8854_v33 = vpop.f32.mrb[128].mxu1  ;;  %v8749_v26 = vpop.f32.mrb[101].mxu0 }
 0x6cb   : > { %v8750_v54 = vadd.f32 %v8749_v26, %v8748_v12  ;;  %v8855_v56 = vpop.f32.mrb[129].mxu1  ;;  %v8751_v25 = vpop.f32.mrb[102].mxu0 }
 0x6cc   : > { %v8856_v6 = vadd.f32 %v8855_v56, %v8854_v33  ;;  %v8857_v51 = vpop.f32.mrb[130].mxu1  ;;  %v8752_v42 = vpop.f32.mrb[103].mxu0 }
 0x6cd   : > { %v8753_v37 = vadd.f32 %v8752_v42, %v8751_v25  ;;  %v8858_v44 = vpop.f32.mrb[131].mxu1  ;;  %v6409_v19 = vadd.f32 %v8750_v54, %v12448_v40 }
 0x6ce   : > { %v12536_v7 = vadd.f32 %v8856_v6, %v6401_v31  ;;  %v8859_v13 = vadd.f32 %v8858_v44, %v8857_v51 }
 0x6cf   : > { %v6412_v55 = vadd.f32 %v8753_v37, %v12448_v40 }
 0x6d0   : > { %v12538_v50 = vadd.f32 %v8859_v13, %v6404_v36 }
 0x6d1   : > { %v8754_v57 = vpop.f32.mrb[104].mxu0 }
 0x6d2   : > { %v8860_v62 = vpop.f32.mrb[132].mxu1  ;;  %v8755_v8 = vpop.f32.mrb[105].mxu0 }
 0x6d3   : > { %v8756_v32 = vadd.f32 %v8755_v8, %v8754_v57  ;;  %v8861_v59 = vpop.f32.mrb[133].mxu1  ;;  %v8757_v5 = vpop.f32.mrb[106].mxu0 }
 0x6d4   : > { %v8862_v0 = vadd.f32 %v8861_v59, %v8860_v62  ;;  %v8863_v38 = vpop.f32.mrb[134].mxu1  ;;  %v8758_v46 = vpop.f32.mrb[107].mxu0 }
 0x6d5   : > { %v8759_v3 = vadd.f32 %v8758_v46, %v8757_v5  ;;  %v8864_v9 = vpop.f32.mrb[135].mxu1  ;;  %v6417_v54 = vadd.f32 %v8756_v32, %v12448_v40 }
 0x6d6   : > { %v12542_v10 = vadd.f32 %v8862_v0, %v6409_v19  ;;  %v8865_v12 = vadd.f32 %v8864_v9, %v8863_v38 }
 0x6d7   : > { %v6420_v37 = vadd.f32 %v8759_v3, %v12448_v40 }
 0x6d8   : > { %v12544_v33 = vadd.f32 %v8865_v12, %v6412_v55 }
 0x6d9   : > { %v8760_v26 = vpop.f32.mrb[108].mxu0 }
 0x6da   : > { %v8866_v56 = vpop.f32.mrb[136].mxu1  ;;  %v8761_v25 = vpop.f32.mrb[109].mxu0 }
 0x6db   : > { %v8762_v31 = vadd.f32 %v8761_v25, %v8760_v26  ;;  %v8867_v6 = vpop.f32.mrb[137].mxu1  ;;  %v8763_v51 = vpop.f32.mrb[110].mxu0 }
 0x6dc   : > { %v8868_v42 = vadd.f32 %v8867_v6, %v8866_v56  ;;  %v8869_v44 = vpop.f32.mrb[138].mxu1  ;;  %v8764_v36 = vpop.f32.mrb[111].mxu0 }
 0x6dd   : > { %v8765_v13 = vadd.f32 %v8764_v36, %v8763_v51  ;;  %v8870_v57 = vpop.f32.mrb[139].mxu1  ;;  %v6425_v32 = vadd.f32 %v8762_v31, %v12448_v40 }
 0x6de   : > { %v12548_v62 = vadd.f32 %v8868_v42, %v6417_v54  ;;  %v8871_v8 = vadd.f32 %v8870_v57, %v8869_v44 }
 0x6df   : > { %v6428_v6 = vadd.f32 %v8765_v13, %v12448_v40 }
 0x6e0   : > { %v12550_v59 = vadd.f32 %v8871_v8, %v6420_v37 }
 0x6e1   : > { %v8894_v5 = vpop.f32.mrb[112].mxu0 }
 0x6e2   : > { %v8872_v19 = vpop.f32.mrb[140].mxu1  ;;  %v8895_v0 = vpop.f32.mrb[113].mxu0 }
 0x6e3   : > { %v8873_v38 = vpop.f32.mrb[141].mxu1  ;;  %v8896_v46 = vadd.f32 %v8895_v0, %v8894_v5  ;;  %v8897_v9 = vpop.f32.mrb[114].mxu0 }
 0x6e4   : > { %v8874_v55 = vadd.f32 %v8873_v38, %v8872_v19  ;;  %v8875_v12 = vpop.f32.mrb[142].mxu1  ;;  %v8898_v26 = vpop.f32.mrb[115].mxu0 }
 0x6e5   : > { %v6627_v56 = vadd.f32 %v8896_v46, %v12454_v15  ;;  %v8876_v25 = vpop.f32.mrb[143].mxu1  ;;  %v8899_v3 = vadd.f32 %v8898_v26, %v8897_v9 }
 0x6e6   : > { %v12555_v51 = vadd.f32 %v8874_v55, %v6425_v32  ;;  %v8877_v54 = vadd.f32 %v8876_v25, %v8875_v12 }
 0x6e7   : > { %v6630_v42 = vadd.f32 %v8899_v3, %v12458_v17 }
 0x6e8   : > { %v12558_v44 = vadd.f32 %v8877_v54, %v6428_v6 }
 0x6e9   : > { %v8900_v36 = vpop.f32.mrb[116].mxu0 }
 0x6ea   : > { %v9006_v57 = vpop.f32.mrb[144].mxu1  ;;  %v8901_v37 = vpop.f32.mrb[117].mxu0 }
 0x6eb   : > { %v8902_v31 = vadd.f32 %v8901_v37, %v8900_v36  ;;  %v9007_v8 = vpop.f32.mrb[145].mxu1  ;;  %v8903_v5 = vpop.f32.mrb[118].mxu0 }
 0x6ec   : > { %v9008_v19 = vadd.f32 %v9007_v8, %v9006_v57  ;;  %v9009_v0 = vpop.f32.mrb[146].mxu1  ;;  %v8904_v15 = vpop.f32.mrb[119].mxu0 }
 0x6ed   : > { %v6635_v38 = vadd.f32 %v8902_v31, %v12462_v45  ;;  %v8905_v46 = vadd.f32 %v8904_v15, %v8903_v5  ;;  %v9010_v40 = vpop.f32.mrb[147].mxu1 }
 0x6ee   : > { %v9011_v13 = vadd.f32 %v9010_v40, %v9009_v0  ;;  %v12561_v9 = vadd.f32 %v9008_v19, %v6627_v56 }
 0x6ef   : > { %v6638_v17 = vadd.f32 %v8905_v46, %v12466_v16 }
 0x6f0   : > { %v12564_v32 = vadd.f32 %v9011_v13, %v6630_v42 }
 0x6f1   : > { %v8906_v55 = vpop.f32.mrb[120].mxu0 }
 0x6f2   : > { %v9012_v12 = vpop.f32.mrb[148].mxu1  ;;  %v8907_v26 = vpop.f32.mrb[121].mxu0 }
 0x6f3   : > { %v8908_v25 = vadd.f32 %v8907_v26, %v8906_v55  ;;  %v9013_v3 = vpop.f32.mrb[149].mxu1  ;;  %v8909_v6 = vpop.f32.mrb[122].mxu0 }
 0x6f4   : > { %v9014_v54 = vadd.f32 %v9013_v3, %v9012_v12  ;;  %v9015_v36 = vpop.f32.mrb[150].mxu1  ;;  %v8910_v57 = vpop.f32.mrb[123].mxu0 }
 0x6f5   : > { %v6643_v45 = vadd.f32 %v8908_v25, %v12472_v24  ;;  %v8911_v37 = vadd.f32 %v8910_v57, %v8909_v6  ;;  %v9016_v31 = vpop.f32.mrb[151].mxu1 }
 0x6f6   : > { %v9017_v8 = vadd.f32 %v9016_v31, %v9015_v36  ;;  %v12567_v56 = vadd.f32 %v9014_v54, %v6635_v38 }
 0x6f7   : > { %v6646_v16 = vadd.f32 %v8911_v37, %v12476_v49 }
 0x6f8   : > { %v12570_v42 = vadd.f32 %v9017_v8, %v6638_v17 }
 0x6f9   : > { %v8912_v5 = vpop.f32.mrb[124].mxu0 }
 0x6fa   : > { %v9018_v19 = vpop.f32.mrb[152].mxu1  ;;  %v8913_v0 = vpop.f32.mrb[125].mxu0 }
 0x6fb   : > { %v8914_v15 = vadd.f32 %v8913_v0, %v8912_v5  ;;  %v9019_v46 = vpop.f32.mrb[153].mxu1  ;;  %v8915_v40 = vpop.f32.mrb[126].mxu0 }
 0x6fc   : > { %v9020_v13 = vadd.f32 %v9019_v46, %v9018_v19  ;;  %v9021_v55 = vpop.f32.mrb[154].mxu1  ;;  %v8916_v12 = vpop.f32.mrb[127].mxu0 }
 0x6fd   : > { %v6651_v24 = vadd.f32 %v8914_v15, %v12480_v23  ;;  %v8917_v26 = vadd.f32 %v8916_v12, %v8915_v40  ;;  %v9022_v25 = vpop.f32.mrb[155].mxu1 }
 0x6fe   : > { %v9023_v3 = vadd.f32 %v9022_v25, %v9021_v55  ;;  %v12573_v38 = vadd.f32 %v9020_v13, %v6643_v45 }
 0x6ff   : > { %v6654_v49 = vadd.f32 %v8917_v26, %v12483_v1 }
 0x700   : > { %v12576_v17 = vadd.f32 %v9023_v3, %v6646_v16 }
 0x701   : > { %v8918_v6 = vpop.f32.mrb[128].mxu0 }
 0x702   : > { %v9024_v54 = vpop.f32.mrb[156].mxu1  ;;  %v8919_v36 = vpop.f32.mrb[129].mxu0 }
 0x703   : > { %v8920_v57 = vadd.f32 %v8919_v36, %v8918_v6  ;;  %v9025_v37 = vpop.f32.mrb[157].mxu1  ;;  %v8921_v31 = vpop.f32.mrb[130].mxu0 }
 0x704   : > { %v9026_v8 = vadd.f32 %v9025_v37, %v9024_v54  ;;  %v9027_v5 = vpop.f32.mrb[158].mxu1  ;;  %v8922_v19 = vpop.f32.mrb[131].mxu0 }
 0x705   : > { %v6659_v23 = vadd.f32 %v8920_v57, %v12487_v39  ;;  %v8923_v0 = vadd.f32 %v8922_v19, %v8921_v31  ;;  %v9028_v15 = vpop.f32.mrb[159].mxu1 }
 0x706   : > { %v9029_v46 = vadd.f32 %v9028_v15, %v9027_v5  ;;  %v12579_v45 = vadd.f32 %v9026_v8, %v6651_v24  ;;  %v372_v24 = vsub.s32 1, %v10685_v14  ;;  %v10260_v5 = vld [vmem:[%s13243_s2] sm:$0x3] }
 0x707   : > { %v6662_v1 = vadd.f32 %v8923_v0, %v12489_v30 }
 0x708   : > { %v12582_v16 = vadd.f32 %v9029_v46, %v6654_v49  ;;  %v12594_v19 = vrot.slane %v10260_v5, %v372_v24 }
 0x709   : > { %v8924_v40 = vpop.f32.mrb[132].mxu0 }
 0x70a   : > { %v9030_v13 = vpop.f32.mrb[160].mxu1  ;;  %v8925_v55 = vpop.f32.mrb[133].mxu0 }
 0x70b   : > { %v8926_v12 = vadd.f32 %v8925_v55, %v8924_v40  ;;  %v9031_v26 = vpop.f32.mrb[161].mxu1  ;;  %v8927_v25 = vpop.f32.mrb[134].mxu0 }
 0x70c   : > { %v9032_v3 = vadd.f32 %v9031_v26, %v9030_v13  ;;  %v9033_v6 = vpop.f32.mrb[162].mxu1  ;;  %v8928_v54 = vpop.f32.mrb[135].mxu0 }
 0x70d   : > { %v6667_v39 = vadd.f32 %v8926_v12, %v12493_v48  ;;  %v8929_v36 = vadd.f32 %v8928_v54, %v8927_v25  ;;  %v9034_v57 = vpop.f32.mrb[163].mxu1  ;;  %v12599_v12 = vadd.f32 %v10698_v21, %v12594_v19 }
 0x70e   : > { %v9035_v37 = vadd.f32 %v9034_v57, %v9033_v6  ;;  %v12586_v31 = vadd.f32 %v9032_v3, %v6659_v23  ;;  %v12606_v6 = vadd.f32 %v10708_v27, %v12594_v19 }
 0x70f   : > { %v6670_v30 = vadd.f32 %v8929_v36, %v12495_v34 }
 0x710   : > { %v12589_v49 = vadd.f32 %v9035_v37, %v6662_v1  ;;  %v748_v5 = vsub.f32 0.0, %v12606_v6 }
 0x711   : > { %v8930_v8 = vpop.f32.mrb[136].mxu0 }
 0x712   : > { %v9036_v0 = vpop.f32.mrb[164].mxu1  ;;  %v8931_v48 = vpop.f32.mrb[137].mxu0 }
 0x713   : > { %v8932_v15 = vadd.f32 %v8931_v48, %v8930_v8  ;;  %v9037_v46 = vpop.f32.mrb[165].mxu1  ;;  %v8933_v40 = vpop.f32.mrb[138].mxu0 }
 0x714   : > { %v9038_v14 = vadd.f32 %v9037_v46, %v9036_v0  ;;  %v9039_v13 = vpop.f32.mrb[166].mxu1  ;;  %v8934_v23 = vpop.f32.mrb[139].mxu0 }
 0x715   : > { %v6675_v55 = vadd.f32 %v8932_v15, %v12499_v47  ;;  %v8935_v34 = vadd.f32 %v8934_v23, %v8933_v40  ;;  %v9040_v1 = vpop.f32.mrb[167].mxu1  ;;  %v746_v47 = vsub.f32 0.0, %v12599_v12  ;;  %v12619_v40 = vadd.f32 %v10728_v43, %v12594_v19 }
 0x716   : > { %v9041_v26 = vadd.f32 %v9040_v1, %v9039_v13  ;;  %v12601_v25 = vadd.f32 %v9038_v14, %v6667_v39  ;;  %v12626_v1 = vadd.f32 %v10738_v52, %v12594_v19 }
 0x717   : > { %v6678_v3 = vadd.f32 %v8935_v34, %v12501_v29  ;;  %v12614_v29 = vadd.f32 %v10718_v35, %v12594_v19  ;;  %v811_v46 = vmul.f32 1.442695, %v746_v47  ;;  %v815_v34 = vmul.f32 1.442695, %v748_v5 }
 0x718   : > { %v12608_v54 = vadd.f32 %v9041_v26, %v6670_v30  ;;  %v754_v52 = vsub.f32 0.0, %v12626_v1  ;;  %v12639_v5 = vadd.f32 %v10748_v63, %v12594_v19  ;;  %v13315_v63 = vld [vmem:[#allocation17_spill] sm:$0xff] }
 0x719   : > { %v8936_v36 = vpop.f32.mrb[140].mxu0  ;;  %10001 = vpow2.f32 %v811_v46 }
 0x71a   : > { %v9042_v57 = vpop.f32.mrb[168].mxu1  ;;  %v8937_v24 = vpop.f32.mrb[141].mxu0  ;;  %10003 = vpow2.f32 %v815_v34 }
 0x71b   : > { %v8938_v37 = vadd.f32 %v8937_v24, %v8936_v36  ;;  %v9043_v8 = vpop.f32.mrb[169].mxu1  ;;  %v8939_v21 = vpop.f32.mrb[142].mxu0  ;;  %v752_v36 = vsub.f32 0.0, %v12619_v40 }
 0x71c   : > { %v9044_v39 = vadd.f32 %v9043_v8, %v9042_v57  ;;  %v9045_v0 = vpop.f32.mrb[170].mxu1  ;;  %v8940_v48 = vpop.f32.mrb[143].mxu0 }
 0x71d   : > { %v6683_v27 = vadd.f32 %v8938_v37, %v12505_v53  ;;  %v8941_v30 = vadd.f32 %v8940_v48, %v8939_v21  ;;  %v9046_v15 = vpop.f32.mrb[171].mxu1  ;;  %v750_v53 = vsub.f32 0.0, %v12614_v29 }
 0x71e   : > { %v9047_v14 = vadd.f32 %v9046_v15, %v9045_v0  ;;  %v12621_v13 = vadd.f32 %v9044_v39, %v6675_v55  ;;  %v12634_v55 = vadd.f32 %v10700_v22, %v12594_v19  ;;  %v823_v22 = vmul.f32 1.442695, %v752_v36 }
 0x71f   : > { %v6686_v23 = vadd.f32 %v8941_v30, %v12507_v20  ;;  %v819_v21 = vmul.f32 1.442695, %v750_v53  ;;  %v12644_v30 = vadd.f32 %v10710_v28, %v12594_v19  ;;  %v827_v53 = vmul.f32 1.442695, %v754_v52 }
 0x720   : > { %13311 = vst [vmem:[#allocation37_spill] sm:$0xff] %v12621_v13  ;;  %v12628_v35 = vadd.f32 %v9047_v14, %v6678_v3  ;;  %13313 = vst [vmem:[#allocation39_spill] sm:$0xff] %v12634_v55  ;;  %v794_v14 = vsub.f32 0.0, %v12634_v55  ;;  %v756_v36 = vsub.f32 0.0, %v12639_v5 }
 0x721   : > { %v8942_v26 = vpop.f32.mrb[144].mxu0  ;;  %13314 = vst [vmem:[#allocation40_spill] sm:$0xff] %v12644_v30  ;;  %10005 = vpow2.f32 %v819_v21  ;;  %v796_v28 = vsub.f32 0.0, %v12644_v30 }
 0x722   : > { %13312 = vst [vmem:[#allocation38_spill] sm:$0xff] %v12628_v35  ;;  %v9048_v43 = vpop.f32.mrb[172].mxu1  ;;  %v8943_v47 = vpop.f32.mrb[145].mxu0  ;;  %10007 = vpow2.f32 %v823_v22  ;;  %v13319_v22 = vld [vmem:[#allocation20_spill] sm:$0xff] }
 0x723   : > { %v8944_v20 = vadd.f32 %v8943_v47, %v8942_v26  ;;  %v9049_v57 = vpop.f32.mrb[173].mxu1  ;;  %v8945_v24 = vpop.f32.mrb[146].mxu0  ;;  %v12652_v26 = vadd.f32 %v13315_v63, %v12594_v19  ;;  %10009 = vpow2.f32 %v827_v53  ;;  %v911_v53 = vmul.f32 1.442695, %v796_v28 }
 0x724   : > { %v9050_v3 = vadd.f32 %v9049_v57, %v9048_v43  ;;  %v9051_v37 = vpop.f32.mrb[174].mxu1  ;;  %v8946_v8 = vpop.f32.mrb[147].mxu0 }
 0x725   : > { %v6691_v39 = vadd.f32 %v8944_v20, %v12511_v41  ;;  %v8947_v0 = vadd.f32 %v8946_v8, %v8945_v24  ;;  %v9052_v48 = vpop.f32.mrb[175].mxu1  ;;  %v907_v20 = vmul.f32 1.442695, %v794_v14  ;;  %v10002_v52 = vpop.eup %10001 }
 0x726   : > { %v9053_v15 = vadd.f32 %v9052_v48, %v9051_v37  ;;  %v12646_v46 = vadd.f32 %v9050_v3, %v6683_v27  ;;  %v758_v3 = vsub.f32 0.0, %v12652_v26  ;;  %v831_v48 = vmul.f32 1.442695, %v756_v36 }
 0x727   : > { %v6694_v34 = vadd.f32 %v8947_v0, %v12513_v4  ;;  %v938_v35 = vadd.f32 1.0, %v10002_v52  ;;  %10011 = vpow2.f32 %v907_v20 }
 0x728   : > { %v12654_v41 = vadd.f32 %v9053_v15, %v6686_v23  ;;  %v13317_v23 = vld [vmem:[#allocation19_spill] sm:$0xff]  ;;  %v12665_v15 = vadd.f32 %v13319_v22, %v12594_v19  ;;  %10013 = vpow2.f32 %v831_v48 }
 0x729   : > { %v8948_v43 = vpop.f32.mrb[148].mxu0  ;;  %v12661_v37 = vadd.f32 %v13317_v23, %v12594_v19  ;;  %v13322_v23 = vld [vmem:[#allocation21_spill] sm:$0xff]  ;;  %10015 = vpow2.f32 %v911_v53  ;;  %v13327_v53 = vld [vmem:[#allocation23_spill] sm:$0xff] }
 0x72a   : > { %13316 = vst [vmem:[#allocation17_spill] sm:$0xff] %v12654_v41  ;;  %v9054_v27 = vpop.f32.mrb[176].mxu1  ;;  %v8949_v47 = vpop.f32.mrb[149].mxu0  ;;  %13320 = vst [vmem:[#allocation20_spill] sm:$0xff] %v12665_v15  ;;  %v12674_v22 = vadd.f32 %v13322_v23, %v12594_v19  ;;  %10017 = vrcp.f32 %v938_v35  ;;  %v12686_v23 = vadd.f32 %v13327_v53, %v12594_v19 }
 0x72b   : > { %v8950_v57 = vadd.f32 %v8949_v47, %v8948_v43  ;;  %v9055_v24 = vpop.f32.mrb[177].mxu1  ;;  %v8951_v4 = vpop.f32.mrb[150].mxu0  ;;  %13318 = vst [vmem:[#allocation19_spill] sm:$0xff] %v12661_v37  ;;  %v760_v36 = vsub.f32 0.0, %v12661_v37 }
 0x72c   : > { %v9056_v8 = vadd.f32 %v9055_v24, %v9054_v27  ;;  %v9057_v21 = vpop.f32.mrb[178].mxu1  ;;  %v8952_v0 = vpop.f32.mrb[151].mxu0  ;;  %v835_v24 = vmul.f32 1.442695, %v758_v3  ;;  %13323 = vst [vmem:[#allocation21_spill] sm:$0xff] %v12674_v22  ;;  %13328 = vst [vmem:[#allocation23_spill] sm:$0xff] %v12686_v23 }
 0x72d   : > { %v6699_v14 = vadd.f32 %v8950_v57, %v12517_v58  ;;  %v8953_v63 = vadd.f32 %v8952_v0, %v8951_v4  ;;  %v9058_v43 = vpop.f32.mrb[179].mxu1  ;;  %v10004_v47 = vpop.eup %10003  ;;  %v762_v58 = vsub.f32 0.0, %v12665_v15 }
 0x72e   : > { %v9059_v30 = vadd.f32 %v9058_v43, %v9057_v21  ;;  %v12668_v55 = vadd.f32 %v9056_v8, %v6691_v39  ;;  %v940_v57 = vadd.f32 1.0, %v10004_v47  ;;  %v10006_v20 = vpop.eup %10005  ;;  %10019 = vpow2.f32 %v835_v24 }
 0x72f   : > { %v6702_v27 = vadd.f32 %v8953_v63, %v12519_v60  ;;  %v13325_v60 = vld [vmem:[#allocation22_spill] sm:$0xff]  ;;  %v10008_v0 = vpop.eup %10007  ;;  %v843_v47 = vmul.f32 1.442695, %v762_v58 }
 0x730   : > { %13321 = vst [vmem:[#allocation41_spill] sm:$0xff] %v12668_v55  ;;  %v12676_v41 = vadd.f32 %v9059_v30, %v6694_v34  ;;  %v12681_v52 = vadd.f32 %v13325_v60, %v12594_v19  ;;  %v839_v30 = vmul.f32 1.442695, %v760_v36  ;;  %v764_v34 = vsub.f32 0.0, %v12674_v22 }
 0x731   : > { %v8954_v28 = vpop.f32.mrb[152].mxu0  ;;  %10021 = vrcp.f32 %v940_v57  ;;  %v944_v36 = vadd.f32 1.0, %v10008_v0  ;;  %v13335_v0 = vld [vmem:[#allocation26_spill] sm:$0xff] }
 0x732   : > { %13324 = vst [vmem:[#allocation42_spill] sm:$0xff] %v12676_v41  ;;  %v9060_v39 = vpop.f32.mrb[180].mxu1  ;;  %v8955_v4 = vpop.f32.mrb[153].mxu0  ;;  %13326 = vst [vmem:[#allocation22_spill] sm:$0xff] %v12681_v52  ;;  %10023 = vpow2.f32 %v839_v30  ;;  %v847_v22 = vmul.f32 1.442695, %v764_v34 }
 0x733   : > { %v8956_v3 = vadd.f32 %v8955_v4, %v8954_v28  ;;  %v9061_v8 = vpop.f32.mrb[181].mxu1  ;;  %v8957_v21 = vpop.f32.mrb[154].mxu0  ;;  %v942_v4 = vadd.f32 1.0, %v10006_v20  ;;  %10025 = vpow2.f32 %v843_v47  ;;  %v768_v20 = vsub.f32 0.0, %v12686_v23 }
 0x734   : > { %v9062_v48 = vadd.f32 %v9061_v8, %v9060_v39  ;;  %v9063_v63 = vpop.f32.mrb[182].mxu1  ;;  %v8958_v43 = vpop.f32.mrb[155].mxu0  ;;  %v766_v39 = vsub.f32 0.0, %v12681_v52  ;;  %v13330_v8 = vld [vmem:[#allocation24_spill] sm:$0xff] }
 0x735   : > { %v6707_v35 = vadd.f32 %v8956_v3, %v12523_v18  ;;  %v8959_v60 = vadd.f32 %v8958_v43, %v8957_v21  ;;  %v9064_v41 = vpop.f32.mrb[183].mxu1  ;;  %v10010_v28 = vpop.eup %10009  ;;  %v12694_v58 = vadd.f32 %v13330_v8, %v12594_v19  ;;  %v13332_v18 = vld [vmem:[#allocation25_spill] sm:$0xff]  ;;  %10027 = vrcp.f32 %v942_v4  ;;  %v13337_v4 = vld [vmem:[#allocation27_spill] sm:$0xff] }
 0x736   : > { %v9065_v55 = vadd.f32 %v9064_v41, %v9063_v63  ;;  %v12689_v24 = vadd.f32 %v9062_v48, %v6699_v14  ;;  %v12699_v3 = vadd.f32 %v13332_v18, %v12594_v19  ;;  %v12703_v41 = vpop.eup %10011  ;;  %v946_v14 = vadd.f32 1.0, %v10010_v28 }
 0x737   : > { %13331 = vst [vmem:[#allocation24_spill] sm:$0xff] %v12694_v58  ;;  %v6710_v53 = vadd.f32 %v8959_v60, %v12526_v2  ;;  %v12708_v48 = vadd.f32 %v13335_v0, %v12594_v19  ;;  %v10014_v34 = vpop.eup %10013  ;;  %10029 = vrcp.f32 %v944_v36  ;;  %v851_v63 = vmul.f32 1.442695, %v766_v39 }
 0x738   : > { %13329 = vst [vmem:[#allocation43_spill] sm:$0xff] %v12689_v24  ;;  %13333 = vst [vmem:[#allocation25_spill] sm:$0xff] %v12699_v3  ;;  %v12701_v57 = vadd.f32 %v9065_v55, %v6702_v27  ;;  %v770_v55 = vsub.f32 0.0, %v12694_v58  ;;  %v12711_v28 = vpop.eup %10015  ;;  %10031 = vpow2.f32 %v847_v22  ;;  %v772_v47 = vsub.f32 0.0, %v12699_v3 }
 0x739   : > { %v8960_v21 = vpop.f32.mrb[156].mxu0  ;;  %13336 = vst [vmem:[#allocation26_spill] sm:$0xff] %v12708_v48  ;;  %v12716_v8 = vadd.f32 %v13337_v4, %v12594_v19  ;;  %10033 = vrcp.f32 %v946_v14  ;;  %v855_v36 = vmul.f32 1.442695, %v768_v20  ;;  %v948_v24 = vadd.f32 1.0, %v10014_v34  ;;  %v13342_v34 = vld [vmem:[#allocation29_spill] sm:$0xff] }
 0x73a   : > { %13334 = vst [vmem:[#allocation44_spill] sm:$0xff] %v12701_v57  ;;  %v9066_v2 = vpop.f32.mrb[184].mxu1  ;;  %v8961_v30 = vpop.f32.mrb[157].mxu0  ;;  %v774_v22 = vsub.f32 0.0, %v12708_v48  ;;  %10035 = vpow2.f32 %v851_v63  ;;  %v859_v4 = vmul.f32 1.442695, %v770_v55 }
 0x73b   : > { %v8962_v27 = vadd.f32 %v8961_v30, %v8960_v21  ;;  %v9067_v43 = vpop.f32.mrb[185].mxu1  ;;  %v8963_v60 = vpop.f32.mrb[158].mxu0  ;;  %13338 = vst [vmem:[#allocation27_spill] sm:$0xff] %v12716_v8  ;;  %10037 = vpow2.f32 %v855_v36 }
 0x73c   : > { %v9068_v18 = vadd.f32 %v9067_v43, %v9066_v2  ;;  %v9069_v0 = vpop.f32.mrb[186].mxu1  ;;  %v8964_v23 = vpop.f32.mrb[159].mxu0  ;;  %v13340_v2 = vld [vmem:[#allocation28_spill] sm:$0xff]  ;;  %10039 = vrcp.f32 %v948_v24 }
 0x73d   : > { %v12718_v57 = vpop.eup %10017  ;;  %v6715_v39 = vadd.f32 %v8962_v27, %v12530_v61  ;;  %v8965_v21 = vadd.f32 %v8964_v23, %v8963_v60  ;;  %v9070_v30 = vpop.f32.mrb[187].mxu1  ;;  %v12726_v43 = vadd.f32 %v13340_v2, %v12594_v19  ;;  %v863_v61 = vmul.f32 1.442695, %v772_v47 }
 0x73e   : > { %v10020_v58 = vpop.eup %10019  ;;  %v9071_v3 = vadd.f32 %v9070_v30, %v9069_v0  ;;  %v12722_v52 = vadd.f32 %v9068_v18, %v6707_v35  ;;  %v776_v23 = vsub.f32 0.0, %v12716_v8  ;;  %v12734_v27 = vadd.f32 %v13342_v34, %v12594_v19  ;;  %v13345_v0 = vld [vmem:[#allocation13_spill] sm:$0xff]  ;;  %v13347_v34 = vld [vmem:[#allocation30_spill] sm:$0xff] }
 0x73f   : > { %13341 = vst [vmem:[#allocation28_spill] sm:$0xff] %v12726_v43  ;;  %v6718_v14 = vadd.f32 %v8965_v21, %v12532_v11  ;;  %v12729_v20 = vpop.eup %10021  ;;  %v950_v35 = vadd.f32 1.0, %v10020_v58  ;;  %v867_v18 = vmul.f32 1.442695, %v774_v22  ;;  %v12740_v11 = vadd.f32 %v13345_v0, %v12594_v19 }
 0x740   : > { %13339 = vst [vmem:[#allocation45_spill] sm:$0xff] %v12722_v52  ;;  %13343 = vst [vmem:[#allocation29_spill] sm:$0xff] %v12734_v27  ;;  %v12736_v60 = vadd.f32 %v9071_v3, %v6710_v53  ;;  %v10024_v55 = vpop.eup %10023  ;;  %10041 = vpow2.f32 %v859_v4  ;;  %v778_v2 = vsub.f32 0.0, %v12726_v43  ;;  %v12745_v53 = vadd.f32 %v13347_v34, %v12594_v19 }
 0x741   : > { %v8966_v63 = vpop.f32.mrb[160].mxu0  ;;  %13346 = vst [vmem:[#allocation13_spill] sm:$0xff] %v12740_v11  ;;  %v10026_v30 = vpop.eup %10025  ;;  %10043 = vpow2.f32 %v863_v61  ;;  %v871_v24 = vmul.f32 1.442695, %v776_v23  ;;  %v780_v22 = vsub.f32 0.0, %v12734_v27  ;;  %v952_v4 = vadd.f32 1.0, %v10024_v55 }
 0x742   : > { %13344 = vst [vmem:[#allocation46_spill] sm:$0xff] %v12736_v60  ;;  %v9072_v21 = vpop.f32.mrb[188].mxu1  ;;  %v8967_v47 = vpop.f32.mrb[161].mxu0  ;;  %13348 = vst [vmem:[#allocation30_spill] sm:$0xff] %v12745_v53  ;;  %10045 = vrcp.f32 %v950_v35  ;;  %v875_v23 = vmul.f32 1.442695, %v778_v2 }
 0x743   : > { %v8968_v58 = vadd.f32 %v8967_v47, %v8966_v63  ;;  %v9073_v3 = vpop.f32.mrb[189].mxu1  ;;  %v8969_v36 = vpop.f32.mrb[162].mxu0  ;;  %v954_v47 = vadd.f32 1.0, %v10026_v30  ;;  %10047 = vpow2.f32 %v867_v18  ;;  %v13353_v18 = vld [vmem:[#allocation32_spill] sm:$0xff] }
 0x744   : > { %v12747_v8 = vpop.eup %10027  ;;  %v9074_v0 = vadd.f32 %v9073_v3, %v9072_v21  ;;  %v9075_v48 = vpop.f32.mrb[190].mxu1  ;;  %v782_v21 = vsub.f32 0.0, %v12745_v53  ;;  %v13350_v3 = vld [vmem:[#allocation31_spill] sm:$0xff]  ;;  %10049 = vpow2.f32 %v871_v24  ;;  %v12768_v30 = vadd.f32 %v13353_v18, %v12594_v19 }
 0x745   : > { %v8970_v60 = vpop.f32.mrb[163].mxu0  ;;  %v12750_v52 = vpop.eup %10029  ;;  %v6723_v43 = vadd.f32 %v8968_v58, %v12536_v7  ;;  %v12760_v27 = vadd.f32 %v13350_v3, %v12594_v19  ;;  %v879_v7 = vmul.f32 1.442695, %v780_v22  ;;  %10051 = vrcp.f32 %v952_v4 }
 0x746   : > { %v8971_v34 = vadd.f32 %v8970_v60, %v8969_v36  ;;  %v9076_v15 = vpop.f32.mrb[191].mxu1  ;;  %v10032_v63 = vpop.eup %10031  ;;  %v12753_v37 = vadd.f32 %v9074_v0, %v6715_v39  ;;  %v798_v60 = vsub.f32 0.0, %v12740_v11  ;;  %10053 = vrcp.f32 %v954_v47  ;;  %13354 = vst [vmem:[#allocation32_spill] sm:$0xff] %v12768_v30  ;;  %v13355_v11 = vld [vmem:[#allocation14_spill] sm:$0xff] }
 0x747   : > { %v9077_v13 = vadd.f32 %v9076_v15, %v9075_v48  ;;  %v12755_v61 = vpop.eup %10033  ;;  %13351 = vst [vmem:[#allocation31_spill] sm:$0xff] %v12760_v27  ;;  %v956_v48 = vadd.f32 1.0, %v10032_v63  ;;  %10055 = vpow2.f32 %v875_v23  ;;  %v784_v24 = vsub.f32 0.0, %v12760_v27 }
 0x748   : > { %13349 = vst [vmem:[#allocation47_spill] sm:$0xff] %v12753_v37  ;;  %v6726_v35 = vadd.f32 %v8971_v34, %v12538_v50  ;;  %v10036_v15 = vpop.eup %10035  ;;  %v883_v50 = vmul.f32 1.442695, %v782_v21  ;;  %10057 = vpow2.f32 %v879_v7  ;;  %v915_v34 = vmul.f32 1.442695, %v798_v60 }
 0x749   : > { %v12764_v55 = vadd.f32 %v9077_v13, %v6718_v14  ;;  %v8972_v39 = vpop.f32.mrb[164].mxu0  ;;  %v10038_v36 = vpop.eup %10037  ;;  %v958_v4 = vadd.f32 1.0, %v10036_v15  ;;  %10059 = vrcp.f32 %v956_v48  ;;  %v12775_v53 = vadd.f32 %v13355_v11, %v12594_v19  ;;  %v13358_v48 = vld [vmem:[#allocation33_spill] sm:$0xff] }
 0x74a   : > { %v9078_v2 = vpop.f32.mrb[192].mxu1  ;;  %v8973_v58 = vpop.f32.mrb[165].mxu0  ;;  %v960_v27 = vadd.f32 1.0, %v10038_v36  ;;  %10061 = vpow2.f32 %v883_v50  ;;  %v986_v50 = vadd.f32 1.0, %v12703_v41 }
 0x74b   : > { %13352 = vst [vmem:[#allocation48_spill] sm:$0xff] %v12764_v55  ;;  %v8974_v22 = vadd.f32 %v8973_v58, %v8972_v39  ;;  %v9079_v0 = vpop.f32.mrb[193].mxu1  ;;  %v8975_v13 = vpop.f32.mrb[166].mxu0  ;;  %13356 = vst [vmem:[#allocation14_spill] sm:$0xff] %v12775_v53  ;;  %v786_v55 = vsub.f32 0.0, %v12768_v30  ;;  %10063 = vrcp.f32 %v958_v4 }
 0x74c   : > { %v12771_v14 = vpop.eup %10039  ;;  %v9080_v63 = vadd.f32 %v9079_v0, %v9078_v2  ;;  %v9081_v47 = vpop.f32.mrb[194].mxu1  ;;  %v887_v2 = vmul.f32 1.442695, %v784_v24  ;;  %v12785_v0 = vadd.f32 %v13358_v48, %v12594_v19  ;;  %10065 = vpow2.f32 %v915_v34 }
 0x74d   : > { %v8976_v3 = vpop.f32.mrb[167].mxu0  ;;  %v10042_v18 = vpop.eup %10041  ;;  %v6731_v23 = vadd.f32 %v8974_v22, %v12542_v10  ;;  %10067 = vrcp.f32 %v960_v27  ;;  %v891_v24 = vmul.f32 1.442695, %v786_v55  ;;  %v13363_v55 = vld [vmem:[#allocation15_spill] sm:$0xff] }
 0x74e   : > { %v8977_v21 = vadd.f32 %v8976_v3, %v8975_v13  ;;  %v9082_v39 = vpop.f32.mrb[195].mxu1  ;;  %v10044_v58 = vpop.eup %10043  ;;  %v12779_v7 = vadd.f32 %v9080_v63, %v6723_v43  ;;  %13359 = vst [vmem:[#allocation33_spill] sm:$0xff] %v12785_v0  ;;  %v962_v22 = vadd.f32 1.0, %v10042_v18  ;;  %v800_v43 = vsub.f32 0.0, %v12775_v53  ;;  %v13361_v3 = vld [vmem:[#allocation34_spill] sm:$0xff] }
 0x74f   : > { %v9083_v15 = vadd.f32 %v9082_v39, %v9081_v47  ;;  %v12781_v60 = vpop.eup %10045  ;;  %v964_v36 = vadd.f32 1.0, %v10044_v58  ;;  %v12794_v39 = vadd.f32 %v13361_v3, %v12594_v19  ;;  %10069 = vpow2.f32 %v887_v2 }
 0x750   : > { %13357 = vst [vmem:[#allocation49_spill] sm:$0xff] %v12779_v7  ;;  %v6734_v11 = vadd.f32 %v8977_v21, %v12544_v33  ;;  %v10048_v10 = vpop.eup %10047  ;;  %v788_v34 = vsub.f32 0.0, %v12785_v0  ;;  %10071 = vrcp.f32 %v962_v22  ;;  %v12804_v48 = vadd.f32 %v13363_v55, %v12594_v19 }
 0x751   : > { %v12788_v13 = vadd.f32 %v9083_v15, %v6726_v35  ;;  %v8978_v63 = vpop.f32.mrb[168].mxu0  ;;  %v10050_v47 = vpop.eup %10049  ;;  %13362 = vst [vmem:[#allocation34_spill] sm:$0xff] %v12794_v39  ;;  %v988_v35 = vadd.f32 1.0, %v12711_v28  ;;  %v966_v41 = vadd.f32 1.0, %v10048_v10  ;;  %10073 = vrcp.f32 %v964_v36 }
 0x752   : > { %v9084_v33 = vpop.f32.mrb[196].mxu1  ;;  %v8979_v21 = vpop.f32.mrb[169].mxu0  ;;  %13364 = vst [vmem:[#allocation15_spill] sm:$0xff] %v12804_v48  ;;  %v968_v28 = vadd.f32 1.0, %v10050_v47  ;;  %10075 = vpow2.f32 %v891_v24  ;;  %v790_v7 = vsub.f32 0.0, %v12794_v39 }
 0x753   : > { %13360 = vst [vmem:[#allocation50_spill] sm:$0xff] %v12788_v13  ;;  %v12796_v4 = vpop.eup %10051  ;;  %v8980_v18 = vadd.f32 %v8979_v21, %v8978_v63  ;;  %v9085_v58 = vpop.f32.mrb[197].mxu1  ;;  %10077 = vrcp.f32 %v986_v50 }
 0x754   : > { %v8981_v15 = vpop.f32.mrb[170].mxu0  ;;  %v12800_v27 = vpop.eup %10053  ;;  %v9086_v3 = vadd.f32 %v9085_v58, %v9084_v33  ;;  %v895_v33 = vmul.f32 1.442695, %v788_v34  ;;  %v13366_v58 = vld [vmem:[#allocation35_spill] sm:$0xff]  ;;  %10079 = vrcp.f32 %v966_v41 }
 0x755   : > { %v9087_v53 = vpop.f32.mrb[198].mxu1  ;;  %v8982_v30 = vpop.f32.mrb[171].mxu0  ;;  %v6739_v2 = vadd.f32 %v8980_v18, %v12548_v62  ;;  %v12814_v55 = vadd.f32 %v13366_v58, %v12594_v19  ;;  %10081 = vrcp.f32 %v968_v28 }
 0x756   : > { %v10056_v13 = vpop.eup %10055  ;;  %v8983_v0 = vadd.f32 %v8982_v30, %v8981_v15  ;;  %v9088_v63 = vpop.f32.mrb[199].mxu1  ;;  %v12808_v10 = vadd.f32 %v9086_v3, %v6731_v23  ;;  %v802_v30 = vsub.f32 0.0, %v12804_v48  ;;  %v13369_v23 = vld [vmem:[#allocation16_spill] sm:$0xff]  ;;  %10083 = vrcp.f32 %v988_v35 }
 0x757   : > { %v10058_v21 = vpop.eup %10057  ;;  %v9089_v22 = vadd.f32 %v9088_v63, %v9087_v53  ;;  %13367 = vst [vmem:[#allocation35_spill] sm:$0xff] %v12814_v55  ;;  %v970_v62 = vadd.f32 1.0, %v10056_v13  ;;  %v12822_v18 = vadd.f32 %v13369_v23, %v12594_v19  ;;  %v899_v15 = vmul.f32 1.442695, %v790_v7 }
 0x758   : > { %13365 = vst [vmem:[#allocation51_spill] sm:$0xff] %v12808_v10  ;;  %v12810_v37 = vpop.eup %10059  ;;  %v6742_v36 = vadd.f32 %v8983_v0, %v12550_v59  ;;  %v972_v53 = vadd.f32 1.0, %v10058_v21  ;;  %v919_v13 = vmul.f32 1.442695, %v800_v43  ;;  %10085 = vpow2.f32 %v895_v33 }
 0x759   : > { %v12818_v47 = vadd.f32 %v9089_v22, %v6734_v11  ;;  %v10062_v24 = vpop.eup %10061  ;;  %13370 = vst [vmem:[#allocation16_spill] sm:$0xff] %v12822_v18  ;;  %v8984_v50 = vpop.f32.mrb[172].mxu0  ;;  %v792_v11 = vsub.f32 0.0, %v12814_v55  ;;  %10087 = vrcp.f32 %v970_v62  ;;  %v923_v58 = vmul.f32 1.442695, %v802_v30 }
 0x75a   : > { %v12824_v34 = vpop.eup %10063  ;;  %v9090_v3 = vpop.f32.mrb[200].mxu1  ;;  %v974_v22 = vadd.f32 1.0, %v10062_v24  ;;  %10089 = vrcp.f32 %v972_v53  ;;  %v804_v7 = vsub.f32 0.0, %v12822_v18  ;;  %v13371_v24 = vld [vmem:[#allocation18_spill] sm:$0xff] }
 0x75b   : > { %13368 = vst [vmem:[#allocation52_spill] sm:$0xff] %v12818_v47  ;;  %v8985_v59 = vpop.f32.mrb[173].mxu0  ;;  %v10066_v0 = vpop.eup %10065  ;;  %10091 = vpow2.f32 %v899_v15  ;;  %v903_v30 = vmul.f32 1.442695, %v792_v11  ;;  %v12839_v53 = vadd.f32 %v13371_v24, %v12594_v19 }
 0x75c   : > { %v8986_v41 = vadd.f32 %v8985_v59, %v8984_v50  ;;  %v9091_v63 = vpop.f32.mrb[201].mxu1  ;;  %v8987_v28 = vpop.f32.mrb[174].mxu0  ;;  %v990_v50 = vadd.f32 1.0, %v10066_v0  ;;  %10093 = vpow2.f32 %v919_v13 }
 0x75d   : > { %v12827_v21 = vpop.eup %10067  ;;  %v9092_v23 = vadd.f32 %v9091_v63, %v9090_v3  ;;  %v9093_v48 = vpop.f32.mrb[202].mxu1  ;;  %13372 = vst [vmem:[#allocation18_spill] sm:$0xff] %v12839_v53  ;;  %10095 = vrcp.f32 %v974_v22  ;;  %v806_v22 = vsub.f32 0.0, %v12839_v53 }
 0x75e   : > { %v8988_v39 = vpop.f32.mrb[175].mxu0  ;;  %v10070_v35 = vpop.eup %10069  ;;  %v6747_v43 = vadd.f32 %v8986_v41, %v12555_v51  ;;  %10097 = vpow2.f32 %v923_v58 }
 0x75f   : > { %v8989_v33 = vadd.f32 %v8988_v39, %v8987_v28  ;;  %v9094_v47 = vpop.f32.mrb[203].mxu1  ;;  %v12831_v55 = vpop.eup %10071  ;;  %v12833_v10 = vadd.f32 %v9092_v23, %v6739_v2  ;;  %v976_v39 = vadd.f32 1.0, %v10070_v35  ;;  %v13374_v2 = vld [vmem:[#allocation36_spill] sm:$0xff]  ;;  %10099 = vrcp.f32 %v990_v50 }
 0x760   : > { %v9095_v59 = vadd.f32 %v9094_v47, %v9093_v48  ;;  %v12835_v62 = vpop.eup %10073  ;;  %v927_v48 = vmul.f32 1.442695, %v804_v7  ;;  %v12848_v47 = vadd.f32 %v13374_v2, %v12594_v19  ;;  %10101 = vpow2.f32 %v903_v30 }
 0x761   : > { %v6750_v3 = vadd.f32 %v8989_v33, %v12558_v44  ;;  %v10076_v51 = vpop.eup %10075  ;;  %v9240_v15 = vpop.f32.mrb[176].mxu0  ;;  %10103 = vrcp.f32 %v976_v39 }
 0x762   : > { %v12842_v41 = vadd.f32 %v9095_v59, %v6742_v36  ;;  %v12844_v0 = vpop.eup %10077  ;;  %13375 = vst [vmem:[#allocation36_spill] sm:$0xff] %v12848_v47  ;;  %v9096_v11 = vpop.f32.mrb[204].mxu1  ;;  %v12853_v44 = vadd.f32 %v9240_v15, %v12567_v56  ;;  %v978_v36 = vadd.f32 1.0, %v10076_v51  ;;  %10105 = vpow2.f32 %v927_v48 }
 0x763   : > { %13373 = vst [vmem:[#allocation53_spill] sm:$0xff] %v12844_v0  ;;  %v12850_v13 = vpop.eup %10079  ;;  %v6948_v63 = vpop.f32.mrb[177].mxu0  ;;  %v808_v30 = vsub.f32 0.0, %v12848_v47 }
 0x764   : > { %v12855_v28 = vpop.eup %10081  ;;  %v9097_v58 = vpop.f32.mrb[205].mxu1  ;;  %v12859_v23 = vadd.f32 %v6948_v63, %v12561_v9  ;;  %v7077_v7 = vsub.f32 0.0, %v12853_v44  ;;  %10107 = vrcp.f32 %v978_v36 }
 0x765   : > { %v9241_v19 = vpop.f32.mrb[178].mxu0  ;;  %v12861_v35 = vpop.eup %10083  ;;  %v9098_v33 = vadd.f32 %v9097_v58, %v9096_v11 }
 0x766   : > { %13376 = vst [vmem:[#allocation54_spill] sm:$0xff] %v12861_v35  ;;  %v9099_v56 = vpop.f32.mrb[206].mxu1  ;;  %v12865_v50 = vadd.f32 %v9241_v19, %v12570_v42  ;;  %v6951_v59 = vpop.f32.mrb[179].mxu0  ;;  %v7075_v51 = vsub.f32 0.0, %v12859_v23  ;;  %v7111_v39 = vmul.f32 1.442695, %v7077_v7 }
 0x767   : > { %v10086_v24 = vpop.eup %10085  ;;  %v9100_v9 = vpop.f32.mrb[207].mxu1  ;;  %v12870_v2 = vadd.f32 %v6951_v59, %v12564_v32  ;;  %v12875_v58 = vadd.f32 %v9098_v33, %v6747_v43  ;;  %v931_v7 = vmul.f32 1.442695, %v806_v22  ;;  %v935_v33 = vmul.f32 1.442695, %v808_v30 }
 0x768   : > { %v12872_v15 = vpop.eup %10087  ;;  %v7078_v11 = vsub.f32 0.0, %v12865_v50  ;;  %v9101_v63 = vadd.f32 %v9100_v9, %v9099_v56  ;;  %v7107_v48 = vmul.f32 1.442695, %v7075_v51  ;;  %v980_v47 = vadd.f32 1.0, %v10086_v24 }
 0x769   : > { %v12877_v42 = vpop.eup %10089  ;;  %v7076_v19 = vsub.f32 0.0, %v12870_v2  ;;  %10109 = vpow2.f32 %v7111_v39  ;;  %v9244_v56 = vpop.f32.mrb[180].mxu0 }
 0x76a   : > { %v10092_v18 = vpop.eup %10091  ;;  %v7113_v53 = vmul.f32 1.442695, %v7078_v11  ;;  %v12880_v32 = vadd.f32 %v9101_v63, %v6750_v3  ;;  %10111 = vpow2.f32 %v7107_v48  ;;  %v12887_v36 = vadd.f32 %v9244_v56, %v12579_v45  ;;  %v6964_v51 = vpop.f32.mrb[181].mxu0 }
 0x76b   : > { %v12882_v59 = vpop.eup %10093  ;;  %v7109_v35 = vmul.f32 1.442695, %v7076_v19  ;;  %v982_v24 = vadd.f32 1.0, %v10092_v18  ;;  %v12892_v3 = vadd.f32 %v6964_v51, %v12573_v38  ;;  %v9245_v39 = vpop.f32.mrb[182].mxu0 }
 0x76c   : > { %v12884_v43 = vpop.eup %10095  ;;  %10113 = vpow2.f32 %v7113_v53  ;;  %v7081_v11 = vsub.f32 0.0, %v12887_v36  ;;  %v12898_v30 = vadd.f32 %v9245_v39, %v12582_v16  ;;  %v6967_v53 = vpop.f32.mrb[183].mxu0 }
 0x76d   : > { %v12889_v9 = vpop.eup %10097  ;;  %10115 = vpow2.f32 %v7109_v35  ;;  %v7079_v63 = vsub.f32 0.0, %v12892_v3  ;;  %v12902_v18 = vadd.f32 %v6967_v53, %v12576_v17 }
 0x76e   : > { %v12894_v22 = vpop.eup %10099  ;;  %10117 = vrcp.f32 %v980_v47  ;;  %v7119_v38 = vmul.f32 1.442695, %v7081_v11  ;;  %v7082_v48 = vsub.f32 0.0, %v12898_v30 }
 0x76f   : > { %13377 = vst [vmem:[#allocation55_spill] sm:$0xff] %v12894_v22  ;;  %v10102_v45 = vpop.eup %10101  ;;  %10119 = vpow2.f32 %v931_v7  ;;  %v7115_v19 = vmul.f32 1.442695, %v7079_v63  ;;  %v7080_v16 = vsub.f32 0.0, %v12902_v18 }
 0x770   : > { %v12904_v35 = vpop.eup %10103  ;;  %10121 = vpow2.f32 %v935_v33  ;;  %v984_v56 = vadd.f32 1.0, %v10102_v45  ;;  %v7121_v7 = vmul.f32 1.442695, %v7082_v48 }
 0x771   : > { %v12907_v47 = vpop.eup %10105  ;;  %10123 = vrcp.f32 %v982_v24  ;;  %v7117_v17 = vmul.f32 1.442695, %v7080_v16  ;;  %v9248_v39 = vpop.f32.mrb[184].mxu0 }
 0x772   : > { %10125 = vpow2.f32 %v7119_v38  ;;  %v12910_v51 = vpop.eup %10107  ;;  %v12913_v33 = vadd.f32 %v9248_v39, %v12601_v25  ;;  %v6980_v11 = vpop.f32.mrb[185].mxu0 }
 0x773   : > { %13378 = vst [vmem:[#allocation56_spill] sm:$0xff] %v12910_v51  ;;  %10127 = vpow2.f32 %v7115_v19  ;;  %v10110_v53 = vpop.eup %10109  ;;  %v12916_v24 = vadd.f32 %v6980_v11, %v12586_v31  ;;  %v9249_v45 = vpop.f32.mrb[186].mxu0 }
 0x774   : > { %10129 = vpow2.f32 %v7121_v7  ;;  %v10112_v0 = vpop.eup %10111  ;;  %v7173_v22 = vadd.f32 1.0, %v10110_v53  ;;  %v7085_v48 = vsub.f32 0.0, %v12913_v33  ;;  %v12920_v19 = vadd.f32 %v9249_v45, %v12608_v54  ;;  %v6983_v16 = vpop.f32.mrb[187].mxu0 }
 0x775   : > { %10131 = vpow2.f32 %v7117_v17  ;;  %v7171_v38 = vadd.f32 1.0, %v10112_v0  ;;  %v7083_v39 = vsub.f32 0.0, %v12916_v24  ;;  %v12924_v17 = vadd.f32 %v6983_v16, %v12589_v49 }
 0x776   : > { %v10114_v63 = vpop.eup %10113  ;;  %10133 = vrcp.f32 %v984_v56  ;;  %v7127_v56 = vmul.f32 1.442695, %v7085_v48  ;;  %v7086_v0 = vsub.f32 0.0, %v12920_v19  ;;  %v12933_v54 = vmul.f32 %v12718_v57, %v12599_v12 }
 0x777   : > { %v10116_v7 = vpop.eup %10115  ;;  %10135 = vrcp.f32 %v7173_v22  ;;  %v7174_v25 = vadd.f32 1.0, %v10114_v63  ;;  %v7123_v22 = vmul.f32 1.442695, %v7083_v39  ;;  %v7084_v45 = vsub.f32 0.0, %v12924_v17 }
 0x778   : > { %v12926_v31 = vpop.eup %10117  ;;  %10137 = vrcp.f32 %v7171_v38  ;;  %v7172_v53 = vadd.f32 1.0, %v10116_v7  ;;  %v12940_v49 = vmul.f32 %v12729_v20, %v12606_v6  ;;  %v1070_v38 = vmul.f32 %v12747_v8, %v12614_v29 }
 0x779   : > { %13379 = vst [vmem:[#allocation57_spill] sm:$0xff] %v12926_v31  ;;  %v12929_v11 = vpop.eup %10119  ;;  %10139 = vrcp.f32 %v7174_v25  ;;  %v7129_v48 = vmul.f32 1.442695, %v7086_v0  ;;  %v12948_v12 = vmul.f32 %v12750_v52, %v12619_v40  ;;  %v12952_v57 = vmul.f32 %v12755_v61, %v12626_v1  ;;  %v9252_v25 = vpop.f32.mrb[188].mxu0  ;;  %v13381_v1 = vld [vmem:[#allocation19_spill] sm:$0xff] }
 0x77a   : > { %v12936_v63 = vpop.eup %10121  ;;  %10141 = vrcp.f32 %v7172_v53  ;;  %v7125_v7 = vmul.f32 1.442695, %v7084_v45  ;;  %v12956_v20 = vmul.f32 %v12771_v14, %v12639_v5  ;;  %v12960_v29 = vmul.f32 %v12781_v60, %v12652_v26  ;;  %v6996_v52 = vpop.f32.mrb[189].mxu0  ;;  %v13382_v53 = vld [vmem:[#allocation37_spill] sm:$0xff] }
 0x77b   : > { %13380 = vst [vmem:[#allocation58_spill] sm:$0xff] %v12936_v63  ;;  %v12944_v16 = vpop.eup %10123  ;;  %10143 = vpow2.f32 %v7127_v56  ;;  %v12963_v40 = vadd.f32 %v9252_v25, %v12646_v46  ;;  %v12967_v61 = vmul.f32 %v12796_v4, %v13381_v1  ;;  %v12970_v5 = vadd.f32 %v6996_v52, %v13382_v53  ;;  %v9253_v14 = vpop.f32.mrb[190].mxu0  ;;  %v13383_v46 = vld [vmem:[#allocation17_spill] sm:$0xff] }
 0x77c   : > { %v10126_v6 = vpop.eup %10125  ;;  %10145 = vpow2.f32 %v7123_v22  ;;  %v12974_v0 = vadd.f32 %v9253_v14, %v13383_v46  ;;  %v6999_v22 = vpop.f32.mrb[191].mxu0  ;;  %v13386_v14 = vld [vmem:[#allocation20_spill] sm:$0xff] }
 0x77d   : > { %v10128_v8 = vpop.eup %10127  ;;  %v7177_v39 = vadd.f32 1.0, %v10126_v6  ;;  %10147 = vpow2.f32 %v7129_v48  ;;  %v7089_v60 = vsub.f32 0.0, %v12963_v40  ;;  %v7087_v25 = vsub.f32 0.0, %v12970_v5  ;;  %v13384_v6 = vld [vmem:[#allocation38_spill] sm:$0xff] }
 0x77e   : > { %v10130_v56 = vpop.eup %10129  ;;  %v7175_v26 = vadd.f32 1.0, %v10128_v8  ;;  %10149 = vpow2.f32 %v7125_v7  ;;  %v12978_v48 = vadd.f32 %v6999_v22, %v13384_v6  ;;  %v7090_v1 = vsub.f32 0.0, %v12974_v0  ;;  %v13387_v22 = vld [vmem:[#allocation21_spill] sm:$0xff] }
 0x77f   : > { %v10132_v45 = vpop.eup %10131  ;;  %10151 = vrcp.f32 %v7177_v39  ;;  %v7178_v4 = vadd.f32 1.0, %v10130_v56  ;;  %v7135_v7 = vmul.f32 1.442695, %v7089_v60  ;;  %v12986_v46 = vmul.f32 %v12800_v27, %v13386_v14 }
 0x780   : > { %v12980_v52 = vpop.eup %10133  ;;  %10153 = vrcp.f32 %v7175_v26  ;;  %v7176_v8 = vadd.f32 1.0, %v10132_v45  ;;  %v7131_v39 = vmul.f32 1.442695, %v7087_v25  ;;  %v7088_v56 = vsub.f32 0.0, %v12978_v48 }
 0x781   : > { %13385 = vst [vmem:[#allocation19_spill] sm:$0xff] %v12980_v52  ;;  %v10136_v53 = vpop.eup %10135  ;;  %10155 = vrcp.f32 %v7178_v4  ;;  %v12991_v6 = vmul.f32 %v12810_v37, %v13387_v22  ;;  %v7137_v60 = vmul.f32 1.442695, %v7090_v1  ;;  %v13388_v52 = vld [vmem:[#allocation22_spill] sm:$0xff]  ;;  %v9256_v25 = vpop.f32.mrb[192].mxu0  ;;  %v13389_v22 = vld [vmem:[#allocation43_spill] sm:$0xff] }
 0x782   : > { %v10138_v31 = vpop.eup %10137  ;;  %v7237_v26 = vmul.f32 %v10136_v53, %v12853_v44  ;;  %10157 = vrcp.f32 %v7176_v8  ;;  %v12996_v63 = vmul.f32 %v12824_v34, %v13388_v52  ;;  %v7133_v4 = vmul.f32 1.442695, %v7088_v56  ;;  %v7012_v8 = vpop.f32.mrb[193].mxu0 }
 0x783   : > { %v10140_v45 = vpop.eup %10139  ;;  %v7235_v27 = vmul.f32 %v10138_v31, %v12859_v23  ;;  %10159 = vpow2.f32 %v7135_v7  ;;  %v13001_v44 = vadd.f32 %v9256_v25, %v13389_v22  ;;  %v13390_v23 = vld [vmem:[#allocation41_spill] sm:$0xff]  ;;  %v9257_v52 = vpop.f32.mrb[194].mxu0 }
 0x784   : > { %v10142_v14 = vpop.eup %10141  ;;  %v7269_v51 = vadd.f32 %v7237_v26, %v1070_v38  ;;  %v7238_v37 = vmul.f32 %v10140_v45, %v12865_v50  ;;  %10161 = vpow2.f32 %v7131_v39  ;;  %v13006_v31 = vadd.f32 %v7012_v8, %v13390_v23  ;;  %v13391_v45 = vld [vmem:[#allocation44_spill] sm:$0xff] }
 0x785   : > { %v10144_v1 = vpop.eup %10143  ;;  %v7267_v53 = vadd.f32 %v7235_v27, %v12933_v54  ;;  %v7236_v34 = vmul.f32 %v10142_v14, %v12870_v2  ;;  %10163 = vpow2.f32 %v7137_v60  ;;  %v7093_v2 = vsub.f32 0.0, %v13001_v44  ;;  %v7015_v54 = vpop.f32.mrb[195].mxu0 }
 0x786   : > { %v10146_v7 = vpop.eup %10145  ;;  %7301 = vst [vmem:[%s13010_s7 + $0x10] sm:$0xff] %v7269_v51  ;;  %v7270_v50 = vadd.f32 %v7238_v37, %v12948_v12  ;;  %v7181_v38 = vadd.f32 1.0, %v10144_v1  ;;  %10165 = vpow2.f32 %v7133_v4  ;;  %v7091_v60 = vsub.f32 0.0, %v13006_v31  ;;  %v13392_v4 = vld [vmem:[#allocation42_spill] sm:$0xff] }
 0x787   : > { %v10148_v39 = vpop.eup %10147  ;;  %7299 = vst [vmem:[%s13010_s7] sm:$0xff] %v7267_v53  ;;  %v7268_v56 = vadd.f32 %v7236_v34, %v12940_v49  ;;  %v7179_v26 = vadd.f32 1.0, %v10146_v7  ;;  %v13019_v27 = vadd.f32 %v9257_v52, %v13391_v45  ;;  %v7143_v12 = vmul.f32 1.442695, %v7093_v2  ;;  %v13393_v53 = vld [vmem:[#allocation23_spill] sm:$0xff] }
 0x788   : > { %v10150_v25 = vpop.eup %10149  ;;  %7302 = vst [vmem:[%s13010_s7 + $0x18] sm:$0xff] %v7270_v50  ;;  %10167 = vrcp.f32 %v7181_v38  ;;  %v7182_v51 = vadd.f32 1.0, %v10148_v39  ;;  %v13023_v14 = vadd.f32 %v7015_v54, %v13392_v4  ;;  %v7139_v8 = vmul.f32 1.442695, %v7091_v60  ;;  %v13394_v50 = vld [vmem:[#allocation24_spill] sm:$0xff] }
 0x789   : > { %v10152_v37 = vpop.eup %10151  ;;  %7300 = vst [vmem:[%s13010_s7 + $0x8] sm:$0xff] %v7268_v56  ;;  %10169 = vrcp.f32 %v7179_v26  ;;  %v7180_v22 = vadd.f32 1.0, %v10150_v25  ;;  %v7094_v49 = vsub.f32 0.0, %v13019_v27  ;;  %v13029_v34 = vmul.f32 %v12827_v21, %v13393_v53  ;;  %v9260_v39 = vpop.f32.mrb[196].mxu0 }
 0x78a   : > { %v10154_v1 = vpop.eup %10153  ;;  %v7241_v23 = vmul.f32 %v10152_v37, %v12887_v36  ;;  %10171 = vrcp.f32 %v7182_v51  ;;  %v7092_v52 = vsub.f32 0.0, %v13023_v14  ;;  %v13035_v38 = vmul.f32 %v12831_v55, %v13394_v50  ;;  %v7028_v60 = vpop.f32.mrb[197].mxu0 }
 0x78b   : > { %v10156_v7 = vpop.eup %10155  ;;  %v7239_v2 = vmul.f32 %v10154_v1, %v12892_v3  ;;  %10173 = vrcp.f32 %v7180_v22  ;;  %v7145_v54 = vmul.f32 1.442695, %v7094_v49  ;;  %v13395_v3 = vld [vmem:[#allocation47_spill] sm:$0xff]  ;;  %v9261_v4 = vpop.f32.mrb[198].mxu0 }
 0x78c   : > { %v10158_v56 = vpop.eup %10157  ;;  %v7273_v21 = vadd.f32 %v7241_v23, %v12960_v29  ;;  %v7242_v26 = vmul.f32 %v10156_v7, %v12898_v30  ;;  %10175 = vpow2.f32 %v7143_v12  ;;  %v7141_v36 = vmul.f32 1.442695, %v7092_v52  ;;  %v13396_v12 = vld [vmem:[#allocation45_spill] sm:$0xff]  ;;  %v7031_v49 = vpop.f32.mrb[199].mxu0  ;;  %v13397_v52 = vld [vmem:[#allocation48_spill] sm:$0xff] }
 0x78d   : > { %v10160_v45 = vpop.eup %10159  ;;  %v7271_v25 = vadd.f32 %v7239_v2, %v12952_v57  ;;  %v7240_v55 = vmul.f32 %v10158_v56, %v12902_v18  ;;  %10177 = vpow2.f32 %v7139_v8  ;;  %v13043_v51 = vadd.f32 %v9260_v39, %v13395_v3  ;;  %v13399_v56 = vld [vmem:[#allocation25_spill] sm:$0xff] }
 0x78e   : > { %v10162_v37 = vpop.eup %10161  ;;  %7305 = vst [vmem:[%s13010_s7 + $0x30] sm:$0xff] %v7273_v21  ;;  %v7274_v29 = vadd.f32 %v7242_v26, %v12967_v61  ;;  %v7185_v30 = vadd.f32 1.0, %v10160_v45  ;;  %10179 = vpow2.f32 %v7145_v54  ;;  %v13048_v22 = vadd.f32 %v7028_v60, %v13396_v12  ;;  %v13398_v54 = vld [vmem:[#allocation46_spill] sm:$0xff] }
 0x78f   : > { %v10164_v57 = vpop.eup %10163  ;;  %7303 = vst [vmem:[%s13010_s7 + $0x20] sm:$0xff] %v7271_v25  ;;  %v7272_v18 = vadd.f32 %v7240_v55, %v12956_v20  ;;  %v7183_v8 = vadd.f32 1.0, %v10162_v37  ;;  %10181 = vpow2.f32 %v7141_v36  ;;  %v7097_v1 = vsub.f32 0.0, %v13043_v51  ;;  %v13400_v45 = vld [vmem:[#allocation26_spill] sm:$0xff] }
 0x790   : > { %v10166_v53 = vpop.eup %10165  ;;  %7306 = vst [vmem:[%s13010_s7 + $0x38] sm:$0xff] %v7274_v29  ;;  %10183 = vrcp.f32 %v7185_v30  ;;  %v7186_v23 = vadd.f32 1.0, %v10164_v57  ;;  %v7095_v61 = vsub.f32 0.0, %v13048_v22  ;;  %v13056_v7 = vadd.f32 %v9261_v4, %v13397_v52  ;;  %v13401_v30 = vld [vmem:[#allocation51_spill] sm:$0xff] }
 0x791   : > { %7304 = vst [vmem:[%s13010_s7 + $0x28] sm:$0xff] %v7272_v18  ;;  %10185 = vrcp.f32 %v7183_v8  ;;  %v7184_v50 = vadd.f32 1.0, %v10166_v53  ;;  %v7151_v2 = vmul.f32 1.442695, %v7097_v1  ;;  %v13060_v39 = vadd.f32 %v7031_v49, %v13398_v54  ;;  %v9264_v4 = vpop.f32.mrb[200].mxu0 }
 0x792   : > { %v10168_v20 = vpop.eup %10167  ;;  %v13064_v21 = vmul.f32 %v12835_v62, %v13399_v56  ;;  %10187 = vrcp.f32 %v7186_v23  ;;  %v7147_v26 = vmul.f32 1.442695, %v7095_v61  ;;  %v7098_v36 = vsub.f32 0.0, %v13056_v7  ;;  %v7044_v49 = vpop.f32.mrb[201].mxu0  ;;  %v13403_v56 = vld [vmem:[#allocation52_spill] sm:$0xff] }
 0x793   : > { %v10170_v60 = vpop.eup %10169  ;;  %v1094_v25 = vmul.f32 %v12850_v13, %v13400_v45  ;;  %v7245_v55 = vmul.f32 %v10168_v20, %v12913_v33  ;;  %10189 = vrcp.f32 %v7184_v50  ;;  %v7096_v3 = vsub.f32 0.0, %v13060_v39  ;;  %v9265_v8 = vpop.f32.mrb[202].mxu0  ;;  %v13404_v45 = vld [vmem:[#allocation50_spill] sm:$0xff] }
 0x794   : > { %v10172_v37 = vpop.eup %10171  ;;  %v7243_v29 = vmul.f32 %v10170_v60, %v12916_v24  ;;  %10191 = vpow2.f32 %v7151_v2  ;;  %v7153_v62 = vmul.f32 1.442695, %v7098_v36  ;;  %v13073_v12 = vadd.f32 %v9264_v4, %v13401_v30  ;;  %v7047_v61 = vpop.f32.mrb[203].mxu0  ;;  %v13405_v4 = vld [vmem:[#allocation27_spill] sm:$0xff] }
 0x795   : > { %v10174_v57 = vpop.eup %10173  ;;  %v7277_v18 = vadd.f32 %v7245_v55, %v12996_v63  ;;  %v7246_v13 = vmul.f32 %v10172_v37, %v12920_v19  ;;  %10193 = vpow2.f32 %v7147_v26  ;;  %v7149_v33 = vmul.f32 1.442695, %v7096_v3  ;;  %v13402_v19 = vld [vmem:[#allocation49_spill] sm:$0xff] }
 0x796   : > { %v10176_v1 = vpop.eup %10175  ;;  %v7275_v53 = vadd.f32 %v7243_v29, %v12986_v46  ;;  %v7244_v24 = vmul.f32 %v10174_v57, %v12924_v17  ;;  %10195 = vpow2.f32 %v7153_v62  ;;  %v7101_v23 = vsub.f32 0.0, %v13073_v12 }
 0x797   : > { %v10178_v52 = vpop.eup %10177  ;;  %7309 = vst [vmem:[%s13010_s7 + $0x50] sm:$0xff] %v7277_v18  ;;  %v7278_v63 = vadd.f32 %v7246_v13, %v13029_v34  ;;  %v7189_v50 = vadd.f32 1.0, %v10176_v1  ;;  %10197 = vpow2.f32 %v7149_v33  ;;  %v13083_v2 = vadd.f32 %v7044_v49, %v13402_v19 }
 0x798   : > { %v10180_v54 = vpop.eup %10179  ;;  %7307 = vst [vmem:[%s13010_s7 + $0x40] sm:$0xff] %v7275_v53  ;;  %v7276_v46 = vadd.f32 %v7244_v24, %v12991_v6  ;;  %v7187_v17 = vadd.f32 1.0, %v10178_v52  ;;  %v7159_v20 = vmul.f32 1.442695, %v7101_v23  ;;  %v13088_v26 = vadd.f32 %v9265_v8, %v13403_v56 }
 0x799   : > { %v10182_v36 = vpop.eup %10181  ;;  %7310 = vst [vmem:[%s13010_s7 + $0x58] sm:$0xff] %v7278_v63  ;;  %10199 = vrcp.f32 %v7189_v50  ;;  %v7190_v60 = vadd.f32 1.0, %v10180_v54  ;;  %v7099_v34 = vsub.f32 0.0, %v13083_v2  ;;  %v13093_v55 = vadd.f32 %v7047_v61, %v13404_v45  ;;  %v9268_v18 = vpop.f32.mrb[204].mxu0 }
 0x79a   : > { %v10184_v3 = vpop.eup %10183  ;;  %v1096_v37 = vmul.f32 %v12855_v28, %v13405_v4  ;;  %7308 = vst [vmem:[%s13010_s7 + $0x48] sm:$0xff] %v7276_v46  ;;  %10201 = vrcp.f32 %v7187_v17  ;;  %v7188_v6 = vadd.f32 1.0, %v10182_v36  ;;  %v7102_v29 = vsub.f32 0.0, %v13088_v26  ;;  %v7060_v1 = vpop.f32.mrb[205].mxu0 }
 0x79b   : > { %v10186_v62 = vpop.eup %10185  ;;  %v7249_v30 = vmul.f32 %v10184_v3, %v12963_v40  ;;  %10203 = vrcp.f32 %v7190_v60  ;;  %v7155_v49 = vmul.f32 1.442695, %v7099_v34  ;;  %v7100_v57 = vsub.f32 0.0, %v13093_v55  ;;  %v9269_v61 = vpop.f32.mrb[206].mxu0  ;;  %v13406_v34 = vld [vmem:[#allocation28_spill] sm:$0xff] }
 0x79c   : > { %v10188_v13 = vpop.eup %10187  ;;  %v7247_v33 = vmul.f32 %v10186_v62, %v12970_v5  ;;  %10205 = vrcp.f32 %v7188_v6  ;;  %v7161_v8 = vmul.f32 1.442695, %v7102_v29  ;;  %v13103_v28 = vadd.f32 %v9268_v18, %v12875_v58  ;;  %v7063_v58 = vpop.f32.mrb[207].mxu0  ;;  %v13407_v62 = vld [vmem:[#allocation30_spill] sm:$0xff] }
 0x79d   : > { %v10190_v53 = vpop.eup %10189  ;;  %v7281_v24 = vadd.f32 %v7249_v30, %v1094_v25  ;;  %v7250_v23 = vmul.f32 %v10188_v13, %v12974_v0  ;;  %10207 = vpow2.f32 %v7159_v20  ;;  %v7157_v40 = vmul.f32 1.442695, %v7100_v57  ;;  %v13408_v57 = vld [vmem:[#allocation31_spill] sm:$0xff] }
 0x79e   : > { %v10192_v52 = vpop.eup %10191  ;;  %v7279_v63 = vadd.f32 %v7247_v33, %v13035_v38  ;;  %v7248_v5 = vmul.f32 %v10190_v53, %v12978_v48  ;;  %10209 = vpow2.f32 %v7155_v49  ;;  %v7105_v50 = vsub.f32 0.0, %v13103_v28 }
 0x79f   : > { %v10194_v19 = vpop.eup %10193  ;;  %7313 = vst [vmem:[%s13010_s7 + $0x70] sm:$0xff] %v7281_v24  ;;  %v7282_v54 = vadd.f32 %v7250_v23, %v1096_v37  ;;  %v7193_v25 = vadd.f32 1.0, %v10192_v52  ;;  %10211 = vpow2.f32 %v7161_v8  ;;  %v13111_v0 = vadd.f32 %v7060_v1, %v12833_v10  ;;  %v13409_v1 = vld [vmem:[#allocation29_spill] sm:$0xff] }
 0x7a0   : > { %v10196_v46 = vpop.eup %10195  ;;  %7311 = vst [vmem:[%s13010_s7 + $0x60] sm:$0xff] %v7279_v63  ;;  %v7280_v38 = vadd.f32 %v7248_v5, %v13064_v21  ;;  %v7191_v17 = vadd.f32 1.0, %v10194_v19  ;;  %10213 = vpow2.f32 %v7157_v40  ;;  %v7167_v48 = vmul.f32 1.442695, %v7105_v50 }
 0x7a1   : > { %v10198_v20 = vpop.eup %10197  ;;  %7314 = vst [vmem:[%s13010_s7 + $0x78] sm:$0xff] %v7282_v54  ;;  %10215 = vrcp.f32 %v7193_v25  ;;  %v7194_v56 = vadd.f32 1.0, %v10196_v46  ;;  %v7103_v36 = vsub.f32 0.0, %v13111_v0  ;;  %v13118_v60 = vadd.f32 %v9269_v61, %v12880_v32  ;;  %v13410_v54 = vld [vmem:[#allocation34_spill] sm:$0xff] }
 0x7a2   : > { %v1098_v10 = vmul.f32 %v12872_v15, %v13406_v34  ;;  %7312 = vst [vmem:[%s13010_s7 + $0x68] sm:$0xff] %v7280_v38  ;;  %10217 = vrcp.f32 %v7191_v17  ;;  %v7192_v45 = vadd.f32 1.0, %v10198_v20  ;;  %v13124_v21 = vadd.f32 %v7063_v58, %v12842_v41 }
 0x7a3   : > { %v10200_v3 = vpop.eup %10199  ;;  %v992_v4 = vadd.f32 1.0, %v12882_v59  ;;  %10219 = vrcp.f32 %v7194_v56  ;;  %v7163_v37 = vmul.f32 1.442695, %v7103_v36  ;;  %v7106_v6 = vsub.f32 0.0, %v13118_v60  ;;  %v13413_v56 = vld [vmem:[#allocation58_spill] sm:$0xff] }
 0x7a4   : > { %v10202_v29 = vpop.eup %10201  ;;  %v1102_v32 = vmul.f32 %v12884_v43, %v13407_v62  ;;  %v7253_v30 = vmul.f32 %v10200_v3, %v13001_v44  ;;  %10221 = vrcp.f32 %v7192_v45  ;;  %v7104_v15 = vsub.f32 0.0, %v13124_v21  ;;  %v13415_v45 = vld [vmem:[#allocation19_spill] sm:$0xff] }
 0x7a5   : > { %v10204_v49 = vpop.eup %10203  ;;  %v1104_v41 = vmul.f32 %v12904_v35, %v13408_v57  ;;  %v7251_v59 = vmul.f32 %v10202_v29, %v13006_v31  ;;  %10223 = vpow2.f32 %v7167_v48  ;;  %v7169_v18 = vmul.f32 1.442695, %v7106_v6  ;;  %v13412_v48 = vld [vmem:[#allocation56_spill] sm:$0xff] }
 0x7a6   : > { %v10206_v13 = vpop.eup %10205  ;;  %v7285_v33 = vadd.f32 %v7253_v30, %v1102_v32  ;;  %v7254_v8 = vmul.f32 %v10204_v49, %v13019_v27  ;;  %10225 = vpow2.f32 %v7163_v37  ;;  %v7165_v43 = vmul.f32 1.442695, %v7104_v15  ;;  %v13417_v37 = vld [vmem:[#allocation57_spill] sm:$0xff] }
 0x7a7   : > { %v10208_v44 = vpop.eup %10207  ;;  %v1100_v53 = vmul.f32 %v12877_v42, %v13409_v1  ;;  %v7283_v24 = vadd.f32 %v7251_v59, %v1098_v10  ;;  %v7252_v23 = vmul.f32 %v10206_v13, %v13023_v14  ;;  %10227 = vpow2.f32 %v7169_v18  ;;  %v13414_v10 = vld [vmem:[#allocation35_spill] sm:$0xff] }
 0x7a8   : > { %v10210_v35 = vpop.eup %10209  ;;  %7317 = vst [vmem:[%s13010_s7 + $0x90] sm:$0xff] %v7285_v33  ;;  %v7286_v31 = vadd.f32 %v7254_v8, %v1104_v41  ;;  %v7197_v40 = vadd.f32 1.0, %v10208_v44  ;;  %10229 = vpow2.f32 %v7165_v43  ;;  %v994_v5 = vadd.f32 1.0, %v12889_v9  ;;  %v13411_v9 = vld [vmem:[#allocation32_spill] sm:$0xff]  ;;  %v13418_v33 = vld [vmem:[#allocation13_spill] sm:$0xff]  ;;  %v13419_v8 = vld [vmem:[#allocation55_spill] sm:$0xff] }
 0x7a9   : > { %v10212_v61 = vpop.eup %10211  ;;  %10231 = vrcp.f32 %v992_v4  ;;  %7315 = vst [vmem:[%s13010_s7 + $0x80] sm:$0xff] %v7283_v24  ;;  %v7284_v27 = vadd.f32 %v7252_v23, %v1100_v53  ;;  %v7195_v52 = vadd.f32 1.0, %v10210_v35  ;;  %v996_v14 = vadd.f32 1.0, %v12907_v47  ;;  %v13416_v4 = vld [vmem:[#allocation33_spill] sm:$0xff]  ;;  %v13420_v53 = vld [vmem:[#allocation39_spill] sm:$0xff] }
 0x7aa   : > { %v10214_v63 = vpop.eup %10213  ;;  %7318 = vst [vmem:[%s13010_s7 + $0x98] sm:$0xff] %v7286_v31  ;;  %10233 = vrcp.f32 %v7197_v40  ;;  %v7198_v42 = vadd.f32 1.0, %v10212_v61  ;;  %v1110_v25 = vmul.f32 %v12944_v16, %v13410_v54  ;;  %v998_v46 = vadd.f32 1.0, %v12929_v11  ;;  %v13421_v24 = vld [vmem:[#allocation53_spill] sm:$0xff]  ;;  %v13422_v40 = vld [vmem:[#allocation14_spill] sm:$0xff] }
 0x7ab   : > { %v10216_v50 = vpop.eup %10215  ;;  %7316 = vst [vmem:[%s13010_s7 + $0x88] sm:$0xff] %v7284_v27  ;;  %10235 = vrcp.f32 %v7195_v52  ;;  %v7196_v58 = vadd.f32 1.0, %v10214_v63  ;;  %v1106_v20 = vmul.f32 %v13412_v48, %v13411_v9  ;;  %v1000_v36 = vadd.f32 1.0, %v13413_v56 }
 0x7ac   : > { %v10218_v19 = vpop.eup %10217  ;;  %v7257_v38 = vmul.f32 %v10216_v50, %v13043_v51  ;;  %10237 = vrcp.f32 %v7198_v42  ;;  %v1112_v16 = vmul.f32 %v13415_v45, %v13414_v10  ;;  %v1108_v6 = vmul.f32 %v13417_v37, %v13416_v4  ;;  %v13424_v42 = vld [vmem:[#allocation54_spill] sm:$0xff] }
 0x7ad   : > { %v10220_v17 = vpop.eup %10219  ;;  %v7255_v47 = vmul.f32 %v10218_v19, %v13048_v22  ;;  %10239 = vrcp.f32 %v7196_v58  ;;  %v1118_v43 = vmul.f32 %v13419_v8, %v13418_v33  ;;  %v1114_v23 = vmul.f32 %v13421_v24, %v13420_v53 }
 0x7ae   : > { %v10222_v34 = vpop.eup %10221  ;;  %10241 = vrcp.f32 %v994_v5  ;;  %v7289_v11 = vadd.f32 %v7257_v38, %v1110_v25  ;;  %v7258_v51 = vmul.f32 %v10220_v17, %v13056_v7  ;;  %v13423_v5 = vld [vmem:[#allocation40_spill] sm:$0xff]  ;;  %v13425_v38 = vld [vmem:[#allocation18_spill] sm:$0xff] }
 0x7af   : > { %v10224_v3 = vpop.eup %10223  ;;  %10243 = vrcp.f32 %v996_v14  ;;  %v7287_v29 = vadd.f32 %v7255_v47, %v1106_v20  ;;  %v7256_v62 = vmul.f32 %v10222_v34, %v13060_v39  ;;  %v13427_v47 = vld [vmem:[#allocation36_spill] sm:$0xff] }
 0x7b0   : > { %v10226_v22 = vpop.eup %10225  ;;  %10245 = vrcp.f32 %v998_v46  ;;  %7321 = vst [vmem:[%s13010_s7 + $0xb0] sm:$0xff] %v7289_v11  ;;  %v7290_v32 = vadd.f32 %v7258_v51, %v1112_v16  ;;  %v7201_v30 = vadd.f32 1.0, %v10224_v3  ;;  %v13428_v16 = vld [vmem:[#allocation16_spill] sm:$0xff] }
 0x7b1   : > { %v10228_v15 = vpop.eup %10227  ;;  %10247 = vrcp.f32 %v1000_v36  ;;  %7319 = vst [vmem:[%s13010_s7 + $0xa0] sm:$0xff] %v7287_v29  ;;  %v7288_v49 = vadd.f32 %v7256_v62, %v1108_v6  ;;  %v7199_v7 = vadd.f32 1.0, %v10226_v22 }
 0x7b2   : > { %v10230_v57 = vpop.eup %10229  ;;  %7322 = vst [vmem:[%s13010_s7 + $0xb8] sm:$0xff] %v7290_v32  ;;  %10249 = vrcp.f32 %v7201_v30  ;;  %v7202_v41 = vadd.f32 1.0, %v10228_v15 }
 0x7b3   : > { %v10232_v59 = vpop.eup %10231  ;;  %7320 = vst [vmem:[%s13010_s7 + $0xa8] sm:$0xff] %v7288_v49  ;;  %10251 = vrcp.f32 %v7199_v7  ;;  %v7200_v18 = vadd.f32 1.0, %v10230_v57 }
 0x7b4   : > { %v10234_v39 = vpop.eup %10233  ;;  %10253 = vrcp.f32 %v7202_v41  ;;  %v1120_v61 = vmul.f32 %v10232_v59, %v13422_v40 }
 0x7b5   : > { %v10236_v13 = vpop.eup %10235  ;;  %v7261_v44 = vmul.f32 %v10234_v39, %v13073_v12  ;;  %10255 = vrcp.f32 %v7200_v18  ;;  %v1116_v12 = vmul.f32 %v13424_v42, %v13423_v5 }
 0x7b6   : > { %v10238_v1 = vpop.eup %10237  ;;  %v7259_v35 = vmul.f32 %v10236_v13, %v13083_v2 }
 0x7b7   : > { %v10240_v31 = vpop.eup %10239  ;;  %v7293_v27 = vadd.f32 %v7261_v44, %v1118_v43  ;;  %v7262_v52 = vmul.f32 %v10238_v1, %v13088_v26 }
 0x7b8   : > { %v10242_v63 = vpop.eup %10241  ;;  %v7291_v50 = vadd.f32 %v7259_v35, %v1114_v23  ;;  %v7260_v14 = vmul.f32 %v10240_v31, %v13093_v55  ;;  %v13426_v55 = vld [vmem:[#allocation15_spill] sm:$0xff] }
 0x7b9   : > { %v10244_v58 = vpop.eup %10243  ;;  %7325 = vst [vmem:[%s13010_s7 + $0xd0] sm:$0xff] %v7293_v27  ;;  %v7294_v2 = vadd.f32 %v7262_v52, %v1120_v61  ;;  %v1122_v20 = vmul.f32 %v10242_v63, %v13426_v55 }
 0x7ba   : > { %v10246_v19 = vpop.eup %10245  ;;  %7323 = vst [vmem:[%s13010_s7 + $0xc0] sm:$0xff] %v7291_v50  ;;  %v7292_v54 = vadd.f32 %v7260_v14, %v1116_v12 }
 0x7bb   : > { %v10248_v25 = vpop.eup %10247  ;;  %7326 = vst [vmem:[%s13010_s7 + $0xd8] sm:$0xff] %v7294_v2  ;;  %v1126_v17 = vmul.f32 %v10246_v19, %v13425_v38 }
 0x7bc   : > { %v10250_v46 = vpop.eup %10249  ;;  %7324 = vst [vmem:[%s13010_s7 + $0xc8] sm:$0xff] %v7292_v54  ;;  %v1128_v34 = vmul.f32 %v10248_v25, %v13427_v47 }
 0x7bd   : > { %v10252_v26 = vpop.eup %10251  ;;  %v7265_v9 = vmul.f32 %v10250_v46, %v13103_v28  ;;  %v1124_v28 = vmul.f32 %v10244_v58, %v13428_v16 }
 0x7be   : > { %v10254_v48 = vpop.eup %10253  ;;  %v7263_v56 = vmul.f32 %v10252_v26, %v13111_v0 }
 0x7bf   : > { %v10256_v36 = vpop.eup %10255  ;;  %v7297_v10 = vadd.f32 %v7265_v9, %v1126_v17  ;;  %v7266_v45 = vmul.f32 %v10254_v48, %v13118_v60 }
 0x7c0   : > { %v7295_v11 = vadd.f32 %v7263_v56, %v1122_v20  ;;  %v7264_v51 = vmul.f32 %v10256_v36, %v13124_v21 }
 0x7c1   : > { %7329 = vst [vmem:[%s13010_s7 + $0xf0] sm:$0xff] %v7297_v10  ;;  %v7298_v3 = vadd.f32 %v7266_v45, %v1128_v34 }
 0x7c2   : > { %7327 = vst [vmem:[%s13010_s7 + $0xe0] sm:$0xff] %v7295_v11  ;;  %v7296_v0 = vadd.f32 %v7264_v51, %v1124_v28 }
 0x7c3   : > { %7330 = vst [vmem:[%s13010_s7 + $0xf8] sm:$0xff] %v7298_v3 }
 0x7c4   : > { %7328 = vst [vmem:[%s13010_s7 + $0xe8] sm:$0xff] %v7296_v0 }
 0x7c5   : > { %10360 = shalt.err (!%p10357_p2)
}
 0x7c6   : > { %s10361_s14 = scalar_lea.hbm %s13192_s22, 4096  ;;  %s10365_s11 = scalar_lea.hbm %s13246_s5, 8192 }
 0x7c7   : > { %p10362_p13 = scmp.ne.s32.totalorder %s13192_s22, %s10361_s14  ;;  %p10366_p4 = scmp.lt.u32.totalorder %s13192_s22, %s13246_s5 }
 0x7c8   : > { %p10367_p7 = scmp.lt.u32.totalorder %s10365_s11, %s10361_s14  ;;  %p10369_p11 = scmp.lt.u32.totalorder %s10361_s14, %s13192_s22 }
 0x7c9   : > { %p10363_p6 = pnand %p10362_p13, %p13429_p0 }
 0x7ca   : > { %p10368_p8 = por %p10367_p7, %p10366_p4 }
 0x7cb   : > { %p10364_p10 = pneg %p10363_p6 }
 0x7cc   : > { %p10370_p1 = por %p10369_p11, %p10368_p8 }
 0x7ce   : > { %p10371_p3 = pnand %p10370_p1, %p10364_p10 }
 0x7d0   : > { %10374 = shalt.err (!%p10371_p3)
}
 0x7d1   : > { %s10429_s6 = smov 128   ;;  %s10430_s9 = smov 8  }
 0x7d2   : > { %9296 = dma.vmem_to_hbm [thread:$0]  (%p13429_p0), %s13194_s8, 4096, %s13192_s22, %s7332_s26, %s10429_s6, %s10429_s6, %s10430_s9  }
 0x7d3 PF: > { %s7360_s24 = sand.u32 1, %s10405_s18   ;;  %p13430_p5 = scmp.ne.s32.totalorder %s13276_s25, 0 }
 0x7d4   : > { %p13431_p9 = scmp.ge.s32.totalorder %s10417_s21, 2  ;;  %s7361_s12 = scalar_lea.sflag [#allocation5], %s7360_s24 }
 0x7d6   : > { %p9310_p12 = pnand %p13431_p9, %p13430_p5 }
 0x7d8   : > { %10400 = dma.done.wait (!%p9310_p12), %s7361_s12, 4096  }
 0x7d9   : > { %10402 = vsyncadd (!%p9310_p12), %s7361_s12, 4294963200  ;;  %p19_p2 = scmp.ge.s32.totalorder %s10574_s16, 4   ;;  %s13432_s18 = smov %s10409_s19 }
 0x7da   : > { %s13433_s19 = smov %s10413_s20  ;;  %s13434_s20 = smov %s10583_s27 }
 0x7db   : > { %s13435_s21 = smov %s10574_s16  ;;  %21 = sbr.rel (!%p19_p2) target bundleno = 6 (0x6), region = 100 }
 0x7e2   :  { %7366 = vsyncpa [#allocation4], 1 }
 0x7e3   :  { %7368 = vsyncpa [#allocation4 + $0x1], 1 }
 0x7e4   :  { %7369 = vsyncpa [#allocation7], 1 }
 0x7e5   :  { %7370 = vsyncpa [#allocation5], 1 }
 0x7e6   :  { %7372 = vsyncpa [#allocation5 + $0x1], 1 }

</bundles_post_ra>
